<compile_context>
chip_gen: v5e
topology: v5e:2x2
jax: 0.10.0
libtpu: 0.0.40
codegen_flags: <defaults>
</compile_context>

<pallas_src>
import numpy as np
import jax
import jax.numpy as jnp
from jax.experimental import pallas as pl
from jax.experimental.pallas import tpu as pltpu

NUM_CHAN = 4                    # NUM_CHAN is not defined in the source file.
H = W = 8                       # spatial size implied by fc = Linear(64*4*4, 512)
PAD = 1                         # zero-ring width of the flat grid (3x3 convs)
WP = W + 2 * PAD                # 10
HPWP = (H + 2 * PAD) * WP       # 100 grid rows per image
G = 16                          # guard rows (>= WP + PAD = 11), multiple of 8
ROWS = 128                      # per-image buffer rows: 16 guard + 100 grid + 12 dead
TILES = ((G, 48), (G + 48, 48))  # row tiles processed per conv (cover [16, 112))
K1 = 5 * 5 * NUM_CHAN           # conv1 im2col depth (100)
K1P = 128                       # ... padded to a full lane group
MXU_DTYPE = jnp.bfloat16        # MXU operand dtype (f32 accumulation always)

OFFS3 = tuple((kh - 1) * WP + (kw - 1) for kh in range(3) for kw in range(3))

# ---- static layout checks (review correctness concern) ----
_TEND = TILES[-1][0] + TILES[-1][1]
assert G % 8 == 0 and ROWS % 8 == 0
assert G >= WP + PAD                                  # 3x3 tap reach above the grid
assert TILES[0][0] == G and _TEND + WP + PAD <= ROWS  # tap reach below stays in-buffer
assert _TEND >= G + (PAD + H - 1) * WP + (PAD + W)    # tiles cover every interior row
assert _TEND == ROWS - G                              # rows [ROWS-G, ROWS) stay zero
assert ROWS >= G + HPWP
for _i in range(1, len(TILES)):
    assert TILES[_i][0] == TILES[_i - 1][0] + TILES[_i - 1][1]
for _s, _t in TILES:
    assert _s % 8 == 0 and _t % 8 == 0


# ------------------------------ fused kernel ------------------------------

def _fused_cnn_kernel(a0_ref, mask_ref, w1_ref, b1_ref, w2_ref, b2_ref,
                      w3_hbm_ref, b3_ref, w4_ref, b4_ref, wfc_hbm_ref, bfc_ref,
                      out_ref,
                      s1_ref, s2_ref, s3_ref, s4_ref, w3_ref, wfc_ref, dma_sems):
    first = pl.program_id(0) == 0

    @pl.when(first)
    def _prologue():
        # Late-needed weights: start their HBM->VMEM DMA now; waited right
        # before first use so the transfer hides under conv1/conv2 compute.
        pltpu.make_async_copy(w3_hbm_ref, w3_ref, dma_sems.at[0]).start()
        pltpu.make_async_copy(wfc_hbm_ref, wfc_ref, dma_sems.at[1]).start()
        # Guard rows are never written by the tile loop; zero them once.  They
        # are never touched again, so later grid steps keep reusing them.
        for ref in (s1_ref, s2_ref, s3_ref):
            ref[pl.ds(0, G), :] = jnp.zeros((G, ref.shape[1]), ref.dtype)
            ref[pl.ds(ROWS - G, G), :] = jnp.zeros((G, ref.shape[1]), ref.dtype)

    mask = mask_ref[...]                     # (ROWS, 1) f32, 1.0 on the 8x8 interior

    def conv_layer(src_ref, dst_ref, get_w, offs, bias, apply_mask=True):
        cout = dst_ref.shape[-1]
        for r0, tr in TILES:
            acc = jnp.zeros((tr, cout), jnp.float32)
            for t, d in enumerate(offs):
                lhs = src_ref[pl.ds(r0 + d, tr), :].astype(MXU_DTYPE)
                acc = acc + jnp.dot(lhs, get_w(t),
                                    preferred_element_type=jnp.float32)
            y = jnp.maximum(acc + bias, 0.0)
            if apply_mask:                           # re-zero ring (= next conv's padding)
                y = y * mask[r0:r0 + tr]
            dst_ref[pl.ds(r0, tr), :] = y.astype(dst_ref.dtype)

    # conv1: one K=100 matmul per tile against the pre-im2col'ed input slab.
    conv_layer(a0_ref, s1_ref, lambda t: w1_ref[...], (0,), b1_ref[...])
    # conv2: 3x3 -> nine shifted matmuls, accumulator resident in vregs.
    conv_layer(s1_ref, s2_ref, lambda t: w2_ref[t], OFFS3, b2_ref[...])

    @pl.when(first)
    def _wait_w3():
        pltpu.make_async_copy(w3_hbm_ref, w3_ref, dma_sems.at[0]).wait()

    conv_layer(s2_ref, s3_ref, lambda t: w3_ref[t], OFFS3, b3_ref[...])
    # conv4: 1x1.  Pool only reads interior rows, so no mask needed here.
    conv_layer(s3_ref, s4_ref, lambda t: w4_ref[...], (0,), b4_ref[...],
               apply_mask=False)

    # ---- maxpool(2,2) + fc + relu: gather 16 pooled rows into a (1,1024) slab.
    chunks = []
    for p in range(H // 2):
        base = G + (PAD + 2 * p) * WP + PAD
        m8 = jnp.maximum(s4_ref[pl.ds(base, W), :],
                         s4_ref[pl.ds(base + WP, W), :])        # (8, 64)
        for q in range(W // 2):
            chunks.append(jnp.maximum(m8[2 * q:2 * q + 1, :],
                                      m8[2 * q + 1:2 * q + 2, :]))  # (1, 64)
    slab = jnp.concatenate(chunks, axis=1).astype(MXU_DTYPE)    # (1, 1024)

    @pl.when(first)
    def _wait_wfc():
        pltpu.make_async_copy(wfc_hbm_ref, wfc_ref, dma_sems.at[1]).wait()

    y = jnp.dot(slab, wfc_ref[...], preferred_element_type=jnp.float32) + bfc_ref[...]
    out_ref[0] = jnp.maximum(y, 0.0).astype(out_ref.dtype)


# ------------------------------ wrapper ------------------------------

def _const_spec(shape):
    nd = len(shape)
    return pl.BlockSpec(shape, lambda b, _nd=nd: (0,) * _nd)


@jax.jit
def base_cnn_forward(x_nchw, params):
    B, Cin, Hx, Wx = x_nchw.shape
    assert (Hx, Wx) == (H, W) and Cin == NUM_CHAN

    # ---- conv1 input: im2col once in the wrapper (layout plumbing on a tiny
    # tensor) so the kernel does one K=100 matmul instead of 25 K=4 MXU passes.
    x_nhwc = jnp.transpose(x_nchw, (0, 2, 3, 1))                  # (B,8,8,C)
    xp = jnp.pad(x_nhwc, ((0, 0), (2, 2), (2, 2), (0, 0)))        # (B,12,12,C)
    pat = jnp.stack([xp[:, kh:kh + H, kw:kw + W, :]
                     for kh in range(5) for kw in range(5)], axis=3)
    pat = pat.reshape(B, H, W, K1)                                # lane = (kh*5+kw)*C + c
    grid_rows = jnp.pad(pat, ((0, 0), (PAD, PAD), (PAD, PAD), (0, 0))).reshape(B, HPWP, K1)
    a0 = jnp.pad(grid_rows, ((0, 0), (G, ROWS - G - HPWP), (0, K1P - K1)))
    a0 = a0.astype(MXU_DTYPE).reshape(B * ROWS, K1P)

    # ---- per-row interior mask (1.0 on the real 8x8 pixels) ----
    mnp = np.zeros((ROWS, 1), np.float32)
    for ip in range(PAD, PAD + H):
        for jp in range(PAD, PAD + W):
            mnp[G + ip * WP + jp, 0] = 1.0
    mask = jnp.asarray(mnp)

    # ---- weights: torch layouts -> kernel layouts ----
    w1 = jnp.transpose(params['w1'], (2, 3, 1, 0)).reshape(K1, 64)     # (kh,kw,cin,cout)
    w1 = jnp.pad(w1, ((0, K1P - K1), (0, 64))).astype(MXU_DTYPE)       # cout 64 -> 128
    b1 = jnp.pad(params['b1'], (0, 64)).reshape(1, 128)

    w2 = jnp.transpose(params['w2'], (2, 3, 1, 0))                     # (3,3,64,128)
    w2 = jnp.pad(w2, ((0, 0), (0, 0), (0, 64), (0, 0)))                # cin 64 -> 128
    w2 = w2.reshape(9, 128, 128).astype(MXU_DTYPE)
    b2 = params['b2'].reshape(1, -1)

    w3 = jnp.transpose(params['w3'], (2, 3, 1, 0)).reshape(9, 128, 256).astype(MXU_DTYPE)
    b3 = params['b3'].reshape(1, -1)

    w4 = jnp.transpose(params['w4'], (2, 3, 1, 0)).reshape(256, 64).astype(MXU_DTYPE)
    b4 = params['b4'].reshape(1, -1)

    # torch flattens the pooled NCHW tensor as (c,p,q); the kernel slab is
    # ordered (p*4+q)*64 + c, so permute the fc weight rows accordingly.
    F = params['wfc'].shape[0]
    wfc = jnp.transpose(params['wfc'].reshape(F, 64, 16), (2, 1, 0)).reshape(1024, F)
    wfc = wfc.astype(MXU_DTYPE)
    bfc = params['bfc'].reshape(1, -1)

    args = (a0, mask, w1, b1, w2, b2, w3, b3, w4, b4, wfc, bfc)

    rows_per_img = sum(tr for _, tr in TILES)
    flops = B * (2 * rows_per_img * (K1P * 128 + 9 * 128 * 128 + 9 * 128 * 256 + 256 * 64)
                 + 2 * 1024 * 512)
    bytes_accessed = sum(int(np.prod(a.shape)) * a.dtype.itemsize for a in args) + B * 512 * 4

    in_specs = [
        pl.BlockSpec((ROWS, K1P), lambda b: (b, 0)),   # conv1 im2col slab (one image/step)
        _const_spec(mask.shape),
        _const_spec(w1.shape), _const_spec(b1.shape),
        _const_spec(w2.shape), _const_spec(b2.shape),
        pl.BlockSpec(memory_space=pl.ANY),             # w3 stays in HBM, manual DMA
        _const_spec(b3.shape),
        _const_spec(w4.shape), _const_spec(b4.shape),
        pl.BlockSpec(memory_space=pl.ANY),             # wfc stays in HBM, manual DMA
        _const_spec(bfc.shape),
    ]

    out = pl.pallas_call(
        _fused_cnn_kernel,
        out_shape=jax.ShapeDtypeStruct((B, 1, 512), jnp.float32),
        grid_spec=pltpu.PrefetchScalarGridSpec(
            num_scalar_prefetch=0,
            grid=(B,),
            in_specs=in_specs,
            out_specs=pl.BlockSpec((1, 1, 512), lambda b: (b, 0, 0)),
            scratch_shapes=[
                pltpu.VMEM((ROWS, 128), jnp.float32),   # s1 (conv1 out, cout padded to 128)
                pltpu.VMEM((ROWS, 128), jnp.float32),   # s2
                pltpu.VMEM((ROWS, 256), jnp.float32),   # s3
                pltpu.VMEM((ROWS, 64), jnp.float32),    # s4
                pltpu.VMEM((9, 128, 256), MXU_DTYPE),   # w3 landing buffer
                pltpu.VMEM((1024, 512), MXU_DTYPE),     # wfc landing buffer
                pltpu.SemaphoreType.DMA((2,)),
            ]),
        # Batch axis must stay "arbitrary" (sequential): the one-shot w3/wfc DMA
        # and guard-row zeroing run on step 0 and later steps reuse the scratch.
        # TODO(synk): for v7x megacore, issue the weight DMAs per step and mark
        # this axis "parallel".
        compiler_params=pltpu.CompilerParams(
            dimension_semantics=("arbitrary",),
            vmem_limit_bytes=32 * 1024 * 1024),
        cost_estimate=pl.CostEstimate(flops=flops, transcendentals=0,
                                      bytes_accessed=bytes_accessed),
    )(*args)
    return out.reshape(B, 512)


# ------------------------------ params / reference ------------------------------

def init_params(key, in_chan=NUM_CHAN):
    ks = jax.random.split(key, 10)

    def conv_init(kw, kb, cout, cin, ksz):
        s = 1.0 / np.sqrt(cin * ksz * ksz)
        w = jax.random.uniform(kw, (cout, cin, ksz, ksz), jnp.float32, -s, s)
        b = jax.random.uniform(kb, (cout,), jnp.float32, -s, s)
        return w, b

    p = {}
    p['w1'], p['b1'] = conv_init(ks[0], ks[1], 64, in_chan, 5)
    p['w2'], p['b2'] = conv_init(ks[2], ks[3], 128, 64, 3)
    p['w3'], p['b3'] = conv_init(ks[4], ks[5], 256, 128, 3)
    p['w4'], p['b4'] = conv_init(ks[6], ks[7], 64, 256, 1)
    s = 1.0 / np.sqrt(64 * 4 * 4)
    p['wfc'] = jax.random.uniform(ks[8], (512, 64 * 4 * 4), jnp.float32, -s, s)
    p['bfc'] = jax.random.uniform(ks[9], (512,), jnp.float32, -s, s)
    return p


def reference_forward(x_nchw, p):
    """Pure-JAX f32 reference mirroring the PyTorch forward (NCHW)."""
    def conv(x, w, b, pad):
        y = jax.lax.conv_general_dilated(
            x, w, window_strides=(1, 1), padding=[(pad, pad), (pad, pad)],
            dimension_numbers=('NCHW', 'OIHW', 'NCHW'))
        return jax.nn.relu(y + b[None, :, None, None])

    x = conv(x_nchw, p['w1'], p['b1'], 2)
    x = conv(x, p['w2'], p['b2'], 1)
    x = conv(x, p['w3'], p['b3'], 1)
    x = conv(x, p['w4'], p['b4'], 0)
    x = jax.lax.reduce_window(x, -jnp.inf, jax.lax.max,
                              (1, 1, 2, 2), (1, 1, 2, 2), 'VALID')
    x = x.reshape(x.shape[0], -1)
    return jax.nn.relu(x @ p['wfc'].T + p['bfc'])


if __name__ == "__main__":
    key = jax.random.PRNGKey(0)
    k_params, k_x = jax.random.split(key)
    params = init_params(k_params, in_chan=NUM_CHAN)
    # Spatial size 8x8 so that after the single 2x2 pool the fc sees 64*4*4.
    x = jax.random.normal(k_x, (2, NUM_CHAN, 8, 8), dtype=jnp.float32)

    out = jax.block_until_ready(base_cnn_forward(x, params))
    ref = jax.block_until_ready(reference_forward(x, params))

    assert out.shape == (2, 512), out.shape
    tol = 1e-4 if MXU_DTYPE == jnp.float32 else 5e-2   # bf16 operands, f32 accumulate
    np.testing.assert_allclose(np.asarray(out), np.asarray(ref),
                               rtol=tol, atol=tol)
    print("KERNEL_OK")
</pallas_src>

<mosaic_0001>
module attributes {stable_mosaic.version = 11 : i64} {
  func.func @_fused_cnn_kernel(%arg0: i32, %arg1: memref<128x128xbf16, #tpu.memory_space<vmem>>, %arg2: memref<128x1xf32, #tpu.memory_space<vmem>>, %arg3: memref<128x128xbf16, #tpu.memory_space<vmem>>, %arg4: memref<1x128xf32, #tpu.memory_space<vmem>>, %arg5: memref<9x128x128xbf16, #tpu.memory_space<vmem>>, %arg6: memref<1x128xf32, #tpu.memory_space<vmem>>, %arg7: memref<9x128x256xbf16, #tpu.memory_space<any>>, %arg8: memref<1x256xf32, #tpu.memory_space<vmem>>, %arg9: memref<256x64xbf16, #tpu.memory_space<vmem>>, %arg10: memref<1x64xf32, #tpu.memory_space<vmem>>, %arg11: memref<1024x512xbf16, #tpu.memory_space<any>>, %arg12: memref<1x512xf32, #tpu.memory_space<vmem>>, %arg13: memref<1x1x512xf32, #tpu.memory_space<vmem>>, %arg14: memref<128x128xf32, #tpu.memory_space<vmem>>, %arg15: memref<128x128xf32, #tpu.memory_space<vmem>>, %arg16: memref<128x256xf32, #tpu.memory_space<vmem>>, %arg17: memref<128x64xf32, #tpu.memory_space<vmem>>, %arg18: memref<9x128x256xbf16, #tpu.memory_space<vmem>>, %arg19: memref<1024x512xbf16, #tpu.memory_space<vmem>>, %arg20: memref<2x!tpu.dma_semaphore, #tpu.memory_space<semaphore_mem>>) attributes {dimension_semantics = [#tpu.dimension_semantics<arbitrary>], iteration_bounds = array<i64: 2>, scalar_prefetch = 0 : i64, scratch_operands = 7 : i64, tpu.core_type = #tpu.core_type<tc>, window_params = [{transform_indices = @transform_0, window_bounds = array<i64: 128, 128>}, {pipeline_mode = #tpu.pipeline_mode<synchronous>, transform_indices = @transform_1, window_bounds = array<i64: 128, 1>}, {pipeline_mode = #tpu.pipeline_mode<synchronous>, transform_indices = @transform_2, window_bounds = array<i64: 128, 128>}, {pipeline_mode = #tpu.pipeline_mode<synchronous>, transform_indices = @transform_3, window_bounds = array<i64: 1, 128>}, {pipeline_mode = #tpu.pipeline_mode<synchronous>, transform_indices = @transform_4, window_bounds = array<i64: 9, 128, 128>}, {pipeline_mode = #tpu.pipeline_mode<synchronous>, transform_indices = @transform_5, window_bounds = array<i64: 1, 128>}, {}, {pipeline_mode = #tpu.pipeline_mode<synchronous>, transform_indices = @transform_7, window_bounds = array<i64: 1, 256>}, {pipeline_mode = #tpu.pipeline_mode<synchronous>, transform_indices = @transform_8, window_bounds = array<i64: 256, 64>}, {pipeline_mode = #tpu.pipeline_mode<synchronous>, transform_indices = @transform_9, window_bounds = array<i64: 1, 64>}, {}, {pipeline_mode = #tpu.pipeline_mode<synchronous>, transform_indices = @transform_11, window_bounds = array<i64: 1, 512>}, {transform_indices = @transform_12, window_bounds = array<i64: 1, 1, 512>}]} {
    %c0_i32 = arith.constant 0 : i32
    %0 = arith.cmpi eq, %arg0, %c0_i32 : i32
    %1 = arith.extui %0 : i1 to i32
    %c0_i32_0 = arith.constant 0 : i32
    %2 = arith.cmpi ne, %1, %c0_i32_0 : i32
    scf.if %2 {
      %c0_i32_274 = arith.constant 0 : i32
      %383 = tpu.memref_slice %arg20[%c0_i32_274] : memref<2x!tpu.dma_semaphore, #tpu.memory_space<semaphore_mem>> -> memref<1x!tpu.dma_semaphore, #tpu.memory_space<semaphore_mem>>
      %384 = tpu.memref_squeeze %383 : memref<1x!tpu.dma_semaphore, #tpu.memory_space<semaphore_mem>> -> memref<!tpu.dma_semaphore, #tpu.memory_space<semaphore_mem>>
      tpu.enqueue_dma source(%arg7 : memref<9x128x256xbf16, #tpu.memory_space<any>>) target(%arg18 : memref<9x128x256xbf16, #tpu.memory_space<vmem>>) target_semaphore(%384 : memref<!tpu.dma_semaphore, #tpu.memory_space<semaphore_mem>>)
      %c1_i32 = arith.constant 1 : i32
      %385 = tpu.memref_slice %arg20[%c1_i32] : memref<2x!tpu.dma_semaphore, #tpu.memory_space<semaphore_mem>> -> memref<1x!tpu.dma_semaphore, #tpu.memory_space<semaphore_mem>>
      %386 = tpu.memref_squeeze %385 : memref<1x!tpu.dma_semaphore, #tpu.memory_space<semaphore_mem>> -> memref<!tpu.dma_semaphore, #tpu.memory_space<semaphore_mem>>
      tpu.enqueue_dma source(%arg11 : memref<1024x512xbf16, #tpu.memory_space<any>>) target(%arg19 : memref<1024x512xbf16, #tpu.memory_space<vmem>>) target_semaphore(%386 : memref<!tpu.dma_semaphore, #tpu.memory_space<semaphore_mem>>)
      %cst_275 = arith.constant 0.000000e+00 : f32
      %387 = vector.broadcast %cst_275 : f32 to vector<16x128xf32>
      %c0_276 = arith.constant 0 : index
      %c0_277 = arith.constant 0 : index
      %388 = vector.load %arg14[%c0_276, %c0_277] : memref<128x128xf32, #tpu.memory_space<vmem>>, vector<16x128xf32>
      tpu.vector_store %arg14[%c0_276, %c0_277], %387 {strides = array<i32>} : memref<128x128xf32, #tpu.memory_space<vmem>>, vector<16x128xf32>,
      %cst_278 = arith.constant 0.000000e+00 : f32
      %389 = vector.broadcast %cst_278 : f32 to vector<16x128xf32>
      %c112 = arith.constant 112 : index
      %c0_279 = arith.constant 0 : index
      %390 = vector.load %arg14[%c112, %c0_279] : memref<128x128xf32, #tpu.memory_space<vmem>>, vector<16x128xf32>
      tpu.vector_store %arg14[%c112, %c0_279], %389 {strides = array<i32>} : memref<128x128xf32, #tpu.memory_space<vmem>>, vector<16x128xf32>,
      %cst_280 = arith.constant 0.000000e+00 : f32
      %391 = vector.broadcast %cst_280 : f32 to vector<16x128xf32>
      %c0_281 = arith.constant 0 : index
      %c0_282 = arith.constant 0 : index
      %392 = vector.load %arg15[%c0_281, %c0_282] : memref<128x128xf32, #tpu.memory_space<vmem>>, vector<16x128xf32>
      tpu.vector_store %arg15[%c0_281, %c0_282], %391 {strides = array<i32>} : memref<128x128xf32, #tpu.memory_space<vmem>>, vector<16x128xf32>,
      %cst_283 = arith.constant 0.000000e+00 : f32
      %393 = vector.broadcast %cst_283 : f32 to vector<16x128xf32>
      %c112_284 = arith.constant 112 : index
      %c0_285 = arith.constant 0 : index
      %394 = vector.load %arg15[%c112_284, %c0_285] : memref<128x128xf32, #tpu.memory_space<vmem>>, vector<16x128xf32>
      tpu.vector_store %arg15[%c112_284, %c0_285], %393 {strides = array<i32>} : memref<128x128xf32, #tpu.memory_space<vmem>>, vector<16x128xf32>,
      %cst_286 = arith.constant 0.000000e+00 : f32
      %395 = vector.broadcast %cst_286 : f32 to vector<16x256xf32>
      %c0_287 = arith.constant 0 : index
      %c0_288 = arith.constant 0 : index
      %396 = vector.load %arg16[%c0_287, %c0_288] : memref<128x256xf32, #tpu.memory_space<vmem>>, vector<16x256xf32>
      tpu.vector_store %arg16[%c0_287, %c0_288], %395 {strides = array<i32>} : memref<128x256xf32, #tpu.memory_space<vmem>>, vector<16x256xf32>,
      %cst_289 = arith.constant 0.000000e+00 : f32
      %397 = vector.broadcast %cst_289 : f32 to vector<16x256xf32>
      %c112_290 = arith.constant 112 : index
      %c0_291 = arith.constant 0 : index
      %398 = vector.load %arg16[%c112_290, %c0_291] : memref<128x256xf32, #tpu.memory_space<vmem>>, vector<16x256xf32>
      tpu.vector_store %arg16[%c112_290, %c0_291], %397 {strides = array<i32>} : memref<128x256xf32, #tpu.memory_space<vmem>>, vector<16x256xf32>,
    } else {
    }
    %c0 = arith.constant 0 : index
    %c0_1 = arith.constant 0 : index
    %3 = vector.load %arg2[%c0, %c0_1] : memref<128x1xf32, #tpu.memory_space<vmem>>, vector<128x1xf32>
    %c0_2 = arith.constant 0 : index
    %c0_3 = arith.constant 0 : index
    %4 = vector.load %arg4[%c0_2, %c0_3] : memref<1x128xf32, #tpu.memory_space<vmem>>, vector<1x128xf32>
    %cst = arith.constant 0.000000e+00 : f32
    %5 = vector.broadcast %cst : f32 to vector<48x128xf32>
    %c16 = arith.constant 16 : index
    %c0_4 = arith.constant 0 : index
    %6 = vector.load %arg1[%c16, %c0_4] : memref<128x128xbf16, #tpu.memory_space<vmem>>, vector<48x128xbf16>
    %c0_5 = arith.constant 0 : index
    %c0_6 = arith.constant 0 : index
    %7 = vector.load %arg3[%c0_5, %c0_6] : memref<128x128xbf16, #tpu.memory_space<vmem>>, vector<128x128xbf16>
    %cst_7 = arith.constant dense<0.000000e+00> : vector<48x128xf32>
    %8 = tpu.matmul %6, %7, %cst_7 {dimension_numbers = #tpu.dot_dimension_numbers<[1], [0], [0], [1], [0, 0, 1, 1], [], []>} : vector<48x128xbf16>, vector<128x128xbf16>, vector<48x128xf32> -> vector<48x128xf32>
    %9 = arith.addf %5, %8 : vector<48x128xf32>
    %10 = vector.broadcast %4 : vector<1x128xf32> to vector<48x128xf32>
    %11 = arith.addf %9, %10 : vector<48x128xf32>
    %cst_8 = arith.constant 0.000000e+00 : f32
    %12 = vector.broadcast %cst_8 : f32 to vector<48x128xf32>
    %13 = arith.maximumf %11, %12 : vector<48x128xf32>
    %14 = vector.extract_strided_slice %3 {offsets = [16, 0], sizes = [48, 1], strides = [1, 1]} : vector<128x1xf32> to vector<48x1xf32>
    %15 = vector.broadcast %14 : vector<48x1xf32> to vector<48x128xf32>
    %16 = arith.mulf %13, %15 : vector<48x128xf32>
    %c16_9 = arith.constant 16 : index
    %c0_10 = arith.constant 0 : index
    %17 = vector.load %arg14[%c16_9, %c0_10] : memref<128x128xf32, #tpu.memory_space<vmem>>, vector<48x128xf32>
    tpu.vector_store %arg14[%c16_9, %c0_10], %16 {strides = array<i32>} : memref<128x128xf32, #tpu.memory_space<vmem>>, vector<48x128xf32>,
    %cst_11 = arith.constant 0.000000e+00 : f32
    %18 = vector.broadcast %cst_11 : f32 to vector<48x128xf32>
    %c64 = arith.constant 64 : index
    %c0_12 = arith.constant 0 : index
    %19 = vector.load %arg1[%c64, %c0_12] : memref<128x128xbf16, #tpu.memory_space<vmem>>, vector<48x128xbf16>
    %c0_13 = arith.constant 0 : index
    %c0_14 = arith.constant 0 : index
    %20 = vector.load %arg3[%c0_13, %c0_14] : memref<128x128xbf16, #tpu.memory_space<vmem>>, vector<128x128xbf16>
    %cst_15 = arith.constant dense<0.000000e+00> : vector<48x128xf32>
    %21 = tpu.matmul %19, %20, %cst_15 {dimension_numbers = #tpu.dot_dimension_numbers<[1], [0], [0], [1], [0, 0, 1, 1], [], []>} : vector<48x128xbf16>, vector<128x128xbf16>, vector<48x128xf32> -> vector<48x128xf32>
    %22 = arith.addf %18, %21 : vector<48x128xf32>
    %23 = vector.broadcast %4 : vector<1x128xf32> to vector<48x128xf32>
    %24 = arith.addf %22, %23 : vector<48x128xf32>
    %cst_16 = arith.constant 0.000000e+00 : f32
    %25 = vector.broadcast %cst_16 : f32 to vector<48x128xf32>
    %26 = arith.maximumf %24, %25 : vector<48x128xf32>
    %27 = vector.extract_strided_slice %3 {offsets = [64, 0], sizes = [48, 1], strides = [1, 1]} : vector<128x1xf32> to vector<48x1xf32>
    %28 = vector.broadcast %27 : vector<48x1xf32> to vector<48x128xf32>
    %29 = arith.mulf %26, %28 : vector<48x128xf32>
    %c64_17 = arith.constant 64 : index
    %c0_18 = arith.constant 0 : index
    %30 = vector.load %arg14[%c64_17, %c0_18] : memref<128x128xf32, #tpu.memory_space<vmem>>, vector<48x128xf32>
    tpu.vector_store %arg14[%c64_17, %c0_18], %29 {strides = array<i32>} : memref<128x128xf32, #tpu.memory_space<vmem>>, vector<48x128xf32>,
    %c0_19 = arith.constant 0 : index
    %c0_20 = arith.constant 0 : index
    %31 = vector.load %arg6[%c0_19, %c0_20] : memref<1x128xf32, #tpu.memory_space<vmem>>, vector<1x128xf32>
    %cst_21 = arith.constant 0.000000e+00 : f32
    %32 = vector.broadcast %cst_21 : f32 to vector<48x128xf32>
    %c5 = arith.constant 5 : index
    %c0_22 = arith.constant 0 : index
    %33 = vector.load %arg14[%c5, %c0_22] : memref<128x128xf32, #tpu.memory_space<vmem>>, vector<48x128xf32>
    %34 = arith.truncf %33 : vector<48x128xf32> to vector<48x128xbf16>
    %c0_23 = arith.constant 0 : index
    %c0_24 = arith.constant 0 : index
    %c0_25 = arith.constant 0 : index
    %35 = vector.load %arg5[%c0_23, %c0_24, %c0_25] : memref<9x128x128xbf16, #tpu.memory_space<vmem>>, vector<1x128x128xbf16>
    %36 = vector.shape_cast %35 : vector<1x128x128xbf16> to vector<128x128xbf16>
    %cst_26 = arith.constant dense<0.000000e+00> : vector<48x128xf32>
    %37 = tpu.matmul %34, %36, %cst_26 {dimension_numbers = #tpu.dot_dimension_numbers<[1], [0], [0], [1], [0, 0, 1, 1], [], []>} : vector<48x128xbf16>, vector<128x128xbf16>, vector<48x128xf32> -> vector<48x128xf32>
    %38 = arith.addf %32, %37 : vector<48x128xf32>
    %c6 = arith.constant 6 : index
    %c0_27 = arith.constant 0 : index
    %39 = vector.load %arg14[%c6, %c0_27] : memref<128x128xf32, #tpu.memory_space<vmem>>, vector<48x128xf32>
    %40 = arith.truncf %39 : vector<48x128xf32> to vector<48x128xbf16>
    %c1 = arith.constant 1 : index
    %c0_28 = arith.constant 0 : index
    %c0_29 = arith.constant 0 : index
    %41 = vector.load %arg5[%c1, %c0_28, %c0_29] : memref<9x128x128xbf16, #tpu.memory_space<vmem>>, vector<1x128x128xbf16>
    %42 = vector.shape_cast %41 : vector<1x128x128xbf16> to vector<128x128xbf16>
    %cst_30 = arith.constant dense<0.000000e+00> : vector<48x128xf32>
    %43 = tpu.matmul %40, %42, %cst_30 {dimension_numbers = #tpu.dot_dimension_numbers<[1], [0], [0], [1], [0, 0, 1, 1], [], []>} : vector<48x128xbf16>, vector<128x128xbf16>, vector<48x128xf32> -> vector<48x128xf32>
    %44 = arith.addf %38, %43 : vector<48x128xf32>
    %c7 = arith.constant 7 : index
    %c0_31 = arith.constant 0 : index
    %45 = vector.load %arg14[%c7, %c0_31] : memref<128x128xf32, #tpu.memory_space<vmem>>, vector<48x128xf32>
    %46 = arith.truncf %45 : vector<48x128xf32> to vector<48x128xbf16>
    %c2 = arith.constant 2 : index
    %c0_32 = arith.constant 0 : index
    %c0_33 = arith.constant 0 : index
    %47 = vector.load %arg5[%c2, %c0_32, %c0_33] : memref<9x128x128xbf16, #tpu.memory_space<vmem>>, vector<1x128x128xbf16>
    %48 = vector.shape_cast %47 : vector<1x128x128xbf16> to vector<128x128xbf16>
    %cst_34 = arith.constant dense<0.000000e+00> : vector<48x128xf32>
    %49 = tpu.matmul %46, %48, %cst_34 {dimension_numbers = #tpu.dot_dimension_numbers<[1], [0], [0], [1], [0, 0, 1, 1], [], []>} : vector<48x128xbf16>, vector<128x128xbf16>, vector<48x128xf32> -> vector<48x128xf32>
    %50 = arith.addf %44, %49 : vector<48x128xf32>
    %c15 = arith.constant 15 : index
    %c0_35 = arith.constant 0 : index
    %51 = vector.load %arg14[%c15, %c0_35] : memref<128x128xf32, #tpu.memory_space<vmem>>, vector<48x128xf32>
    %52 = arith.truncf %51 : vector<48x128xf32> to vector<48x128xbf16>
    %c3 = arith.constant 3 : index
    %c0_36 = arith.constant 0 : index
    %c0_37 = arith.constant 0 : index
    %53 = vector.load %arg5[%c3, %c0_36, %c0_37] : memref<9x128x128xbf16, #tpu.memory_space<vmem>>, vector<1x128x128xbf16>
    %54 = vector.shape_cast %53 : vector<1x128x128xbf16> to vector<128x128xbf16>
    %cst_38 = arith.constant dense<0.000000e+00> : vector<48x128xf32>
    %55 = tpu.matmul %52, %54, %cst_38 {dimension_numbers = #tpu.dot_dimension_numbers<[1], [0], [0], [1], [0, 0, 1, 1], [], []>} : vector<48x128xbf16>, vector<128x128xbf16>, vector<48x128xf32> -> vector<48x128xf32>
    %56 = arith.addf %50, %55 : vector<48x128xf32>
    %c16_39 = arith.constant 16 : index
    %c0_40 = arith.constant 0 : index
    %57 = vector.load %arg14[%c16_39, %c0_40] : memref<128x128xf32, #tpu.memory_space<vmem>>, vector<48x128xf32>
    %58 = arith.truncf %57 : vector<48x128xf32> to vector<48x128xbf16>
    %c4 = arith.constant 4 : index
    %c0_41 = arith.constant 0 : index
    %c0_42 = arith.constant 0 : index
    %59 = vector.load %arg5[%c4, %c0_41, %c0_42] : memref<9x128x128xbf16, #tpu.memory_space<vmem>>, vector<1x128x128xbf16>
    %60 = vector.shape_cast %59 : vector<1x128x128xbf16> to vector<128x128xbf16>
    %cst_43 = arith.constant dense<0.000000e+00> : vector<48x128xf32>
    %61 = tpu.matmul %58, %60, %cst_43 {dimension_numbers = #tpu.dot_dimension_numbers<[1], [0], [0], [1], [0, 0, 1, 1], [], []>} : vector<48x128xbf16>, vector<128x128xbf16>, vector<48x128xf32> -> vector<48x128xf32>
    %62 = arith.addf %56, %61 : vector<48x128xf32>
    %c17 = arith.constant 17 : index
    %c0_44 = arith.constant 0 : index
    %63 = vector.load %arg14[%c17, %c0_44] : memref<128x128xf32, #tpu.memory_space<vmem>>, vector<48x128xf32>
    %64 = arith.truncf %63 : vector<48x128xf32> to vector<48x128xbf16>
    %c5_45 = arith.constant 5 : index
    %c0_46 = arith.constant 0 : index
    %c0_47 = arith.constant 0 : index
    %65 = vector.load %arg5[%c5_45, %c0_46, %c0_47] : memref<9x128x128xbf16, #tpu.memory_space<vmem>>, vector<1x128x128xbf16>
    %66 = vector.shape_cast %65 : vector<1x128x128xbf16> to vector<128x128xbf16>
    %cst_48 = arith.constant dense<0.000000e+00> : vector<48x128xf32>
    %67 = tpu.matmul %64, %66, %cst_48 {dimension_numbers = #tpu.dot_dimension_numbers<[1], [0], [0], [1], [0, 0, 1, 1], [], []>} : vector<48x128xbf16>, vector<128x128xbf16>, vector<48x128xf32> -> vector<48x128xf32>
    %68 = arith.addf %62, %67 : vector<48x128xf32>
    %c25 = arith.constant 25 : index
    %c0_49 = arith.constant 0 : index
    %69 = vector.load %arg14[%c25, %c0_49] : memref<128x128xf32, #tpu.memory_space<vmem>>, vector<48x128xf32>
    %70 = arith.truncf %69 : vector<48x128xf32> to vector<48x128xbf16>
    %c6_50 = arith.constant 6 : index
    %c0_51 = arith.constant 0 : index
    %c0_52 = arith.constant 0 : index
    %71 = vector.load %arg5[%c6_50, %c0_51, %c0_52] : memref<9x128x128xbf16, #tpu.memory_space<vmem>>, vector<1x128x128xbf16>
    %72 = vector.shape_cast %71 : vector<1x128x128xbf16> to vector<128x128xbf16>
    %cst_53 = arith.constant dense<0.000000e+00> : vector<48x128xf32>
    %73 = tpu.matmul %70, %72, %cst_53 {dimension_numbers = #tpu.dot_dimension_numbers<[1], [0], [0], [1], [0, 0, 1, 1], [], []>} : vector<48x128xbf16>, vector<128x128xbf16>, vector<48x128xf32> -> vector<48x128xf32>
    %74 = arith.addf %68, %73 : vector<48x128xf32>
    %c26 = arith.constant 26 : index
    %c0_54 = arith.constant 0 : index
    %75 = vector.load %arg14[%c26, %c0_54] : memref<128x128xf32, #tpu.memory_space<vmem>>, vector<48x128xf32>
    %76 = arith.truncf %75 : vector<48x128xf32> to vector<48x128xbf16>
    %c7_55 = arith.constant 7 : index
    %c0_56 = arith.constant 0 : index
    %c0_57 = arith.constant 0 : index
    %77 = vector.load %arg5[%c7_55, %c0_56, %c0_57] : memref<9x128x128xbf16, #tpu.memory_space<vmem>>, vector<1x128x128xbf16>
    %78 = vector.shape_cast %77 : vector<1x128x128xbf16> to vector<128x128xbf16>
    %cst_58 = arith.constant dense<0.000000e+00> : vector<48x128xf32>
    %79 = tpu.matmul %76, %78, %cst_58 {dimension_numbers = #tpu.dot_dimension_numbers<[1], [0], [0], [1], [0, 0, 1, 1], [], []>} : vector<48x128xbf16>, vector<128x128xbf16>, vector<48x128xf32> -> vector<48x128xf32>
    %80 = arith.addf %74, %79 : vector<48x128xf32>
    %c27 = arith.constant 27 : index
    %c0_59 = arith.constant 0 : index
    %81 = vector.load %arg14[%c27, %c0_59] : memref<128x128xf32, #tpu.memory_space<vmem>>, vector<48x128xf32>
    %82 = arith.truncf %81 : vector<48x128xf32> to vector<48x128xbf16>
    %c8 = arith.constant 8 : index
    %c0_60 = arith.constant 0 : index
    %c0_61 = arith.constant 0 : index
    %83 = vector.load %arg5[%c8, %c0_60, %c0_61] : memref<9x128x128xbf16, #tpu.memory_space<vmem>>, vector<1x128x128xbf16>
    %84 = vector.shape_cast %83 : vector<1x128x128xbf16> to vector<128x128xbf16>
    %cst_62 = arith.constant dense<0.000000e+00> : vector<48x128xf32>
    %85 = tpu.matmul %82, %84, %cst_62 {dimension_numbers = #tpu.dot_dimension_numbers<[1], [0], [0], [1], [0, 0, 1, 1], [], []>} : vector<48x128xbf16>, vector<128x128xbf16>, vector<48x128xf32> -> vector<48x128xf32>
    %86 = arith.addf %80, %85 : vector<48x128xf32>
    %87 = vector.broadcast %31 : vector<1x128xf32> to vector<48x128xf32>
    %88 = arith.addf %86, %87 : vector<48x128xf32>
    %cst_63 = arith.constant 0.000000e+00 : f32
    %89 = vector.broadcast %cst_63 : f32 to vector<48x128xf32>
    %90 = arith.maximumf %88, %89 : vector<48x128xf32>
    %91 = vector.extract_strided_slice %3 {offsets = [16, 0], sizes = [48, 1], strides = [1, 1]} : vector<128x1xf32> to vector<48x1xf32>
    %92 = vector.broadcast %91 : vector<48x1xf32> to vector<48x128xf32>
    %93 = arith.mulf %90, %92 : vector<48x128xf32>
    %c16_64 = arith.constant 16 : index
    %c0_65 = arith.constant 0 : index
    %94 = vector.load %arg15[%c16_64, %c0_65] : memref<128x128xf32, #tpu.memory_space<vmem>>, vector<48x128xf32>
    tpu.vector_store %arg15[%c16_64, %c0_65], %93 {strides = array<i32>} : memref<128x128xf32, #tpu.memory_space<vmem>>, vector<48x128xf32>,
    %cst_66 = arith.constant 0.000000e+00 : f32
    %95 = vector.broadcast %cst_66 : f32 to vector<48x128xf32>
    %c53 = arith.constant 53 : index
    %c0_67 = arith.constant 0 : index
    %96 = vector.load %arg14[%c53, %c0_67] : memref<128x128xf32, #tpu.memory_space<vmem>>, vector<48x128xf32>
    %97 = arith.truncf %96 : vector<48x128xf32> to vector<48x128xbf16>
    %c0_68 = arith.constant 0 : index
    %c0_69 = arith.constant 0 : index
    %c0_70 = arith.constant 0 : index
    %98 = vector.load %arg5[%c0_68, %c0_69, %c0_70] : memref<9x128x128xbf16, #tpu.memory_space<vmem>>, vector<1x128x128xbf16>
    %99 = vector.shape_cast %98 : vector<1x128x128xbf16> to vector<128x128xbf16>
    %cst_71 = arith.constant dense<0.000000e+00> : vector<48x128xf32>
    %100 = tpu.matmul %97, %99, %cst_71 {dimension_numbers = #tpu.dot_dimension_numbers<[1], [0], [0], [1], [0, 0, 1, 1], [], []>} : vector<48x128xbf16>, vector<128x128xbf16>, vector<48x128xf32> -> vector<48x128xf32>
    %101 = arith.addf %95, %100 : vector<48x128xf32>
    %c54 = arith.constant 54 : index
    %c0_72 = arith.constant 0 : index
    %102 = vector.load %arg14[%c54, %c0_72] : memref<128x128xf32, #tpu.memory_space<vmem>>, vector<48x128xf32>
    %103 = arith.truncf %102 : vector<48x128xf32> to vector<48x128xbf16>
    %c1_73 = arith.constant 1 : index
    %c0_74 = arith.constant 0 : index
    %c0_75 = arith.constant 0 : index
    %104 = vector.load %arg5[%c1_73, %c0_74, %c0_75] : memref<9x128x128xbf16, #tpu.memory_space<vmem>>, vector<1x128x128xbf16>
    %105 = vector.shape_cast %104 : vector<1x128x128xbf16> to vector<128x128xbf16>
    %cst_76 = arith.constant dense<0.000000e+00> : vector<48x128xf32>
    %106 = tpu.matmul %103, %105, %cst_76 {dimension_numbers = #tpu.dot_dimension_numbers<[1], [0], [0], [1], [0, 0, 1, 1], [], []>} : vector<48x128xbf16>, vector<128x128xbf16>, vector<48x128xf32> -> vector<48x128xf32>
    %107 = arith.addf %101, %106 : vector<48x128xf32>
    %c55 = arith.constant 55 : index
    %c0_77 = arith.constant 0 : index
    %108 = vector.load %arg14[%c55, %c0_77] : memref<128x128xf32, #tpu.memory_space<vmem>>, vector<48x128xf32>
    %109 = arith.truncf %108 : vector<48x128xf32> to vector<48x128xbf16>
    %c2_78 = arith.constant 2 : index
    %c0_79 = arith.constant 0 : index
    %c0_80 = arith.constant 0 : index
    %110 = vector.load %arg5[%c2_78, %c0_79, %c0_80] : memref<9x128x128xbf16, #tpu.memory_space<vmem>>, vector<1x128x128xbf16>
    %111 = vector.shape_cast %110 : vector<1x128x128xbf16> to vector<128x128xbf16>
    %cst_81 = arith.constant dense<0.000000e+00> : vector<48x128xf32>
    %112 = tpu.matmul %109, %111, %cst_81 {dimension_numbers = #tpu.dot_dimension_numbers<[1], [0], [0], [1], [0, 0, 1, 1], [], []>} : vector<48x128xbf16>, vector<128x128xbf16>, vector<48x128xf32> -> vector<48x128xf32>
    %113 = arith.addf %107, %112 : vector<48x128xf32>
    %c63 = arith.constant 63 : index
    %c0_82 = arith.constant 0 : index
    %114 = vector.load %arg14[%c63, %c0_82] : memref<128x128xf32, #tpu.memory_space<vmem>>, vector<48x128xf32>
    %115 = arith.truncf %114 : vector<48x128xf32> to vector<48x128xbf16>
    %c3_83 = arith.constant 3 : index
    %c0_84 = arith.constant 0 : index
    %c0_85 = arith.constant 0 : index
    %116 = vector.load %arg5[%c3_83, %c0_84, %c0_85] : memref<9x128x128xbf16, #tpu.memory_space<vmem>>, vector<1x128x128xbf16>
    %117 = vector.shape_cast %116 : vector<1x128x128xbf16> to vector<128x128xbf16>
    %cst_86 = arith.constant dense<0.000000e+00> : vector<48x128xf32>
    %118 = tpu.matmul %115, %117, %cst_86 {dimension_numbers = #tpu.dot_dimension_numbers<[1], [0], [0], [1], [0, 0, 1, 1], [], []>} : vector<48x128xbf16>, vector<128x128xbf16>, vector<48x128xf32> -> vector<48x128xf32>
    %119 = arith.addf %113, %118 : vector<48x128xf32>
    %c64_87 = arith.constant 64 : index
    %c0_88 = arith.constant 0 : index
    %120 = vector.load %arg14[%c64_87, %c0_88] : memref<128x128xf32, #tpu.memory_space<vmem>>, vector<48x128xf32>
    %121 = arith.truncf %120 : vector<48x128xf32> to vector<48x128xbf16>
    %c4_89 = arith.constant 4 : index
    %c0_90 = arith.constant 0 : index
    %c0_91 = arith.constant 0 : index
    %122 = vector.load %arg5[%c4_89, %c0_90, %c0_91] : memref<9x128x128xbf16, #tpu.memory_space<vmem>>, vector<1x128x128xbf16>
    %123 = vector.shape_cast %122 : vector<1x128x128xbf16> to vector<128x128xbf16>
    %cst_92 = arith.constant dense<0.000000e+00> : vector<48x128xf32>
    %124 = tpu.matmul %121, %123, %cst_92 {dimension_numbers = #tpu.dot_dimension_numbers<[1], [0], [0], [1], [0, 0, 1, 1], [], []>} : vector<48x128xbf16>, vector<128x128xbf16>, vector<48x128xf32> -> vector<48x128xf32>
    %125 = arith.addf %119, %124 : vector<48x128xf32>
    %c65 = arith.constant 65 : index
    %c0_93 = arith.constant 0 : index
    %126 = vector.load %arg14[%c65, %c0_93] : memref<128x128xf32, #tpu.memory_space<vmem>>, vector<48x128xf32>
    %127 = arith.truncf %126 : vector<48x128xf32> to vector<48x128xbf16>
    %c5_94 = arith.constant 5 : index
    %c0_95 = arith.constant 0 : index
    %c0_96 = arith.constant 0 : index
    %128 = vector.load %arg5[%c5_94, %c0_95, %c0_96] : memref<9x128x128xbf16, #tpu.memory_space<vmem>>, vector<1x128x128xbf16>
    %129 = vector.shape_cast %128 : vector<1x128x128xbf16> to vector<128x128xbf16>
    %cst_97 = arith.constant dense<0.000000e+00> : vector<48x128xf32>
    %130 = tpu.matmul %127, %129, %cst_97 {dimension_numbers = #tpu.dot_dimension_numbers<[1], [0], [0], [1], [0, 0, 1, 1], [], []>} : vector<48x128xbf16>, vector<128x128xbf16>, vector<48x128xf32> -> vector<48x128xf32>
    %131 = arith.addf %125, %130 : vector<48x128xf32>
    %c73 = arith.constant 73 : index
    %c0_98 = arith.constant 0 : index
    %132 = vector.load %arg14[%c73, %c0_98] : memref<128x128xf32, #tpu.memory_space<vmem>>, vector<48x128xf32>
    %133 = arith.truncf %132 : vector<48x128xf32> to vector<48x128xbf16>
    %c6_99 = arith.constant 6 : index
    %c0_100 = arith.constant 0 : index
    %c0_101 = arith.constant 0 : index
    %134 = vector.load %arg5[%c6_99, %c0_100, %c0_101] : memref<9x128x128xbf16, #tpu.memory_space<vmem>>, vector<1x128x128xbf16>
    %135 = vector.shape_cast %134 : vector<1x128x128xbf16> to vector<128x128xbf16>
    %cst_102 = arith.constant dense<0.000000e+00> : vector<48x128xf32>
    %136 = tpu.matmul %133, %135, %cst_102 {dimension_numbers = #tpu.dot_dimension_numbers<[1], [0], [0], [1], [0, 0, 1, 1], [], []>} : vector<48x128xbf16>, vector<128x128xbf16>, vector<48x128xf32> -> vector<48x128xf32>
    %137 = arith.addf %131, %136 : vector<48x128xf32>
    %c74 = arith.constant 74 : index
    %c0_103 = arith.constant 0 : index
    %138 = vector.load %arg14[%c74, %c0_103] : memref<128x128xf32, #tpu.memory_space<vmem>>, vector<48x128xf32>
    %139 = arith.truncf %138 : vector<48x128xf32> to vector<48x128xbf16>
    %c7_104 = arith.constant 7 : index
    %c0_105 = arith.constant 0 : index
    %c0_106 = arith.constant 0 : index
    %140 = vector.load %arg5[%c7_104, %c0_105, %c0_106] : memref<9x128x128xbf16, #tpu.memory_space<vmem>>, vector<1x128x128xbf16>
    %141 = vector.shape_cast %140 : vector<1x128x128xbf16> to vector<128x128xbf16>
    %cst_107 = arith.constant dense<0.000000e+00> : vector<48x128xf32>
    %142 = tpu.matmul %139, %141, %cst_107 {dimension_numbers = #tpu.dot_dimension_numbers<[1], [0], [0], [1], [0, 0, 1, 1], [], []>} : vector<48x128xbf16>, vector<128x128xbf16>, vector<48x128xf32> -> vector<48x128xf32>
    %143 = arith.addf %137, %142 : vector<48x128xf32>
    %c75 = arith.constant 75 : index
    %c0_108 = arith.constant 0 : index
    %144 = vector.load %arg14[%c75, %c0_108] : memref<128x128xf32, #tpu.memory_space<vmem>>, vector<48x128xf32>
    %145 = arith.truncf %144 : vector<48x128xf32> to vector<48x128xbf16>
    %c8_109 = arith.constant 8 : index
    %c0_110 = arith.constant 0 : index
    %c0_111 = arith.constant 0 : index
    %146 = vector.load %arg5[%c8_109, %c0_110, %c0_111] : memref<9x128x128xbf16, #tpu.memory_space<vmem>>, vector<1x128x128xbf16>
    %147 = vector.shape_cast %146 : vector<1x128x128xbf16> to vector<128x128xbf16>
    %cst_112 = arith.constant dense<0.000000e+00> : vector<48x128xf32>
    %148 = tpu.matmul %145, %147, %cst_112 {dimension_numbers = #tpu.dot_dimension_numbers<[1], [0], [0], [1], [0, 0, 1, 1], [], []>} : vector<48x128xbf16>, vector<128x128xbf16>, vector<48x128xf32> -> vector<48x128xf32>
    %149 = arith.addf %143, %148 : vector<48x128xf32>
    %150 = vector.broadcast %31 : vector<1x128xf32> to vector<48x128xf32>
    %151 = arith.addf %149, %150 : vector<48x128xf32>
    %cst_113 = arith.constant 0.000000e+00 : f32
    %152 = vector.broadcast %cst_113 : f32 to vector<48x128xf32>
    %153 = arith.maximumf %151, %152 : vector<48x128xf32>
    %154 = vector.extract_strided_slice %3 {offsets = [64, 0], sizes = [48, 1], strides = [1, 1]} : vector<128x1xf32> to vector<48x1xf32>
    %155 = vector.broadcast %154 : vector<48x1xf32> to vector<48x128xf32>
    %156 = arith.mulf %153, %155 : vector<48x128xf32>
    %c64_114 = arith.constant 64 : index
    %c0_115 = arith.constant 0 : index
    %157 = vector.load %arg15[%c64_114, %c0_115] : memref<128x128xf32, #tpu.memory_space<vmem>>, vector<48x128xf32>
    tpu.vector_store %arg15[%c64_114, %c0_115], %156 {strides = array<i32>} : memref<128x128xf32, #tpu.memory_space<vmem>>, vector<48x128xf32>,
    %158 = arith.extui %0 : i1 to i32
    %c0_i32_116 = arith.constant 0 : i32
    %159 = arith.cmpi ne, %158, %c0_i32_116 : i32
    scf.if %159 {
      %c0_i32_274 = arith.constant 0 : i32
      %383 = tpu.memref_slice %arg20[%c0_i32_274] : memref<2x!tpu.dma_semaphore, #tpu.memory_space<semaphore_mem>> -> memref<1x!tpu.dma_semaphore, #tpu.memory_space<semaphore_mem>>
      %384 = tpu.memref_squeeze %383 : memref<1x!tpu.dma_semaphore, #tpu.memory_space<semaphore_mem>> -> memref<!tpu.dma_semaphore, #tpu.memory_space<semaphore_mem>>
      tpu.wait_dma2 semaphore(%384 : memref<!tpu.dma_semaphore, #tpu.memory_space<semaphore_mem>>) src(%arg7 : memref<9x128x256xbf16, #tpu.memory_space<any>>) dst(%arg18 : memref<9x128x256xbf16, #tpu.memory_space<vmem>>)
    } else {
    }
    %c0_117 = arith.constant 0 : index
    %c0_118 = arith.constant 0 : index
    %160 = vector.load %arg8[%c0_117, %c0_118] : memref<1x256xf32, #tpu.memory_space<vmem>>, vector<1x256xf32>
    %cst_119 = arith.constant 0.000000e+00 : f32
    %161 = vector.broadcast %cst_119 : f32 to vector<48x256xf32>
    %c5_120 = arith.constant 5 : index
    %c0_121 = arith.constant 0 : index
    %162 = vector.load %arg15[%c5_120, %c0_121] : memref<128x128xf32, #tpu.memory_space<vmem>>, vector<48x128xf32>
    %163 = arith.truncf %162 : vector<48x128xf32> to vector<48x128xbf16>
    %c0_122 = arith.constant 0 : index
    %c0_123 = arith.constant 0 : index
    %c0_124 = arith.constant 0 : index
    %164 = vector.load %arg18[%c0_122, %c0_123, %c0_124] : memref<9x128x256xbf16, #tpu.memory_space<vmem>>, vector<1x128x256xbf16>
    %165 = vector.shape_cast %164 : vector<1x128x256xbf16> to vector<128x256xbf16>
    %cst_125 = arith.constant dense<0.000000e+00> : vector<48x256xf32>
    %166 = tpu.matmul %163, %165, %cst_125 {dimension_numbers = #tpu.dot_dimension_numbers<[1], [0], [0], [1], [0, 0, 1, 1], [], []>} : vector<48x128xbf16>, vector<128x256xbf16>, vector<48x256xf32> -> vector<48x256xf32>
    %167 = arith.addf %161, %166 : vector<48x256xf32>
    %c6_126 = arith.constant 6 : index
    %c0_127 = arith.constant 0 : index
    %168 = vector.load %arg15[%c6_126, %c0_127] : memref<128x128xf32, #tpu.memory_space<vmem>>, vector<48x128xf32>
    %169 = arith.truncf %168 : vector<48x128xf32> to vector<48x128xbf16>
    %c1_128 = arith.constant 1 : index
    %c0_129 = arith.constant 0 : index
    %c0_130 = arith.constant 0 : index
    %170 = vector.load %arg18[%c1_128, %c0_129, %c0_130] : memref<9x128x256xbf16, #tpu.memory_space<vmem>>, vector<1x128x256xbf16>
    %171 = vector.shape_cast %170 : vector<1x128x256xbf16> to vector<128x256xbf16>
    %cst_131 = arith.constant dense<0.000000e+00> : vector<48x256xf32>
    %172 = tpu.matmul %169, %171, %cst_131 {dimension_numbers = #tpu.dot_dimension_numbers<[1], [0], [0], [1], [0, 0, 1, 1], [], []>} : vector<48x128xbf16>, vector<128x256xbf16>, vector<48x256xf32> -> vector<48x256xf32>
    %173 = arith.addf %167, %172 : vector<48x256xf32>
    %c7_132 = arith.constant 7 : index
    %c0_133 = arith.constant 0 : index
    %174 = vector.load %arg15[%c7_132, %c0_133] : memref<128x128xf32, #tpu.memory_space<vmem>>, vector<48x128xf32>
    %175 = arith.truncf %174 : vector<48x128xf32> to vector<48x128xbf16>
    %c2_134 = arith.constant 2 : index
    %c0_135 = arith.constant 0 : index
    %c0_136 = arith.constant 0 : index
    %176 = vector.load %arg18[%c2_134, %c0_135, %c0_136] : memref<9x128x256xbf16, #tpu.memory_space<vmem>>, vector<1x128x256xbf16>
    %177 = vector.shape_cast %176 : vector<1x128x256xbf16> to vector<128x256xbf16>
    %cst_137 = arith.constant dense<0.000000e+00> : vector<48x256xf32>
    %178 = tpu.matmul %175, %177, %cst_137 {dimension_numbers = #tpu.dot_dimension_numbers<[1], [0], [0], [1], [0, 0, 1, 1], [], []>} : vector<48x128xbf16>, vector<128x256xbf16>, vector<48x256xf32> -> vector<48x256xf32>
    %179 = arith.addf %173, %178 : vector<48x256xf32>
    %c15_138 = arith.constant 15 : index
    %c0_139 = arith.constant 0 : index
    %180 = vector.load %arg15[%c15_138, %c0_139] : memref<128x128xf32, #tpu.memory_space<vmem>>, vector<48x128xf32>
    %181 = arith.truncf %180 : vector<48x128xf32> to vector<48x128xbf16>
    %c3_140 = arith.constant 3 : index
    %c0_141 = arith.constant 0 : index
    %c0_142 = arith.constant 0 : index
    %182 = vector.load %arg18[%c3_140, %c0_141, %c0_142] : memref<9x128x256xbf16, #tpu.memory_space<vmem>>, vector<1x128x256xbf16>
    %183 = vector.shape_cast %182 : vector<1x128x256xbf16> to vector<128x256xbf16>
    %cst_143 = arith.constant dense<0.000000e+00> : vector<48x256xf32>
    %184 = tpu.matmul %181, %183, %cst_143 {dimension_numbers = #tpu.dot_dimension_numbers<[1], [0], [0], [1], [0, 0, 1, 1], [], []>} : vector<48x128xbf16>, vector<128x256xbf16>, vector<48x256xf32> -> vector<48x256xf32>
    %185 = arith.addf %179, %184 : vector<48x256xf32>
    %c16_144 = arith.constant 16 : index
    %c0_145 = arith.constant 0 : index
    %186 = vector.load %arg15[%c16_144, %c0_145] : memref<128x128xf32, #tpu.memory_space<vmem>>, vector<48x128xf32>
    %187 = arith.truncf %186 : vector<48x128xf32> to vector<48x128xbf16>
    %c4_146 = arith.constant 4 : index
    %c0_147 = arith.constant 0 : index
    %c0_148 = arith.constant 0 : index
    %188 = vector.load %arg18[%c4_146, %c0_147, %c0_148] : memref<9x128x256xbf16, #tpu.memory_space<vmem>>, vector<1x128x256xbf16>
    %189 = vector.shape_cast %188 : vector<1x128x256xbf16> to vector<128x256xbf16>
    %cst_149 = arith.constant dense<0.000000e+00> : vector<48x256xf32>
    %190 = tpu.matmul %187, %189, %cst_149 {dimension_numbers = #tpu.dot_dimension_numbers<[1], [0], [0], [1], [0, 0, 1, 1], [], []>} : vector<48x128xbf16>, vector<128x256xbf16>, vector<48x256xf32> -> vector<48x256xf32>
    %191 = arith.addf %185, %190 : vector<48x256xf32>
    %c17_150 = arith.constant 17 : index
    %c0_151 = arith.constant 0 : index
    %192 = vector.load %arg15[%c17_150, %c0_151] : memref<128x128xf32, #tpu.memory_space<vmem>>, vector<48x128xf32>
    %193 = arith.truncf %192 : vector<48x128xf32> to vector<48x128xbf16>
    %c5_152 = arith.constant 5 : index
    %c0_153 = arith.constant 0 : index
    %c0_154 = arith.constant 0 : index
    %194 = vector.load %arg18[%c5_152, %c0_153, %c0_154] : memref<9x128x256xbf16, #tpu.memory_space<vmem>>, vector<1x128x256xbf16>
    %195 = vector.shape_cast %194 : vector<1x128x256xbf16> to vector<128x256xbf16>
    %cst_155 = arith.constant dense<0.000000e+00> : vector<48x256xf32>
    %196 = tpu.matmul %193, %195, %cst_155 {dimension_numbers = #tpu.dot_dimension_numbers<[1], [0], [0], [1], [0, 0, 1, 1], [], []>} : vector<48x128xbf16>, vector<128x256xbf16>, vector<48x256xf32> -> vector<48x256xf32>
    %197 = arith.addf %191, %196 : vector<48x256xf32>
    %c25_156 = arith.constant 25 : index
    %c0_157 = arith.constant 0 : index
    %198 = vector.load %arg15[%c25_156, %c0_157] : memref<128x128xf32, #tpu.memory_space<vmem>>, vector<48x128xf32>
    %199 = arith.truncf %198 : vector<48x128xf32> to vector<48x128xbf16>
    %c6_158 = arith.constant 6 : index
    %c0_159 = arith.constant 0 : index
    %c0_160 = arith.constant 0 : index
    %200 = vector.load %arg18[%c6_158, %c0_159, %c0_160] : memref<9x128x256xbf16, #tpu.memory_space<vmem>>, vector<1x128x256xbf16>
    %201 = vector.shape_cast %200 : vector<1x128x256xbf16> to vector<128x256xbf16>
    %cst_161 = arith.constant dense<0.000000e+00> : vector<48x256xf32>
    %202 = tpu.matmul %199, %201, %cst_161 {dimension_numbers = #tpu.dot_dimension_numbers<[1], [0], [0], [1], [0, 0, 1, 1], [], []>} : vector<48x128xbf16>, vector<128x256xbf16>, vector<48x256xf32> -> vector<48x256xf32>
    %203 = arith.addf %197, %202 : vector<48x256xf32>
    %c26_162 = arith.constant 26 : index
    %c0_163 = arith.constant 0 : index
    %204 = vector.load %arg15[%c26_162, %c0_163] : memref<128x128xf32, #tpu.memory_space<vmem>>, vector<48x128xf32>
    %205 = arith.truncf %204 : vector<48x128xf32> to vector<48x128xbf16>
    %c7_164 = arith.constant 7 : index
    %c0_165 = arith.constant 0 : index
    %c0_166 = arith.constant 0 : index
    %206 = vector.load %arg18[%c7_164, %c0_165, %c0_166] : memref<9x128x256xbf16, #tpu.memory_space<vmem>>, vector<1x128x256xbf16>
    %207 = vector.shape_cast %206 : vector<1x128x256xbf16> to vector<128x256xbf16>
    %cst_167 = arith.constant dense<0.000000e+00> : vector<48x256xf32>
    %208 = tpu.matmul %205, %207, %cst_167 {dimension_numbers = #tpu.dot_dimension_numbers<[1], [0], [0], [1], [0, 0, 1, 1], [], []>} : vector<48x128xbf16>, vector<128x256xbf16>, vector<48x256xf32> -> vector<48x256xf32>
    %209 = arith.addf %203, %208 : vector<48x256xf32>
    %c27_168 = arith.constant 27 : index
    %c0_169 = arith.constant 0 : index
    %210 = vector.load %arg15[%c27_168, %c0_169] : memref<128x128xf32, #tpu.memory_space<vmem>>, vector<48x128xf32>
    %211 = arith.truncf %210 : vector<48x128xf32> to vector<48x128xbf16>
    %c8_170 = arith.constant 8 : index
    %c0_171 = arith.constant 0 : index
    %c0_172 = arith.constant 0 : index
    %212 = vector.load %arg18[%c8_170, %c0_171, %c0_172] : memref<9x128x256xbf16, #tpu.memory_space<vmem>>, vector<1x128x256xbf16>
    %213 = vector.shape_cast %212 : vector<1x128x256xbf16> to vector<128x256xbf16>
    %cst_173 = arith.constant dense<0.000000e+00> : vector<48x256xf32>
    %214 = tpu.matmul %211, %213, %cst_173 {dimension_numbers = #tpu.dot_dimension_numbers<[1], [0], [0], [1], [0, 0, 1, 1], [], []>} : vector<48x128xbf16>, vector<128x256xbf16>, vector<48x256xf32> -> vector<48x256xf32>
    %215 = arith.addf %209, %214 : vector<48x256xf32>
    %216 = vector.broadcast %160 : vector<1x256xf32> to vector<48x256xf32>
    %217 = arith.addf %215, %216 : vector<48x256xf32>
    %cst_174 = arith.constant 0.000000e+00 : f32
    %218 = vector.broadcast %cst_174 : f32 to vector<48x256xf32>
    %219 = arith.maximumf %217, %218 : vector<48x256xf32>
    %220 = vector.extract_strided_slice %3 {offsets = [16, 0], sizes = [48, 1], strides = [1, 1]} : vector<128x1xf32> to vector<48x1xf32>
    %221 = vector.broadcast %220 : vector<48x1xf32> to vector<48x256xf32>
    %222 = arith.mulf %219, %221 : vector<48x256xf32>
    %c16_175 = arith.constant 16 : index
    %c0_176 = arith.constant 0 : index
    %223 = vector.load %arg16[%c16_175, %c0_176] : memref<128x256xf32, #tpu.memory_space<vmem>>, vector<48x256xf32>
    tpu.vector_store %arg16[%c16_175, %c0_176], %222 {strides = array<i32>} : memref<128x256xf32, #tpu.memory_space<vmem>>, vector<48x256xf32>,
    %cst_177 = arith.constant 0.000000e+00 : f32
    %224 = vector.broadcast %cst_177 : f32 to vector<48x256xf32>
    %c53_178 = arith.constant 53 : index
    %c0_179 = arith.constant 0 : index
    %225 = vector.load %arg15[%c53_178, %c0_179] : memref<128x128xf32, #tpu.memory_space<vmem>>, vector<48x128xf32>
    %226 = arith.truncf %225 : vector<48x128xf32> to vector<48x128xbf16>
    %c0_180 = arith.constant 0 : index
    %c0_181 = arith.constant 0 : index
    %c0_182 = arith.constant 0 : index
    %227 = vector.load %arg18[%c0_180, %c0_181, %c0_182] : memref<9x128x256xbf16, #tpu.memory_space<vmem>>, vector<1x128x256xbf16>
    %228 = vector.shape_cast %227 : vector<1x128x256xbf16> to vector<128x256xbf16>
    %cst_183 = arith.constant dense<0.000000e+00> : vector<48x256xf32>
    %229 = tpu.matmul %226, %228, %cst_183 {dimension_numbers = #tpu.dot_dimension_numbers<[1], [0], [0], [1], [0, 0, 1, 1], [], []>} : vector<48x128xbf16>, vector<128x256xbf16>, vector<48x256xf32> -> vector<48x256xf32>
    %230 = arith.addf %224, %229 : vector<48x256xf32>
    %c54_184 = arith.constant 54 : index
    %c0_185 = arith.constant 0 : index
    %231 = vector.load %arg15[%c54_184, %c0_185] : memref<128x128xf32, #tpu.memory_space<vmem>>, vector<48x128xf32>
    %232 = arith.truncf %231 : vector<48x128xf32> to vector<48x128xbf16>
    %c1_186 = arith.constant 1 : index
    %c0_187 = arith.constant 0 : index
    %c0_188 = arith.constant 0 : index
    %233 = vector.load %arg18[%c1_186, %c0_187, %c0_188] : memref<9x128x256xbf16, #tpu.memory_space<vmem>>, vector<1x128x256xbf16>
    %234 = vector.shape_cast %233 : vector<1x128x256xbf16> to vector<128x256xbf16>
    %cst_189 = arith.constant dense<0.000000e+00> : vector<48x256xf32>
    %235 = tpu.matmul %232, %234, %cst_189 {dimension_numbers = #tpu.dot_dimension_numbers<[1], [0], [0], [1], [0, 0, 1, 1], [], []>} : vector<48x128xbf16>, vector<128x256xbf16>, vector<48x256xf32> -> vector<48x256xf32>
    %236 = arith.addf %230, %235 : vector<48x256xf32>
    %c55_190 = arith.constant 55 : index
    %c0_191 = arith.constant 0 : index
    %237 = vector.load %arg15[%c55_190, %c0_191] : memref<128x128xf32, #tpu.memory_space<vmem>>, vector<48x128xf32>
    %238 = arith.truncf %237 : vector<48x128xf32> to vector<48x128xbf16>
    %c2_192 = arith.constant 2 : index
    %c0_193 = arith.constant 0 : index
    %c0_194 = arith.constant 0 : index
    %239 = vector.load %arg18[%c2_192, %c0_193, %c0_194] : memref<9x128x256xbf16, #tpu.memory_space<vmem>>, vector<1x128x256xbf16>
    %240 = vector.shape_cast %239 : vector<1x128x256xbf16> to vector<128x256xbf16>
    %cst_195 = arith.constant dense<0.000000e+00> : vector<48x256xf32>
    %241 = tpu.matmul %238, %240, %cst_195 {dimension_numbers = #tpu.dot_dimension_numbers<[1], [0], [0], [1], [0, 0, 1, 1], [], []>} : vector<48x128xbf16>, vector<128x256xbf16>, vector<48x256xf32> -> vector<48x256xf32>
    %242 = arith.addf %236, %241 : vector<48x256xf32>
    %c63_196 = arith.constant 63 : index
    %c0_197 = arith.constant 0 : index
    %243 = vector.load %arg15[%c63_196, %c0_197] : memref<128x128xf32, #tpu.memory_space<vmem>>, vector<48x128xf32>
    %244 = arith.truncf %243 : vector<48x128xf32> to vector<48x128xbf16>
    %c3_198 = arith.constant 3 : index
    %c0_199 = arith.constant 0 : index
    %c0_200 = arith.constant 0 : index
    %245 = vector.load %arg18[%c3_198, %c0_199, %c0_200] : memref<9x128x256xbf16, #tpu.memory_space<vmem>>, vector<1x128x256xbf16>
    %246 = vector.shape_cast %245 : vector<1x128x256xbf16> to vector<128x256xbf16>
    %cst_201 = arith.constant dense<0.000000e+00> : vector<48x256xf32>
    %247 = tpu.matmul %244, %246, %cst_201 {dimension_numbers = #tpu.dot_dimension_numbers<[1], [0], [0], [1], [0, 0, 1, 1], [], []>} : vector<48x128xbf16>, vector<128x256xbf16>, vector<48x256xf32> -> vector<48x256xf32>
    %248 = arith.addf %242, %247 : vector<48x256xf32>
    %c64_202 = arith.constant 64 : index
    %c0_203 = arith.constant 0 : index
    %249 = vector.load %arg15[%c64_202, %c0_203] : memref<128x128xf32, #tpu.memory_space<vmem>>, vector<48x128xf32>
    %250 = arith.truncf %249 : vector<48x128xf32> to vector<48x128xbf16>
    %c4_204 = arith.constant 4 : index
    %c0_205 = arith.constant 0 : index
    %c0_206 = arith.constant 0 : index
    %251 = vector.load %arg18[%c4_204, %c0_205, %c0_206] : memref<9x128x256xbf16, #tpu.memory_space<vmem>>, vector<1x128x256xbf16>
    %252 = vector.shape_cast %251 : vector<1x128x256xbf16> to vector<128x256xbf16>
    %cst_207 = arith.constant dense<0.000000e+00> : vector<48x256xf32>
    %253 = tpu.matmul %250, %252, %cst_207 {dimension_numbers = #tpu.dot_dimension_numbers<[1], [0], [0], [1], [0, 0, 1, 1], [], []>} : vector<48x128xbf16>, vector<128x256xbf16>, vector<48x256xf32> -> vector<48x256xf32>
    %254 = arith.addf %248, %253 : vector<48x256xf32>
    %c65_208 = arith.constant 65 : index
    %c0_209 = arith.constant 0 : index
    %255 = vector.load %arg15[%c65_208, %c0_209] : memref<128x128xf32, #tpu.memory_space<vmem>>, vector<48x128xf32>
    %256 = arith.truncf %255 : vector<48x128xf32> to vector<48x128xbf16>
    %c5_210 = arith.constant 5 : index
    %c0_211 = arith.constant 0 : index
    %c0_212 = arith.constant 0 : index
    %257 = vector.load %arg18[%c5_210, %c0_211, %c0_212] : memref<9x128x256xbf16, #tpu.memory_space<vmem>>, vector<1x128x256xbf16>
    %258 = vector.shape_cast %257 : vector<1x128x256xbf16> to vector<128x256xbf16>
    %cst_213 = arith.constant dense<0.000000e+00> : vector<48x256xf32>
    %259 = tpu.matmul %256, %258, %cst_213 {dimension_numbers = #tpu.dot_dimension_numbers<[1], [0], [0], [1], [0, 0, 1, 1], [], []>} : vector<48x128xbf16>, vector<128x256xbf16>, vector<48x256xf32> -> vector<48x256xf32>
    %260 = arith.addf %254, %259 : vector<48x256xf32>
    %c73_214 = arith.constant 73 : index
    %c0_215 = arith.constant 0 : index
    %261 = vector.load %arg15[%c73_214, %c0_215] : memref<128x128xf32, #tpu.memory_space<vmem>>, vector<48x128xf32>
    %262 = arith.truncf %261 : vector<48x128xf32> to vector<48x128xbf16>
    %c6_216 = arith.constant 6 : index
    %c0_217 = arith.constant 0 : index
    %c0_218 = arith.constant 0 : index
    %263 = vector.load %arg18[%c6_216, %c0_217, %c0_218] : memref<9x128x256xbf16, #tpu.memory_space<vmem>>, vector<1x128x256xbf16>
    %264 = vector.shape_cast %263 : vector<1x128x256xbf16> to vector<128x256xbf16>
    %cst_219 = arith.constant dense<0.000000e+00> : vector<48x256xf32>
    %265 = tpu.matmul %262, %264, %cst_219 {dimension_numbers = #tpu.dot_dimension_numbers<[1], [0], [0], [1], [0, 0, 1, 1], [], []>} : vector<48x128xbf16>, vector<128x256xbf16>, vector<48x256xf32> -> vector<48x256xf32>
    %266 = arith.addf %260, %265 : vector<48x256xf32>
    %c74_220 = arith.constant 74 : index
    %c0_221 = arith.constant 0 : index
    %267 = vector.load %arg15[%c74_220, %c0_221] : memref<128x128xf32, #tpu.memory_space<vmem>>, vector<48x128xf32>
    %268 = arith.truncf %267 : vector<48x128xf32> to vector<48x128xbf16>
    %c7_222 = arith.constant 7 : index
    %c0_223 = arith.constant 0 : index
    %c0_224 = arith.constant 0 : index
    %269 = vector.load %arg18[%c7_222, %c0_223, %c0_224] : memref<9x128x256xbf16, #tpu.memory_space<vmem>>, vector<1x128x256xbf16>
    %270 = vector.shape_cast %269 : vector<1x128x256xbf16> to vector<128x256xbf16>
    %cst_225 = arith.constant dense<0.000000e+00> : vector<48x256xf32>
    %271 = tpu.matmul %268, %270, %cst_225 {dimension_numbers = #tpu.dot_dimension_numbers<[1], [0], [0], [1], [0, 0, 1, 1], [], []>} : vector<48x128xbf16>, vector<128x256xbf16>, vector<48x256xf32> -> vector<48x256xf32>
    %272 = arith.addf %266, %271 : vector<48x256xf32>
    %c75_226 = arith.constant 75 : index
    %c0_227 = arith.constant 0 : index
    %273 = vector.load %arg15[%c75_226, %c0_227] : memref<128x128xf32, #tpu.memory_space<vmem>>, vector<48x128xf32>
    %274 = arith.truncf %273 : vector<48x128xf32> to vector<48x128xbf16>
    %c8_228 = arith.constant 8 : index
    %c0_229 = arith.constant 0 : index
    %c0_230 = arith.constant 0 : index
    %275 = vector.load %arg18[%c8_228, %c0_229, %c0_230] : memref<9x128x256xbf16, #tpu.memory_space<vmem>>, vector<1x128x256xbf16>
    %276 = vector.shape_cast %275 : vector<1x128x256xbf16> to vector<128x256xbf16>
    %cst_231 = arith.constant dense<0.000000e+00> : vector<48x256xf32>
    %277 = tpu.matmul %274, %276, %cst_231 {dimension_numbers = #tpu.dot_dimension_numbers<[1], [0], [0], [1], [0, 0, 1, 1], [], []>} : vector<48x128xbf16>, vector<128x256xbf16>, vector<48x256xf32> -> vector<48x256xf32>
    %278 = arith.addf %272, %277 : vector<48x256xf32>
    %279 = vector.broadcast %160 : vector<1x256xf32> to vector<48x256xf32>
    %280 = arith.addf %278, %279 : vector<48x256xf32>
    %cst_232 = arith.constant 0.000000e+00 : f32
    %281 = vector.broadcast %cst_232 : f32 to vector<48x256xf32>
    %282 = arith.maximumf %280, %281 : vector<48x256xf32>
    %283 = vector.extract_strided_slice %3 {offsets = [64, 0], sizes = [48, 1], strides = [1, 1]} : vector<128x1xf32> to vector<48x1xf32>
    %284 = vector.broadcast %283 : vector<48x1xf32> to vector<48x256xf32>
    %285 = arith.mulf %282, %284 : vector<48x256xf32>
    %c64_233 = arith.constant 64 : index
    %c0_234 = arith.constant 0 : index
    %286 = vector.load %arg16[%c64_233, %c0_234] : memref<128x256xf32, #tpu.memory_space<vmem>>, vector<48x256xf32>
    tpu.vector_store %arg16[%c64_233, %c0_234], %285 {strides = array<i32>} : memref<128x256xf32, #tpu.memory_space<vmem>>, vector<48x256xf32>,
    %c0_235 = arith.constant 0 : index
    %c0_236 = arith.constant 0 : index
    %287 = vector.load %arg10[%c0_235, %c0_236] : memref<1x64xf32, #tpu.memory_space<vmem>>, vector<1x64xf32>
    %cst_237 = arith.constant 0.000000e+00 : f32
    %288 = vector.broadcast %cst_237 : f32 to vector<48x64xf32>
    %c16_238 = arith.constant 16 : index
    %c0_239 = arith.constant 0 : index
    %289 = vector.load %arg16[%c16_238, %c0_239] : memref<128x256xf32, #tpu.memory_space<vmem>>, vector<48x256xf32>
    %290 = arith.truncf %289 : vector<48x256xf32> to vector<48x256xbf16>
    %c0_240 = arith.constant 0 : index
    %c0_241 = arith.constant 0 : index
    %291 = vector.load %arg9[%c0_240, %c0_241] : memref<256x64xbf16, #tpu.memory_space<vmem>>, vector<256x64xbf16>
    %cst_242 = arith.constant dense<0.000000e+00> : vector<48x64xf32>
    %292 = tpu.matmul %290, %291, %cst_242 {dimension_numbers = #tpu.dot_dimension_numbers<[1], [0], [0], [1], [0, 0, 1, 1], [], []>} : vector<48x256xbf16>, vector<256x64xbf16>, vector<48x64xf32> -> vector<48x64xf32>
    %293 = arith.addf %288, %292 : vector<48x64xf32>
    %294 = vector.broadcast %287 : vector<1x64xf32> to vector<48x64xf32>
    %295 = arith.addf %293, %294 : vector<48x64xf32>
    %cst_243 = arith.constant 0.000000e+00 : f32
    %296 = vector.broadcast %cst_243 : f32 to vector<48x64xf32>
    %297 = arith.maximumf %295, %296 : vector<48x64xf32>
    %c16_244 = arith.constant 16 : index
    %c0_245 = arith.constant 0 : index
    %298 = vector.load %arg17[%c16_244, %c0_245] : memref<128x64xf32, #tpu.memory_space<vmem>>, vector<48x64xf32>
    tpu.vector_store %arg17[%c16_244, %c0_245], %297 {strides = array<i32>} : memref<128x64xf32, #tpu.memory_space<vmem>>, vector<48x64xf32>,
    %cst_246 = arith.constant 0.000000e+00 : f32
    %299 = vector.broadcast %cst_246 : f32 to vector<48x64xf32>
    %c64_247 = arith.constant 64 : index
    %c0_248 = arith.constant 0 : index
    %300 = vector.load %arg16[%c64_247, %c0_248] : memref<128x256xf32, #tpu.memory_space<vmem>>, vector<48x256xf32>
    %301 = arith.truncf %300 : vector<48x256xf32> to vector<48x256xbf16>
    %c0_249 = arith.constant 0 : index
    %c0_250 = arith.constant 0 : index
    %302 = vector.load %arg9[%c0_249, %c0_250] : memref<256x64xbf16, #tpu.memory_space<vmem>>, vector<256x64xbf16>
    %cst_251 = arith.constant dense<0.000000e+00> : vector<48x64xf32>
    %303 = tpu.matmul %301, %302, %cst_251 {dimension_numbers = #tpu.dot_dimension_numbers<[1], [0], [0], [1], [0, 0, 1, 1], [], []>} : vector<48x256xbf16>, vector<256x64xbf16>, vector<48x64xf32> -> vector<48x64xf32>
    %304 = arith.addf %299, %303 : vector<48x64xf32>
    %305 = vector.broadcast %287 : vector<1x64xf32> to vector<48x64xf32>
    %306 = arith.addf %304, %305 : vector<48x64xf32>
    %cst_252 = arith.constant 0.000000e+00 : f32
    %307 = vector.broadcast %cst_252 : f32 to vector<48x64xf32>
    %308 = arith.maximumf %306, %307 : vector<48x64xf32>
    %c64_253 = arith.constant 64 : index
    %c0_254 = arith.constant 0 : index
    %309 = vector.load %arg17[%c64_253, %c0_254] : memref<128x64xf32, #tpu.memory_space<vmem>>, vector<48x64xf32>
    tpu.vector_store %arg17[%c64_253, %c0_254], %308 {strides = array<i32>} : memref<128x64xf32, #tpu.memory_space<vmem>>, vector<48x64xf32>,
    %c27_255 = arith.constant 27 : index
    %c0_256 = arith.constant 0 : index
    %310 = vector.load %arg17[%c27_255, %c0_256] : memref<128x64xf32, #tpu.memory_space<vmem>>, vector<8x64xf32>
    %c37 = arith.constant 37 : index
    %c0_257 = arith.constant 0 : index
    %311 = vector.load %arg17[%c37, %c0_257] : memref<128x64xf32, #tpu.memory_space<vmem>>, vector<8x64xf32>
    %312 = arith.maximumf %310, %311 : vector<8x64xf32>
    %313 = vector.extract_strided_slice %312 {offsets = [0, 0], sizes = [1, 64], strides = [1, 1]} : vector<8x64xf32> to vector<1x64xf32>
    %314 = vector.extract_strided_slice %312 {offsets = [1, 0], sizes = [1, 64], strides = [1, 1]} : vector<8x64xf32> to vector<1x64xf32>
    %315 = arith.maximumf %313, %314 : vector<1x64xf32>
    %316 = vector.extract_strided_slice %312 {offsets = [2, 0], sizes = [1, 64], strides = [1, 1]} : vector<8x64xf32> to vector<1x64xf32>
    %317 = vector.extract_strided_slice %312 {offsets = [3, 0], sizes = [1, 64], strides = [1, 1]} : vector<8x64xf32> to vector<1x64xf32>
    %318 = arith.maximumf %316, %317 : vector<1x64xf32>
    %319 = vector.extract_strided_slice %312 {offsets = [4, 0], sizes = [1, 64], strides = [1, 1]} : vector<8x64xf32> to vector<1x64xf32>
    %320 = vector.extract_strided_slice %312 {offsets = [5, 0], sizes = [1, 64], strides = [1, 1]} : vector<8x64xf32> to vector<1x64xf32>
    %321 = arith.maximumf %319, %320 : vector<1x64xf32>
    %322 = vector.extract_strided_slice %312 {offsets = [6, 0], sizes = [1, 64], strides = [1, 1]} : vector<8x64xf32> to vector<1x64xf32>
    %323 = vector.extract_strided_slice %312 {offsets = [7, 0], sizes = [1, 64], strides = [1, 1]} : vector<8x64xf32> to vector<1x64xf32>
    %324 = arith.maximumf %322, %323 : vector<1x64xf32>
    %c47 = arith.constant 47 : index
    %c0_258 = arith.constant 0 : index
    %325 = vector.load %arg17[%c47, %c0_258] : memref<128x64xf32, #tpu.memory_space<vmem>>, vector<8x64xf32>
    %c57 = arith.constant 57 : index
    %c0_259 = arith.constant 0 : index
    %326 = vector.load %arg17[%c57, %c0_259] : memref<128x64xf32, #tpu.memory_space<vmem>>, vector<8x64xf32>
    %327 = arith.maximumf %325, %326 : vector<8x64xf32>
    %328 = vector.extract_strided_slice %327 {offsets = [0, 0], sizes = [1, 64], strides = [1, 1]} : vector<8x64xf32> to vector<1x64xf32>
    %329 = vector.extract_strided_slice %327 {offsets = [1, 0], sizes = [1, 64], strides = [1, 1]} : vector<8x64xf32> to vector<1x64xf32>
    %330 = arith.maximumf %328, %329 : vector<1x64xf32>
    %331 = vector.extract_strided_slice %327 {offsets = [2, 0], sizes = [1, 64], strides = [1, 1]} : vector<8x64xf32> to vector<1x64xf32>
    %332 = vector.extract_strided_slice %327 {offsets = [3, 0], sizes = [1, 64], strides = [1, 1]} : vector<8x64xf32> to vector<1x64xf32>
    %333 = arith.maximumf %331, %332 : vector<1x64xf32>
    %334 = vector.extract_strided_slice %327 {offsets = [4, 0], sizes = [1, 64], strides = [1, 1]} : vector<8x64xf32> to vector<1x64xf32>
    %335 = vector.extract_strided_slice %327 {offsets = [5, 0], sizes = [1, 64], strides = [1, 1]} : vector<8x64xf32> to vector<1x64xf32>
    %336 = arith.maximumf %334, %335 : vector<1x64xf32>
    %337 = vector.extract_strided_slice %327 {offsets = [6, 0], sizes = [1, 64], strides = [1, 1]} : vector<8x64xf32> to vector<1x64xf32>
    %338 = vector.extract_strided_slice %327 {offsets = [7, 0], sizes = [1, 64], strides = [1, 1]} : vector<8x64xf32> to vector<1x64xf32>
    %339 = arith.maximumf %337, %338 : vector<1x64xf32>
    %c67 = arith.constant 67 : index
    %c0_260 = arith.constant 0 : index
    %340 = vector.load %arg17[%c67, %c0_260] : memref<128x64xf32, #tpu.memory_space<vmem>>, vector<8x64xf32>
    %c77 = arith.constant 77 : index
    %c0_261 = arith.constant 0 : index
    %341 = vector.load %arg17[%c77, %c0_261] : memref<128x64xf32, #tpu.memory_space<vmem>>, vector<8x64xf32>
    %342 = arith.maximumf %340, %341 : vector<8x64xf32>
    %343 = vector.extract_strided_slice %342 {offsets = [0, 0], sizes = [1, 64], strides = [1, 1]} : vector<8x64xf32> to vector<1x64xf32>
    %344 = vector.extract_strided_slice %342 {offsets = [1, 0], sizes = [1, 64], strides = [1, 1]} : vector<8x64xf32> to vector<1x64xf32>
    %345 = arith.maximumf %343, %344 : vector<1x64xf32>
    %346 = vector.extract_strided_slice %342 {offsets = [2, 0], sizes = [1, 64], strides = [1, 1]} : vector<8x64xf32> to vector<1x64xf32>
    %347 = vector.extract_strided_slice %342 {offsets = [3, 0], sizes = [1, 64], strides = [1, 1]} : vector<8x64xf32> to vector<1x64xf32>
    %348 = arith.maximumf %346, %347 : vector<1x64xf32>
    %349 = vector.extract_strided_slice %342 {offsets = [4, 0], sizes = [1, 64], strides = [1, 1]} : vector<8x64xf32> to vector<1x64xf32>
    %350 = vector.extract_strided_slice %342 {offsets = [5, 0], sizes = [1, 64], strides = [1, 1]} : vector<8x64xf32> to vector<1x64xf32>
    %351 = arith.maximumf %349, %350 : vector<1x64xf32>
    %352 = vector.extract_strided_slice %342 {offsets = [6, 0], sizes = [1, 64], strides = [1, 1]} : vector<8x64xf32> to vector<1x64xf32>
    %353 = vector.extract_strided_slice %342 {offsets = [7, 0], sizes = [1, 64], strides = [1, 1]} : vector<8x64xf32> to vector<1x64xf32>
    %354 = arith.maximumf %352, %353 : vector<1x64xf32>
    %c87 = arith.constant 87 : index
    %c0_262 = arith.constant 0 : index
    %355 = vector.load %arg17[%c87, %c0_262] : memref<128x64xf32, #tpu.memory_space<vmem>>, vector<8x64xf32>
    %c97 = arith.constant 97 : index
    %c0_263 = arith.constant 0 : index
    %356 = vector.load %arg17[%c97, %c0_263] : memref<128x64xf32, #tpu.memory_space<vmem>>, vector<8x64xf32>
    %357 = arith.maximumf %355, %356 : vector<8x64xf32>
    %358 = vector.extract_strided_slice %357 {offsets = [0, 0], sizes = [1, 64], strides = [1, 1]} : vector<8x64xf32> to vector<1x64xf32>
    %359 = vector.extract_strided_slice %357 {offsets = [1, 0], sizes = [1, 64], strides = [1, 1]} : vector<8x64xf32> to vector<1x64xf32>
    %360 = arith.maximumf %358, %359 : vector<1x64xf32>
    %361 = vector.extract_strided_slice %357 {offsets = [2, 0], sizes = [1, 64], strides = [1, 1]} : vector<8x64xf32> to vector<1x64xf32>
    %362 = vector.extract_strided_slice %357 {offsets = [3, 0], sizes = [1, 64], strides = [1, 1]} : vector<8x64xf32> to vector<1x64xf32>
    %363 = arith.maximumf %361, %362 : vector<1x64xf32>
    %364 = vector.extract_strided_slice %357 {offsets = [4, 0], sizes = [1, 64], strides = [1, 1]} : vector<8x64xf32> to vector<1x64xf32>
    %365 = vector.extract_strided_slice %357 {offsets = [5, 0], sizes = [1, 64], strides = [1, 1]} : vector<8x64xf32> to vector<1x64xf32>
    %366 = arith.maximumf %364, %365 : vector<1x64xf32>
    %367 = vector.extract_strided_slice %357 {offsets = [6, 0], sizes = [1, 64], strides = [1, 1]} : vector<8x64xf32> to vector<1x64xf32>
    %368 = vector.extract_strided_slice %357 {offsets = [7, 0], sizes = [1, 64], strides = [1, 1]} : vector<8x64xf32> to vector<1x64xf32>
    %369 = arith.maximumf %367, %368 : vector<1x64xf32>
    %370 = tpu.concatenate %315, %318, %321, %324, %330, %333, %336, %339, %345, %348, %351, %354, %360, %363, %366, %369 in 1 : vector<1x64xf32>, vector<1x64xf32>, vector<1x64xf32>, vector<1x64xf32>, vector<1x64xf32>, vector<1x64xf32>, vector<1x64xf32>, vector<1x64xf32>, vector<1x64xf32>, vector<1x64xf32>, vector<1x64xf32>, vector<1x64xf32>, vector<1x64xf32>, vector<1x64xf32>, vector<1x64xf32>, vector<1x64xf32> -> vector<1x1024xf32>
    %371 = arith.truncf %370 : vector<1x1024xf32> to vector<1x1024xbf16>
    %372 = arith.extui %0 : i1 to i32
    %c0_i32_264 = arith.constant 0 : i32
    %373 = arith.cmpi ne, %372, %c0_i32_264 : i32
    scf.if %373 {
      %c1_i32 = arith.constant 1 : i32
      %383 = tpu.memref_slice %arg20[%c1_i32] : memref<2x!tpu.dma_semaphore, #tpu.memory_space<semaphore_mem>> -> memref<1x!tpu.dma_semaphore, #tpu.memory_space<semaphore_mem>>
      %384 = tpu.memref_squeeze %383 : memref<1x!tpu.dma_semaphore, #tpu.memory_space<semaphore_mem>> -> memref<!tpu.dma_semaphore, #tpu.memory_space<semaphore_mem>>
      tpu.wait_dma2 semaphore(%384 : memref<!tpu.dma_semaphore, #tpu.memory_space<semaphore_mem>>) src(%arg11 : memref<1024x512xbf16, #tpu.memory_space<any>>) dst(%arg19 : memref<1024x512xbf16, #tpu.memory_space<vmem>>)
    } else {
    }
    %c0_265 = arith.constant 0 : index
    %c0_266 = arith.constant 0 : index
    %374 = vector.load %arg19[%c0_265, %c0_266] : memref<1024x512xbf16, #tpu.memory_space<vmem>>, vector<1024x512xbf16>
    %cst_267 = arith.constant dense<0.000000e+00> : vector<1x512xf32>
    %375 = tpu.matmul %371, %374, %cst_267 {dimension_numbers = #tpu.dot_dimension_numbers<[1], [0], [0], [1], [0, 0, 1, 1], [], []>} : vector<1x1024xbf16>, vector<1024x512xbf16>, vector<1x512xf32> -> vector<1x512xf32>
    %c0_268 = arith.constant 0 : index
    %c0_269 = arith.constant 0 : index
    %376 = vector.load %arg12[%c0_268, %c0_269] : memref<1x512xf32, #tpu.memory_space<vmem>>, vector<1x512xf32>
    %377 = arith.addf %375, %376 : vector<1x512xf32>
    %cst_270 = arith.constant 0.000000e+00 : f32
    %378 = vector.broadcast %cst_270 : f32 to vector<1x512xf32>
    %379 = arith.maximumf %377, %378 : vector<1x512xf32>
    %c0_271 = arith.constant 0 : index
    %c0_272 = arith.constant 0 : index
    %c0_273 = arith.constant 0 : index
    %380 = vector.load %arg13[%c0_271, %c0_272, %c0_273] : memref<1x1x512xf32, #tpu.memory_space<vmem>>, vector<1x1x512xf32>
    %381 = vector.shape_cast %380 : vector<1x1x512xf32> to vector<1x512xf32>
    %382 = vector.shape_cast %379 : vector<1x512xf32> to vector<1x1x512xf32>
    tpu.vector_store %arg13[%c0_271, %c0_272, %c0_273], %382 {strides = array<i32>} : memref<1x1x512xf32, #tpu.memory_space<vmem>>, vector<1x1x512xf32>,
    return
  }
  func.func @transform_0(%arg0: i32) -> (i32, i32) {
    %c0_i32 = arith.constant 0 : i32
    %c0_i32_0 = arith.constant 0 : i32
    return %arg0, %c0_i32 : i32, i32
  }
  func.func @transform_1(%arg0: i32) -> (i32, i32) {
    %c0_i32 = arith.constant 0 : i32
    %c0_i32_0 = arith.constant 0 : i32
    %c0_i32_1 = arith.constant 0 : i32
    return %c0_i32, %c0_i32_0 : i32, i32
  }
  func.func @transform_2(%arg0: i32) -> (i32, i32) {
    %c0_i32 = arith.constant 0 : i32
    %c0_i32_0 = arith.constant 0 : i32
    %c0_i32_1 = arith.constant 0 : i32
    return %c0_i32, %c0_i32_0 : i32, i32
  }
  func.func @transform_3(%arg0: i32) -> (i32, i32) {
    %c0_i32 = arith.constant 0 : i32
    %c0_i32_0 = arith.constant 0 : i32
    %c0_i32_1 = arith.constant 0 : i32
    return %c0_i32, %c0_i32_0 : i32, i32
  }
  func.func @transform_4(%arg0: i32) -> (i32, i32, i32) {
    %c0_i32 = arith.constant 0 : i32
    %c0_i32_0 = arith.constant 0 : i32
    %c0_i32_1 = arith.constant 0 : i32
    %c0_i32_2 = arith.constant 0 : i32
    return %c0_i32, %c0_i32_0, %c0_i32_1 : i32, i32, i32
  }
  func.func @transform_5(%arg0: i32) -> (i32, i32) {
    %c0_i32 = arith.constant 0 : i32
    %c0_i32_0 = arith.constant 0 : i32
    %c0_i32_1 = arith.constant 0 : i32
    return %c0_i32, %c0_i32_0 : i32, i32
  }
  func.func @transform_7(%arg0: i32) -> (i32, i32) {
    %c0_i32 = arith.constant 0 : i32
    %c0_i32_0 = arith.constant 0 : i32
    %c0_i32_1 = arith.constant 0 : i32
    return %c0_i32, %c0_i32_0 : i32, i32
  }
  func.func @transform_8(%arg0: i32) -> (i32, i32) {
    %c0_i32 = arith.constant 0 : i32
    %c0_i32_0 = arith.constant 0 : i32
    %c0_i32_1 = arith.constant 0 : i32
    return %c0_i32, %c0_i32_0 : i32, i32
  }
  func.func @transform_9(%arg0: i32) -> (i32, i32) {
    %c0_i32 = arith.constant 0 : i32
    %c0_i32_0 = arith.constant 0 : i32
    %c0_i32_1 = arith.constant 0 : i32
    return %c0_i32, %c0_i32_0 : i32, i32
  }
  func.func @transform_11(%arg0: i32) -> (i32, i32) {
    %c0_i32 = arith.constant 0 : i32
    %c0_i32_0 = arith.constant 0 : i32
    %c0_i32_1 = arith.constant 0 : i32
    return %c0_i32, %c0_i32_0 : i32, i32
  }
  func.func @transform_12(%arg0: i32) -> (i32, i32, i32) {
    %c0_i32 = arith.constant 0 : i32
    %c0_i32_0 = arith.constant 0 : i32
    %c0_i32_1 = arith.constant 0 : i32
    return %arg0, %c0_i32, %c0_i32_0 : i32, i32, i32
  }
}

</mosaic_0001>

<bundles_post_ra>
// kernel: base_cnn_forward.1
= control target key start
LH: loop header
LB: loop body
LE: loop exit
PB: predicated region body
PF: predicated region fallthrough
CT: control target
= control target key end

     0   :  { %s13161_s21 = smov 0   ;;  %s15834_s0 = inlined_call_operand.vmem [shape: bf16[256,128], index: 0, kind: input, shape index: {}]   ;;  %s15835_s1 = inlined_call_operand.vmem [shape: f32[128,1], index: 1, kind: input, shape index: {}]   ;;  %s15836_s2 = inlined_call_operand.vmem [shape: bf16[128,128], index: 2, kind: input, shape index: {}]   ;;  %s15837_s3 = inlined_call_operand.vmem [shape: f32[1,128], index: 3, kind: input, shape index: {}]   ;;  %s15838_s4 = inlined_call_operand.vmem [shape: bf16[9,128,128], index: 4, kind: input, shape index: {}]   ;;  %s15839_s5 = inlined_call_operand.vmem [shape: f32[1,128], index: 5, kind: input, shape index: {}]   ;;  %s15840_s6 = inlined_call_operand.vmem [shape: bf16[9,128,256], index: 6, kind: input, shape index: {}]   ;;  %s15841_s7 = inlined_call_operand.vmem [shape: f32[1,256], index: 7, kind: input, shape index: {}]   ;;  %s15842_s8 = inlined_call_operand.vmem [shape: bf16[256,64], index: 8, kind: input, shape index: {}]   ;;  %s15843_s9 = inlined_call_operand.vmem [shape: f32[1,64], index: 9, kind: input, shape index: {}]   ;;  %s15844_s10 = inlined_call_operand.vmem [shape: bf16[1024,512], index: 10, kind: input, shape index: {}]   ;;  %s15845_s11 = inlined_call_operand.vmem [shape: f32[1,512], index: 11, kind: input, shape index: {}]   ;;  %s15846_s12 = inlined_call_operand.vmem [shape: f32[2,1,512], index: 12, kind: output, shape index: {}]  }
   0x1 LB: > { %s13167_s22 = sadd.s32 4294967295, %s13091_s21   ;;  %p9057_p0 = scmp.ge.s32.totalorder %s13091_s21, 1  ;;  %s13091_s21 = sphi %s13161_s21, %s22_s21  }
   0x2   : > { %p315_p1 = scmp.lt.s32.totalorder %s13091_s21, 3 }
   0x4   : > { %p316_p2 = pnand %p9057_p0, %p315_p1 }
   0x6   : > { %319 = sbr.rel (%p316_p2) target bundleno = 2270 (0x8de), region = 60 }
   0xb   : > { %s9058_s23 = sshll.u32 %s13167_s22, 4  ;;  %p358_p3 = scmp.lt.s32.totalorder %s13167_s22, 1 }
   0xc   : > { %p353_p4 = scmp.lt.s32.totalorder %s9058_s23, 31  ;;  %p9061_p5 = scmp.ne.s32.totalorder %s13167_s22, 0 }
   0xd   : > { %s359_s24 = scalar_select %p358_p3, %s13167_s22, 1 }
   0xe   : > { %s15852_s23 = smov (!%p353_p4, %s9058_s23), 31  ;;  %365 = sbr.rel (%p9061_p5) target bundleno = 430 (0x1ae), region = 64 }
   0xf   : > { %s9060_s25 = sshll.u32 %s359_s24, 2  ;;  %s9059_s26 = sshll.u32 %s15852_s23, 2 }
  0x10   : > { %s13177_s29 = scalar_lea.vmem %s15846_s12, %s9060_s25  ;;  %s13182_s14 = scalar_lea.vmem %s15834_s0, %s9059_s26 }
  0x13   : > { %v376_v0 = vld [vmem:[%s15840_s6] sm:$0xff]  ;;  %v378_v1 = vld [vmem:[%s15840_s6 + $0x8] sm:$0xff]  ;;  %v380_v2 = vld [vmem:[%s15840_s6 + $0x10] sm:$0xff] }
  0x14   : > { %377 = vst [vmem:[#allocation6] sm:$0xff] %v376_v0  ;;  %v382_v3 = vld [vmem:[%s15840_s6 + $0x18] sm:$0xff]  ;;  %v384_v4 = vld [vmem:[%s15840_s6 + $0x20] sm:$0xff]  ;;  %v386_v5 = vld [vmem:[%s15840_s6 + $0x28] sm:$0xff] }
  0x15   : > { %379 = vst [vmem:[#allocation6 + $0x8] sm:$0xff] %v378_v1  ;;  %v388_v6 = vld [vmem:[%s15840_s6 + $0x30] sm:$0xff]  ;;  %v390_v7 = vld [vmem:[%s15840_s6 + $0x38] sm:$0xff]  ;;  %v392_v8 = vld [vmem:[%s15840_s6 + $0x40] sm:$0xff] }
  0x16   : > { %381 = vst [vmem:[#allocation6 + $0x10] sm:$0xff] %v380_v2  ;;  %v394_v9 = vld [vmem:[%s15840_s6 + $0x48] sm:$0xff]  ;;  %v396_v10 = vld [vmem:[%s15840_s6 + $0x50] sm:$0xff]  ;;  %v398_v11 = vld [vmem:[%s15840_s6 + $0x58] sm:$0xff] }
  0x17   : > { %383 = vst [vmem:[#allocation6 + $0x18] sm:$0xff] %v382_v3  ;;  %v400_v12 = vld [vmem:[%s15840_s6 + $0x60] sm:$0xff]  ;;  %v402_v13 = vld [vmem:[%s15840_s6 + $0x68] sm:$0xff]  ;;  %v404_v14 = vld [vmem:[%s15840_s6 + $0x70] sm:$0xff] }
  0x18   : > { %385 = vst [vmem:[#allocation6 + $0x20] sm:$0xff] %v384_v4  ;;  %v406_v15 = vld [vmem:[%s15840_s6 + $0x78] sm:$0xff]  ;;  %v408_v16 = vld [vmem:[%s15840_s6 + $0x80] sm:$0xff]  ;;  %v410_v17 = vld [vmem:[%s15840_s6 + $0x88] sm:$0xff] }
  0x19   : > { %387 = vst [vmem:[#allocation6 + $0x28] sm:$0xff] %v386_v5  ;;  %v412_v18 = vld [vmem:[%s15840_s6 + $0x90] sm:$0xff]  ;;  %v414_v19 = vld [vmem:[%s15840_s6 + $0x98] sm:$0xff]  ;;  %v416_v20 = vld [vmem:[%s15840_s6 + $0xa0] sm:$0xff] }
  0x1a   : > { %389 = vst [vmem:[#allocation6 + $0x30] sm:$0xff] %v388_v6  ;;  %v418_v21 = vld [vmem:[%s15840_s6 + $0xa8] sm:$0xff]  ;;  %v420_v22 = vld [vmem:[%s15840_s6 + $0xb0] sm:$0xff]  ;;  %v422_v23 = vld [vmem:[%s15840_s6 + $0xb8] sm:$0xff] }
  0x1b   : > { %391 = vst [vmem:[#allocation6 + $0x38] sm:$0xff] %v390_v7  ;;  %v424_v24 = vld [vmem:[%s15840_s6 + $0xc0] sm:$0xff]  ;;  %v426_v25 = vld [vmem:[%s15840_s6 + $0xc8] sm:$0xff]  ;;  %v428_v26 = vld [vmem:[%s15840_s6 + $0xd0] sm:$0xff] }
  0x1c   : > { %393 = vst [vmem:[#allocation6 + $0x40] sm:$0xff] %v392_v8  ;;  %v430_v27 = vld [vmem:[%s15840_s6 + $0xd8] sm:$0xff]  ;;  %v432_v28 = vld [vmem:[%s15840_s6 + $0xe0] sm:$0xff]  ;;  %v434_v29 = vld [vmem:[%s15840_s6 + $0xe8] sm:$0xff] }
  0x1d   : > { %395 = vst [vmem:[#allocation6 + $0x48] sm:$0xff] %v394_v9  ;;  %v436_v30 = vld [vmem:[%s15840_s6 + $0xf0] sm:$0xff]  ;;  %v438_v31 = vld [vmem:[%s15840_s6 + $0xf8] sm:$0xff]  ;;  %v440_v32 = vld [vmem:[%s15840_s6 + $0x100] sm:$0xff] }
  0x1e   : > { %397 = vst [vmem:[#allocation6 + $0x50] sm:$0xff] %v396_v10  ;;  %v442_v33 = vld [vmem:[%s15840_s6 + $0x108] sm:$0xff]  ;;  %v444_v34 = vld [vmem:[%s15840_s6 + $0x110] sm:$0xff]  ;;  %v446_v35 = vld [vmem:[%s15840_s6 + $0x118] sm:$0xff] }
  0x1f   : > { %399 = vst [vmem:[#allocation6 + $0x58] sm:$0xff] %v398_v11  ;;  %v448_v36 = vld [vmem:[%s15840_s6 + $0x120] sm:$0xff]  ;;  %v450_v37 = vld [vmem:[%s15840_s6 + $0x128] sm:$0xff]  ;;  %v452_v38 = vld [vmem:[%s15840_s6 + $0x130] sm:$0xff] }
  0x20   : > { %401 = vst [vmem:[#allocation6 + $0x60] sm:$0xff] %v400_v12  ;;  %v454_v39 = vld [vmem:[%s15840_s6 + $0x138] sm:$0xff]  ;;  %v456_v40 = vld [vmem:[%s15840_s6 + $0x140] sm:$0xff]  ;;  %v458_v41 = vld [vmem:[%s15840_s6 + $0x148] sm:$0xff] }
  0x21   : > { %403 = vst [vmem:[#allocation6 + $0x68] sm:$0xff] %v402_v13  ;;  %v460_v42 = vld [vmem:[%s15840_s6 + $0x150] sm:$0xff]  ;;  %v462_v43 = vld [vmem:[%s15840_s6 + $0x158] sm:$0xff]  ;;  %v464_v44 = vld [vmem:[%s15840_s6 + $0x160] sm:$0xff] }
  0x22   : > { %405 = vst [vmem:[#allocation6 + $0x70] sm:$0xff] %v404_v14  ;;  %v466_v45 = vld [vmem:[%s15840_s6 + $0x168] sm:$0xff]  ;;  %v468_v46 = vld [vmem:[%s15840_s6 + $0x170] sm:$0xff]  ;;  %v470_v47 = vld [vmem:[%s15840_s6 + $0x178] sm:$0xff] }
  0x23   : > { %407 = vst [vmem:[#allocation6 + $0x78] sm:$0xff] %v406_v15  ;;  %v472_v48 = vld [vmem:[%s15840_s6 + $0x180] sm:$0xff]  ;;  %v474_v49 = vld [vmem:[%s15840_s6 + $0x188] sm:$0xff]  ;;  %v476_v50 = vld [vmem:[%s15840_s6 + $0x190] sm:$0xff] }
  0x24   : > { %409 = vst [vmem:[#allocation6 + $0x80] sm:$0xff] %v408_v16  ;;  %v478_v51 = vld [vmem:[%s15840_s6 + $0x198] sm:$0xff]  ;;  %v480_v52 = vld [vmem:[%s15840_s6 + $0x1a0] sm:$0xff]  ;;  %v482_v53 = vld [vmem:[%s15840_s6 + $0x1a8] sm:$0xff] }
  0x25   : > { %411 = vst [vmem:[#allocation6 + $0x88] sm:$0xff] %v410_v17  ;;  %v484_v54 = vld [vmem:[%s15840_s6 + $0x1b0] sm:$0xff]  ;;  %v486_v55 = vld [vmem:[%s15840_s6 + $0x1b8] sm:$0xff]  ;;  %v488_v56 = vld [vmem:[%s15840_s6 + $0x1c0] sm:$0xff] }
  0x26   : > { %413 = vst [vmem:[#allocation6 + $0x90] sm:$0xff] %v412_v18  ;;  %v490_v57 = vld [vmem:[%s15840_s6 + $0x1c8] sm:$0xff]  ;;  %v492_v58 = vld [vmem:[%s15840_s6 + $0x1d0] sm:$0xff]  ;;  %v494_v59 = vld [vmem:[%s15840_s6 + $0x1d8] sm:$0xff] }
  0x27   : > { %415 = vst [vmem:[#allocation6 + $0x98] sm:$0xff] %v414_v19  ;;  %v496_v60 = vld [vmem:[%s15840_s6 + $0x1e0] sm:$0xff]  ;;  %v498_v61 = vld [vmem:[%s15840_s6 + $0x1e8] sm:$0xff]  ;;  %v500_v62 = vld [vmem:[%s15840_s6 + $0x1f0] sm:$0xff] }
  0x28   : > { %417 = vst [vmem:[#allocation6 + $0xa0] sm:$0xff] %v416_v20  ;;  %v502_v63 = vld [vmem:[%s15840_s6 + $0x1f8] sm:$0xff]  ;;  %v504_v0 = vld [vmem:[%s15840_s6 + $0x200] sm:$0xff]  ;;  %v506_v1 = vld [vmem:[%s15840_s6 + $0x208] sm:$0xff] }
  0x29   : > { %419 = vst [vmem:[#allocation6 + $0xa8] sm:$0xff] %v418_v21  ;;  %v508_v2 = vld [vmem:[%s15840_s6 + $0x210] sm:$0xff]  ;;  %v510_v3 = vld [vmem:[%s15840_s6 + $0x218] sm:$0xff]  ;;  %v512_v4 = vld [vmem:[%s15840_s6 + $0x220] sm:$0xff] }
  0x2a   : > { %421 = vst [vmem:[#allocation6 + $0xb0] sm:$0xff] %v420_v22  ;;  %v514_v5 = vld [vmem:[%s15840_s6 + $0x228] sm:$0xff]  ;;  %v516_v6 = vld [vmem:[%s15840_s6 + $0x230] sm:$0xff]  ;;  %v518_v7 = vld [vmem:[%s15840_s6 + $0x238] sm:$0xff] }
  0x2b   : > { %423 = vst [vmem:[#allocation6 + $0xb8] sm:$0xff] %v422_v23  ;;  %v520_v8 = vld [vmem:[%s15840_s6 + $0x240] sm:$0xff]  ;;  %v522_v9 = vld [vmem:[%s15840_s6 + $0x248] sm:$0xff]  ;;  %v524_v10 = vld [vmem:[%s15840_s6 + $0x250] sm:$0xff] }
  0x2c   : > { %425 = vst [vmem:[#allocation6 + $0xc0] sm:$0xff] %v424_v24  ;;  %v526_v11 = vld [vmem:[%s15840_s6 + $0x258] sm:$0xff]  ;;  %v528_v12 = vld [vmem:[%s15840_s6 + $0x260] sm:$0xff]  ;;  %v530_v13 = vld [vmem:[%s15840_s6 + $0x268] sm:$0xff] }
  0x2d   : > { %427 = vst [vmem:[#allocation6 + $0xc8] sm:$0xff] %v426_v25  ;;  %v532_v14 = vld [vmem:[%s15840_s6 + $0x270] sm:$0xff]  ;;  %v534_v15 = vld [vmem:[%s15840_s6 + $0x278] sm:$0xff]  ;;  %v536_v16 = vld [vmem:[%s15840_s6 + $0x280] sm:$0xff] }
  0x2e   : > { %429 = vst [vmem:[#allocation6 + $0xd0] sm:$0xff] %v428_v26  ;;  %v538_v17 = vld [vmem:[%s15840_s6 + $0x288] sm:$0xff]  ;;  %v540_v18 = vld [vmem:[%s15840_s6 + $0x290] sm:$0xff]  ;;  %v542_v19 = vld [vmem:[%s15840_s6 + $0x298] sm:$0xff] }
  0x2f   : > { %431 = vst [vmem:[#allocation6 + $0xd8] sm:$0xff] %v430_v27  ;;  %v544_v20 = vld [vmem:[%s15840_s6 + $0x2a0] sm:$0xff]  ;;  %v546_v21 = vld [vmem:[%s15840_s6 + $0x2a8] sm:$0xff]  ;;  %v548_v22 = vld [vmem:[%s15840_s6 + $0x2b0] sm:$0xff] }
  0x30   : > { %433 = vst [vmem:[#allocation6 + $0xe0] sm:$0xff] %v432_v28  ;;  %v550_v23 = vld [vmem:[%s15840_s6 + $0x2b8] sm:$0xff]  ;;  %v552_v24 = vld [vmem:[%s15840_s6 + $0x2c0] sm:$0xff]  ;;  %v554_v25 = vld [vmem:[%s15840_s6 + $0x2c8] sm:$0xff] }
  0x31   : > { %435 = vst [vmem:[#allocation6 + $0xe8] sm:$0xff] %v434_v29  ;;  %v556_v26 = vld [vmem:[%s15840_s6 + $0x2d0] sm:$0xff]  ;;  %v558_v27 = vld [vmem:[%s15840_s6 + $0x2d8] sm:$0xff]  ;;  %v560_v28 = vld [vmem:[%s15840_s6 + $0x2e0] sm:$0xff] }
  0x32   : > { %437 = vst [vmem:[#allocation6 + $0xf0] sm:$0xff] %v436_v30  ;;  %v562_v29 = vld [vmem:[%s15840_s6 + $0x2e8] sm:$0xff]  ;;  %v564_v30 = vld [vmem:[%s15840_s6 + $0x2f0] sm:$0xff] }
  0x33   : > { %439 = vst [vmem:[#allocation6 + $0xf8] sm:$0xff] %v438_v31  ;;  %v566_v31 = vld [vmem:[%s15840_s6 + $0x2f8] sm:$0xff] }
  0x34   : > { %441 = vst [vmem:[#allocation6 + $0x100] sm:$0xff] %v440_v32  ;;  %v568_v32 = vld [vmem:[%s15840_s6 + $0x300] sm:$0xff] }
  0x35   : > { %443 = vst [vmem:[#allocation6 + $0x108] sm:$0xff] %v442_v33  ;;  %v570_v33 = vld [vmem:[%s15840_s6 + $0x308] sm:$0xff] }
  0x36   : > { %445 = vst [vmem:[#allocation6 + $0x110] sm:$0xff] %v444_v34  ;;  %v572_v34 = vld [vmem:[%s15840_s6 + $0x310] sm:$0xff] }
  0x37   : > { %447 = vst [vmem:[#allocation6 + $0x118] sm:$0xff] %v446_v35  ;;  %v574_v35 = vld [vmem:[%s15840_s6 + $0x318] sm:$0xff] }
  0x38   : > { %449 = vst [vmem:[#allocation6 + $0x120] sm:$0xff] %v448_v36  ;;  %v576_v36 = vld [vmem:[%s15840_s6 + $0x320] sm:$0xff] }
  0x39   : > { %451 = vst [vmem:[#allocation6 + $0x128] sm:$0xff] %v450_v37  ;;  %v578_v37 = vld [vmem:[%s15840_s6 + $0x328] sm:$0xff] }
  0x3a   : > { %453 = vst [vmem:[#allocation6 + $0x130] sm:$0xff] %v452_v38  ;;  %v580_v38 = vld [vmem:[%s15840_s6 + $0x330] sm:$0xff] }
  0x3b   : > { %455 = vst [vmem:[#allocation6 + $0x138] sm:$0xff] %v454_v39  ;;  %v582_v39 = vld [vmem:[%s15840_s6 + $0x338] sm:$0xff] }
  0x3c   : > { %457 = vst [vmem:[#allocation6 + $0x140] sm:$0xff] %v456_v40  ;;  %v584_v40 = vld [vmem:[%s15840_s6 + $0x340] sm:$0xff] }
  0x3d   : > { %459 = vst [vmem:[#allocation6 + $0x148] sm:$0xff] %v458_v41  ;;  %v586_v41 = vld [vmem:[%s15840_s6 + $0x348] sm:$0xff] }
  0x3e   : > { %461 = vst [vmem:[#allocation6 + $0x150] sm:$0xff] %v460_v42  ;;  %v588_v42 = vld [vmem:[%s15840_s6 + $0x350] sm:$0xff] }
  0x3f   : > { %463 = vst [vmem:[#allocation6 + $0x158] sm:$0xff] %v462_v43  ;;  %v590_v43 = vld [vmem:[%s15840_s6 + $0x358] sm:$0xff] }
  0x40   : > { %465 = vst [vmem:[#allocation6 + $0x160] sm:$0xff] %v464_v44  ;;  %v592_v44 = vld [vmem:[%s15840_s6 + $0x360] sm:$0xff] }
  0x41   : > { %467 = vst [vmem:[#allocation6 + $0x168] sm:$0xff] %v466_v45  ;;  %v594_v45 = vld [vmem:[%s15840_s6 + $0x368] sm:$0xff] }
  0x42   : > { %469 = vst [vmem:[#allocation6 + $0x170] sm:$0xff] %v468_v46  ;;  %v596_v46 = vld [vmem:[%s15840_s6 + $0x370] sm:$0xff] }
  0x43   : > { %471 = vst [vmem:[#allocation6 + $0x178] sm:$0xff] %v470_v47  ;;  %v598_v47 = vld [vmem:[%s15840_s6 + $0x378] sm:$0xff] }
  0x44   : > { %473 = vst [vmem:[#allocation6 + $0x180] sm:$0xff] %v472_v48  ;;  %v600_v48 = vld [vmem:[%s15840_s6 + $0x380] sm:$0xff] }
  0x45   : > { %475 = vst [vmem:[#allocation6 + $0x188] sm:$0xff] %v474_v49  ;;  %v602_v49 = vld [vmem:[%s15840_s6 + $0x388] sm:$0xff] }
  0x46   : > { %477 = vst [vmem:[#allocation6 + $0x190] sm:$0xff] %v476_v50  ;;  %v604_v50 = vld [vmem:[%s15840_s6 + $0x390] sm:$0xff] }
  0x47   : > { %479 = vst [vmem:[#allocation6 + $0x198] sm:$0xff] %v478_v51  ;;  %v606_v51 = vld [vmem:[%s15840_s6 + $0x398] sm:$0xff] }
  0x48   : > { %481 = vst [vmem:[#allocation6 + $0x1a0] sm:$0xff] %v480_v52  ;;  %v608_v52 = vld [vmem:[%s15840_s6 + $0x3a0] sm:$0xff] }
  0x49   : > { %483 = vst [vmem:[#allocation6 + $0x1a8] sm:$0xff] %v482_v53  ;;  %v610_v53 = vld [vmem:[%s15840_s6 + $0x3a8] sm:$0xff] }
  0x4a   : > { %485 = vst [vmem:[#allocation6 + $0x1b0] sm:$0xff] %v484_v54  ;;  %v612_v54 = vld [vmem:[%s15840_s6 + $0x3b0] sm:$0xff] }
  0x4b   : > { %487 = vst [vmem:[#allocation6 + $0x1b8] sm:$0xff] %v486_v55  ;;  %v614_v55 = vld [vmem:[%s15840_s6 + $0x3b8] sm:$0xff] }
  0x4c   : > { %489 = vst [vmem:[#allocation6 + $0x1c0] sm:$0xff] %v488_v56  ;;  %v616_v56 = vld [vmem:[%s15840_s6 + $0x3c0] sm:$0xff] }
  0x4d   : > { %491 = vst [vmem:[#allocation6 + $0x1c8] sm:$0xff] %v490_v57  ;;  %v618_v57 = vld [vmem:[%s15840_s6 + $0x3c8] sm:$0xff] }
  0x4e   : > { %493 = vst [vmem:[#allocation6 + $0x1d0] sm:$0xff] %v492_v58  ;;  %v620_v58 = vld [vmem:[%s15840_s6 + $0x3d0] sm:$0xff] }
  0x4f   : > { %495 = vst [vmem:[#allocation6 + $0x1d8] sm:$0xff] %v494_v59  ;;  %v622_v59 = vld [vmem:[%s15840_s6 + $0x3d8] sm:$0xff] }
  0x50   : > { %497 = vst [vmem:[#allocation6 + $0x1e0] sm:$0xff] %v496_v60  ;;  %v624_v60 = vld [vmem:[%s15840_s6 + $0x3e0] sm:$0xff] }
  0x51   : > { %499 = vst [vmem:[#allocation6 + $0x1e8] sm:$0xff] %v498_v61  ;;  %v626_v61 = vld [vmem:[%s15840_s6 + $0x3e8] sm:$0xff] }
  0x52   : > { %501 = vst [vmem:[#allocation6 + $0x1f0] sm:$0xff] %v500_v62  ;;  %v628_v62 = vld [vmem:[%s15840_s6 + $0x3f0] sm:$0xff] }
  0x53   : > { %503 = vst [vmem:[#allocation6 + $0x1f8] sm:$0xff] %v502_v63  ;;  %v630_v63 = vld [vmem:[%s15840_s6 + $0x3f8] sm:$0xff] }
  0x54   : > { %505 = vst [vmem:[#allocation6 + $0x200] sm:$0xff] %v504_v0  ;;  %v632_v0 = vld [vmem:[%s15840_s6 + $0x400] sm:$0xff] }
  0x55   : > { %507 = vst [vmem:[#allocation6 + $0x208] sm:$0xff] %v506_v1  ;;  %v634_v1 = vld [vmem:[%s15840_s6 + $0x408] sm:$0xff] }
  0x56   : > { %509 = vst [vmem:[#allocation6 + $0x210] sm:$0xff] %v508_v2  ;;  %v636_v2 = vld [vmem:[%s15840_s6 + $0x410] sm:$0xff] }
  0x57   : > { %511 = vst [vmem:[#allocation6 + $0x218] sm:$0xff] %v510_v3  ;;  %v638_v3 = vld [vmem:[%s15840_s6 + $0x418] sm:$0xff] }
  0x58   : > { %513 = vst [vmem:[#allocation6 + $0x220] sm:$0xff] %v512_v4  ;;  %v640_v4 = vld [vmem:[%s15840_s6 + $0x420] sm:$0xff] }
  0x59   : > { %515 = vst [vmem:[#allocation6 + $0x228] sm:$0xff] %v514_v5  ;;  %v642_v5 = vld [vmem:[%s15840_s6 + $0x428] sm:$0xff] }
  0x5a   : > { %517 = vst [vmem:[#allocation6 + $0x230] sm:$0xff] %v516_v6  ;;  %v644_v6 = vld [vmem:[%s15840_s6 + $0x430] sm:$0xff] }
  0x5b   : > { %519 = vst [vmem:[#allocation6 + $0x238] sm:$0xff] %v518_v7  ;;  %v646_v7 = vld [vmem:[%s15840_s6 + $0x438] sm:$0xff] }
  0x5c   : > { %521 = vst [vmem:[#allocation6 + $0x240] sm:$0xff] %v520_v8  ;;  %v648_v8 = vld [vmem:[%s15840_s6 + $0x440] sm:$0xff] }
  0x5d   : > { %523 = vst [vmem:[#allocation6 + $0x248] sm:$0xff] %v522_v9  ;;  %v650_v9 = vld [vmem:[%s15840_s6 + $0x448] sm:$0xff] }
  0x5e   : > { %525 = vst [vmem:[#allocation6 + $0x250] sm:$0xff] %v524_v10  ;;  %v652_v10 = vld [vmem:[%s15840_s6 + $0x450] sm:$0xff] }
  0x5f   : > { %527 = vst [vmem:[#allocation6 + $0x258] sm:$0xff] %v526_v11  ;;  %v654_v11 = vld [vmem:[%s15840_s6 + $0x458] sm:$0xff] }
  0x60   : > { %529 = vst [vmem:[#allocation6 + $0x260] sm:$0xff] %v528_v12  ;;  %v656_v12 = vld [vmem:[%s15840_s6 + $0x460] sm:$0xff] }
  0x61   : > { %531 = vst [vmem:[#allocation6 + $0x268] sm:$0xff] %v530_v13  ;;  %v658_v13 = vld [vmem:[%s15840_s6 + $0x468] sm:$0xff] }
  0x62   : > { %533 = vst [vmem:[#allocation6 + $0x270] sm:$0xff] %v532_v14  ;;  %v660_v14 = vld [vmem:[%s15840_s6 + $0x470] sm:$0xff] }
  0x63   : > { %535 = vst [vmem:[#allocation6 + $0x278] sm:$0xff] %v534_v15  ;;  %v662_v15 = vld [vmem:[%s15840_s6 + $0x478] sm:$0xff] }
  0x64   : > { %537 = vst [vmem:[#allocation6 + $0x280] sm:$0xff] %v536_v16 }
  0x65   : > { %539 = vst [vmem:[#allocation6 + $0x288] sm:$0xff] %v538_v17 }
  0x66   : > { %541 = vst [vmem:[#allocation6 + $0x290] sm:$0xff] %v540_v18 }
  0x67   : > { %543 = vst [vmem:[#allocation6 + $0x298] sm:$0xff] %v542_v19 }
  0x68   : > { %545 = vst [vmem:[#allocation6 + $0x2a0] sm:$0xff] %v544_v20 }
  0x69   : > { %547 = vst [vmem:[#allocation6 + $0x2a8] sm:$0xff] %v546_v21 }
  0x6a   : > { %549 = vst [vmem:[#allocation6 + $0x2b0] sm:$0xff] %v548_v22 }
  0x6b   : > { %551 = vst [vmem:[#allocation6 + $0x2b8] sm:$0xff] %v550_v23 }
  0x6c   : > { %553 = vst [vmem:[#allocation6 + $0x2c0] sm:$0xff] %v552_v24 }
  0x6d   : > { %555 = vst [vmem:[#allocation6 + $0x2c8] sm:$0xff] %v554_v25 }
  0x6e   : > { %557 = vst [vmem:[#allocation6 + $0x2d0] sm:$0xff] %v556_v26 }
  0x6f   : > { %559 = vst [vmem:[#allocation6 + $0x2d8] sm:$0xff] %v558_v27 }
  0x70   : > { %561 = vst [vmem:[#allocation6 + $0x2e0] sm:$0xff] %v560_v28 }
  0x71   : > { %563 = vst [vmem:[#allocation6 + $0x2e8] sm:$0xff] %v562_v29 }
  0x72   : > { %565 = vst [vmem:[#allocation6 + $0x2f0] sm:$0xff] %v564_v30 }
  0x73   : > { %567 = vst [vmem:[#allocation6 + $0x2f8] sm:$0xff] %v566_v31 }
  0x74   : > { %569 = vst [vmem:[#allocation6 + $0x300] sm:$0xff] %v568_v32 }
  0x75   : > { %571 = vst [vmem:[#allocation6 + $0x308] sm:$0xff] %v570_v33 }
  0x76   : > { %573 = vst [vmem:[#allocation6 + $0x310] sm:$0xff] %v572_v34 }
  0x77   : > { %575 = vst [vmem:[#allocation6 + $0x318] sm:$0xff] %v574_v35 }
  0x78   : > { %577 = vst [vmem:[#allocation6 + $0x320] sm:$0xff] %v576_v36 }
  0x79   : > { %579 = vst [vmem:[#allocation6 + $0x328] sm:$0xff] %v578_v37 }
  0x7a   : > { %581 = vst [vmem:[#allocation6 + $0x330] sm:$0xff] %v580_v38 }
  0x7b   : > { %583 = vst [vmem:[#allocation6 + $0x338] sm:$0xff] %v582_v39 }
  0x7c   : > { %585 = vst [vmem:[#allocation6 + $0x340] sm:$0xff] %v584_v40 }
  0x7d   : > { %587 = vst [vmem:[#allocation6 + $0x348] sm:$0xff] %v586_v41 }
  0x7e   : > { %589 = vst [vmem:[#allocation6 + $0x350] sm:$0xff] %v588_v42 }
  0x7f   : > { %591 = vst [vmem:[#allocation6 + $0x358] sm:$0xff] %v590_v43 }
  0x80   : > { %593 = vst [vmem:[#allocation6 + $0x360] sm:$0xff] %v592_v44 }
  0x81   : > { %595 = vst [vmem:[#allocation6 + $0x368] sm:$0xff] %v594_v45 }
  0x82   : > { %597 = vst [vmem:[#allocation6 + $0x370] sm:$0xff] %v596_v46 }
  0x83   : > { %599 = vst [vmem:[#allocation6 + $0x378] sm:$0xff] %v598_v47 }
  0x84   : > { %601 = vst [vmem:[#allocation6 + $0x380] sm:$0xff] %v600_v48 }
  0x85   : > { %603 = vst [vmem:[#allocation6 + $0x388] sm:$0xff] %v602_v49 }
  0x86   : > { %605 = vst [vmem:[#allocation6 + $0x390] sm:$0xff] %v604_v50 }
  0x87   : > { %607 = vst [vmem:[#allocation6 + $0x398] sm:$0xff] %v606_v51 }
  0x88   : > { %609 = vst [vmem:[#allocation6 + $0x3a0] sm:$0xff] %v608_v52 }
  0x89   : > { %611 = vst [vmem:[#allocation6 + $0x3a8] sm:$0xff] %v610_v53 }
  0x8a   : > { %613 = vst [vmem:[#allocation6 + $0x3b0] sm:$0xff] %v612_v54 }
  0x8b   : > { %615 = vst [vmem:[#allocation6 + $0x3b8] sm:$0xff] %v614_v55 }
  0x8c   : > { %617 = vst [vmem:[#allocation6 + $0x3c0] sm:$0xff] %v616_v56 }
  0x8d   : > { %619 = vst [vmem:[#allocation6 + $0x3c8] sm:$0xff] %v618_v57 }
  0x8e   : > { %621 = vst [vmem:[#allocation6 + $0x3d0] sm:$0xff] %v620_v58 }
  0x8f   : > { %623 = vst [vmem:[#allocation6 + $0x3d8] sm:$0xff] %v622_v59 }
  0x90   : > { %625 = vst [vmem:[#allocation6 + $0x3e0] sm:$0xff] %v624_v60 }
  0x91   : > { %627 = vst [vmem:[#allocation6 + $0x3e8] sm:$0xff] %v626_v61 }
  0x92   : > { %629 = vst [vmem:[#allocation6 + $0x3f0] sm:$0xff] %v628_v62 }
  0x93   : > { %631 = vst [vmem:[#allocation6 + $0x3f8] sm:$0xff] %v630_v63 }
  0x94   : > { %633 = vst [vmem:[#allocation6 + $0x400] sm:$0xff] %v632_v0 }
  0x95   : > { %635 = vst [vmem:[#allocation6 + $0x408] sm:$0xff] %v634_v1 }
  0x96   : > { %637 = vst [vmem:[#allocation6 + $0x410] sm:$0xff] %v636_v2 }
  0x97   : > { %639 = vst [vmem:[#allocation6 + $0x418] sm:$0xff] %v638_v3 }
  0x98   : > { %641 = vst [vmem:[#allocation6 + $0x420] sm:$0xff] %v640_v4 }
  0x99   : > { %643 = vst [vmem:[#allocation6 + $0x428] sm:$0xff] %v642_v5 }
  0x9a   : > { %645 = vst [vmem:[#allocation6 + $0x430] sm:$0xff] %v644_v6 }
  0x9b   : > { %647 = vst [vmem:[#allocation6 + $0x438] sm:$0xff] %v646_v7 }
  0x9c   : > { %649 = vst [vmem:[#allocation6 + $0x440] sm:$0xff] %v648_v8 }
  0x9d   : > { %651 = vst [vmem:[#allocation6 + $0x448] sm:$0xff] %v650_v9 }
  0x9e   : > { %653 = vst [vmem:[#allocation6 + $0x450] sm:$0xff] %v652_v10 }
  0x9f   : > { %655 = vst [vmem:[#allocation6 + $0x458] sm:$0xff] %v654_v11 }
  0xa0   : > { %657 = vst [vmem:[#allocation6 + $0x460] sm:$0xff] %v656_v12 }
  0xa1   : > { %659 = vst [vmem:[#allocation6 + $0x468] sm:$0xff] %v658_v13 }
  0xa2   : > { %661 = vst [vmem:[#allocation6 + $0x470] sm:$0xff] %v660_v14 }
  0xa3   : > { %663 = vst [vmem:[#allocation6 + $0x478] sm:$0xff] %v662_v15 }
  0xa4   : > { %669 = vsyncadd [#allocation8], 18432  ;;  %v681_v16 = vld [vmem:[%s15844_s10] sm:$0xff]  ;;  %v683_v17 = vld [vmem:[%s15844_s10 + $0x8] sm:$0xff] }
  0xa5   : > { %682 = vst [vmem:[#allocation7] sm:$0xff] %v681_v16  ;;  %v685_v18 = vld [vmem:[%s15844_s10 + $0x10] sm:$0xff]  ;;  %v687_v19 = vld [vmem:[%s15844_s10 + $0x18] sm:$0xff]  ;;  %v689_v20 = vld [vmem:[%s15844_s10 + $0x20] sm:$0xff] }
  0xa6   : > { %684 = vst [vmem:[#allocation7 + $0x8] sm:$0xff] %v683_v17  ;;  %v691_v21 = vld [vmem:[%s15844_s10 + $0x28] sm:$0xff]  ;;  %v693_v22 = vld [vmem:[%s15844_s10 + $0x30] sm:$0xff]  ;;  %v695_v23 = vld [vmem:[%s15844_s10 + $0x38] sm:$0xff] }
  0xa7   : > { %686 = vst [vmem:[#allocation7 + $0x10] sm:$0xff] %v685_v18  ;;  %v697_v24 = vld [vmem:[%s15844_s10 + $0x40] sm:$0xff]  ;;  %v699_v25 = vld [vmem:[%s15844_s10 + $0x48] sm:$0xff]  ;;  %v701_v26 = vld [vmem:[%s15844_s10 + $0x50] sm:$0xff] }
  0xa8   : > { %688 = vst [vmem:[#allocation7 + $0x18] sm:$0xff] %v687_v19  ;;  %v703_v27 = vld [vmem:[%s15844_s10 + $0x58] sm:$0xff]  ;;  %v705_v28 = vld [vmem:[%s15844_s10 + $0x60] sm:$0xff]  ;;  %v707_v29 = vld [vmem:[%s15844_s10 + $0x68] sm:$0xff] }
  0xa9   : > { %690 = vst [vmem:[#allocation7 + $0x20] sm:$0xff] %v689_v20  ;;  %v709_v30 = vld [vmem:[%s15844_s10 + $0x70] sm:$0xff]  ;;  %v711_v31 = vld [vmem:[%s15844_s10 + $0x78] sm:$0xff]  ;;  %v713_v32 = vld [vmem:[%s15844_s10 + $0x80] sm:$0xff] }
  0xaa   : > { %692 = vst [vmem:[#allocation7 + $0x28] sm:$0xff] %v691_v21  ;;  %v715_v33 = vld [vmem:[%s15844_s10 + $0x88] sm:$0xff]  ;;  %v717_v34 = vld [vmem:[%s15844_s10 + $0x90] sm:$0xff]  ;;  %v719_v35 = vld [vmem:[%s15844_s10 + $0x98] sm:$0xff] }
  0xab   : > { %694 = vst [vmem:[#allocation7 + $0x30] sm:$0xff] %v693_v22  ;;  %v721_v36 = vld [vmem:[%s15844_s10 + $0xa0] sm:$0xff]  ;;  %v723_v37 = vld [vmem:[%s15844_s10 + $0xa8] sm:$0xff]  ;;  %v725_v38 = vld [vmem:[%s15844_s10 + $0xb0] sm:$0xff] }
  0xac   : > { %696 = vst [vmem:[#allocation7 + $0x38] sm:$0xff] %v695_v23  ;;  %v727_v39 = vld [vmem:[%s15844_s10 + $0xb8] sm:$0xff]  ;;  %v729_v40 = vld [vmem:[%s15844_s10 + $0xc0] sm:$0xff]  ;;  %v731_v41 = vld [vmem:[%s15844_s10 + $0xc8] sm:$0xff] }
  0xad   : > { %698 = vst [vmem:[#allocation7 + $0x40] sm:$0xff] %v697_v24  ;;  %v733_v42 = vld [vmem:[%s15844_s10 + $0xd0] sm:$0xff]  ;;  %v735_v43 = vld [vmem:[%s15844_s10 + $0xd8] sm:$0xff]  ;;  %v737_v44 = vld [vmem:[%s15844_s10 + $0xe0] sm:$0xff] }
  0xae   : > { %700 = vst [vmem:[#allocation7 + $0x48] sm:$0xff] %v699_v25  ;;  %v739_v45 = vld [vmem:[%s15844_s10 + $0xe8] sm:$0xff]  ;;  %v741_v46 = vld [vmem:[%s15844_s10 + $0xf0] sm:$0xff]  ;;  %v743_v47 = vld [vmem:[%s15844_s10 + $0xf8] sm:$0xff] }
  0xaf   : > { %702 = vst [vmem:[#allocation7 + $0x50] sm:$0xff] %v701_v26  ;;  %v745_v48 = vld [vmem:[%s15844_s10 + $0x100] sm:$0xff]  ;;  %v747_v49 = vld [vmem:[%s15844_s10 + $0x108] sm:$0xff]  ;;  %v749_v50 = vld [vmem:[%s15844_s10 + $0x110] sm:$0xff] }
  0xb0   : > { %704 = vst [vmem:[#allocation7 + $0x58] sm:$0xff] %v703_v27  ;;  %v751_v51 = vld [vmem:[%s15844_s10 + $0x118] sm:$0xff]  ;;  %v753_v52 = vld [vmem:[%s15844_s10 + $0x120] sm:$0xff]  ;;  %v755_v53 = vld [vmem:[%s15844_s10 + $0x128] sm:$0xff] }
  0xb1   : > { %706 = vst [vmem:[#allocation7 + $0x60] sm:$0xff] %v705_v28  ;;  %v757_v54 = vld [vmem:[%s15844_s10 + $0x130] sm:$0xff]  ;;  %v759_v55 = vld [vmem:[%s15844_s10 + $0x138] sm:$0xff]  ;;  %v761_v56 = vld [vmem:[%s15844_s10 + $0x140] sm:$0xff] }
  0xb2   : > { %708 = vst [vmem:[#allocation7 + $0x68] sm:$0xff] %v707_v29  ;;  %v763_v57 = vld [vmem:[%s15844_s10 + $0x148] sm:$0xff]  ;;  %v765_v58 = vld [vmem:[%s15844_s10 + $0x150] sm:$0xff]  ;;  %v767_v59 = vld [vmem:[%s15844_s10 + $0x158] sm:$0xff] }
  0xb3   : > { %710 = vst [vmem:[#allocation7 + $0x70] sm:$0xff] %v709_v30  ;;  %v769_v60 = vld [vmem:[%s15844_s10 + $0x160] sm:$0xff]  ;;  %v771_v61 = vld [vmem:[%s15844_s10 + $0x168] sm:$0xff]  ;;  %v773_v62 = vld [vmem:[%s15844_s10 + $0x170] sm:$0xff] }
  0xb4   : > { %712 = vst [vmem:[#allocation7 + $0x78] sm:$0xff] %v711_v31  ;;  %v775_v63 = vld [vmem:[%s15844_s10 + $0x178] sm:$0xff]  ;;  %v777_v0 = vld [vmem:[%s15844_s10 + $0x180] sm:$0xff]  ;;  %v779_v1 = vld [vmem:[%s15844_s10 + $0x188] sm:$0xff] }
  0xb5   : > { %714 = vst [vmem:[#allocation7 + $0x80] sm:$0xff] %v713_v32  ;;  %v781_v2 = vld [vmem:[%s15844_s10 + $0x190] sm:$0xff]  ;;  %v783_v3 = vld [vmem:[%s15844_s10 + $0x198] sm:$0xff]  ;;  %v785_v4 = vld [vmem:[%s15844_s10 + $0x1a0] sm:$0xff] }
  0xb6   : > { %716 = vst [vmem:[#allocation7 + $0x88] sm:$0xff] %v715_v33  ;;  %v787_v5 = vld [vmem:[%s15844_s10 + $0x1a8] sm:$0xff]  ;;  %v789_v6 = vld [vmem:[%s15844_s10 + $0x1b0] sm:$0xff]  ;;  %v791_v7 = vld [vmem:[%s15844_s10 + $0x1b8] sm:$0xff] }
  0xb7   : > { %718 = vst [vmem:[#allocation7 + $0x90] sm:$0xff] %v717_v34  ;;  %v793_v8 = vld [vmem:[%s15844_s10 + $0x1c0] sm:$0xff]  ;;  %v795_v9 = vld [vmem:[%s15844_s10 + $0x1c8] sm:$0xff]  ;;  %v797_v10 = vld [vmem:[%s15844_s10 + $0x1d0] sm:$0xff] }
  0xb8   : > { %720 = vst [vmem:[#allocation7 + $0x98] sm:$0xff] %v719_v35  ;;  %v799_v11 = vld [vmem:[%s15844_s10 + $0x1d8] sm:$0xff]  ;;  %v801_v12 = vld [vmem:[%s15844_s10 + $0x1e0] sm:$0xff]  ;;  %v803_v13 = vld [vmem:[%s15844_s10 + $0x1e8] sm:$0xff] }
  0xb9   : > { %722 = vst [vmem:[#allocation7 + $0xa0] sm:$0xff] %v721_v36  ;;  %v805_v14 = vld [vmem:[%s15844_s10 + $0x1f0] sm:$0xff]  ;;  %v807_v15 = vld [vmem:[%s15844_s10 + $0x1f8] sm:$0xff]  ;;  %v809_v16 = vld [vmem:[%s15844_s10 + $0x200] sm:$0xff] }
  0xba   : > { %724 = vst [vmem:[#allocation7 + $0xa8] sm:$0xff] %v723_v37  ;;  %v811_v17 = vld [vmem:[%s15844_s10 + $0x208] sm:$0xff]  ;;  %v813_v18 = vld [vmem:[%s15844_s10 + $0x210] sm:$0xff]  ;;  %v815_v19 = vld [vmem:[%s15844_s10 + $0x218] sm:$0xff] }
  0xbb   : > { %726 = vst [vmem:[#allocation7 + $0xb0] sm:$0xff] %v725_v38  ;;  %v817_v20 = vld [vmem:[%s15844_s10 + $0x220] sm:$0xff]  ;;  %v819_v21 = vld [vmem:[%s15844_s10 + $0x228] sm:$0xff]  ;;  %v821_v22 = vld [vmem:[%s15844_s10 + $0x230] sm:$0xff] }
  0xbc   : > { %728 = vst [vmem:[#allocation7 + $0xb8] sm:$0xff] %v727_v39  ;;  %v823_v23 = vld [vmem:[%s15844_s10 + $0x238] sm:$0xff]  ;;  %v825_v24 = vld [vmem:[%s15844_s10 + $0x240] sm:$0xff]  ;;  %v827_v25 = vld [vmem:[%s15844_s10 + $0x248] sm:$0xff] }
  0xbd   : > { %730 = vst [vmem:[#allocation7 + $0xc0] sm:$0xff] %v729_v40  ;;  %v829_v26 = vld [vmem:[%s15844_s10 + $0x250] sm:$0xff]  ;;  %v831_v27 = vld [vmem:[%s15844_s10 + $0x258] sm:$0xff]  ;;  %v833_v28 = vld [vmem:[%s15844_s10 + $0x260] sm:$0xff] }
  0xbe   : > { %732 = vst [vmem:[#allocation7 + $0xc8] sm:$0xff] %v731_v41  ;;  %v835_v29 = vld [vmem:[%s15844_s10 + $0x268] sm:$0xff]  ;;  %v837_v30 = vld [vmem:[%s15844_s10 + $0x270] sm:$0xff]  ;;  %v839_v31 = vld [vmem:[%s15844_s10 + $0x278] sm:$0xff] }
  0xbf   : > { %734 = vst [vmem:[#allocation7 + $0xd0] sm:$0xff] %v733_v42  ;;  %v841_v32 = vld [vmem:[%s15844_s10 + $0x280] sm:$0xff]  ;;  %v843_v33 = vld [vmem:[%s15844_s10 + $0x288] sm:$0xff]  ;;  %v845_v34 = vld [vmem:[%s15844_s10 + $0x290] sm:$0xff] }
  0xc0   : > { %736 = vst [vmem:[#allocation7 + $0xd8] sm:$0xff] %v735_v43  ;;  %v847_v35 = vld [vmem:[%s15844_s10 + $0x298] sm:$0xff]  ;;  %v849_v36 = vld [vmem:[%s15844_s10 + $0x2a0] sm:$0xff]  ;;  %v851_v37 = vld [vmem:[%s15844_s10 + $0x2a8] sm:$0xff] }
  0xc1   : > { %738 = vst [vmem:[#allocation7 + $0xe0] sm:$0xff] %v737_v44  ;;  %v853_v38 = vld [vmem:[%s15844_s10 + $0x2b0] sm:$0xff]  ;;  %v855_v39 = vld [vmem:[%s15844_s10 + $0x2b8] sm:$0xff]  ;;  %v857_v40 = vld [vmem:[%s15844_s10 + $0x2c0] sm:$0xff] }
  0xc2   : > { %740 = vst [vmem:[#allocation7 + $0xe8] sm:$0xff] %v739_v45  ;;  %v859_v41 = vld [vmem:[%s15844_s10 + $0x2c8] sm:$0xff]  ;;  %v861_v42 = vld [vmem:[%s15844_s10 + $0x2d0] sm:$0xff]  ;;  %v863_v43 = vld [vmem:[%s15844_s10 + $0x2d8] sm:$0xff] }
  0xc3   : > { %742 = vst [vmem:[#allocation7 + $0xf0] sm:$0xff] %v741_v46  ;;  %v865_v44 = vld [vmem:[%s15844_s10 + $0x2e0] sm:$0xff]  ;;  %v867_v45 = vld [vmem:[%s15844_s10 + $0x2e8] sm:$0xff]  ;;  %v869_v46 = vld [vmem:[%s15844_s10 + $0x2f0] sm:$0xff] }
  0xc4   : > { %744 = vst [vmem:[#allocation7 + $0xf8] sm:$0xff] %v743_v47  ;;  %v871_v47 = vld [vmem:[%s15844_s10 + $0x2f8] sm:$0xff] }
  0xc5   : > { %746 = vst [vmem:[#allocation7 + $0x100] sm:$0xff] %v745_v48  ;;  %v873_v48 = vld [vmem:[%s15844_s10 + $0x300] sm:$0xff] }
  0xc6   : > { %748 = vst [vmem:[#allocation7 + $0x108] sm:$0xff] %v747_v49  ;;  %v875_v49 = vld [vmem:[%s15844_s10 + $0x308] sm:$0xff] }
  0xc7   : > { %750 = vst [vmem:[#allocation7 + $0x110] sm:$0xff] %v749_v50  ;;  %v877_v50 = vld [vmem:[%s15844_s10 + $0x310] sm:$0xff] }
  0xc8   : > { %752 = vst [vmem:[#allocation7 + $0x118] sm:$0xff] %v751_v51  ;;  %v879_v51 = vld [vmem:[%s15844_s10 + $0x318] sm:$0xff] }
  0xc9   : > { %754 = vst [vmem:[#allocation7 + $0x120] sm:$0xff] %v753_v52  ;;  %v881_v52 = vld [vmem:[%s15844_s10 + $0x320] sm:$0xff] }
  0xca   : > { %756 = vst [vmem:[#allocation7 + $0x128] sm:$0xff] %v755_v53  ;;  %v883_v53 = vld [vmem:[%s15844_s10 + $0x328] sm:$0xff] }
  0xcb   : > { %758 = vst [vmem:[#allocation7 + $0x130] sm:$0xff] %v757_v54  ;;  %v885_v54 = vld [vmem:[%s15844_s10 + $0x330] sm:$0xff] }
  0xcc   : > { %760 = vst [vmem:[#allocation7 + $0x138] sm:$0xff] %v759_v55  ;;  %v887_v55 = vld [vmem:[%s15844_s10 + $0x338] sm:$0xff] }
  0xcd   : > { %762 = vst [vmem:[#allocation7 + $0x140] sm:$0xff] %v761_v56  ;;  %v889_v56 = vld [vmem:[%s15844_s10 + $0x340] sm:$0xff] }
  0xce   : > { %764 = vst [vmem:[#allocation7 + $0x148] sm:$0xff] %v763_v57  ;;  %v891_v57 = vld [vmem:[%s15844_s10 + $0x348] sm:$0xff] }
  0xcf   : > { %766 = vst [vmem:[#allocation7 + $0x150] sm:$0xff] %v765_v58  ;;  %v893_v58 = vld [vmem:[%s15844_s10 + $0x350] sm:$0xff] }
  0xd0   : > { %768 = vst [vmem:[#allocation7 + $0x158] sm:$0xff] %v767_v59  ;;  %v895_v59 = vld [vmem:[%s15844_s10 + $0x358] sm:$0xff] }
  0xd1   : > { %770 = vst [vmem:[#allocation7 + $0x160] sm:$0xff] %v769_v60  ;;  %v897_v60 = vld [vmem:[%s15844_s10 + $0x360] sm:$0xff] }
  0xd2   : > { %772 = vst [vmem:[#allocation7 + $0x168] sm:$0xff] %v771_v61  ;;  %v899_v61 = vld [vmem:[%s15844_s10 + $0x368] sm:$0xff] }
  0xd3   : > { %774 = vst [vmem:[#allocation7 + $0x170] sm:$0xff] %v773_v62  ;;  %v901_v62 = vld [vmem:[%s15844_s10 + $0x370] sm:$0xff] }
  0xd4   : > { %776 = vst [vmem:[#allocation7 + $0x178] sm:$0xff] %v775_v63  ;;  %v903_v63 = vld [vmem:[%s15844_s10 + $0x378] sm:$0xff] }
  0xd5   : > { %778 = vst [vmem:[#allocation7 + $0x180] sm:$0xff] %v777_v0  ;;  %v905_v0 = vld [vmem:[%s15844_s10 + $0x380] sm:$0xff] }
  0xd6   : > { %780 = vst [vmem:[#allocation7 + $0x188] sm:$0xff] %v779_v1  ;;  %v907_v1 = vld [vmem:[%s15844_s10 + $0x388] sm:$0xff] }
  0xd7   : > { %782 = vst [vmem:[#allocation7 + $0x190] sm:$0xff] %v781_v2  ;;  %v909_v2 = vld [vmem:[%s15844_s10 + $0x390] sm:$0xff] }
  0xd8   : > { %784 = vst [vmem:[#allocation7 + $0x198] sm:$0xff] %v783_v3  ;;  %v911_v3 = vld [vmem:[%s15844_s10 + $0x398] sm:$0xff] }
  0xd9   : > { %786 = vst [vmem:[#allocation7 + $0x1a0] sm:$0xff] %v785_v4  ;;  %v913_v4 = vld [vmem:[%s15844_s10 + $0x3a0] sm:$0xff] }
  0xda   : > { %788 = vst [vmem:[#allocation7 + $0x1a8] sm:$0xff] %v787_v5  ;;  %v915_v5 = vld [vmem:[%s15844_s10 + $0x3a8] sm:$0xff] }
  0xdb   : > { %790 = vst [vmem:[#allocation7 + $0x1b0] sm:$0xff] %v789_v6  ;;  %v917_v6 = vld [vmem:[%s15844_s10 + $0x3b0] sm:$0xff] }
  0xdc   : > { %792 = vst [vmem:[#allocation7 + $0x1b8] sm:$0xff] %v791_v7  ;;  %v919_v7 = vld [vmem:[%s15844_s10 + $0x3b8] sm:$0xff] }
  0xdd   : > { %794 = vst [vmem:[#allocation7 + $0x1c0] sm:$0xff] %v793_v8  ;;  %v921_v8 = vld [vmem:[%s15844_s10 + $0x3c0] sm:$0xff] }
  0xde   : > { %796 = vst [vmem:[#allocation7 + $0x1c8] sm:$0xff] %v795_v9  ;;  %v923_v9 = vld [vmem:[%s15844_s10 + $0x3c8] sm:$0xff] }
  0xdf   : > { %798 = vst [vmem:[#allocation7 + $0x1d0] sm:$0xff] %v797_v10  ;;  %v925_v10 = vld [vmem:[%s15844_s10 + $0x3d0] sm:$0xff] }
  0xe0   : > { %800 = vst [vmem:[#allocation7 + $0x1d8] sm:$0xff] %v799_v11  ;;  %v927_v11 = vld [vmem:[%s15844_s10 + $0x3d8] sm:$0xff] }
  0xe1   : > { %802 = vst [vmem:[#allocation7 + $0x1e0] sm:$0xff] %v801_v12  ;;  %v929_v12 = vld [vmem:[%s15844_s10 + $0x3e0] sm:$0xff] }
  0xe2   : > { %804 = vst [vmem:[#allocation7 + $0x1e8] sm:$0xff] %v803_v13  ;;  %v931_v13 = vld [vmem:[%s15844_s10 + $0x3e8] sm:$0xff] }
  0xe3   : > { %806 = vst [vmem:[#allocation7 + $0x1f0] sm:$0xff] %v805_v14  ;;  %v933_v14 = vld [vmem:[%s15844_s10 + $0x3f0] sm:$0xff] }
  0xe4   : > { %808 = vst [vmem:[#allocation7 + $0x1f8] sm:$0xff] %v807_v15  ;;  %v935_v15 = vld [vmem:[%s15844_s10 + $0x3f8] sm:$0xff] }
  0xe5   : > { %810 = vst [vmem:[#allocation7 + $0x200] sm:$0xff] %v809_v16  ;;  %v937_v16 = vld [vmem:[%s15844_s10 + $0x400] sm:$0xff] }
  0xe6   : > { %812 = vst [vmem:[#allocation7 + $0x208] sm:$0xff] %v811_v17  ;;  %v939_v17 = vld [vmem:[%s15844_s10 + $0x408] sm:$0xff] }
  0xe7   : > { %814 = vst [vmem:[#allocation7 + $0x210] sm:$0xff] %v813_v18  ;;  %v941_v18 = vld [vmem:[%s15844_s10 + $0x410] sm:$0xff] }
  0xe8   : > { %816 = vst [vmem:[#allocation7 + $0x218] sm:$0xff] %v815_v19  ;;  %v943_v19 = vld [vmem:[%s15844_s10 + $0x418] sm:$0xff] }
  0xe9   : > { %818 = vst [vmem:[#allocation7 + $0x220] sm:$0xff] %v817_v20  ;;  %v945_v20 = vld [vmem:[%s15844_s10 + $0x420] sm:$0xff] }
  0xea   : > { %820 = vst [vmem:[#allocation7 + $0x228] sm:$0xff] %v819_v21  ;;  %v947_v21 = vld [vmem:[%s15844_s10 + $0x428] sm:$0xff] }
  0xeb   : > { %822 = vst [vmem:[#allocation7 + $0x230] sm:$0xff] %v821_v22  ;;  %v949_v22 = vld [vmem:[%s15844_s10 + $0x430] sm:$0xff] }
  0xec   : > { %824 = vst [vmem:[#allocation7 + $0x238] sm:$0xff] %v823_v23  ;;  %v951_v23 = vld [vmem:[%s15844_s10 + $0x438] sm:$0xff] }
  0xed   : > { %826 = vst [vmem:[#allocation7 + $0x240] sm:$0xff] %v825_v24  ;;  %v953_v24 = vld [vmem:[%s15844_s10 + $0x440] sm:$0xff] }
  0xee   : > { %828 = vst [vmem:[#allocation7 + $0x248] sm:$0xff] %v827_v25  ;;  %v955_v25 = vld [vmem:[%s15844_s10 + $0x448] sm:$0xff] }
  0xef   : > { %830 = vst [vmem:[#allocation7 + $0x250] sm:$0xff] %v829_v26  ;;  %v957_v26 = vld [vmem:[%s15844_s10 + $0x450] sm:$0xff] }
  0xf0   : > { %832 = vst [vmem:[#allocation7 + $0x258] sm:$0xff] %v831_v27  ;;  %v959_v27 = vld [vmem:[%s15844_s10 + $0x458] sm:$0xff] }
  0xf1   : > { %834 = vst [vmem:[#allocation7 + $0x260] sm:$0xff] %v833_v28  ;;  %v961_v28 = vld [vmem:[%s15844_s10 + $0x460] sm:$0xff] }
  0xf2   : > { %836 = vst [vmem:[#allocation7 + $0x268] sm:$0xff] %v835_v29  ;;  %v963_v29 = vld [vmem:[%s15844_s10 + $0x468] sm:$0xff] }
  0xf3   : > { %838 = vst [vmem:[#allocation7 + $0x270] sm:$0xff] %v837_v30  ;;  %v965_v30 = vld [vmem:[%s15844_s10 + $0x470] sm:$0xff] }
  0xf4   : > { %840 = vst [vmem:[#allocation7 + $0x278] sm:$0xff] %v839_v31  ;;  %v967_v31 = vld [vmem:[%s15844_s10 + $0x478] sm:$0xff] }
  0xf5   : > { %842 = vst [vmem:[#allocation7 + $0x280] sm:$0xff] %v841_v32  ;;  %v969_v32 = vld [vmem:[%s15844_s10 + $0x480] sm:$0xff] }
  0xf6   : > { %844 = vst [vmem:[#allocation7 + $0x288] sm:$0xff] %v843_v33  ;;  %v971_v33 = vld [vmem:[%s15844_s10 + $0x488] sm:$0xff] }
  0xf7   : > { %846 = vst [vmem:[#allocation7 + $0x290] sm:$0xff] %v845_v34  ;;  %v973_v34 = vld [vmem:[%s15844_s10 + $0x490] sm:$0xff] }
  0xf8   : > { %848 = vst [vmem:[#allocation7 + $0x298] sm:$0xff] %v847_v35  ;;  %v975_v35 = vld [vmem:[%s15844_s10 + $0x498] sm:$0xff] }
  0xf9   : > { %850 = vst [vmem:[#allocation7 + $0x2a0] sm:$0xff] %v849_v36  ;;  %v977_v36 = vld [vmem:[%s15844_s10 + $0x4a0] sm:$0xff] }
  0xfa   : > { %852 = vst [vmem:[#allocation7 + $0x2a8] sm:$0xff] %v851_v37  ;;  %v979_v37 = vld [vmem:[%s15844_s10 + $0x4a8] sm:$0xff] }
  0xfb   : > { %854 = vst [vmem:[#allocation7 + $0x2b0] sm:$0xff] %v853_v38  ;;  %v981_v38 = vld [vmem:[%s15844_s10 + $0x4b0] sm:$0xff] }
  0xfc   : > { %856 = vst [vmem:[#allocation7 + $0x2b8] sm:$0xff] %v855_v39  ;;  %v983_v39 = vld [vmem:[%s15844_s10 + $0x4b8] sm:$0xff] }
  0xfd   : > { %858 = vst [vmem:[#allocation7 + $0x2c0] sm:$0xff] %v857_v40  ;;  %v985_v40 = vld [vmem:[%s15844_s10 + $0x4c0] sm:$0xff] }
  0xfe   : > { %860 = vst [vmem:[#allocation7 + $0x2c8] sm:$0xff] %v859_v41  ;;  %v987_v41 = vld [vmem:[%s15844_s10 + $0x4c8] sm:$0xff] }
  0xff   : > { %862 = vst [vmem:[#allocation7 + $0x2d0] sm:$0xff] %v861_v42  ;;  %v989_v42 = vld [vmem:[%s15844_s10 + $0x4d0] sm:$0xff] }
 0x100   : > { %864 = vst [vmem:[#allocation7 + $0x2d8] sm:$0xff] %v863_v43  ;;  %v991_v43 = vld [vmem:[%s15844_s10 + $0x4d8] sm:$0xff] }
 0x101   : > { %866 = vst [vmem:[#allocation7 + $0x2e0] sm:$0xff] %v865_v44  ;;  %v993_v44 = vld [vmem:[%s15844_s10 + $0x4e0] sm:$0xff] }
 0x102   : > { %868 = vst [vmem:[#allocation7 + $0x2e8] sm:$0xff] %v867_v45  ;;  %v995_v45 = vld [vmem:[%s15844_s10 + $0x4e8] sm:$0xff] }
 0x103   : > { %870 = vst [vmem:[#allocation7 + $0x2f0] sm:$0xff] %v869_v46  ;;  %v997_v46 = vld [vmem:[%s15844_s10 + $0x4f0] sm:$0xff] }
 0x104   : > { %872 = vst [vmem:[#allocation7 + $0x2f8] sm:$0xff] %v871_v47  ;;  %v999_v47 = vld [vmem:[%s15844_s10 + $0x4f8] sm:$0xff] }
 0x105   : > { %874 = vst [vmem:[#allocation7 + $0x300] sm:$0xff] %v873_v48  ;;  %v1001_v48 = vld [vmem:[%s15844_s10 + $0x500] sm:$0xff] }
 0x106   : > { %876 = vst [vmem:[#allocation7 + $0x308] sm:$0xff] %v875_v49  ;;  %v1003_v49 = vld [vmem:[%s15844_s10 + $0x508] sm:$0xff] }
 0x107   : > { %878 = vst [vmem:[#allocation7 + $0x310] sm:$0xff] %v877_v50  ;;  %v1005_v50 = vld [vmem:[%s15844_s10 + $0x510] sm:$0xff] }
 0x108   : > { %880 = vst [vmem:[#allocation7 + $0x318] sm:$0xff] %v879_v51  ;;  %v1007_v51 = vld [vmem:[%s15844_s10 + $0x518] sm:$0xff] }
 0x109   : > { %882 = vst [vmem:[#allocation7 + $0x320] sm:$0xff] %v881_v52  ;;  %v1009_v52 = vld [vmem:[%s15844_s10 + $0x520] sm:$0xff] }
 0x10a   : > { %884 = vst [vmem:[#allocation7 + $0x328] sm:$0xff] %v883_v53  ;;  %v1011_v53 = vld [vmem:[%s15844_s10 + $0x528] sm:$0xff] }
 0x10b   : > { %886 = vst [vmem:[#allocation7 + $0x330] sm:$0xff] %v885_v54  ;;  %v1013_v54 = vld [vmem:[%s15844_s10 + $0x530] sm:$0xff] }
 0x10c   : > { %888 = vst [vmem:[#allocation7 + $0x338] sm:$0xff] %v887_v55  ;;  %v1015_v55 = vld [vmem:[%s15844_s10 + $0x538] sm:$0xff] }
 0x10d   : > { %890 = vst [vmem:[#allocation7 + $0x340] sm:$0xff] %v889_v56  ;;  %v1017_v56 = vld [vmem:[%s15844_s10 + $0x540] sm:$0xff] }
 0x10e   : > { %892 = vst [vmem:[#allocation7 + $0x348] sm:$0xff] %v891_v57  ;;  %v1019_v57 = vld [vmem:[%s15844_s10 + $0x548] sm:$0xff] }
 0x10f   : > { %894 = vst [vmem:[#allocation7 + $0x350] sm:$0xff] %v893_v58  ;;  %v1021_v58 = vld [vmem:[%s15844_s10 + $0x550] sm:$0xff] }
 0x110   : > { %896 = vst [vmem:[#allocation7 + $0x358] sm:$0xff] %v895_v59  ;;  %v1023_v59 = vld [vmem:[%s15844_s10 + $0x558] sm:$0xff] }
 0x111   : > { %898 = vst [vmem:[#allocation7 + $0x360] sm:$0xff] %v897_v60  ;;  %v1025_v60 = vld [vmem:[%s15844_s10 + $0x560] sm:$0xff] }
 0x112   : > { %900 = vst [vmem:[#allocation7 + $0x368] sm:$0xff] %v899_v61  ;;  %v1027_v61 = vld [vmem:[%s15844_s10 + $0x568] sm:$0xff] }
 0x113   : > { %902 = vst [vmem:[#allocation7 + $0x370] sm:$0xff] %v901_v62  ;;  %v1029_v62 = vld [vmem:[%s15844_s10 + $0x570] sm:$0xff] }
 0x114   : > { %904 = vst [vmem:[#allocation7 + $0x378] sm:$0xff] %v903_v63  ;;  %v1031_v63 = vld [vmem:[%s15844_s10 + $0x578] sm:$0xff] }
 0x115   : > { %906 = vst [vmem:[#allocation7 + $0x380] sm:$0xff] %v905_v0  ;;  %v1033_v0 = vld [vmem:[%s15844_s10 + $0x580] sm:$0xff] }
 0x116   : > { %908 = vst [vmem:[#allocation7 + $0x388] sm:$0xff] %v907_v1  ;;  %v1035_v1 = vld [vmem:[%s15844_s10 + $0x588] sm:$0xff] }
 0x117   : > { %910 = vst [vmem:[#allocation7 + $0x390] sm:$0xff] %v909_v2  ;;  %v1037_v2 = vld [vmem:[%s15844_s10 + $0x590] sm:$0xff] }
 0x118   : > { %912 = vst [vmem:[#allocation7 + $0x398] sm:$0xff] %v911_v3  ;;  %v1039_v3 = vld [vmem:[%s15844_s10 + $0x598] sm:$0xff] }
 0x119   : > { %914 = vst [vmem:[#allocation7 + $0x3a0] sm:$0xff] %v913_v4  ;;  %v1041_v4 = vld [vmem:[%s15844_s10 + $0x5a0] sm:$0xff] }
 0x11a   : > { %916 = vst [vmem:[#allocation7 + $0x3a8] sm:$0xff] %v915_v5  ;;  %v1043_v5 = vld [vmem:[%s15844_s10 + $0x5a8] sm:$0xff] }
 0x11b   : > { %918 = vst [vmem:[#allocation7 + $0x3b0] sm:$0xff] %v917_v6  ;;  %v1045_v6 = vld [vmem:[%s15844_s10 + $0x5b0] sm:$0xff] }
 0x11c   : > { %920 = vst [vmem:[#allocation7 + $0x3b8] sm:$0xff] %v919_v7  ;;  %v1047_v7 = vld [vmem:[%s15844_s10 + $0x5b8] sm:$0xff] }
 0x11d   : > { %922 = vst [vmem:[#allocation7 + $0x3c0] sm:$0xff] %v921_v8  ;;  %v1049_v8 = vld [vmem:[%s15844_s10 + $0x5c0] sm:$0xff] }
 0x11e   : > { %924 = vst [vmem:[#allocation7 + $0x3c8] sm:$0xff] %v923_v9  ;;  %v1051_v9 = vld [vmem:[%s15844_s10 + $0x5c8] sm:$0xff] }
 0x11f   : > { %926 = vst [vmem:[#allocation7 + $0x3d0] sm:$0xff] %v925_v10  ;;  %v1053_v10 = vld [vmem:[%s15844_s10 + $0x5d0] sm:$0xff] }
 0x120   : > { %928 = vst [vmem:[#allocation7 + $0x3d8] sm:$0xff] %v927_v11  ;;  %v1055_v11 = vld [vmem:[%s15844_s10 + $0x5d8] sm:$0xff] }
 0x121   : > { %930 = vst [vmem:[#allocation7 + $0x3e0] sm:$0xff] %v929_v12  ;;  %v1057_v12 = vld [vmem:[%s15844_s10 + $0x5e0] sm:$0xff] }
 0x122   : > { %932 = vst [vmem:[#allocation7 + $0x3e8] sm:$0xff] %v931_v13  ;;  %v1059_v13 = vld [vmem:[%s15844_s10 + $0x5e8] sm:$0xff] }
 0x123   : > { %934 = vst [vmem:[#allocation7 + $0x3f0] sm:$0xff] %v933_v14  ;;  %v1061_v14 = vld [vmem:[%s15844_s10 + $0x5f0] sm:$0xff] }
 0x124   : > { %936 = vst [vmem:[#allocation7 + $0x3f8] sm:$0xff] %v935_v15  ;;  %v1063_v15 = vld [vmem:[%s15844_s10 + $0x5f8] sm:$0xff] }
 0x125   : > { %938 = vst [vmem:[#allocation7 + $0x400] sm:$0xff] %v937_v16  ;;  %v1065_v16 = vld [vmem:[%s15844_s10 + $0x600] sm:$0xff] }
 0x126   : > { %940 = vst [vmem:[#allocation7 + $0x408] sm:$0xff] %v939_v17  ;;  %v1067_v17 = vld [vmem:[%s15844_s10 + $0x608] sm:$0xff] }
 0x127   : > { %942 = vst [vmem:[#allocation7 + $0x410] sm:$0xff] %v941_v18  ;;  %v1069_v18 = vld [vmem:[%s15844_s10 + $0x610] sm:$0xff] }
 0x128   : > { %944 = vst [vmem:[#allocation7 + $0x418] sm:$0xff] %v943_v19  ;;  %v1071_v19 = vld [vmem:[%s15844_s10 + $0x618] sm:$0xff] }
 0x129   : > { %946 = vst [vmem:[#allocation7 + $0x420] sm:$0xff] %v945_v20  ;;  %v1073_v20 = vld [vmem:[%s15844_s10 + $0x620] sm:$0xff] }
 0x12a   : > { %948 = vst [vmem:[#allocation7 + $0x428] sm:$0xff] %v947_v21  ;;  %v1075_v21 = vld [vmem:[%s15844_s10 + $0x628] sm:$0xff] }
 0x12b   : > { %950 = vst [vmem:[#allocation7 + $0x430] sm:$0xff] %v949_v22  ;;  %v1077_v22 = vld [vmem:[%s15844_s10 + $0x630] sm:$0xff] }
 0x12c   : > { %952 = vst [vmem:[#allocation7 + $0x438] sm:$0xff] %v951_v23  ;;  %v1079_v23 = vld [vmem:[%s15844_s10 + $0x638] sm:$0xff] }
 0x12d   : > { %954 = vst [vmem:[#allocation7 + $0x440] sm:$0xff] %v953_v24  ;;  %v1081_v24 = vld [vmem:[%s15844_s10 + $0x640] sm:$0xff] }
 0x12e   : > { %956 = vst [vmem:[#allocation7 + $0x448] sm:$0xff] %v955_v25  ;;  %v1083_v25 = vld [vmem:[%s15844_s10 + $0x648] sm:$0xff] }
 0x12f   : > { %958 = vst [vmem:[#allocation7 + $0x450] sm:$0xff] %v957_v26  ;;  %v1085_v26 = vld [vmem:[%s15844_s10 + $0x650] sm:$0xff] }
 0x130   : > { %960 = vst [vmem:[#allocation7 + $0x458] sm:$0xff] %v959_v27  ;;  %v1087_v27 = vld [vmem:[%s15844_s10 + $0x658] sm:$0xff] }
 0x131   : > { %962 = vst [vmem:[#allocation7 + $0x460] sm:$0xff] %v961_v28  ;;  %v1089_v28 = vld [vmem:[%s15844_s10 + $0x660] sm:$0xff] }
 0x132   : > { %964 = vst [vmem:[#allocation7 + $0x468] sm:$0xff] %v963_v29  ;;  %v1091_v29 = vld [vmem:[%s15844_s10 + $0x668] sm:$0xff] }
 0x133   : > { %966 = vst [vmem:[#allocation7 + $0x470] sm:$0xff] %v965_v30  ;;  %v1093_v30 = vld [vmem:[%s15844_s10 + $0x670] sm:$0xff] }
 0x134   : > { %968 = vst [vmem:[#allocation7 + $0x478] sm:$0xff] %v967_v31  ;;  %v1095_v31 = vld [vmem:[%s15844_s10 + $0x678] sm:$0xff] }
 0x135   : > { %970 = vst [vmem:[#allocation7 + $0x480] sm:$0xff] %v969_v32  ;;  %v1097_v32 = vld [vmem:[%s15844_s10 + $0x680] sm:$0xff] }
 0x136   : > { %972 = vst [vmem:[#allocation7 + $0x488] sm:$0xff] %v971_v33  ;;  %v1099_v33 = vld [vmem:[%s15844_s10 + $0x688] sm:$0xff] }
 0x137   : > { %974 = vst [vmem:[#allocation7 + $0x490] sm:$0xff] %v973_v34  ;;  %v1101_v34 = vld [vmem:[%s15844_s10 + $0x690] sm:$0xff] }
 0x138   : > { %976 = vst [vmem:[#allocation7 + $0x498] sm:$0xff] %v975_v35  ;;  %v1103_v35 = vld [vmem:[%s15844_s10 + $0x698] sm:$0xff] }
 0x139   : > { %978 = vst [vmem:[#allocation7 + $0x4a0] sm:$0xff] %v977_v36  ;;  %v1105_v36 = vld [vmem:[%s15844_s10 + $0x6a0] sm:$0xff] }
 0x13a   : > { %980 = vst [vmem:[#allocation7 + $0x4a8] sm:$0xff] %v979_v37  ;;  %v1107_v37 = vld [vmem:[%s15844_s10 + $0x6a8] sm:$0xff] }
 0x13b   : > { %982 = vst [vmem:[#allocation7 + $0x4b0] sm:$0xff] %v981_v38  ;;  %v1109_v38 = vld [vmem:[%s15844_s10 + $0x6b0] sm:$0xff] }
 0x13c   : > { %984 = vst [vmem:[#allocation7 + $0x4b8] sm:$0xff] %v983_v39  ;;  %v1111_v39 = vld [vmem:[%s15844_s10 + $0x6b8] sm:$0xff] }
 0x13d   : > { %986 = vst [vmem:[#allocation7 + $0x4c0] sm:$0xff] %v985_v40  ;;  %v1113_v40 = vld [vmem:[%s15844_s10 + $0x6c0] sm:$0xff] }
 0x13e   : > { %988 = vst [vmem:[#allocation7 + $0x4c8] sm:$0xff] %v987_v41  ;;  %v1115_v41 = vld [vmem:[%s15844_s10 + $0x6c8] sm:$0xff] }
 0x13f   : > { %990 = vst [vmem:[#allocation7 + $0x4d0] sm:$0xff] %v989_v42  ;;  %v1117_v42 = vld [vmem:[%s15844_s10 + $0x6d0] sm:$0xff] }
 0x140   : > { %992 = vst [vmem:[#allocation7 + $0x4d8] sm:$0xff] %v991_v43  ;;  %v1119_v43 = vld [vmem:[%s15844_s10 + $0x6d8] sm:$0xff] }
 0x141   : > { %994 = vst [vmem:[#allocation7 + $0x4e0] sm:$0xff] %v993_v44  ;;  %v1121_v44 = vld [vmem:[%s15844_s10 + $0x6e0] sm:$0xff] }
 0x142   : > { %996 = vst [vmem:[#allocation7 + $0x4e8] sm:$0xff] %v995_v45  ;;  %v1123_v45 = vld [vmem:[%s15844_s10 + $0x6e8] sm:$0xff] }
 0x143   : > { %998 = vst [vmem:[#allocation7 + $0x4f0] sm:$0xff] %v997_v46  ;;  %v1125_v46 = vld [vmem:[%s15844_s10 + $0x6f0] sm:$0xff] }
 0x144   : > { %1000 = vst [vmem:[#allocation7 + $0x4f8] sm:$0xff] %v999_v47  ;;  %v1127_v47 = vld [vmem:[%s15844_s10 + $0x6f8] sm:$0xff] }
 0x145   : > { %1002 = vst [vmem:[#allocation7 + $0x500] sm:$0xff] %v1001_v48  ;;  %v1129_v48 = vld [vmem:[%s15844_s10 + $0x700] sm:$0xff] }
 0x146   : > { %1004 = vst [vmem:[#allocation7 + $0x508] sm:$0xff] %v1003_v49  ;;  %v1131_v49 = vld [vmem:[%s15844_s10 + $0x708] sm:$0xff] }
 0x147   : > { %1006 = vst [vmem:[#allocation7 + $0x510] sm:$0xff] %v1005_v50  ;;  %v1133_v50 = vld [vmem:[%s15844_s10 + $0x710] sm:$0xff] }
 0x148   : > { %1008 = vst [vmem:[#allocation7 + $0x518] sm:$0xff] %v1007_v51  ;;  %v1135_v51 = vld [vmem:[%s15844_s10 + $0x718] sm:$0xff] }
 0x149   : > { %1010 = vst [vmem:[#allocation7 + $0x520] sm:$0xff] %v1009_v52  ;;  %v1137_v52 = vld [vmem:[%s15844_s10 + $0x720] sm:$0xff] }
 0x14a   : > { %1012 = vst [vmem:[#allocation7 + $0x528] sm:$0xff] %v1011_v53  ;;  %v1139_v53 = vld [vmem:[%s15844_s10 + $0x728] sm:$0xff] }
 0x14b   : > { %1014 = vst [vmem:[#allocation7 + $0x530] sm:$0xff] %v1013_v54  ;;  %v1141_v54 = vld [vmem:[%s15844_s10 + $0x730] sm:$0xff] }
 0x14c   : > { %1016 = vst [vmem:[#allocation7 + $0x538] sm:$0xff] %v1015_v55  ;;  %v1143_v55 = vld [vmem:[%s15844_s10 + $0x738] sm:$0xff] }
 0x14d   : > { %1018 = vst [vmem:[#allocation7 + $0x540] sm:$0xff] %v1017_v56  ;;  %v1145_v56 = vld [vmem:[%s15844_s10 + $0x740] sm:$0xff] }
 0x14e   : > { %1020 = vst [vmem:[#allocation7 + $0x548] sm:$0xff] %v1019_v57  ;;  %v1147_v57 = vld [vmem:[%s15844_s10 + $0x748] sm:$0xff] }
 0x14f   : > { %1022 = vst [vmem:[#allocation7 + $0x550] sm:$0xff] %v1021_v58  ;;  %v1149_v58 = vld [vmem:[%s15844_s10 + $0x750] sm:$0xff] }
 0x150   : > { %1024 = vst [vmem:[#allocation7 + $0x558] sm:$0xff] %v1023_v59  ;;  %v1151_v59 = vld [vmem:[%s15844_s10 + $0x758] sm:$0xff] }
 0x151   : > { %1026 = vst [vmem:[#allocation7 + $0x560] sm:$0xff] %v1025_v60  ;;  %v1153_v60 = vld [vmem:[%s15844_s10 + $0x760] sm:$0xff] }
 0x152   : > { %1028 = vst [vmem:[#allocation7 + $0x568] sm:$0xff] %v1027_v61  ;;  %v1155_v61 = vld [vmem:[%s15844_s10 + $0x768] sm:$0xff] }
 0x153   : > { %1030 = vst [vmem:[#allocation7 + $0x570] sm:$0xff] %v1029_v62  ;;  %v1157_v62 = vld [vmem:[%s15844_s10 + $0x770] sm:$0xff] }
 0x154   : > { %1032 = vst [vmem:[#allocation7 + $0x578] sm:$0xff] %v1031_v63  ;;  %v1159_v63 = vld [vmem:[%s15844_s10 + $0x778] sm:$0xff] }
 0x155   : > { %1034 = vst [vmem:[#allocation7 + $0x580] sm:$0xff] %v1033_v0  ;;  %v1161_v0 = vld [vmem:[%s15844_s10 + $0x780] sm:$0xff] }
 0x156   : > { %1036 = vst [vmem:[#allocation7 + $0x588] sm:$0xff] %v1035_v1  ;;  %v1163_v1 = vld [vmem:[%s15844_s10 + $0x788] sm:$0xff] }
 0x157   : > { %1038 = vst [vmem:[#allocation7 + $0x590] sm:$0xff] %v1037_v2  ;;  %v1165_v2 = vld [vmem:[%s15844_s10 + $0x790] sm:$0xff] }
 0x158   : > { %1040 = vst [vmem:[#allocation7 + $0x598] sm:$0xff] %v1039_v3  ;;  %v1167_v3 = vld [vmem:[%s15844_s10 + $0x798] sm:$0xff] }
 0x159   : > { %1042 = vst [vmem:[#allocation7 + $0x5a0] sm:$0xff] %v1041_v4  ;;  %v1169_v4 = vld [vmem:[%s15844_s10 + $0x7a0] sm:$0xff] }
 0x15a   : > { %1044 = vst [vmem:[#allocation7 + $0x5a8] sm:$0xff] %v1043_v5  ;;  %v1171_v5 = vld [vmem:[%s15844_s10 + $0x7a8] sm:$0xff] }
 0x15b   : > { %1046 = vst [vmem:[#allocation7 + $0x5b0] sm:$0xff] %v1045_v6  ;;  %v1173_v6 = vld [vmem:[%s15844_s10 + $0x7b0] sm:$0xff] }
 0x15c   : > { %1048 = vst [vmem:[#allocation7 + $0x5b8] sm:$0xff] %v1047_v7  ;;  %v1175_v7 = vld [vmem:[%s15844_s10 + $0x7b8] sm:$0xff] }
 0x15d   : > { %1050 = vst [vmem:[#allocation7 + $0x5c0] sm:$0xff] %v1049_v8  ;;  %v1177_v8 = vld [vmem:[%s15844_s10 + $0x7c0] sm:$0xff] }
 0x15e   : > { %1052 = vst [vmem:[#allocation7 + $0x5c8] sm:$0xff] %v1051_v9  ;;  %v1179_v9 = vld [vmem:[%s15844_s10 + $0x7c8] sm:$0xff] }
 0x15f   : > { %1054 = vst [vmem:[#allocation7 + $0x5d0] sm:$0xff] %v1053_v10  ;;  %v1181_v10 = vld [vmem:[%s15844_s10 + $0x7d0] sm:$0xff] }
 0x160   : > { %1056 = vst [vmem:[#allocation7 + $0x5d8] sm:$0xff] %v1055_v11  ;;  %v1183_v11 = vld [vmem:[%s15844_s10 + $0x7d8] sm:$0xff] }
 0x161   : > { %1058 = vst [vmem:[#allocation7 + $0x5e0] sm:$0xff] %v1057_v12  ;;  %v1185_v12 = vld [vmem:[%s15844_s10 + $0x7e0] sm:$0xff] }
 0x162   : > { %1060 = vst [vmem:[#allocation7 + $0x5e8] sm:$0xff] %v1059_v13  ;;  %v1187_v13 = vld [vmem:[%s15844_s10 + $0x7e8] sm:$0xff] }
 0x163   : > { %1062 = vst [vmem:[#allocation7 + $0x5f0] sm:$0xff] %v1061_v14  ;;  %v1189_v14 = vld [vmem:[%s15844_s10 + $0x7f0] sm:$0xff] }
 0x164   : > { %1064 = vst [vmem:[#allocation7 + $0x5f8] sm:$0xff] %v1063_v15  ;;  %v1191_v15 = vld [vmem:[%s15844_s10 + $0x7f8] sm:$0xff] }
 0x165   : > { %1066 = vst [vmem:[#allocation7 + $0x600] sm:$0xff] %v1065_v16 }
 0x166   : > { %1068 = vst [vmem:[#allocation7 + $0x608] sm:$0xff] %v1067_v17 }
 0x167   : > { %1070 = vst [vmem:[#allocation7 + $0x610] sm:$0xff] %v1069_v18 }
 0x168   : > { %1072 = vst [vmem:[#allocation7 + $0x618] sm:$0xff] %v1071_v19 }
 0x169   : > { %1074 = vst [vmem:[#allocation7 + $0x620] sm:$0xff] %v1073_v20 }
 0x16a   : > { %1076 = vst [vmem:[#allocation7 + $0x628] sm:$0xff] %v1075_v21 }
 0x16b   : > { %1078 = vst [vmem:[#allocation7 + $0x630] sm:$0xff] %v1077_v22 }
 0x16c   : > { %1080 = vst [vmem:[#allocation7 + $0x638] sm:$0xff] %v1079_v23 }
 0x16d   : > { %1082 = vst [vmem:[#allocation7 + $0x640] sm:$0xff] %v1081_v24 }
 0x16e   : > { %1084 = vst [vmem:[#allocation7 + $0x648] sm:$0xff] %v1083_v25 }
 0x16f   : > { %1086 = vst [vmem:[#allocation7 + $0x650] sm:$0xff] %v1085_v26 }
 0x170   : > { %1088 = vst [vmem:[#allocation7 + $0x658] sm:$0xff] %v1087_v27 }
 0x171   : > { %1090 = vst [vmem:[#allocation7 + $0x660] sm:$0xff] %v1089_v28 }
 0x172   : > { %1092 = vst [vmem:[#allocation7 + $0x668] sm:$0xff] %v1091_v29 }
 0x173   : > { %1094 = vst [vmem:[#allocation7 + $0x670] sm:$0xff] %v1093_v30 }
 0x174   : > { %1096 = vst [vmem:[#allocation7 + $0x678] sm:$0xff] %v1095_v31 }
 0x175   : > { %1098 = vst [vmem:[#allocation7 + $0x680] sm:$0xff] %v1097_v32 }
 0x176   : > { %1100 = vst [vmem:[#allocation7 + $0x688] sm:$0xff] %v1099_v33 }
 0x177   : > { %1102 = vst [vmem:[#allocation7 + $0x690] sm:$0xff] %v1101_v34 }
 0x178   : > { %1104 = vst [vmem:[#allocation7 + $0x698] sm:$0xff] %v1103_v35 }
 0x179   : > { %1106 = vst [vmem:[#allocation7 + $0x6a0] sm:$0xff] %v1105_v36 }
 0x17a   : > { %1108 = vst [vmem:[#allocation7 + $0x6a8] sm:$0xff] %v1107_v37 }
 0x17b   : > { %1110 = vst [vmem:[#allocation7 + $0x6b0] sm:$0xff] %v1109_v38 }
 0x17c   : > { %1112 = vst [vmem:[#allocation7 + $0x6b8] sm:$0xff] %v1111_v39 }
 0x17d   : > { %1114 = vst [vmem:[#allocation7 + $0x6c0] sm:$0xff] %v1113_v40 }
 0x17e   : > { %1116 = vst [vmem:[#allocation7 + $0x6c8] sm:$0xff] %v1115_v41 }
 0x17f   : > { %1118 = vst [vmem:[#allocation7 + $0x6d0] sm:$0xff] %v1117_v42 }
 0x180   : > { %1120 = vst [vmem:[#allocation7 + $0x6d8] sm:$0xff] %v1119_v43 }
 0x181   : > { %1122 = vst [vmem:[#allocation7 + $0x6e0] sm:$0xff] %v1121_v44 }
 0x182   : > { %1124 = vst [vmem:[#allocation7 + $0x6e8] sm:$0xff] %v1123_v45 }
 0x183   : > { %1126 = vst [vmem:[#allocation7 + $0x6f0] sm:$0xff] %v1125_v46 }
 0x184   : > { %1128 = vst [vmem:[#allocation7 + $0x6f8] sm:$0xff] %v1127_v47 }
 0x185   : > { %1130 = vst [vmem:[#allocation7 + $0x700] sm:$0xff] %v1129_v48 }
 0x186   : > { %1132 = vst [vmem:[#allocation7 + $0x708] sm:$0xff] %v1131_v49 }
 0x187   : > { %1134 = vst [vmem:[#allocation7 + $0x710] sm:$0xff] %v1133_v50 }
 0x188   : > { %1136 = vst [vmem:[#allocation7 + $0x718] sm:$0xff] %v1135_v51 }
 0x189   : > { %1138 = vst [vmem:[#allocation7 + $0x720] sm:$0xff] %v1137_v52 }
 0x18a   : > { %1140 = vst [vmem:[#allocation7 + $0x728] sm:$0xff] %v1139_v53 }
 0x18b   : > { %1142 = vst [vmem:[#allocation7 + $0x730] sm:$0xff] %v1141_v54 }
 0x18c   : > { %1144 = vst [vmem:[#allocation7 + $0x738] sm:$0xff] %v1143_v55 }
 0x18d   : > { %1146 = vst [vmem:[#allocation7 + $0x740] sm:$0xff] %v1145_v56 }
 0x18e   : > { %1148 = vst [vmem:[#allocation7 + $0x748] sm:$0xff] %v1147_v57 }
 0x18f   : > { %1150 = vst [vmem:[#allocation7 + $0x750] sm:$0xff] %v1149_v58 }
 0x190   : > { %1152 = vst [vmem:[#allocation7 + $0x758] sm:$0xff] %v1151_v59 }
 0x191   : > { %1154 = vst [vmem:[#allocation7 + $0x760] sm:$0xff] %v1153_v60 }
 0x192   : > { %1156 = vst [vmem:[#allocation7 + $0x768] sm:$0xff] %v1155_v61 }
 0x193   : > { %1158 = vst [vmem:[#allocation7 + $0x770] sm:$0xff] %v1157_v62 }
 0x194   : > { %1160 = vst [vmem:[#allocation7 + $0x778] sm:$0xff] %v1159_v63 }
 0x195   : > { %1162 = vst [vmem:[#allocation7 + $0x780] sm:$0xff] %v1161_v0 }
 0x196   : > { %1164 = vst [vmem:[#allocation7 + $0x788] sm:$0xff] %v1163_v1 }
 0x197   : > { %1166 = vst [vmem:[#allocation7 + $0x790] sm:$0xff] %v1165_v2 }
 0x198   : > { %1168 = vst [vmem:[#allocation7 + $0x798] sm:$0xff] %v1167_v3 }
 0x199   : > { %1170 = vst [vmem:[#allocation7 + $0x7a0] sm:$0xff] %v1169_v4 }
 0x19a   : > { %1172 = vst [vmem:[#allocation7 + $0x7a8] sm:$0xff] %v1171_v5 }
 0x19b   : > { %1174 = vst [vmem:[#allocation7 + $0x7b0] sm:$0xff] %v1173_v6 }
 0x19c   : > { %1176 = vst [vmem:[#allocation7 + $0x7b8] sm:$0xff] %v1175_v7 }
 0x19d   : > { %1178 = vst [vmem:[#allocation7 + $0x7c0] sm:$0xff] %v1177_v8 }
 0x19e   : > { %1180 = vst [vmem:[#allocation7 + $0x7c8] sm:$0xff] %v1179_v9 }
 0x19f   : > { %1182 = vst [vmem:[#allocation7 + $0x7d0] sm:$0xff] %v1181_v10 }
 0x1a0   : > { %1184 = vst [vmem:[#allocation7 + $0x7d8] sm:$0xff] %v1183_v11 }
 0x1a1   : > { %1186 = vst [vmem:[#allocation7 + $0x7e0] sm:$0xff] %v1185_v12 }
 0x1a2   : > { %1188 = vst [vmem:[#allocation7 + $0x7e8] sm:$0xff] %v1187_v13 }
 0x1a3   : > { %1190 = vst [vmem:[#allocation7 + $0x7f0] sm:$0xff] %v1189_v14 }
 0x1a4   : > { %1192 = vst [vmem:[#allocation7 + $0x7f8] sm:$0xff] %v1191_v15 }
 0x1a5   : > { %1198 = vsyncadd [#allocation8 + $0x1], 32768  ;;  %v13093_v16 = vmov 0.0  }
 0x1a6   : > { %1199 = vst [vmem:[#allocation2] sm:$0xff] %v13093_v16 }
 0x1a7   : > { %1200 = vst [vmem:[#allocation2 + $0x8] sm:$0xff] %v13093_v16 }
 0x1a8   : > { %1201 = vst [vmem:[#allocation2 + $0x70] sm:$0xff] %v13093_v16 }
 0x1a9   : > { %1202 = vst [vmem:[#allocation2 + $0x78] sm:$0xff] %v13093_v16 }
 0x1aa   : > { %1203 = vst [vmem:[#allocation3] sm:$0xff] %v13093_v16 }
 0x1ab   : > { %1204 = vst [vmem:[#allocation3 + $0x8] sm:$0xff] %v13093_v16 }
 0x1ac   : > { %1205 = vst [vmem:[#allocation3 + $0x70] sm:$0xff] %v13093_v16 }
 0x1ad   : > { %1206 = vst [vmem:[#allocation3 + $0x78] sm:$0xff] %v13093_v16 }
 0x1ae PF: > { %v12302_v17 = vld [vmem:[%s15836_s2 + $0x38] sm:$0xff]  ;;  %v13094_v19 = vmov 0   ;;  %v12301_v20 = vld [vmem:[%s15836_s2 + $0x30] sm:$0xff]  ;;  %v12300_v23 = vld [vmem:[%s15836_s2 + $0x28] sm:$0xff]  ;;  %p13038_p6 = scmp.eq.s32.totalorder %s13167_s22, 0 }
 0x1af   : > { %v12313_v18 = vld [vmem:[%s15836_s2 + $0x38] sm:$0xff]  ;;  %13051 = vset.pattern.permute.xlu0 %v13094_v19  ;;  %13052 = vset.pattern.permute.xlu1 %v13094_v19  ;;  %v12312_v21 = vld [vmem:[%s15836_s2 + $0x30] sm:$0xff]  ;;  %v12311_v24 = vld [vmem:[%s15836_s2 + $0x28] sm:$0xff] }
 0x1b0   : > { %1319 = vmatpush.bf16.msra.mxu0 %v12302_v17  ;;  %1479 = vmatpush.bf16.msra.mxu1 %v12313_v18  ;;  %v1215_v22 = vld [vmem:[%s15835_s1 + $0x10] sm:$0xff]  ;;  %v1217_v25 = vld [vmem:[%s15835_s1 + $0x20] sm:$0xff]  ;;  %v1216_v28 = vld [vmem:[%s15835_s1 + $0x18] sm:$0xff] }
 0x1b1   : > { %13053 = vset.pattern.permute.xlu2 %v13094_v19  ;;  %1351 = vperm.xlu0 %13051, %v1215_v22   ;;  %v12299_v26 = vld [vmem:[%s15836_s2 + $0x20] sm:$0xff]  ;;  %v1218_v29 = vld [vmem:[%s15835_s1 + $0x28] sm:$0xff]  ;;  %v12298_v30 = vld [vmem:[%s15836_s2 + $0x18] sm:$0xff] }
 0x1b2   : > { %1361 = vperm.xlu1 %13052, %v1217_v25   ;;  %v12310_v27 = vld [vmem:[%s15836_s2 + $0x20] sm:$0xff]  ;;  %v12309_v31 = vld [vmem:[%s15836_s2 + $0x18] sm:$0xff]  ;;  %v12297_v32 = vld [vmem:[%s15836_s2 + $0x10] sm:$0xff] }
 0x1b3   : > { %v12308_v33 = vld [vmem:[%s15836_s2 + $0x10] sm:$0xff]  ;;  %v1221_v34 = vld [vmem:[%s15835_s1 + $0x40] sm:$0xff]  ;;  %v1222_v35 = vld [vmem:[%s15835_s1 + $0x48] sm:$0xff] }
 0x1b4   : > { %1320 = vmatpush.bf16.msra.mxu0 %v12301_v20  ;;  %1480 = vmatpush.bf16.msra.mxu1 %v12312_v21  ;;  %v12296_v36 = vld [vmem:[%s15836_s2 + $0x8] sm:$0xff]  ;;  %v12295_v38 = vld [vmem:[%s15836_s2] sm:$0xff]  ;;  %v1224_v40 = vld [vmem:[%s15835_s1 + $0x58] sm:$0xff] }
 0x1b5   : > { %v12307_v37 = vld [vmem:[%s15836_s2 + $0x8] sm:$0xff]  ;;  %v12306_v39 = vld [vmem:[%s15836_s2] sm:$0xff]  ;;  %v1219_v44 = vld [vmem:[%s15835_s1 + $0x30] sm:$0xff] }
 0x1b6   : > { %v1225_v41 = vld [vmem:[%s15835_s1 + $0x60] sm:$0xff]  ;;  %v12292_v42 = vld [vmem:[%s13182_s14 + $0x8] sm:$0xff]  ;;  %1371 = vperm.xlu2 %13053, %v1219_v44   ;;  %v1220_v45 = vld [vmem:[%s15835_s1 + $0x38] sm:$0xff] }
 0x1b7   : > { %v12303_v43 = vld [vmem:[%s13182_s14 + $0x20] sm:$0xff]  ;;  %v12293_v46 = vld [vmem:[%s13182_s14 + $0x10] sm:$0xff]  ;;  %v12304_v47 = vld [vmem:[%s13182_s14 + $0x28] sm:$0xff] }
 0x1b8   : > { %1321 = vmatpush.bf16.msra.mxu0 %v12300_v23  ;;  %1481 = vmatpush.bf16.msra.mxu1 %v12311_v24  ;;  %v1223_v48 = vld [vmem:[%s15835_s1 + $0x50] sm:$0xff]  ;;  %v1226_v49 = vld [vmem:[%s15835_s1 + $0x68] sm:$0xff]  ;;  %v12294_v50 = vld [vmem:[%s13182_s14 + $0x18] sm:$0xff] }
 0x1b9   : > { %1356 = vperm.xlu0 %13051, %v1216_v28   ;;  %v12305_v51 = vld [vmem:[%s13182_s14 + $0x30] sm:$0xff]  ;;  %v12329_v52 = vld [vmem:[%s15838_s4 + $0x78] sm:$0xff]  ;;  %v12327_v58 = vld [vmem:[%s15838_s4 + $0x68] sm:$0xff] }
 0x1ba   : > { %1366 = vperm.xlu1 %13052, %v1218_v29   ;;  %v12321_v53 = vld [vmem:[%s15838_s4 + $0x38] sm:$0xff]  ;;  %1651 = vmatpush.bf16.msra.mxu2 %v12329_v52  ;;  %v12328_v55 = vld [vmem:[%s15838_s4 + $0x70] sm:$0xff]  ;;  %v12319_v59 = vld [vmem:[%s15838_s4 + $0x28] sm:$0xff] }
 0x1bb   : > { %v12337_v54 = vld [vmem:[%s15838_s4 + $0xb8] sm:$0xff]  ;;  %1723 = vmatpush.bf16.msra.mxu3 %v12321_v53  ;;  %v12320_v56 = vld [vmem:[%s15838_s4 + $0x30] sm:$0xff]  ;;  %v12335_v61 = vld [vmem:[%s15838_s4 + $0xa8] sm:$0xff] }
 0x1bc   : > { %1322 = vmatpush.bf16.msra.mxu0 %v12299_v26  ;;  %1482 = vmatpush.bf16.msra.mxu1 %v12310_v27  ;;  %v12336_v57 = vld [vmem:[%s15838_s4 + $0xb0] sm:$0xff]  ;;  %v12345_v60 = vld [vmem:[%s15838_s4 + $0xf8] sm:$0xff]  ;;  %v12326_v62 = vld [vmem:[%s15838_s4 + $0x60] sm:$0xff] }
 0x1bd   : > { %v12318_v63 = vld [vmem:[%s15838_s4 + $0x20] sm:$0xff]  ;;  %v12344_v1 = vld [vmem:[%s15838_s4 + $0xf0] sm:$0xff]  ;;  %v12325_v2 = vld [vmem:[%s15838_s4 + $0x58] sm:$0xff] }
 0x1be   : > { %1376 = vperm.xlu2 %13053, %v1220_v45   ;;  %1652 = vmatpush.bf16.msra.mxu2 %v12328_v55  ;;  %v12334_v0 = vld [vmem:[%s15838_s4 + $0xa0] sm:$0xff]  ;;  %v12317_v3 = vld [vmem:[%s15838_s4 + $0x18] sm:$0xff]  ;;  %v12343_v5 = vld [vmem:[%s15838_s4 + $0xe8] sm:$0xff] }
 0x1bf   : > { %1724 = vmatpush.bf16.msra.mxu3 %v12320_v56  ;;  %v12333_v4 = vld [vmem:[%s15838_s4 + $0x98] sm:$0xff]  ;;  %v12324_v6 = vld [vmem:[%s15838_s4 + $0x50] sm:$0xff]  ;;  %v12342_v9 = vld [vmem:[%s15838_s4 + $0xe0] sm:$0xff] }
 0x1c0   : > { %1323 = vmatpush.bf16.msra.mxu0 %v12298_v30  ;;  %1483 = vmatpush.bf16.msra.mxu1 %v12309_v31  ;;  %v12316_v7 = vld [vmem:[%s15838_s4 + $0x10] sm:$0xff]  ;;  %v12323_v10 = vld [vmem:[%s15838_s4 + $0x48] sm:$0xff]  ;;  %v12341_v13 = vld [vmem:[%s15838_s4 + $0xd8] sm:$0xff] }
 0x1c1   : > { %1511 = vperm.xlu0 %13051, %v1221_v34   ;;  %v12332_v8 = vld [vmem:[%s15838_s4 + $0x90] sm:$0xff]  ;;  %v12315_v11 = vld [vmem:[%s15838_s4 + $0x8] sm:$0xff]  ;;  %v12322_v14 = vld [vmem:[%s15838_s4 + $0x40] sm:$0xff] }
 0x1c2   : > { %1516 = vperm.xlu1 %13052, %v1222_v35   ;;  %1653 = vmatpush.bf16.msra.mxu2 %v12327_v58  ;;  %v12331_v12 = vld [vmem:[%s15838_s4 + $0x88] sm:$0xff]  ;;  %v12314_v15 = vld [vmem:[%s15838_s4] sm:$0xff]  ;;  %v12340_v17 = vld [vmem:[%s15838_s4 + $0xd0] sm:$0xff] }
 0x1c3   : > { %1725 = vmatpush.bf16.msra.mxu3 %v12319_v59  ;;  %v12330_v16 = vld [vmem:[%s15838_s4 + $0x80] sm:$0xff]  ;;  %v12339_v19 = vld [vmem:[%s15838_s4 + $0xc8] sm:$0xff]  ;;  %v12353_v22 = vld [vmem:[%s15838_s4 + $0x138] sm:$0xff] }
 0x1c4   : > { %1324 = vmatpush.bf16.msra.mxu0 %v12297_v32  ;;  %1484 = vmatpush.bf16.msra.mxu1 %v12308_v33  ;;  %v12338_v21 = vld [vmem:[%s15838_s4 + $0xc0] sm:$0xff]  ;;  %v12361_v23 = vld [vmem:[%s15838_s4 + $0x178] sm:$0xff]  ;;  %v12352_v24 = vld [vmem:[%s15838_s4 + $0x130] sm:$0xff] }
 0x1c5   : > { %v14589_v26 = vld [vmem:[%s15837_s3] ss:$0 sm:$0xff]  ;;  %v12360_v31 = vld [vmem:[%s15838_s4 + $0x170] sm:$0xff]  ;;  %v12351_v32 = vld [vmem:[%s15838_s4 + $0x128] sm:$0xff] }
 0x1c6   : > { %1521 = vperm.xlu2 %13053, %v1223_v48   ;;  %1654 = vmatpush.bf16.msra.mxu2 %v12326_v62  ;;  %v12369_v35 = vld [vmem:[%s15838_s4 + $0x1b8] sm:$0xff]  ;;  %v1577_v55 = vld [vmem:[#allocation2 + $0x6] sm:$0xff] }
 0x1c7   : > { %1726 = vmatpush.bf16.msra.mxu3 %v12318_v63  ;;  %v1552_v56 = vld [vmem:[#allocation2 + $0x5] sm:$0xff] }
 0x1c8   : > { %1325 = vmatpush.bf16.msra.mxu0 %v12296_v36  ;;  %1485 = vmatpush.bf16.msra.mxu1 %v12307_v37  ;;  %v12359_v36 = vld [vmem:[%s15838_s4 + $0x168] sm:$0xff] }
 0x1c9   : > { %1526 = vperm.xlu0 %13051, %v1224_v40  }
 0x1ca   : > { %1531 = vperm.xlu1 %13052, %v1225_v41   ;;  %1655 = vmatpush.bf16.msra.mxu2 %v12325_v2 }
 0x1cb   : > { %1727 = vmatpush.bf16.msra.mxu3 %v12317_v3 }
 0x1cc   : > { %1326 = vmatpush.bf16.msra.mxu0 %v12295_v38  ;;  %1486 = vmatpush.bf16.msra.mxu1 %v12306_v39 }
 0x1ce   : > { %1536 = vperm.xlu2 %13053, %v1226_v49   ;;  %1656 = vmatpush.bf16.msra.mxu2 %v12324_v6  ;;  %v12349_v6 = vld [vmem:[%s15838_s4 + $0x118] sm:$0xff] }
 0x1cf   : > { %1327 = vmatmul.bf16.vlgmr.msra.gmra.mxu0 %v12292_v42  ;;  %1487 = vmatmul.bf16.vlgmr.msra.gmra.mxu1 %v12303_v43  ;;  %v12368_v42 = vld [vmem:[%s15838_s4 + $0x1b0] sm:$0xff] }
 0x1d0   : > { %1821 = vmatpush.bf16.msrb.mxu0 %v12337_v54  ;;  %1925 = vmatpush.bf16.msrb.mxu1 %v12345_v60  ;;  %v12366_v60 = vld [vmem:[%s15838_s4 + $0x1a0] sm:$0xff] }
 0x1d1   : > { %1728 = vmatpush.bf16.msra.mxu3 %v12316_v7  ;;  %v12357_v7 = vld [vmem:[%s15838_s4 + $0x158] sm:$0xff] }
 0x1d2   : > { %1657 = vmatpush.bf16.msra.mxu2 %v12323_v10  ;;  %v12365_v10 = vld [vmem:[%s15838_s4 + $0x198] sm:$0xff] }
 0x1d4   : > { %1822 = vmatpush.bf16.msrb.mxu0 %v12336_v57  ;;  %1926 = vmatpush.bf16.msrb.mxu1 %v12344_v1  ;;  %v1747_v57 = vld [vmem:[#allocation2 + $0x7] sm:$0xff] }
 0x1d5   : > { %1729 = vmatpush.bf16.msra.mxu3 %v12315_v11  ;;  %v12375_v11 = vld [vmem:[%s15838_s4 + $0x1e8] sm:$0xff] }
 0x1d6   : > { %1658 = vmatpush.bf16.msra.mxu2 %v12322_v14 }
 0x1d8   : > { %1823 = vmatpush.bf16.msrb.mxu0 %v12335_v61  ;;  %1927 = vmatpush.bf16.msrb.mxu1 %v12343_v5  ;;  %v12376_v61 = vld [vmem:[%s15838_s4 + $0x1f0] sm:$0xff] }
 0x1d9   : > { %1730 = vmatpush.bf16.msra.mxu3 %v12314_v15 }
 0x1da   : > { %2029 = vmatpush.bf16.msrb.mxu2 %v12353_v22 }
 0x1dc   : > { %1824 = vmatpush.bf16.msrb.mxu0 %v12334_v0  ;;  %1928 = vmatpush.bf16.msrb.mxu1 %v12342_v9 }
 0x1dd   : > { %2133 = vmatpush.bf16.msrb.mxu3 %v12361_v23 }
 0x1de   : > { %2030 = vmatpush.bf16.msrb.mxu2 %v12352_v24  ;;  %v12347_v24 = vld [vmem:[%s15838_s4 + $0x108] sm:$0xff] }
 0x1df   : > { %1332 = vmatmul.bf16.gmra.mxu0 %v12293_v46  ;;  %1492 = vmatmul.bf16.gmra.mxu1 %v12304_v47  ;;  %v12350_v46 = vld [vmem:[%s15838_s4 + $0x120] sm:$0xff] }
 0x1e0   : > { %1825 = vmatpush.bf16.msrb.mxu0 %v12333_v4  ;;  %1929 = vmatpush.bf16.msrb.mxu1 %v12341_v13  ;;  %v12358_v47 = vld [vmem:[%s15838_s4 + $0x160] sm:$0xff]  ;;  %v12348_v13 = vld [vmem:[%s15838_s4 + $0x110] sm:$0xff] }
 0x1e1   : > { %2134 = vmatpush.bf16.msrb.mxu3 %v12360_v31 }
 0x1e2   : > { %2031 = vmatpush.bf16.msrb.mxu2 %v12351_v32 }
 0x1e4   : > { %1826 = vmatpush.bf16.msrb.mxu0 %v12332_v8  ;;  %1930 = vmatpush.bf16.msrb.mxu1 %v12340_v17  ;;  %v12364_v17 = vld [vmem:[%s15838_s4 + $0x190] sm:$0xff] }
 0x1e5   : > { %2135 = vmatpush.bf16.msrb.mxu3 %v12359_v36  ;;  %v12373_v36 = vld [vmem:[%s15838_s4 + $0x1d8] sm:$0xff] }
 0x1e6   : > { %2032 = vmatpush.bf16.msrb.mxu2 %v12350_v46  ;;  %v12372_v46 = vld [vmem:[%s15838_s4 + $0x1d0] sm:$0xff] }
 0x1e8   : > { %1827 = vmatpush.bf16.msrb.mxu0 %v12331_v12  ;;  %1931 = vmatpush.bf16.msrb.mxu1 %v12339_v19  ;;  %v12374_v19 = vld [vmem:[%s15838_s4 + $0x1e0] sm:$0xff] }
 0x1e9   : > { %2136 = vmatpush.bf16.msrb.mxu3 %v12358_v47 }
 0x1ea   : > { %2033 = vmatpush.bf16.msrb.mxu2 %v12349_v6  ;;  %v12384_v6 = vld [vmem:[%s15838_s4 + $0x230] sm:$0xff] }
 0x1ec   : > { %1828 = vmatpush.bf16.msrb.mxu0 %v12330_v16  ;;  %1932 = vmatpush.bf16.msrb.mxu1 %v12338_v21  ;;  %v12356_v16 = vld [vmem:[%s15838_s4 + $0x150] sm:$0xff] }
 0x1ed   : > { %2137 = vmatpush.bf16.msrb.mxu3 %v12357_v7 }
 0x1ee   : > { %2034 = vmatpush.bf16.msrb.mxu2 %v12348_v13 }
 0x1ef   : > { %1337 = vmatmul.bf16.gmra.mxu0 %v12294_v50  ;;  %1497 = vmatmul.bf16.gmra.mxu1 %v12305_v51  ;;  %v12367_v50 = vld [vmem:[%s15838_s4 + $0x1a8] sm:$0xff]  ;;  %v12377_v51 = vld [vmem:[%s15838_s4 + $0x1f8] sm:$0xff] }
 0x1f0   : > { %2237 = vmatpush.bf16.msra.mxu0 %v12369_v35  ;;  %2341 = vmatpush.bf16.msra.mxu1 %v12377_v51  ;;  %v12363_v35 = vld [vmem:[%s15838_s4 + $0x188] sm:$0xff] }
 0x1f1   : > { %2138 = vmatpush.bf16.msrb.mxu3 %v12356_v16  ;;  %v12400_v16 = vld [vmem:[%s15838_s4 + $0x70] sm:$0xff] }
 0x1f2   : > { %2035 = vmatpush.bf16.msrb.mxu2 %v12347_v24 }
 0x1f4   : > { %2238 = vmatpush.bf16.msra.mxu0 %v12368_v42  ;;  %2342 = vmatpush.bf16.msra.mxu1 %v12376_v61  ;;  %v12354_v42 = vld [vmem:[%s15838_s4 + $0x140] sm:$0xff] }
 0x1f8   : > { %2239 = vmatpush.bf16.msra.mxu0 %v12367_v50  ;;  %2343 = vmatpush.bf16.msra.mxu1 %v12375_v11 }
 0x1fc   : > { %2240 = vmatpush.bf16.msra.mxu0 %v12366_v60  ;;  %2344 = vmatpush.bf16.msra.mxu1 %v12374_v19 }
 0x200   : > { %2241 = vmatpush.bf16.msra.mxu0 %v12365_v10  ;;  %2345 = vmatpush.bf16.msra.mxu1 %v12373_v36 }
 0x204   : > { %2242 = vmatpush.bf16.msra.mxu0 %v12364_v17  ;;  %2346 = vmatpush.bf16.msra.mxu1 %v12372_v46  ;;  %v12383_v17 = vld [vmem:[%s15838_s4 + $0x228] sm:$0xff] }
 0x208   : > { %2243 = vmatpush.bf16.msra.mxu0 %v12363_v35 }
 0x210   : > { %v14591_v27 = vpop.permute.xlu2 %1371 }
 0x218   : > { %v14619_v43 = vpop.permute.xlu2 %1376 }
 0x220   : > { %v14662_v12 = vpop.permute.xlu2 %1521 }
 0x223   : > { %v14565_v18 = vpop.permute.xlu0 %1351 }
 0x224   : > { %v14570_v20 = vpop.permute.xlu1 %1361 }
 0x228   : > { %v14749_v24 = vpop.permute.xlu2 %1536 }
 0x229   : > { %15849 = vst [vmem:[#allocation13_spill] sm:$0xff] %v14749_v24 }
 0x22b   : > { %v14584_v25 = vpop.permute.xlu0 %1356 }
 0x22c   : > { %v14593_v28 = vpop.permute.xlu1 %1366 }
 0x233   : > { %v14609_v39 = vpop.permute.xlu0 %1511 }
 0x234   : > { %v14635_v52 = vpop.permute.xlu1 %1516 }
 0x24c   : > { %v1328_v29 = vpop.f32.mrf.mxu0  ;;  %v1488_v30 = vpop.f32.mrf.mxu1 }
 0x24d   : > { %v1329_v33 = vadd.f32 %v14589_v26, %v1328_v29  ;;  %v1489_v34 = vadd.f32 %v14589_v26, %v1488_v30  ;;  %v12355_v30 = vld [vmem:[%s15838_s4 + $0x148] sm:$0xff] }
 0x24e   : > { %2139 = vmatpush.bf16.msrb.mxu3 %v12355_v30 }
 0x24f   : > { %v1343_v37 = vmax.f32 %v1329_v33, 0.0  ;;  %v1503_v38 = vmax.f32 %v1489_v34, 0.0 }
 0x251   : > { %v14612_v40 = vmul.f32 %v14565_v18, %v1343_v37  ;;  %v1539_v41 = vmul.f32 %v14609_v39, %v1503_v38  ;;  %v12346_v37 = vld [vmem:[%s15838_s4 + $0x100] sm:$0xff] }
 0x252   : > { %2036 = vmatpush.bf16.msrb.mxu2 %v12346_v37  ;;  %2140 = vmatpush.bf16.msrb.mxu3 %v12354_v42  ;;  %v12398_v42 = vld [vmem:[%s15838_s4 + $0x60] sm:$0xff] }
 0x253   : > { %1385 = vst [vmem:[#allocation2 + $0x10] sm:$0xff] %v14612_v40 }
 0x254   : > { %1545 = vst [vmem:[#allocation2 + $0x40] sm:$0xff] %v1539_v41  ;;  %v1330_v44 = vpop.f32.mrf.mxu0  ;;  %v1490_v45 = vpop.f32.mrf.mxu1 }
 0x255   : > { %v1331_v48 = vadd.f32 %v14589_v26, %v1330_v44  ;;  %v1491_v49 = vadd.f32 %v14589_v26, %v1490_v45  ;;  %v12362_v44 = vld [vmem:[%s15838_s4 + $0x180] sm:$0xff]  ;;  %v14704_v45 = vpop.permute.xlu0 %1526 }
 0x256   : > { %2244 = vmatpush.bf16.msra.mxu0 %v12362_v44  ;;  %v12392_v44 = vld [vmem:[%s15838_s4 + $0x30] sm:$0xff] }
 0x257   : > { %v1344_v53 = vmax.f32 %v1331_v48, 0.0  ;;  %v1504_v54 = vmax.f32 %v1491_v49, 0.0 }
 0x259   : > { %v14638_v58 = vmul.f32 %v14584_v25, %v1344_v53  ;;  %v1540_v59 = vmul.f32 %v14635_v52, %v1504_v54 }
 0x25a   : > { %v1578_v62 = vld [vmem:[#allocation2 + $0xe] sm:$0xff] }
 0x25b   : > { %v1553_v63 = vld [vmem:[#allocation2 + $0xd] sm:$0xff]  ;;  %1386 = vst [vmem:[#allocation2 + $0x18] sm:$0xff] %v14638_v58  ;;  %v1583_v1 = vpack.c.bf16 %v1578_v62, %v1577_v55 }
 0x25c   : > { %v1748_v0 = vld [vmem:[#allocation2 + $0xf] sm:$0xff]  ;;  %v1558_v2 = vpack.c.bf16 %v1553_v63, %v1552_v56  ;;  %1546 = vst [vmem:[#allocation2 + $0x48] sm:$0xff] %v1540_v59  ;;  %v1333_v4 = vpop.f32.mrf.mxu0  ;;  %v1493_v5 = vpop.f32.mrf.mxu1 }
 0x25d   : > { %v1753_v3 = vpack.c.bf16 %v1748_v0, %v1747_v57  ;;  %v1334_v8 = vadd.f32 %v14589_v26, %v1333_v4  ;;  %v1494_v9 = vadd.f32 %v14589_v26, %v1493_v5  ;;  %1659 = vmatmul.bf16.vlgmr.msra.gmra.mxu2 %v1583_v1  ;;  %v12371_v63 = vld [vmem:[%s15838_s4 + $0x1c8] sm:$0xff]  ;;  %v12401_v1 = vld [vmem:[%s15838_s4 + $0x78] sm:$0xff]  ;;  %v14725_v4 = vpop.permute.xlu1 %1531  ;;  %v12370_v5 = vld [vmem:[%s15838_s4 + $0x1c0] sm:$0xff] }
 0x25e   : > { %1731 = vmatmul.bf16.vlgmr.msra.gmra.mxu3 %v1558_v2  ;;  %2347 = vmatpush.bf16.msra.mxu1 %v12371_v63 }
 0x25f   : > { %1829 = vmatmul.bf16.vlgmr.msrb.gmra.mxu0 %v1753_v3  ;;  %v1345_v14 = vmax.f32 %v1334_v8, 0.0  ;;  %v1505_v15 = vmax.f32 %v1494_v9, 0.0  ;;  %2600 = vmatpush.bf16.msra.mxu3 %v12401_v1  ;;  %v12407_v1 = vld [vmem:[%s15838_s4 + $0xa8] sm:$0xff] }
 0x261   : > { %v14677_v21 = vmul.f32 %v14570_v20, %v1345_v14  ;;  %v1541_v22 = vmul.f32 %v14662_v12, %v1505_v15 }
 0x262   : > { %v1852_v23 = vld [vmem:[#allocation2 + $0x17] sm:$0xff]  ;;  %2348 = vmatpush.bf16.msra.mxu1 %v12370_v5  ;;  %v12406_v5 = vld [vmem:[%s15838_s4 + $0xa0] sm:$0xff] }
 0x263   : > { %1387 = vst [vmem:[#allocation2 + $0x20] sm:$0xff] %v14677_v21  ;;  %v1857_v29 = vpack.c.bf16 %v1852_v23, %v1748_v0  ;;  %v1579_v49 = vld [vmem:[#allocation2 + $0x16] sm:$0xff]  ;;  %2601 = vmatpush.bf16.msra.mxu3 %v12400_v16 }
 0x264   : > { %1547 = vst [vmem:[#allocation2 + $0x50] sm:$0xff] %v1541_v22  ;;  %v1335_v31 = vpop.f32.mrf.mxu0  ;;  %v1495_v32 = vpop.f32.mrf.mxu1  ;;  %v1554_v50 = vld [vmem:[#allocation2 + $0x15] sm:$0xff] }
 0x265   : > { %v1336_v33 = vadd.f32 %v14589_v26, %v1335_v31  ;;  %v1496_v34 = vadd.f32 %v14589_v26, %v1495_v32  ;;  %1933 = vmatmul.bf16.vlgmr.msrb.gmra.mxu1 %v1857_v29  ;;  %v12385_v0 = vld [vmem:[%s15838_s4 + $0x238] sm:$0xff] }
 0x266   : > { %2445 = vmatpush.bf16.msra.mxu2 %v12385_v0  ;;  %v12389_v0 = vld [vmem:[%s15838_s4 + $0x18] sm:$0xff] }
 0x267   : > { %v1346_v38 = vmax.f32 %v1336_v33, 0.0  ;;  %v1506_v41 = vmax.f32 %v1496_v34, 0.0 }
 0x269   : > { %v14710_v47 = vmul.f32 %v14593_v28, %v1346_v38  ;;  %v1542_v48 = vmul.f32 %v14704_v45, %v1506_v41  ;;  %v12393_v38 = vld [vmem:[%s15838_s4 + $0x38] sm:$0xff]  ;;  %v12382_v41 = vld [vmem:[%s15838_s4 + $0x220] sm:$0xff] }
 0x26a   : > { %v1580_v51 = vld [vmem:[#allocation2 + $0x1e] sm:$0xff]  ;;  %2446 = vmatpush.bf16.msra.mxu2 %v12384_v6  ;;  %2672 = vmatpush.bf16.msrb.mxu0 %v12393_v38  ;;  %v12395_v6 = vld [vmem:[%s15838_s4 + $0x48] sm:$0xff] }
 0x26b   : > { %v1555_v53 = vld [vmem:[#allocation2 + $0x1d] sm:$0xff]  ;;  %1388 = vst [vmem:[#allocation2 + $0x28] sm:$0xff] %v14710_v47  ;;  %v1584_v55 = vpack.c.bf16 %v1580_v51, %v1579_v49  ;;  %v12423_v38 = vld [vmem:[%s15838_s4 + $0x128] sm:$0xff] }
 0x26c   : > { %v1750_v54 = vld [vmem:[#allocation2 + $0x1f] sm:$0xff]  ;;  %v1559_v56 = vpack.c.bf16 %v1555_v53, %v1554_v50  ;;  %1548 = vst [vmem:[#allocation2 + $0x58] sm:$0xff] %v1542_v48  ;;  %v1338_v59 = vpop.f32.mrf.mxu0  ;;  %v1498_v60 = vpop.f32.mrf.mxu1  ;;  %v12391_v50 = vld [vmem:[%s15838_s4 + $0x28] sm:$0xff] }
 0x26d   : > { %v1754_v57 = vpack.c.bf16 %v1750_v54, %v1852_v23  ;;  %v1339_v61 = vadd.f32 %v14589_v26, %v1338_v59  ;;  %v1499_v62 = vadd.f32 %v14589_v26, %v1498_v60  ;;  %1664 = vmatmul.bf16.gmra.mxu2 %v1584_v55  ;;  %v12399_v23 = vld [vmem:[%s15838_s4 + $0x68] sm:$0xff]  ;;  %v12381_v49 = vld [vmem:[%s15838_s4 + $0x218] sm:$0xff]  ;;  %v12380_v55 = vld [vmem:[%s15838_s4 + $0x210] sm:$0xff] }
 0x26e   : > { %1736 = vmatmul.bf16.gmra.mxu3 %v1559_v56  ;;  %2447 = vmatpush.bf16.msra.mxu2 %v12383_v17  ;;  %v12409_v51 = vld [vmem:[%s15838_s4 + $0xb8] sm:$0xff]  ;;  %v12404_v17 = vld [vmem:[%s15838_s4 + $0x90] sm:$0xff] }
 0x26f   : > { %1834 = vmatmul.bf16.gmra.mxu0 %v1754_v57  ;;  %v1347_v2 = vmax.f32 %v1339_v61, 0.0  ;;  %v1507_v3 = vmax.f32 %v1499_v62, 0.0  ;;  %2602 = vmatpush.bf16.msra.mxu3 %v12399_v23  ;;  %v12397_v53 = vld [vmem:[%s15838_s4 + $0x58] sm:$0xff]  ;;  %v12408_v57 = vld [vmem:[%s15838_s4 + $0xb0] sm:$0xff]  ;;  %v1961_v61 = vpack.c.bf16 %v14638_v58, %v14612_v40  ;;  %v12379_v58 = vld [vmem:[%s15838_s4 + $0x208] sm:$0xff] }
 0x270   : > { %2673 = vmatpush.bf16.msrb.mxu0 %v12392_v44  ;;  %v2060_v56 = vld [vmem:[#allocation2 + $0x19] sm:$0xff]  ;;  %2769 = vmatpush.bf16.msrb.mxu1 %v12409_v51  ;;  %v2059_v60 = vld [vmem:[#allocation2 + $0x11] sm:$0xff] }
 0x271   : > { %v14734_v7 = vmul.f32 %v14591_v27, %v1347_v2  ;;  %v1543_v8 = vmul.f32 %v14725_v4, %v1507_v3  ;;  %v2065_v62 = vpack.c.bf16 %v2060_v56, %v2059_v60  ;;  %v12396_v40 = vld [vmem:[%s15838_s4 + $0x50] sm:$0xff]  ;;  %v12414_v51 = vld [vmem:[%s15838_s4 + $0xe0] sm:$0xff]  ;;  %v12421_v60 = vld [vmem:[%s15838_s4 + $0x118] sm:$0xff] }
 0x272   : > { %v1854_v9 = vld [vmem:[#allocation2 + $0x27] sm:$0xff]  ;;  %2448 = vmatpush.bf16.msra.mxu2 %v12382_v41  ;;  %v12388_v2 = vld [vmem:[%s15838_s4 + $0x10] sm:$0xff] }
 0x273   : > { %1389 = vst [vmem:[#allocation2 + $0x30] sm:$0xff] %v14734_v7  ;;  %v1858_v10 = vpack.c.bf16 %v1854_v9, %v1750_v54  ;;  %v1581_v30 = vld [vmem:[#allocation2 + $0x26] sm:$0xff]  ;;  %2603 = vmatpush.bf16.msra.mxu3 %v12398_v42 }
 0x274   : > { %1549 = vst [vmem:[#allocation2 + $0x60] sm:$0xff] %v1543_v8  ;;  %v1340_v11 = vpop.f32.mrf.mxu0  ;;  %v1500_v13 = vpop.f32.mrf.mxu1  ;;  %v1556_v31 = vld [vmem:[#allocation2 + $0x25] sm:$0xff]  ;;  %2674 = vmatpush.bf16.msrb.mxu0 %v12391_v50  ;;  %2770 = vmatpush.bf16.msrb.mxu1 %v12408_v57  ;;  %v2267_v8 = vld [vmem:[#allocation2 + $0x1a] sm:$0xff] }
 0x275   : > { %v1341_v14 = vadd.f32 %v14589_v26, %v1340_v11  ;;  %v1501_v15 = vadd.f32 %v14589_v26, %v1500_v13  ;;  %1938 = vmatmul.bf16.gmra.mxu1 %v1858_v10  ;;  %v12390_v54 = vld [vmem:[%s15838_s4 + $0x20] sm:$0xff]  ;;  %v12387_v10 = vld [vmem:[%s15838_s4 + $0x8] sm:$0xff]  ;;  %v12405_v11 = vld [vmem:[%s15838_s4 + $0x98] sm:$0xff] }
 0x276   : > { %2449 = vmatpush.bf16.msra.mxu2 %v12381_v49  ;;  %v2164_v59 = vld [vmem:[#allocation2 + $0x21] sm:$0xff]  ;;  %v12433_v50 = vld [vmem:[%s15838_s4 + $0x178] sm:$0xff] }
 0x277   : > { %v1348_v19 = vmax.f32 %v1341_v14, 0.0  ;;  %v1508_v22 = vmax.f32 %v1501_v15, 0.0  ;;  %2604 = vmatpush.bf16.msra.mxu3 %v12397_v53  ;;  %v2169_v63 = vpack.c.bf16 %v2164_v59, %v2060_v56  ;;  %v2268_v3 = vld [vmem:[#allocation2 + $0x22] sm:$0xff]  ;;  %v12432_v53 = vld [vmem:[%s15838_s4 + $0x170] sm:$0xff]  ;;  %v12413_v56 = vld [vmem:[%s15838_s4 + $0xd8] sm:$0xff] }
 0x278   : > { %2675 = vmatpush.bf16.msrb.mxu0 %v12390_v54  ;;  %2771 = vmatpush.bf16.msrb.mxu1 %v12407_v1  ;;  %v12378_v13 = vld [vmem:[%s15838_s4 + $0x200] sm:$0xff]  ;;  %v12431_v57 = vld [vmem:[%s15838_s4 + $0x168] sm:$0xff] }
 0x279   : > { %v14752_v26 = vmul.f32 %v14619_v43, %v1348_v19  ;;  %v1544_v29 = vmul.f32 %v14749_v24, %v1508_v22  ;;  %v12394_v14 = vld [vmem:[%s15838_s4 + $0x40] sm:$0xff]  ;;  %v1962_v22 = vpack.c.bf16 %v14710_v47, %v14677_v21 }
 0x27a   : > { %v1582_v32 = vld [vmem:[#allocation2 + $0x2e] sm:$0xff]  ;;  %2450 = vmatpush.bf16.msra.mxu2 %v12380_v55  ;;  %v12386_v15 = vld [vmem:[%s15838_s4] sm:$0xff] }
 0x27b   : > { %v1557_v33 = vld [vmem:[#allocation2 + $0x2d] sm:$0xff]  ;;  %1390 = vst [vmem:[#allocation2 + $0x38] sm:$0xff] %v14752_v26  ;;  %v1585_v35 = vpack.c.bf16 %v1582_v32, %v1581_v30  ;;  %2605 = vmatpush.bf16.msra.mxu3 %v12396_v40  ;;  %v12417_v30 = vld [vmem:[%s15838_s4 + $0xf8] sm:$0xff]  ;;  %v12402_v47 = vld [vmem:[%s15838_s4 + $0x80] sm:$0xff]  ;;  %v1963_v42 = vpack.c.bf16 %v14752_v26, %v14734_v7 }
 0x27c   : > { %v1752_v34 = vld [vmem:[#allocation2 + $0x2f] sm:$0xff]  ;;  %v1560_v36 = vpack.c.bf16 %v1557_v33, %v1556_v31  ;;  %1550 = vst [vmem:[#allocation2 + $0x68] sm:$0xff] %v1544_v29  ;;  %2676 = vmatpush.bf16.msrb.mxu0 %v12389_v0  ;;  %2772 = vmatpush.bf16.msrb.mxu1 %v12406_v5  ;;  %v12425_v32 = vld [vmem:[%s15838_s4 + $0x138] sm:$0xff]  ;;  %v12422_v7 = vld [vmem:[%s15838_s4 + $0x120] sm:$0xff] }
 0x27d   : > { %v1755_v37 = vpack.c.bf16 %v1752_v34, %v1854_v9  ;;  %1669 = vmatmul.bf16.gmra.mxu2 %v1585_v35  ;;  %v2273_v9 = vpack.c.bf16 %v2268_v3, %v2267_v8  ;;  %v2062_v16 = vld [vmem:[#allocation2 + $0x29] sm:$0xff]  ;;  %v2371_v40 = vld [vmem:[#allocation2 + $0x1b] sm:$0xff] }
 0x27e   : > { %1741 = vmatmul.bf16.gmra.mxu3 %v1560_v36  ;;  %2451 = vmatpush.bf16.msra.mxu2 %v12379_v58  ;;  %v2066_v23 = vpack.c.bf16 %v2062_v16, %v2164_v59  ;;  %v12403_v31 = vld [vmem:[%s15838_s4 + $0x88] sm:$0xff]  ;;  %v12416_v33 = vld [vmem:[%s15838_s4 + $0xf0] sm:$0xff]  ;;  %v12441_v59 = vld [vmem:[%s15838_s4 + $0x1b8] sm:$0xff] }
 0x27f   : > { %1839 = vmatmul.bf16.gmra.mxu0 %v1755_v37  ;;  %2606 = vmatpush.bf16.msra.mxu3 %v12395_v6  ;;  %v12424_v36 = vld [vmem:[%s15838_s4 + $0x130] sm:$0xff]  ;;  %v12415_v37 = vld [vmem:[%s15838_s4 + $0xe8] sm:$0xff]  ;;  %v12430_v3 = vld [vmem:[%s15838_s4 + $0x160] sm:$0xff] }
 0x280   : > { %2677 = vmatpush.bf16.msrb.mxu0 %v12388_v2  ;;  %2773 = vmatpush.bf16.msrb.mxu1 %v12405_v11  ;;  %v2272_v54 = vld [vmem:[#allocation2 + $0x42] sm:$0xff]  ;;  %v12440_v5 = vld [vmem:[%s15838_s4 + $0x1b0] sm:$0xff]  ;;  %v12429_v11 = vld [vmem:[%s15838_s4 + $0x158] sm:$0xff] }
 0x281   : > { %v12412_v6 = vld [vmem:[%s15838_s4 + $0xd0] sm:$0xff] }
 0x282   : > { %v14768_v46 = vld [vmem:[#allocation2 + $0x37] sm:$0xff]  ;;  %2452 = vmatpush.bf16.msra.mxu2 %v12378_v13  ;;  %v14906_v13 = vld [vmem:[#allocation2 + $0x3f] sm:$0xff] }
 0x283   : > { %v1859_v48 = vpack.c.bf16 %v14768_v46, %v1752_v34  ;;  %2607 = vmatpush.bf16.msra.mxu3 %v12394_v14  ;;  %v2166_v19 = vld [vmem:[#allocation2 + $0x31] sm:$0xff]  ;;  %v2064_v41 = vld [vmem:[#allocation2 + $0x39] sm:$0xff]  ;;  %v12411_v14 = vld [vmem:[%s15838_s4 + $0xc8] sm:$0xff] }
 0x284   : > { %2678 = vmatpush.bf16.msrb.mxu0 %v12387_v10  ;;  %v2170_v29 = vpack.c.bf16 %v2166_v19, %v2062_v16  ;;  %2774 = vmatpush.bf16.msrb.mxu1 %v12404_v17  ;;  %v2270_v21 = vld [vmem:[#allocation2 + $0x32] sm:$0xff]  ;;  %v2269_v34 = vld [vmem:[#allocation2 + $0x2a] sm:$0xff]  ;;  %v2067_v44 = vpack.c.bf16 %v2064_v41, %v2166_v19  ;;  %v2271_v26 = vld [vmem:[#allocation2 + $0x3a] sm:$0xff] }
 0x285   : > { %1943 = vmatmul.bf16.gmra.mxu1 %v1859_v48  ;;  %v2274_v35 = vpack.c.bf16 %v2270_v21, %v2269_v34  ;;  %v14861_v48 = vld [vmem:[#allocation2 + $0x41] sm:$0xff]  ;;  %v2275_v55 = vpack.c.bf16 %v2272_v54, %v2271_v26  ;;  %v2502_v0 = vld [vmem:[#allocation2 + $0x35] sm:$0xff]  ;;  %v2373_v21 = vld [vmem:[#allocation2 + $0x2b] sm:$0xff] }
 0x286   : > { %v2171_v49 = vpack.c.bf16 %v14861_v48, %v2064_v41  ;;  %v2503_v1 = vld [vmem:[#allocation2 + $0x3d] sm:$0xff]  ;;  %v12439_v10 = vld [vmem:[%s15838_s4 + $0x1a8] sm:$0xff]  ;;  %v12428_v16 = vld [vmem:[%s15838_s4 + $0x150] sm:$0xff] }
 0x287   : > { %v2508_v8 = vpack.c.bf16 %v2503_v1, %v2502_v0  ;;  %v12438_v17 = vld [vmem:[%s15838_s4 + $0x1a0] sm:$0xff]  ;;  %v12419_v19 = vld [vmem:[%s15838_s4 + $0x108] sm:$0xff]  ;;  %v12449_v41 = vld [vmem:[%s15838_s4 + $0x1f8] sm:$0xff] }
 0x288   : > { %2679 = vmatpush.bf16.msrb.mxu0 %v12386_v15  ;;  %2775 = vmatpush.bf16.msrb.mxu1 %v12403_v31  ;;  %v2702_v15 = vpack.c.bf16 %v14906_v13, %v14768_v46  ;;  %v12427_v46 = vld [vmem:[%s15838_s4 + $0x148] sm:$0xff]  ;;  %v12448_v26 = vld [vmem:[%s15838_s4 + $0x1f0] sm:$0xff]  ;;  %v2375_v54 = vld [vmem:[#allocation2 + $0x3b] sm:$0xff] }
 0x289   : > { %v2505_v31 = vld [vmem:[#allocation2 + $0x4d] sm:$0xff]  ;;  %v2506_v0 = vld [vmem:[#allocation2 + $0x55] sm:$0xff] }
 0x28c   : > { %2776 = vmatpush.bf16.msrb.mxu1 %v12402_v47  ;;  %v2529_v47 = vld [vmem:[#allocation2 + $0x46] sm:$0xff] }
 0x28d   : > { %2037 = vmatmul.bf16.vlgmr.msrb.gmra.mxu2 %v1961_v61  ;;  %v2372_v61 = vld [vmem:[#allocation2 + $0x23] sm:$0xff] }
 0x28e   : > { %2141 = vmatmul.bf16.vlgmr.msrb.gmra.mxu3 %v2065_v62  ;;  %2872 = vmatpush.bf16.msrb.mxu2 %v12417_v30  ;;  %v2527_v62 = vld [vmem:[#allocation2 + $0x36] sm:$0xff]  ;;  %v2377_v58 = vpack.c.bf16 %v2372_v61, %v2371_v40  ;;  %v2530_v30 = vld [vmem:[#allocation2 + $0x4e] sm:$0xff] }
 0x28f   : > { %2245 = vmatmul.bf16.vlgmr.msra.gmra.mxu0 %v2169_v63  ;;  %2975 = vmatpush.bf16.msrb.mxu3 %v12425_v32  ;;  %v2528_v63 = vld [vmem:[#allocation2 + $0x3e] sm:$0xff]  ;;  %v2534_v34 = vpack.c.bf16 %v2530_v30, %v2529_v47  ;;  %v12455_v40 = vld [vmem:[%s15838_s4 + $0x228] sm:$0xff]  ;;  %v12444_v47 = vld [vmem:[%s15838_s4 + $0x1d0] sm:$0xff] }
 0x290   : > { %3078 = vmatpush.bf16.msra.mxu0 %v12433_v50  ;;  %v2533_v2 = vpack.c.bf16 %v2528_v63, %v2527_v62  ;;  %v12418_v32 = vld [vmem:[%s15838_s4 + $0x100] sm:$0xff] }
 0x291   : > { %v2698_v50 = vld [vmem:[#allocation2 + $0x47] sm:$0xff] }
 0x292   : > { %2873 = vmatpush.bf16.msrb.mxu2 %v12416_v33  ;;  %v2902_v30 = vld [vmem:[#allocation2 + $0x40] sm:$0xff] }
 0x293   : > { %2976 = vmatpush.bf16.msrb.mxu3 %v12424_v36 }
 0x294   : > { %3079 = vmatpush.bf16.msra.mxu0 %v12432_v53  ;;  %v12456_v53 = vld [vmem:[%s15838_s4 + $0x230] sm:$0xff] }
 0x295   : > { %2349 = vmatmul.bf16.vlgmr.msra.gmra.mxu1 %v2273_v9  ;;  %v12420_v9 = vld [vmem:[%s15838_s4 + $0x110] sm:$0xff] }
 0x296   : > { %2874 = vmatpush.bf16.msrb.mxu2 %v12415_v37  ;;  %3181 = vmatpush.bf16.msra.mxu1 %v12441_v59  ;;  %v12426_v37 = vld [vmem:[%s15838_s4 + $0x140] sm:$0xff] }
 0x297   : > { %2977 = vmatpush.bf16.msrb.mxu3 %v12423_v38  ;;  %v12436_v38 = vld [vmem:[%s15838_s4 + $0x190] sm:$0xff]  ;;  %v2376_v59 = vld [vmem:[#allocation2 + $0x43] sm:$0xff] }
 0x298   : > { %3080 = vmatpush.bf16.msra.mxu0 %v12431_v57  ;;  %v12447_v57 = vld [vmem:[%s15838_s4 + $0x1e8] sm:$0xff]  ;;  %v2379_v62 = vpack.c.bf16 %v2376_v59, %v2375_v54  ;;  %v12450_v59 = vld [vmem:[%s15838_s4 + $0x200] sm:$0xff] }
 0x29a   : > { %2875 = vmatpush.bf16.msrb.mxu2 %v12414_v51  ;;  %3182 = vmatpush.bf16.msra.mxu1 %v12440_v5  ;;  %v14972_v5 = vld [vmem:[#allocation2 + $0x5f] sm:$0xff] }
 0x29b   : > { %2978 = vmatpush.bf16.msrb.mxu3 %v12422_v7  ;;  %v12434_v7 = vld [vmem:[%s15838_s4 + $0x180] sm:$0xff] }
 0x29c   : > { %3081 = vmatpush.bf16.msra.mxu0 %v12430_v3 }
 0x29d   : > { %2042 = vmatmul.bf16.gmra.mxu2 %v1962_v22  ;;  %v12410_v22 = vld [vmem:[%s15838_s4 + $0xc0] sm:$0xff] }
 0x29e   : > { %2146 = vmatmul.bf16.gmra.mxu3 %v2066_v23  ;;  %2876 = vmatpush.bf16.msrb.mxu2 %v12413_v56  ;;  %v12437_v23 = vld [vmem:[%s15838_s4 + $0x198] sm:$0xff] }
 0x29f   : > { %2250 = vmatmul.bf16.gmra.mxu0 %v2170_v29  ;;  %2979 = vmatpush.bf16.msrb.mxu3 %v12421_v60  ;;  %v2374_v29 = vld [vmem:[#allocation2 + $0x33] sm:$0xff]  ;;  %v2507_v56 = vld [vmem:[#allocation2 + $0x5d] sm:$0xff] }
 0x2a0   : > { %3183 = vmatpush.bf16.msra.mxu1 %v12439_v10  ;;  %3082 = vmatpush.bf16.msra.mxu0 %v12429_v11  ;;  %v2378_v33 = vpack.c.bf16 %v2374_v29, %v2373_v21  ;;  %v2531_v60 = vld [vmem:[#allocation2 + $0x56] sm:$0xff]  ;;  %v2510_v1 = vpack.c.bf16 %v2507_v56, %v2506_v0 }
 0x2a1   : > { %v2700_v10 = vld [vmem:[#allocation2 + $0x57] sm:$0xff] }
 0x2a2   : > { %2877 = vmatpush.bf16.msrb.mxu2 %v12412_v6  ;;  %v2704_v11 = vpack.c.bf16 %v14972_v5, %v2700_v10 }
 0x2a3   : > { %2980 = vmatpush.bf16.msrb.mxu3 %v12420_v9 }
 0x2a4   : > { %3083 = vmatpush.bf16.msra.mxu0 %v12428_v16  ;;  %3184 = vmatpush.bf16.msra.mxu1 %v12438_v17  ;;  %v12453_v16 = vld [vmem:[%s15838_s4 + $0x218] sm:$0xff] }
 0x2a5   : > { %2354 = vmatmul.bf16.gmra.mxu1 %v2274_v35  ;;  %v2504_v35 = vld [vmem:[#allocation2 + $0x45] sm:$0xff] }
 0x2a6   : > { %2878 = vmatpush.bf16.msrb.mxu2 %v12411_v14  ;;  %v2509_v36 = vpack.c.bf16 %v2505_v31, %v2504_v35  ;;  %v2805_v31 = vpack.c.bf16 %v2698_v50, %v14906_v13  ;;  %v3109_v13 = vld [vmem:[#allocation2 + $0x51] sm:$0xff] }
 0x2a7   : > { %2981 = vmatpush.bf16.msrb.mxu3 %v12419_v19 }
 0x2a8   : > { %3084 = vmatpush.bf16.msra.mxu0 %v12427_v46  ;;  %3185 = vmatpush.bf16.msra.mxu1 %v12437_v23  ;;  %v3006_v23 = vld [vmem:[#allocation2 + $0x49] sm:$0xff] }
 0x2a9   : > { %v3011_v21 = vpack.c.bf16 %v3006_v23, %v14861_v48 }
 0x2aa   : > { %2879 = vmatpush.bf16.msrb.mxu2 %v12410_v22  ;;  %v2903_v22 = vld [vmem:[#allocation2 + $0x48] sm:$0xff] }
 0x2ab   : > { %2982 = vmatpush.bf16.msrb.mxu3 %v12418_v32  ;;  %v2908_v32 = vpack.c.bf16 %v2903_v22, %v2902_v30 }
 0x2ac   : > { %3085 = vmatpush.bf16.msra.mxu0 %v12426_v37  ;;  %3186 = vmatpush.bf16.msra.mxu1 %v12436_v38  ;;  %v3114_v38 = vpack.c.bf16 %v3109_v13, %v3006_v23 }
 0x2ad   : > { %2047 = vmatmul.bf16.gmra.mxu2 %v1963_v42  ;;  %v12457_v42 = vld [vmem:[%s15838_s4 + $0x238] sm:$0xff] }
 0x2ae   : > { %2151 = vmatmul.bf16.gmra.mxu3 %v2067_v44  ;;  %v12435_v44 = vld [vmem:[%s15838_s4 + $0x188] sm:$0xff] }
 0x2af   : > { %2255 = vmatmul.bf16.gmra.mxu0 %v2171_v49  ;;  %v14949_v49 = vld [vmem:[#allocation2 + $0x4f] sm:$0xff] }
 0x2b0   : > { %v2703_v51 = vpack.c.bf16 %v14949_v49, %v2698_v50  ;;  %3187 = vmatpush.bf16.msra.mxu1 %v12435_v44  ;;  %v12442_v44 = vld [vmem:[%s15838_s4 + $0x1c0] sm:$0xff]  ;;  %v2806_v56 = vpack.c.bf16 %v2700_v10, %v14949_v49 }
 0x2b1   : > { %v2804_v10 = vld [vmem:[#allocation2 + $0x67] sm:$0xff] }
 0x2b4   : > { %3188 = vmatpush.bf16.msra.mxu1 %v12434_v7  ;;  %v2904_v7 = vld [vmem:[#allocation2 + $0x50] sm:$0xff] }
 0x2b5   : > { %2359 = vmatmul.bf16.gmra.mxu1 %v2275_v55  ;;  %v2532_v55 = vld [vmem:[#allocation2 + $0x5e] sm:$0xff] }
 0x2b6   : > { %v2535_v63 = vpack.c.bf16 %v2532_v55, %v2531_v60  ;;  %v3008_v55 = vld [vmem:[#allocation2 + $0x59] sm:$0xff] }
 0x2b7   : > { %v3012_v60 = vpack.c.bf16 %v3008_v55, %v3109_v13 }
 0x2bd   : > { %2453 = vmatmul.bf16.vlgmr.msra.gmra.mxu2 %v2377_v58  ;;  %v12446_v58 = vld [vmem:[%s15838_s4 + $0x1e0] sm:$0xff] }
 0x2be   : > { %2608 = vmatmul.bf16.vlgmr.msra.gmra.mxu3 %v2533_v2  ;;  %3284 = vmatpush.bf16.msra.mxu2 %v12449_v41  ;;  %v12443_v41 = vld [vmem:[%s15838_s4 + $0x1c8] sm:$0xff] }
 0x2bf   : > { %2680 = vmatmul.bf16.vlgmr.msrb.gmra.mxu0 %v2508_v8  ;;  %3387 = vmatpush.bf16.msra.mxu3 %v12457_v42  ;;  %v12454_v8 = vld [vmem:[%s15838_s4 + $0x220] sm:$0xff]  ;;  %v12451_v42 = vld [vmem:[%s15838_s4 + $0x208] sm:$0xff] }
 0x2c2   : > { %3285 = vmatpush.bf16.msra.mxu2 %v12448_v26  ;;  %v2905_v26 = vld [vmem:[#allocation2 + $0x58] sm:$0xff] }
 0x2c3   : > { %3388 = vmatpush.bf16.msra.mxu3 %v12456_v53 }
 0x2c5   : > { %2777 = vmatmul.bf16.vlgmr.msrb.gmra.mxu1 %v2702_v15  ;;  %v12445_v15 = vld [vmem:[%s15838_s4 + $0x1d8] sm:$0xff] }
 0x2c6   : > { %3286 = vmatpush.bf16.msra.mxu2 %v12447_v57  ;;  %v2909_v57 = vpack.c.bf16 %v2905_v26, %v2904_v7 }
 0x2c7   : > { %3389 = vmatpush.bf16.msra.mxu3 %v12455_v40 }
 0x2ca   : > { %3287 = vmatpush.bf16.msra.mxu2 %v12446_v58 }
 0x2cb   : > { %3390 = vmatpush.bf16.msra.mxu3 %v12454_v8 }
 0x2cd   : > { %2458 = vmatmul.bf16.gmra.mxu2 %v2378_v33  ;;  %v12452_v33 = vld [vmem:[%s15838_s4 + $0x210] sm:$0xff] }
 0x2ce   : > { %2613 = vmatmul.bf16.gmra.mxu3 %v2534_v34  ;;  %3288 = vmatpush.bf16.msra.mxu2 %v12445_v15 }
 0x2cf   : > { %2685 = vmatmul.bf16.gmra.mxu0 %v2509_v36  ;;  %3391 = vmatpush.bf16.msra.mxu3 %v12453_v16  ;;  %v3010_v16 = vld [vmem:[#allocation2 + $0x69] sm:$0xff] }
 0x2d2   : > { %3289 = vmatpush.bf16.msra.mxu2 %v12444_v47 }
 0x2d3   : > { %3392 = vmatpush.bf16.msra.mxu3 %v12452_v33 }
 0x2d5   : > { %2782 = vmatmul.bf16.gmra.mxu1 %v2703_v51 }
 0x2d6   : > { %3290 = vmatpush.bf16.msra.mxu2 %v12443_v41  ;;  %v3315_v41 = vld [vmem:[#allocation2 + $0x53] sm:$0xff] }
 0x2d7   : > { %3393 = vmatpush.bf16.msra.mxu3 %v12451_v42  ;;  %v3314_v42 = vld [vmem:[#allocation2 + $0x4b] sm:$0xff] }
 0x2da   : > { %3291 = vmatpush.bf16.msra.mxu2 %v12442_v44 }
 0x2db   : > { %3394 = vmatpush.bf16.msra.mxu3 %v12450_v59 }
 0x2dc   : > { %v14964_v61 = vpop.f32.mrf.mxu0 }
 0x2dd   : > { %2463 = vmatmul.bf16.gmra.mxu2 %v2379_v62 }
 0x2de   : > { %2618 = vmatmul.bf16.gmra.mxu3 %v2535_v63 }
 0x2df   : > { %2690 = vmatmul.bf16.gmra.mxu0 %v2510_v1  ;;  %v3111_v1 = vld [vmem:[#allocation2 + $0x61] sm:$0xff] }
 0x2e0   : > { %v1660_v2 = vpop.f32.mrf.mxu2  ;;  %v3115_v49 = vpack.c.bf16 %v3111_v1, %v3008_v55  ;;  %v3013_v23 = vpack.c.bf16 %v3010_v16, %v3111_v1  ;;  %v3316_v1 = vld [vmem:[#allocation2 + $0x5b] sm:$0xff] }
 0x2e1   : > { %v1732_v3 = vpop.f32.mrf.mxu3 }
 0x2e2   : > { %v14974_v6 = vadd.f32 %v1732_v3, %v1660_v2  ;;  %v14979_v9 = vpop.f32.mrf.mxu1 }
 0x2e4   : > { %v14982_v14 = vpop.f32.mrf.mxu0 }
 0x2e5   : > { %2787 = vmatmul.bf16.gmra.mxu1 %v2704_v11  ;;  %v2907_v11 = vld [vmem:[#allocation2 + $0x68] sm:$0xff] }
 0x2e8   : > { %v1662_v17 = vpop.f32.mrf.mxu2 }
 0x2e9   : > { %v1734_v19 = vpop.f32.mrf.mxu3 }
 0x2ea   : > { %v14990_v46 = vadd.f32 %v1734_v19, %v1662_v17  ;;  %v14992_v29 = vpop.f32.mrf.mxu1  ;;  %v2906_v17 = vld [vmem:[#allocation2 + $0x60] sm:$0xff]  ;;  %v2807_v19 = vpack.c.bf16 %v2804_v10, %v14972_v5  ;;  %v3211_v5 = vld [vmem:[#allocation2 + $0x4a] sm:$0xff]  ;;  %v1845_v10 = vadd.f32 %v14964_v61, %v14974_v6 }
 0x2eb   : > { %v2910_v22 = vpack.c.bf16 %v2907_v11, %v2906_v17  ;;  %v3215_v61 = vld [vmem:[#allocation2 + $0x6a] sm:$0xff] }
 0x2ec   : > { %v15002_v34 = vpop.f32.mrf.mxu0  ;;  %v3318_v6 = vld [vmem:[#allocation2 + $0x6b] sm:$0xff] }
 0x2ed   : > { %2880 = vmatmul.bf16.vlgmr.msrb.gmra.mxu2 %v2805_v31 }
 0x2ee   : > { %2983 = vmatmul.bf16.vlgmr.msrb.gmra.mxu3 %v2908_v32 }
 0x2ef   : > { %3086 = vmatmul.bf16.vlgmr.msra.gmra.mxu0 %v3011_v21  ;;  %v3113_v21 = vld [vmem:[#allocation2 + $0x71] sm:$0xff] }
 0x2f0   : > { %v1665_v35 = vpop.f32.mrf.mxu2  ;;  %v3116_v33 = vpack.c.bf16 %v3113_v21, %v3010_v16 }
 0x2f1   : > { %v1737_v36 = vpop.f32.mrf.mxu3 }
 0x2f2   : > { %v15004_v37 = vadd.f32 %v1737_v36, %v1665_v35  ;;  %v15006_v48 = vpop.f32.mrf.mxu1 }
 0x2f4   : > { %v15017_v53 = vpop.f32.mrf.mxu0 }
 0x2f5   : > { %3189 = vmatmul.bf16.vlgmr.msra.gmra.mxu1 %v3114_v38  ;;  %v3212_v38 = vld [vmem:[#allocation2 + $0x52] sm:$0xff] }
 0x2f8   : > { %v1667_v50 = vpop.f32.mrf.mxu2 }
 0x2f9   : > { %v1739_v51 = vpop.f32.mrf.mxu3 }
 0x2fa   : > { %v15019_v54 = vadd.f32 %v1739_v51, %v1667_v50  ;;  %v15025_v62 = vpop.f32.mrf.mxu1  ;;  %v3217_v50 = vpack.c.bf16 %v3212_v38, %v3211_v5  ;;  %v3320_v51 = vpack.c.bf16 %v3315_v41, %v3314_v42  ;;  %v3216_v38 = vld [vmem:[#allocation2 + $0x72] sm:$0xff] }
 0x2fb   : > { %v3319_v42 = vld [vmem:[#allocation2 + $0x73] sm:$0xff] }
 0x2fc   : > { %v15029_v58 = vpop.f32.mrf.mxu0 }
 0x2fd   : > { %2885 = vmatmul.bf16.gmra.mxu2 %v2806_v56 }
 0x2fe   : > { %2988 = vmatmul.bf16.gmra.mxu3 %v2909_v57 }
 0x2ff   : > { %3091 = vmatmul.bf16.gmra.mxu0 %v3012_v60  ;;  %v3214_v60 = vld [vmem:[#allocation2 + $0x62] sm:$0xff] }
 0x300   : > { %v1670_v63 = vpop.f32.mrf.mxu2 }
 0x301   : > { %v1742_v0 = vpop.f32.mrf.mxu3 }
 0x302   : > { %v15027_v40 = vadd.f32 %v1742_v0, %v1670_v63  ;;  %v15031_v2 = vpop.f32.mrf.mxu1  ;;  %v3317_v63 = vld [vmem:[#allocation2 + $0x63] sm:$0xff]  ;;  %v3213_v0 = vld [vmem:[#allocation2 + $0x5a] sm:$0xff] }
 0x304   : > { %v15036_v30 = vpop.f32.mrf.mxu0 }
 0x305   : > { %3194 = vmatmul.bf16.gmra.mxu1 %v3115_v49 }
 0x308   : > { %v1672_v3 = vpop.f32.mrf.mxu2 }
 0x309   : > { %v1744_v8 = vpop.f32.mrf.mxu3 }
 0x30a   : > { %v15033_v15 = vadd.f32 %v1744_v8, %v1672_v3  ;;  %v15038_v47 = vpop.f32.mrf.mxu1  ;;  %v3218_v3 = vpack.c.bf16 %v3214_v60, %v3213_v0  ;;  %v3321_v8 = vpack.c.bf16 %v3317_v63, %v3316_v1  ;;  %v15059_v1 = vld [vmem:[%s15839_s5] ss:$0 sm:$0xff] }
 0x30c   : > { %v2246_v35 = vpop.f32.mrf.mxu0 }
 0x30d   : > { %2890 = vmatmul.bf16.gmra.mxu2 %v2807_v19  ;;  %v1949_v19 = vadd.f32 %v14979_v9, %v1845_v10  ;;  %v3219_v9 = vpack.c.bf16 %v3216_v38, %v3215_v61 }
 0x30e   : > { %2993 = vmatmul.bf16.gmra.mxu3 %v2910_v22 }
 0x30f   : > { %3096 = vmatmul.bf16.gmra.mxu0 %v3013_v23  ;;  %v1846_v23 = vadd.f32 %v14982_v14, %v14990_v46  ;;  %v1847_v14 = vadd.f32 %v15002_v34, %v15004_v37  ;;  %v1848_v37 = vadd.f32 %v15017_v53, %v15019_v54  ;;  %v1849_v53 = vadd.f32 %v15029_v58, %v15027_v40 }
 0x310   : > { %v2038_v31 = vpop.f32.mrf.mxu2  ;;  %v1850_v40 = vadd.f32 %v15036_v30, %v15033_v15 }
 0x311   : > { %v2142_v32 = vpop.f32.mrf.mxu3  ;;  %v2053_v22 = vadd.f32 %v2038_v31, %v1949_v19  ;;  %v3322_v31 = vpack.c.bf16 %v3319_v42, %v3318_v6  ;;  %v1952_v61 = vadd.f32 %v15025_v62, %v1848_v37 }
 0x312   : > { %v2350_v44 = vpop.f32.mrf.mxu1 }
 0x314   : > { %v2248_v55 = vpop.f32.mrf.mxu0 }
 0x315   : > { %3199 = vmatmul.bf16.gmra.mxu1 %v3116_v33  ;;  %v2157_v33 = vadd.f32 %v2142_v32, %v2053_v22 }
 0x317   : > { %v2261_v60 = vadd.f32 %v2246_v35, %v2157_v33  ;;  %v1951_v35 = vadd.f32 %v15006_v48, %v1847_v14 }
 0x318   : > { %v2040_v36 = vpop.f32.mrf.mxu2 }
 0x319   : > { %v2144_v13 = vpop.f32.mrf.mxu3  ;;  %v2365_v46 = vadd.f32 %v2350_v44, %v2261_v60 }
 0x31a   : > { %v2352_v56 = vpop.f32.mrf.mxu1 }
 0x31c   : > { %v2251_v49 = vpop.f32.mrf.mxu0 }
 0x31d   : > { %3292 = vmatmul.bf16.vlgmr.msra.gmra.mxu2 %v3217_v50  ;;  %v1950_v50 = vadd.f32 %v14992_v29, %v1846_v23 }
 0x31e   : > { %3395 = vmatmul.bf16.vlgmr.msra.gmra.mxu3 %v3320_v51 }
 0x31f   : > { %v2054_v63 = vadd.f32 %v2040_v36, %v1950_v50 }
 0x320   : > { %v2043_v7 = vpop.f32.mrf.mxu2 }
 0x321   : > { %v2147_v26 = vpop.f32.mrf.mxu3  ;;  %v2158_v32 = vadd.f32 %v2144_v13, %v2054_v63  ;;  %v2055_v10 = vadd.f32 %v2043_v7, %v1951_v35 }
 0x322   : > { %v2355_v11 = vpop.f32.mrf.mxu1 }
 0x323   : > { %v2159_v22 = vadd.f32 %v2147_v26, %v2055_v10 }
 0x324   : > { %v2253_v21 = vpop.f32.mrf.mxu0 }
 0x325   : > { %v2263_v7 = vadd.f32 %v2251_v49, %v2159_v22 }
 0x328   : > { %v2045_v57 = vpop.f32.mrf.mxu2 }
 0x329   : > { %v15040_v59 = vpop.f32.mrf.mxu3  ;;  %v2056_v6 = vadd.f32 %v2045_v57, %v1952_v61 }
 0x32a   : > { %v2357_v51 = vpop.f32.mrf.mxu1 }
 0x32b   : > { %v2160_v50 = vadd.f32 %v15040_v59, %v2056_v6 }
 0x32c   : > { %v2256_v0 = vpop.f32.mrf.mxu0 }
 0x32d   : > { %3297 = vmatmul.bf16.gmra.mxu2 %v3218_v3  ;;  %v2264_v49 = vadd.f32 %v2253_v21, %v2160_v50  ;;  %v1954_v21 = vadd.f32 %v15038_v47, %v1850_v40 }
 0x32e   : > { %3400 = vmatmul.bf16.gmra.mxu3 %v3321_v8  ;;  %v2262_v8 = vadd.f32 %v2248_v55, %v2158_v32 }
 0x32f   : > { %v2368_v59 = vadd.f32 %v2357_v51, %v2264_v49 }
 0x330   : > { %v2048_v16 = vpop.f32.mrf.mxu2  ;;  %v2366_v44 = vadd.f32 %v2352_v56, %v2262_v8  ;;  %v2367_v56 = vadd.f32 %v2355_v11, %v2263_v7 }
 0x331   : > { %v15044_v17 = vpop.f32.mrf.mxu3 }
 0x332   : > { %v2360_v19 = vpop.f32.mrf.mxu1 }
 0x334   : > { %v2258_v48 = vpop.f32.mrf.mxu0 }
 0x338   : > { %v15049_v41 = vpop.f32.mrf.mxu2 }
 0x339   : > { %v15051_v5 = vpop.f32.mrf.mxu3  ;;  %v2058_v8 = vadd.f32 %v15049_v41, %v1954_v21 }
 0x33a   : > { %v2362_v54 = vpop.f32.mrf.mxu1 }
 0x33c   : > { %v2681_v14 = vpop.f32.mrf.mxu0 }
 0x33d   : > { %3302 = vmatmul.bf16.gmra.mxu2 %v3219_v9  ;;  %v1953_v9 = vadd.f32 %v15031_v2, %v1849_v53 }
 0x33e   : > { %3405 = vmatmul.bf16.gmra.mxu3 %v3322_v31 }
 0x33f   : > { %v2057_v31 = vadd.f32 %v2048_v16, %v1953_v9 }
 0x340   : > { %v2454_v3 = vpop.f32.mrf.mxu2 }
 0x341   : > { %v15061_v29 = vpop.f32.mrf.mxu3  ;;  %v2469_v36 = vadd.f32 %v2454_v3, %v2365_v46  ;;  %v2161_v11 = vadd.f32 %v15044_v17, %v2057_v31  ;;  %v2162_v17 = vadd.f32 %v15051_v5, %v2058_v8 }
 0x342   : > { %v2778_v32 = vpop.f32.mrf.mxu1 }
 0x343   : > { %v2478_v34 = vadd.f32 %v15059_v1, %v2469_v36  ;;  %v2265_v36 = vadd.f32 %v2256_v0, %v2161_v11  ;;  %v2266_v22 = vadd.f32 %v2258_v48, %v2162_v17 }
 0x344   : > { %v2683_v15 = vpop.f32.mrf.mxu0 }
 0x345   : > { %v2484_v13 = vmax.f32 %v2478_v34, 0.0  ;;  %v2369_v51 = vadd.f32 %v2360_v19, %v2265_v36  ;;  %v2370_v41 = vadd.f32 %v2362_v54, %v2266_v22 }
 0x347   : > { %v2490_v23 = vmul.f32 %v2484_v13, %v14565_v18 }
 0x348   : > { %v2456_v33 = vpop.f32.mrf.mxu2 }
 0x349   : > { %v15068_v38 = vpop.f32.mrf.mxu3  ;;  %2496 = vst [vmem:[#allocation3 + $0x10] sm:$0xff] %v2490_v23  ;;  %v2470_v55 = vadd.f32 %v2456_v33, %v2366_v44 }
 0x34a   : > { %v2780_v44 = vpop.f32.mrf.mxu1  ;;  %v2684_v8 = vadd.f32 %v2683_v15, %v15068_v38 }
 0x34b   : > { %v2479_v42 = vadd.f32 %v15059_v1, %v2470_v55 }
 0x34c   : > { %v2686_v33 = vpop.f32.mrf.mxu0  ;;  %v2794_v17 = vadd.f32 %v2780_v44, %v2684_v8 }
 0x34d   : > { %v2485_v26 = vmax.f32 %v2479_v42, 0.0 }
 0x34f   : > { %v2491_v60 = vmul.f32 %v2485_v26, %v14584_v25 }
 0x350   : > { %v2459_v63 = vpop.f32.mrf.mxu2 }
 0x351   : > { %v15076_v62 = vpop.f32.mrf.mxu3  ;;  %2497 = vst [vmem:[#allocation3 + $0x18] sm:$0xff] %v2491_v60  ;;  %v2471_v57 = vadd.f32 %v2459_v63, %v2367_v56 }
 0x352   : > { %v2783_v7 = vpop.f32.mrf.mxu1  ;;  %v2687_v22 = vadd.f32 %v2686_v33, %v15076_v62 }
 0x353   : > { %v2480_v46 = vadd.f32 %v15059_v1, %v2471_v57 }
 0x354   : > { %v2688_v56 = vpop.f32.mrf.mxu0 }
 0x355   : > { %v2486_v58 = vmax.f32 %v2480_v46, 0.0 }
 0x357   : > { %v2492_v3 = vmul.f32 %v2486_v58, %v14570_v20 }
 0x358   : > { %v2461_v35 = vpop.f32.mrf.mxu2 }
 0x359   : > { %v15085_v2 = vpop.f32.mrf.mxu3  ;;  %2498 = vst [vmem:[#allocation3 + $0x20] sm:$0xff] %v2492_v3  ;;  %v2472_v16 = vadd.f32 %v2461_v35, %v2368_v59  ;;  %v2682_v59 = vadd.f32 %v2681_v14, %v15061_v29 }
 0x35a   : > { %v2785_v50 = vpop.f32.mrf.mxu1 }
 0x35b   : > { %v2481_v10 = vadd.f32 %v15059_v1, %v2472_v16  ;;  %v2793_v21 = vadd.f32 %v2778_v32, %v2682_v59  ;;  %v2795_v32 = vadd.f32 %v2783_v7, %v2687_v22 }
 0x35c   : > { %v2691_v63 = vpop.f32.mrf.mxu0 }
 0x35d   : > { %v2487_v30 = vmax.f32 %v2481_v10, 0.0 }
 0x35f   : > { %v2493_v34 = vmul.f32 %v2487_v30, %v14593_v28 }
 0x360   : > { %v2464_v37 = vpop.f32.mrf.mxu2 }
 0x361   : > { %v15092_v13 = vpop.f32.mrf.mxu3  ;;  %2499 = vst [vmem:[#allocation3 + $0x28] sm:$0xff] %v2493_v34  ;;  %v2473_v47 = vadd.f32 %v2464_v37, %v2369_v51 }
 0x362   : > { %v2788_v9 = vpop.f32.mrf.mxu1 }
 0x363   : > { %v2482_v0 = vadd.f32 %v15059_v1, %v2473_v47 }
 0x364   : > { %v2693_v31 = vpop.f32.mrf.mxu0 }
 0x365   : > { %v2488_v23 = vmax.f32 %v2482_v0, 0.0 }
 0x367   : > { %v2494_v61 = vmul.f32 %v2488_v23, %v14591_v27 }
 0x368   : > { %v2466_v55 = vpop.f32.mrf.mxu2 }
 0x369   : > { %v15096_v19 = vpop.f32.mrf.mxu3  ;;  %2500 = vst [vmem:[#allocation3 + $0x30] sm:$0xff] %v2494_v61  ;;  %v2474_v5 = vadd.f32 %v2466_v55, %v2370_v41 }
 0x36a   : > { %v15100_v58 = vpop.f32.mrf.mxu1 }
 0x36b   : > { %v2483_v6 = vadd.f32 %v15059_v1, %v2474_v5 }
 0x36c   : > { %v3087_v11 = vpop.f32.mrf.mxu0 }
 0x36d   : > { %v2489_v42 = vmax.f32 %v2483_v6, 0.0  ;;  %v2689_v6 = vadd.f32 %v2688_v56, %v15085_v2 }
 0x36f   : > { %v2495_v53 = vmul.f32 %v2489_v42, %v14619_v43 }
 0x370   : > { %v2881_v26 = vpop.f32.mrf.mxu2 }
 0x371   : > { %v2984_v48 = vpop.f32.mrf.mxu3  ;;  %2501 = vst [vmem:[#allocation3 + $0x38] sm:$0xff] %v2495_v53  ;;  %v2896_v16 = vadd.f32 %v2881_v26, %v2793_v21 }
 0x372   : > { %v3190_v36 = vpop.f32.mrf.mxu1 }
 0x373   : > { %v2999_v10 = vadd.f32 %v2984_v48, %v2896_v16 }
 0x374   : > { %v3089_v34 = vpop.f32.mrf.mxu0 }
 0x375   : > { %v3102_v37 = vadd.f32 %v3087_v11, %v2999_v10 }
 0x377   : > { %v3205_v29 = vadd.f32 %v3190_v36, %v3102_v37 }
 0x378   : > { %v2883_v54 = vpop.f32.mrf.mxu2 }
 0x379   : > { %v2986_v60 = vpop.f32.mrf.mxu3  ;;  %v2897_v47 = vadd.f32 %v2883_v54, %v2794_v17  ;;  %v2796_v54 = vadd.f32 %v2785_v50, %v2689_v6 }
 0x37a   : > { %v3192_v0 = vpop.f32.mrf.mxu1 }
 0x37b   : > { %v3000_v14 = vadd.f32 %v2986_v60, %v2897_v47 }
 0x37c   : > { %v3092_v55 = vpop.f32.mrf.mxu0 }
 0x37d   : > { %v3103_v5 = vadd.f32 %v3089_v34, %v3000_v14 }
 0x37f   : > { %v3206_v42 = vadd.f32 %v3192_v0, %v3103_v5  ;;  %v2694_v0 = vadd.f32 %v2693_v31, %v15096_v19 }
 0x380   : > { %v2886_v57 = vpop.f32.mrf.mxu2 }
 0x381   : > { %v2989_v49 = vpop.f32.mrf.mxu3  ;;  %v2898_v38 = vadd.f32 %v2886_v57, %v2795_v32  ;;  %v2692_v57 = vadd.f32 %v2691_v63, %v15092_v13 }
 0x382   : > { %v3195_v26 = vpop.f32.mrf.mxu1 }
 0x383   : > { %v3001_v53 = vadd.f32 %v2989_v49, %v2898_v38  ;;  %v2797_v17 = vadd.f32 %v2788_v9, %v2692_v57  ;;  %v2798_v9 = vadd.f32 %v15100_v58, %v2694_v0 }
 0x384   : > { %v3094_v16 = vpop.f32.mrf.mxu0 }
 0x385   : > { %v3104_v7 = vadd.f32 %v3092_v55, %v3001_v53 }
 0x387   : > { %v3207_v56 = vadd.f32 %v3195_v26, %v3104_v7 }
 0x388   : > { %v2888_v46 = vpop.f32.mrf.mxu2 }
 0x389   : > { %v2991_v40 = vpop.f32.mrf.mxu3  ;;  %v2899_v11 = vadd.f32 %v2888_v46, %v2796_v54 }
 0x38a   : > { %v3197_v37 = vpop.f32.mrf.mxu1 }
 0x38b   : > { %v3002_v36 = vadd.f32 %v2991_v40, %v2899_v11 }
 0x38c   : > { %v3097_v63 = vpop.f32.mrf.mxu0 }
 0x38d   : > { %v3105_v47 = vadd.f32 %v3094_v16, %v3002_v36 }
 0x390   : > { %v2891_v3 = vpop.f32.mrf.mxu2 }
 0x391   : > { %v2994_v35 = vpop.f32.mrf.mxu3  ;;  %v2900_v22 = vadd.f32 %v2891_v3, %v2797_v17 }
 0x392   : > { %v3200_v38 = vpop.f32.mrf.mxu1 }
 0x393   : > { %v3003_v14 = vadd.f32 %v2994_v35, %v2900_v22 }
 0x394   : > { %v3099_v58 = vpop.f32.mrf.mxu0 }
 0x395   : > { %v3106_v55 = vadd.f32 %v3097_v63, %v3003_v14 }
 0x397   : > { %v3209_v31 = vadd.f32 %v3200_v38, %v3106_v55 }
 0x398   : > { %v2893_v30 = vpop.f32.mrf.mxu2 }
 0x399   : > { %v15104_v51 = vpop.f32.mrf.mxu3  ;;  %v2901_v5 = vadd.f32 %v2893_v30, %v2798_v9 }
 0x3a0   : > { %v3293_v23 = vpop.f32.mrf.mxu2 }
 0x3a1   : > { %v3396_v41 = vpop.f32.mrf.mxu3  ;;  %v3308_v61 = vadd.f32 %v3293_v23, %v3205_v29  ;;  %v3208_v29 = vadd.f32 %v3197_v37, %v3105_v47 }
 0x3a3   : > { %v3411_v15 = vadd.f32 %v3396_v41, %v3308_v61 }
 0x3a5   : > { %v3417_v44 = vadd.f32 %v15059_v1, %v3411_v15  ;;  %v3004_v15 = vadd.f32 %v15104_v51, %v2901_v5 }
 0x3a7   : > { %v3423_v48 = vmax.f32 %v3417_v44, 0.0  ;;  %v3107_v26 = vadd.f32 %v3099_v58, %v3004_v15 }
 0x3a8   : > { %v3295_v62 = vpop.f32.mrf.mxu2 }
 0x3a9   : > { %v3398_v33 = vpop.f32.mrf.mxu3  ;;  %v3429_v60 = vmul.f32 %v3423_v48, %v14609_v39  ;;  %v3309_v59 = vadd.f32 %v3295_v62, %v3206_v42  ;;  %v3202_v62 = vpop.f32.mrf.mxu1 }
 0x3ab   : > { %3435 = vst [vmem:[#allocation3 + $0x40] sm:$0xff] %v3429_v60  ;;  %v3412_v21 = vadd.f32 %v3398_v33, %v3309_v59  ;;  %v3210_v33 = vadd.f32 %v3202_v62, %v3107_v26 }
 0x3ad   : > { %v3418_v2 = vadd.f32 %v15059_v1, %v3412_v21 }
 0x3af   : > { %v3424_v49 = vmax.f32 %v3418_v2, 0.0 }
 0x3b0   : > { %v3298_v8 = vpop.f32.mrf.mxu2 }
 0x3b1   : > { %v3401_v10 = vpop.f32.mrf.mxu3  ;;  %v3430_v50 = vmul.f32 %v3424_v49, %v14635_v52  ;;  %v3310_v34 = vadd.f32 %v3298_v8, %v3207_v56 }
 0x3b3   : > { %3436 = vst [vmem:[#allocation3 + $0x48] sm:$0xff] %v3430_v50  ;;  %v3413_v46 = vadd.f32 %v3401_v10, %v3310_v34 }
 0x3b5   : > { %v3419_v13 = vadd.f32 %v15059_v1, %v3413_v46 }
 0x3b7   : > { %v3425_v40 = vmax.f32 %v3419_v13, 0.0 }
 0x3b8   : > { %v3300_v23 = vpop.f32.mrf.mxu2 }
 0x3b9   : > { %v3403_v41 = vpop.f32.mrf.mxu3  ;;  %v3431_v32 = vmul.f32 %v3425_v40, %v14662_v12  ;;  %v3311_v61 = vadd.f32 %v3300_v23, %v3208_v29 }
 0x3bb   : > { %3437 = vst [vmem:[#allocation3 + $0x50] sm:$0xff] %v3431_v32  ;;  %v3414_v3 = vadd.f32 %v3403_v41, %v3311_v61 }
 0x3bd   : > { %v3420_v19 = vadd.f32 %v15059_v1, %v3414_v3 }
 0x3bf   : > { %v3426_v6 = vmax.f32 %v3420_v19, 0.0 }
 0x3c0   : > { %v3303_v35 = vpop.f32.mrf.mxu2 }
 0x3c1   : > { %v3406_v44 = vpop.f32.mrf.mxu3  ;;  %v3432_v42 = vmul.f32 %v3426_v6, %v14704_v45  ;;  %v3312_v53 = vadd.f32 %v3303_v35, %v3209_v31 }
 0x3c3   : > { %3438 = vst [vmem:[#allocation3 + $0x58] sm:$0xff] %v3432_v42  ;;  %v3415_v48 = vadd.f32 %v3406_v44, %v3312_v53 }
 0x3c5   : > { %v3421_v30 = vadd.f32 %v15059_v1, %v3415_v48 }
 0x3c7   : > { %v3427_v54 = vmax.f32 %v3421_v30, 0.0 }
 0x3c8   : > { %v3305_v60 = vpop.f32.mrf.mxu2 }
 0x3c9   : > { %v3433_v59 = vmul.f32 %v3427_v54, %v14725_v4  ;;  %v3313_v51 = vadd.f32 %v3305_v60, %v3210_v33  ;;  %v3408_v7 = vpop.f32.mrf.mxu3 }
 0x3cb   : > { %3439 = vst [vmem:[#allocation3 + $0x60] sm:$0xff] %v3433_v59  ;;  %v3416_v11 = vadd.f32 %v3408_v7, %v3313_v51 }
 0x3cd   : > { %v3422_v21 = vadd.f32 %v15059_v1, %v3416_v11 }
 0x3cf   : > { %v3428_v57 = vmax.f32 %v3422_v21, 0.0 }
 0x3d1   : > { %v3434_v16 = vmul.f32 %v3428_v57, %v14749_v24 }
 0x3d3   : > { %3440 = vst [vmem:[#allocation3 + $0x68] sm:$0xff] %v3434_v16 }
 0x3d4   : > { %13082 = dma.done.wait (%p13038_p6), [#allocation8], 18432 }
 0x3d5   : > { %13084 = vsyncadd (%p13038_p6), [#allocation8], 4294948864  ;;  %v10041_v2 = vld [vmem:[#allocation6 + $0xf0] sm:$0xf]  ;;  %v12489_v56 = vld [vmem:[#allocation6 + $0xf4] sm:$0xf0] }
 0x3d6   : > { %v12488_v36 = vld [vmem:[#allocation6 + $0xf4] sm:$0xf]  ;;  %v10042_v49 = vor.u32 %v12489_v56, %v10041_v2  ;;  %v10043_v8 = vld [vmem:[#allocation6 + $0xf8] sm:$0xf0]  ;;  %v10105_v10 = vld [vmem:[#allocation6 + $0x70] sm:$0xf] }
 0x3d7   : > { %v12473_v17 = vld [vmem:[#allocation6 + $0x74] sm:$0xf0]  ;;  %v10046_v50 = vor.u32 %v12488_v36, %v10043_v8  ;;  %v12472_v37 = vld [vmem:[#allocation6 + $0x74] sm:$0xf]  ;;  %v10107_v1 = vld [vmem:[#allocation6 + $0x78] sm:$0xf0] }
 0x3d8   : > { %v10106_v34 = vor.u32 %v12473_v17, %v10105_v10  ;;  %v10033_v47 = vld [vmem:[#allocation6 + $0xe0] sm:$0xf]  ;;  %3581 = vmatpush.bf16.msrb.mxu0 %v10042_v49  ;;  %v10110_v22 = vor.u32 %v12472_v37, %v10107_v1  ;;  %v12487_v46 = vld [vmem:[#allocation6 + $0xe4] sm:$0xf0]  ;;  %v12486_v0 = vld [vmem:[#allocation6 + $0xe4] sm:$0xf] }
 0x3d9   : > { %v10035_v13 = vld [vmem:[#allocation6 + $0xe8] sm:$0xf0]  ;;  %3605 = vmatpush.bf16.msrb.mxu1 %v10046_v50  ;;  %v10034_v63 = vor.u32 %v12487_v46, %v10033_v47  ;;  %v10097_v14 = vld [vmem:[#allocation6 + $0x60] sm:$0xf]  ;;  %v12471_v40 = vld [vmem:[#allocation6 + $0x64] sm:$0xf0] }
 0x3da   : > { %3709 = vmatpush.bf16.msrb.mxu2 %v10106_v34  ;;  %v10038_v29 = vor.u32 %v12486_v0, %v10035_v13  ;;  %v12470_v23 = vld [vmem:[#allocation6 + $0x64] sm:$0xf]  ;;  %3733 = vmatpush.bf16.msrb.mxu3 %v10110_v22  ;;  %v10098_v41 = vor.u32 %v12471_v40, %v10097_v14  ;;  %v10099_v9 = vld [vmem:[#allocation6 + $0x68] sm:$0xf0]  ;;  %v10025_v32 = vld [vmem:[#allocation6 + $0xd0] sm:$0xf] }
 0x3db   : > { %v12485_v61 = vld [vmem:[#allocation6 + $0xd4] sm:$0xf0]  ;;  %v10102_v55 = vor.u32 %v12470_v23, %v10099_v9  ;;  %v12484_v5 = vld [vmem:[#allocation6 + $0xd4] sm:$0xf]  ;;  %v10027_v3 = vld [vmem:[#allocation6 + $0xd8] sm:$0xf0] }
 0x3dc   : > { %v10089_v38 = vld [vmem:[#allocation6 + $0x50] sm:$0xf]  ;;  %3582 = vmatpush.bf16.msrb.mxu0 %v10034_v63  ;;  %v10026_v19 = vor.u32 %v12485_v61, %v10025_v32  ;;  %v12469_v31 = vld [vmem:[#allocation6 + $0x54] sm:$0xf0]  ;;  %v12468_v15 = vld [vmem:[#allocation6 + $0x54] sm:$0xf]  ;;  %v10030_v35 = vor.u32 %v12484_v5, %v10027_v3 }
 0x3dd   : > { %v10091_v6 = vld [vmem:[#allocation6 + $0x58] sm:$0xf0]  ;;  %3606 = vmatpush.bf16.msrb.mxu1 %v10038_v29  ;;  %v10090_v44 = vor.u32 %v12469_v31, %v10089_v38  ;;  %v10017_v42 = vld [vmem:[#allocation6 + $0xc0] sm:$0xf]  ;;  %v12483_v53 = vld [vmem:[#allocation6 + $0xc4] sm:$0xf0] }
 0x3de   : > { %3710 = vmatpush.bf16.msrb.mxu2 %v10098_v41  ;;  %v12482_v58 = vld [vmem:[#allocation6 + $0xc4] sm:$0xf]  ;;  %3734 = vmatpush.bf16.msrb.mxu3 %v10102_v55  ;;  %v10094_v26 = vor.u32 %v12468_v15, %v10091_v6  ;;  %v10019_v48 = vld [vmem:[#allocation6 + $0xc8] sm:$0xf0]  ;;  %v10081_v30 = vld [vmem:[#allocation6 + $0x40] sm:$0xf]  ;;  %v10018_v60 = vor.u32 %v12483_v53, %v10017_v42 }
 0x3df   : > { %v12467_v62 = vld [vmem:[#allocation6 + $0x44] sm:$0xf0]  ;;  %v12466_v33 = vld [vmem:[#allocation6 + $0x44] sm:$0xf]  ;;  %v10083_v54 = vld [vmem:[#allocation6 + $0x48] sm:$0xf0]  ;;  %v10022_v59 = vor.u32 %v12482_v58, %v10019_v48 }
 0x3e0   : > { %3583 = vmatpush.bf16.msrb.mxu0 %v10026_v19  ;;  %v10082_v51 = vor.u32 %v12467_v62, %v10081_v30  ;;  %v10009_v7 = vld [vmem:[#allocation6 + $0xb0] sm:$0xf]  ;;  %v12481_v11 = vld [vmem:[#allocation6 + $0xb4] sm:$0xf0]  ;;  %v12480_v21 = vld [vmem:[#allocation6 + $0xb4] sm:$0xf]  ;;  %v10086_v57 = vor.u32 %v12466_v33, %v10083_v54 }
 0x3e1   : > { %3607 = vmatpush.bf16.msrb.mxu1 %v10030_v35  ;;  %v10011_v16 = vld [vmem:[#allocation6 + $0xb8] sm:$0xf0]  ;;  %v10073_v2 = vld [vmem:[#allocation6 + $0x30] sm:$0xf]  ;;  %v12465_v56 = vld [vmem:[#allocation6 + $0x34] sm:$0xf0]  ;;  %v10010_v8 = vor.u32 %v12481_v11, %v10009_v7 }
 0x3e2   : > { %3711 = vmatpush.bf16.msrb.mxu2 %v10090_v44  ;;  %3735 = vmatpush.bf16.msrb.mxu3 %v10094_v26  ;;  %v12464_v36 = vld [vmem:[#allocation6 + $0x34] sm:$0xf]  ;;  %v10075_v49 = vld [vmem:[#allocation6 + $0x38] sm:$0xf0]  ;;  %v10014_v10 = vor.u32 %v12480_v21, %v10011_v16  ;;  %v10074_v17 = vor.u32 %v12465_v56, %v10073_v2  ;;  %v10001_v50 = vld [vmem:[#allocation6 + $0xa0] sm:$0xf] }
 0x3e3   : > { %v12479_v34 = vld [vmem:[#allocation6 + $0xa4] sm:$0xf0]  ;;  %v12478_v37 = vld [vmem:[#allocation6 + $0xa4] sm:$0xf]  ;;  %v10078_v1 = vor.u32 %v12464_v36, %v10075_v49  ;;  %v10003_v47 = vld [vmem:[#allocation6 + $0xa8] sm:$0xf0] }
 0x3e4   : > { %3584 = vmatpush.bf16.msrb.mxu0 %v10018_v60  ;;  %v10065_v22 = vld [vmem:[#allocation6 + $0x20] sm:$0xf]  ;;  %v12463_v46 = vld [vmem:[#allocation6 + $0x24] sm:$0xf0]  ;;  %v12462_v0 = vld [vmem:[#allocation6 + $0x24] sm:$0xf]  ;;  %v10002_v63 = vor.u32 %v12479_v34, %v10001_v50  ;;  %v10006_v29 = vor.u32 %v12478_v37, %v10003_v47 }
 0x3e5   : > { %3608 = vmatpush.bf16.msrb.mxu1 %v10022_v59  ;;  %v10067_v13 = vld [vmem:[#allocation6 + $0x28] sm:$0xf0]  ;;  %v10066_v14 = vor.u32 %v12463_v46, %v10065_v22  ;;  %v9993_v40 = vld [vmem:[#allocation6 + $0x90] sm:$0xf]  ;;  %v12477_v23 = vld [vmem:[#allocation6 + $0x94] sm:$0xf0] }
 0x3e6   : > { %3712 = vmatpush.bf16.msrb.mxu2 %v10082_v51  ;;  %3736 = vmatpush.bf16.msrb.mxu3 %v10086_v57  ;;  %v12476_v41 = vld [vmem:[#allocation6 + $0x94] sm:$0xf]  ;;  %v10070_v9 = vor.u32 %v12462_v0, %v10067_v13  ;;  %v9995_v32 = vld [vmem:[#allocation6 + $0x98] sm:$0xf0]  ;;  %v10057_v61 = vld [vmem:[#allocation6 + $0x10] sm:$0xf]  ;;  %v9994_v38 = vor.u32 %v12477_v23, %v9993_v40 }
 0x3e7   : > { %v12461_v55 = vld [vmem:[#allocation6 + $0x14] sm:$0xf0]  ;;  %v12460_v5 = vld [vmem:[#allocation6 + $0x14] sm:$0xf]  ;;  %v10059_v3 = vld [vmem:[#allocation6 + $0x18] sm:$0xf0]  ;;  %v9998_v15 = vor.u32 %v12476_v41, %v9995_v32 }
 0x3e8   : > { %3585 = vmatpush.bf16.msrb.mxu0 %v10010_v8  ;;  %v9985_v19 = vld [vmem:[#allocation6 + $0x80] sm:$0xf]  ;;  %v12475_v31 = vld [vmem:[#allocation6 + $0x84] sm:$0xf0]  ;;  %v10058_v6 = vor.u32 %v12461_v55, %v10057_v61  ;;  %v12474_v35 = vld [vmem:[#allocation6 + $0x84] sm:$0xf]  ;;  %v10062_v53 = vor.u32 %v12460_v5, %v10059_v3 }
 0x3e9   : > { %3609 = vmatpush.bf16.msrb.mxu1 %v10014_v10  ;;  %v9987_v44 = vld [vmem:[#allocation6 + $0x88] sm:$0xf0]  ;;  %v10049_v42 = vld [vmem:[#allocation6] sm:$0xf]  ;;  %v12459_v58 = vld [vmem:[#allocation6 + $0x4] sm:$0xf0]  ;;  %v9986_v54 = vor.u32 %v12475_v31, %v9985_v19 }
 0x3ea   : > { %3713 = vmatpush.bf16.msrb.mxu2 %v10074_v17  ;;  %3737 = vmatpush.bf16.msrb.mxu3 %v10078_v1  ;;  %v12458_v26 = vld [vmem:[#allocation6 + $0x4] sm:$0xf]  ;;  %v10051_v48 = vld [vmem:[#allocation6 + $0x8] sm:$0xf0]  ;;  %v10233_v62 = vld [vmem:[#allocation6 + $0x1f0] sm:$0xf]  ;;  %v9990_v7 = vor.u32 %v12474_v35, %v9987_v44  ;;  %v10050_v11 = vor.u32 %v12459_v58, %v10049_v42 }
 0x3eb   : > { %v3475_v30 = vld [vmem:[#allocation3 + $0x6] sm:$0xff]  ;;  %v12521_v33 = vld [vmem:[#allocation6 + $0x1f4] sm:$0xf0]  ;;  %v3476_v60 = vld [vmem:[#allocation3 + $0xe] sm:$0xff]  ;;  %v10054_v16 = vor.u32 %v12458_v26, %v10051_v48  ;;  %vm6685_vm0 = vcmask 523264   ;;  %s13095_s17 = smov 64  }
 0x3ec   : > { %3586 = vmatpush.bf16.msrb.mxu0 %v10002_v63  ;;  %v12520_v59 = vld [vmem:[#allocation6 + $0x1f4] sm:$0xf]  ;;  %v10235_v51 = vld [vmem:[#allocation6 + $0x1f8] sm:$0xf0]  ;;  %v3450_v21 = vld [vmem:[#allocation3 + $0x5] sm:$0xff]  ;;  %v10234_v2 = vor.u32 %v12521_v33, %v10233_v62  ;;  %v3481_v8 = vpack.c.bf16 %v3476_v60, %v3475_v30 }
 0x3ed   : > { %3610 = vmatpush.bf16.msrb.mxu1 %v10006_v29  ;;  %v3451_v57 = vld [vmem:[#allocation3 + $0xd] sm:$0xff]  ;;  %v12505_v36 = vld [vmem:[#allocation6 + $0x174] sm:$0xf0]  ;;  %v10238_v10 = vor.u32 %v12520_v59, %v10235_v51  ;;  %v10171_v17 = vld [vmem:[#allocation6 + $0x178] sm:$0xf0] }
 0x3ee   : > { %3714 = vmatpush.bf16.msrb.mxu2 %v10066_v14  ;;  %3738 = vmatpush.bf16.msrb.mxu3 %v10070_v9  ;;  %v10169_v56 = vld [vmem:[#allocation6 + $0x170] sm:$0xf]  ;;  %v12504_v49 = vld [vmem:[#allocation6 + $0x174] sm:$0xf]  ;;  %v10225_v50 = vld [vmem:[#allocation6 + $0x1e0] sm:$0xf]  ;;  %v3456_v37 = vpack.c.bf16 %v3451_v57, %v3450_v21 }
 0x3ef   : > { %v12519_v34 = vld [vmem:[#allocation6 + $0x1e4] sm:$0xf0]  ;;  %v12518_v1 = vld [vmem:[#allocation6 + $0x1e4] sm:$0xf]  ;;  %v10227_v47 = vld [vmem:[#allocation6 + $0x1e8] sm:$0xf0]  ;;  %v10170_v22 = vor.u32 %v12505_v36, %v10169_v56  ;;  %v10174_v46 = vor.u32 %v12504_v49, %v10171_v17 }
 0x3f0   : > { %3587 = vmatpush.bf16.msrb.mxu0 %v9994_v38  ;;  %v10226_v0 = vor.u32 %v12519_v34, %v10225_v50  ;;  %v10161_v13 = vld [vmem:[#allocation6 + $0x160] sm:$0xf]  ;;  %v12503_v63 = vld [vmem:[#allocation6 + $0x164] sm:$0xf0]  ;;  %v12502_v29 = vld [vmem:[#allocation6 + $0x164] sm:$0xf]  ;;  %v10230_v14 = vor.u32 %v12518_v1, %v10227_v47 }
 0x3f1   : > { %3611 = vmatpush.bf16.msrb.mxu1 %v9998_v15  ;;  %v10163_v40 = vld [vmem:[#allocation6 + $0x168] sm:$0xf0]  ;;  %v10217_v23 = vld [vmem:[#allocation6 + $0x1d0] sm:$0xf]  ;;  %v12517_v41 = vld [vmem:[#allocation6 + $0x1d4] sm:$0xf0]  ;;  %v10162_v61 = vor.u32 %v12503_v63, %v10161_v13 }
 0x3f2   : > { %3715 = vmatpush.bf16.msrb.mxu2 %v10058_v6  ;;  %3739 = vmatpush.bf16.msrb.mxu3 %v10062_v53  ;;  %v12516_v9 = vld [vmem:[#allocation6 + $0x1d4] sm:$0xf]  ;;  %v10219_v32 = vld [vmem:[#allocation6 + $0x1d8] sm:$0xf0]  ;;  %v10166_v55 = vor.u32 %v12502_v29, %v10163_v40  ;;  %v10218_v5 = vor.u32 %v12517_v41, %v10217_v23  ;;  %v10153_v3 = vld [vmem:[#allocation6 + $0x150] sm:$0xf] }
 0x3f3   : > { %v12501_v38 = vld [vmem:[#allocation6 + $0x154] sm:$0xf0]  ;;  %v12500_v19 = vld [vmem:[#allocation6 + $0x154] sm:$0xf]  ;;  %v10222_v31 = vor.u32 %v12516_v9, %v10219_v32  ;;  %v10155_v15 = vld [vmem:[#allocation6 + $0x158] sm:$0xf0] }
 0x3f4   : > { %3588 = vmatpush.bf16.msrb.mxu0 %v9986_v54  ;;  %v10209_v6 = vld [vmem:[#allocation6 + $0x1c0] sm:$0xf]  ;;  %v12515_v35 = vld [vmem:[#allocation6 + $0x1c4] sm:$0xf0]  ;;  %v12514_v44 = vld [vmem:[#allocation6 + $0x1c4] sm:$0xf]  ;;  %v10154_v53 = vor.u32 %v12501_v38, %v10153_v3  ;;  %v10158_v26 = vor.u32 %v12500_v19, %v10155_v15 }
 0x3f5   : > { %3612 = vmatpush.bf16.msrb.mxu1 %v9990_v7  ;;  %v10211_v42 = vld [vmem:[#allocation6 + $0x1c8] sm:$0xf0]  ;;  %v3477_v58 = vld [vmem:[#allocation3 + $0x16] sm:$0xff]  ;;  %v10210_v48 = vor.u32 %v12515_v35, %v10209_v6  ;;  %v10145_v30 = vld [vmem:[#allocation6 + $0x140] sm:$0xf] }
 0x3f6   : > { %3716 = vmatpush.bf16.msrb.mxu2 %v10050_v11  ;;  %3740 = vmatpush.bf16.msrb.mxu3 %v10054_v16  ;;  %v12499_v62 = vld [vmem:[#allocation6 + $0x144] sm:$0xf0]  ;;  %v12498_v33 = vld [vmem:[#allocation6 + $0x144] sm:$0xf]  ;;  %v10214_v54 = vor.u32 %v12514_v44, %v10211_v42  ;;  %v10147_v60 = vld [vmem:[#allocation6 + $0x148] sm:$0xf0] }
 0x3f7   : > { %3589 = vmatmul.bf16.vlgmr.msrb.gmra.mxu0 %v3481_v8  ;;  %v10201_v59 = vld [vmem:[#allocation6 + $0x1b0] sm:$0xf]  ;;  %v12513_v51 = vld [vmem:[#allocation6 + $0x1b4] sm:$0xf0]  ;;  %v3478_v7 = vld [vmem:[#allocation3 + $0x1e] sm:$0xff]  ;;  %v10150_v56 = vor.u32 %v12498_v33, %v10147_v60 }
 0x3f8   : > { %3613 = vmatmul.bf16.vlgmr.msrb.gmra.mxu1 %v3481_v8  ;;  %3863 = vmatpush.bf16.msra.mxu0 %v10170_v22  ;;  %v12512_v11 = vld [vmem:[#allocation6 + $0x1b4] sm:$0xf]  ;;  %v10203_v21 = vld [vmem:[#allocation6 + $0x1b8] sm:$0xf0]  ;;  %v10202_v36 = vor.u32 %v12513_v51, %v10201_v59  ;;  %v10137_v49 = vld [vmem:[#allocation6 + $0x130] sm:$0xf]  ;;  %v3482_v17 = vpack.c.bf16 %v3478_v7, %v3477_v58 }
 0x3f9   : > { %3717 = vmatmul.bf16.vlgmr.msrb.gmra.mxu2 %v3456_v37  ;;  %3741 = vmatmul.bf16.vlgmr.msrb.gmra.mxu3 %v3456_v37  ;;  %v3452_v57 = vld [vmem:[#allocation3 + $0x15] sm:$0xff]  ;;  %v3453_v16 = vld [vmem:[#allocation3 + $0x1d] sm:$0xff]  ;;  %v10206_v50 = vor.u32 %v12512_v11, %v10203_v21  ;;  %v12511_v1 = vld [vmem:[#allocation6 + $0x1a4] sm:$0xf0] }
 0x3fa   : > { %4029 = vmatpush.bf16.msra.mxu2 %v10234_v2  ;;  %4053 = vmatpush.bf16.msra.mxu3 %v10238_v10  ;;  %v10146_v2 = vor.u32 %v12499_v62, %v10145_v30  ;;  %v12497_v8 = vld [vmem:[#allocation6 + $0x134] sm:$0xf0]  ;;  %v12496_v10 = vld [vmem:[#allocation6 + $0x134] sm:$0xf]  ;;  %v10139_v34 = vld [vmem:[#allocation6 + $0x138] sm:$0xf0]  ;;  %v3457_v47 = vpack.c.bf16 %v3453_v16, %v3452_v57 }
 0x3fb   : > { %3887 = vmatpush.bf16.msra.mxu1 %v10174_v46  ;;  %v10193_v37 = vld [vmem:[#allocation6 + $0x1a0] sm:$0xf]  ;;  %v12510_v22 = vld [vmem:[#allocation6 + $0x1a4] sm:$0xf]  ;;  %v10195_v46 = vld [vmem:[#allocation6 + $0x1a8] sm:$0xf0]  ;;  %v10142_v13 = vor.u32 %v12496_v10, %v10139_v34 }
 0x3fc   : > { %3864 = vmatpush.bf16.msra.mxu0 %v10162_v61  ;;  %v10194_v63 = vor.u32 %v12511_v1, %v10193_v37  ;;  %v10129_v29 = vld [vmem:[#allocation6 + $0x120] sm:$0xf]  ;;  %v12494_v40 = vld [vmem:[#allocation6 + $0x124] sm:$0xf]  ;;  %v10198_v23 = vor.u32 %v12510_v22, %v10195_v46  ;;  %v10131_v41 = vld [vmem:[#allocation6 + $0x128] sm:$0xf0] }
 0x3fd   : > { %v10185_v9 = vld [vmem:[#allocation6 + $0x190] sm:$0xf]  ;;  %v12509_v32 = vld [vmem:[#allocation6 + $0x194] sm:$0xf0]  ;;  %v12508_v61 = vld [vmem:[#allocation6 + $0x194] sm:$0xf]  ;;  %v10134_v38 = vor.u32 %v12494_v40, %v10131_v41 }
 0x3fe   : > { %4030 = vmatpush.bf16.msra.mxu2 %v10226_v0  ;;  %4054 = vmatpush.bf16.msra.mxu3 %v10230_v14  ;;  %v10138_v0 = vor.u32 %v12497_v8, %v10137_v49  ;;  %v12495_v14 = vld [vmem:[#allocation6 + $0x124] sm:$0xf0]  ;;  %v10121_v3 = vld [vmem:[#allocation6 + $0x110] sm:$0xf]  ;;  %v10186_v19 = vor.u32 %v12509_v32, %v10185_v9  ;;  %v12492_v15 = vld [vmem:[#allocation6 + $0x114] sm:$0xf] }
 0x3ff   : > { %3888 = vmatpush.bf16.msra.mxu1 %v10166_v55  ;;  %v10187_v55 = vld [vmem:[#allocation6 + $0x198] sm:$0xf0]  ;;  %v10177_v44 = vld [vmem:[#allocation6 + $0x180] sm:$0xf]  ;;  %v12507_v42 = vld [vmem:[#allocation6 + $0x184] sm:$0xf0] }
 0x400   : > { %3865 = vmatpush.bf16.msra.mxu0 %v10154_v53  ;;  %v10123_v6 = vld [vmem:[#allocation6 + $0x118] sm:$0xf0]  ;;  %v10190_v35 = vor.u32 %v12508_v61, %v10187_v55  ;;  %v12506_v53 = vld [vmem:[#allocation6 + $0x184] sm:$0xf]  ;;  %v10179_v58 = vld [vmem:[#allocation6 + $0x188] sm:$0xf0]  ;;  %v10178_v59 = vor.u32 %v12507_v42, %v10177_v44 }
 0x401   : > { %v12552_v62 = vld [vmem:[#allocation6 + $0x2f4] sm:$0xf]  ;;  %v10363_v33 = vld [vmem:[#allocation6 + $0x2f8] sm:$0xf0]  ;;  %v10126_v60 = vor.u32 %v12492_v15, %v10123_v6  ;;  %v10113_v51 = vld [vmem:[#allocation6 + $0x100] sm:$0xf]  ;;  %v10182_v21 = vor.u32 %v12506_v53, %v10179_v58 }
 0x402   : > { %4031 = vmatpush.bf16.msra.mxu2 %v10218_v5  ;;  %4055 = vmatpush.bf16.msra.mxu3 %v10222_v31  ;;  %v10130_v5 = vor.u32 %v12495_v14, %v10129_v29  ;;  %v12493_v31 = vld [vmem:[#allocation6 + $0x114] sm:$0xf0]  ;;  %v12491_v7 = vld [vmem:[#allocation6 + $0x104] sm:$0xf0]  ;;  %v12490_v11 = vld [vmem:[#allocation6 + $0x104] sm:$0xf]  ;;  %v10366_v49 = vor.u32 %v12552_v62, %v10363_v33 }
 0x403   : > { %3889 = vmatpush.bf16.msra.mxu1 %v10158_v26  ;;  %v10361_v26 = vld [vmem:[#allocation6 + $0x2f0] sm:$0xf]  ;;  %v10122_v30 = vor.u32 %v12493_v31, %v10121_v3  ;;  %v10115_v57 = vld [vmem:[#allocation6 + $0x108] sm:$0xf0]  ;;  %v12536_v8 = vld [vmem:[#allocation6 + $0x274] sm:$0xf]  ;;  %v10114_v34 = vor.u32 %v12491_v7, %v10113_v51 }
 0x404   : > { %3866 = vmatpush.bf16.msra.mxu0 %v10146_v2  ;;  %v10297_v2 = vld [vmem:[#allocation6 + $0x270] sm:$0xf]  ;;  %v10299_v10 = vld [vmem:[#allocation6 + $0x278] sm:$0xf0]  ;;  %v10118_v37 = vor.u32 %v12490_v11, %v10115_v57  ;;  %v12551_v22 = vld [vmem:[#allocation6 + $0x2e4] sm:$0xf0] }
 0x405   : > { %v12550_v46 = vld [vmem:[#allocation6 + $0x2e4] sm:$0xf]  ;;  %v10289_v29 = vld [vmem:[#allocation6 + $0x260] sm:$0xf]  ;;  %v12535_v14 = vld [vmem:[#allocation6 + $0x264] sm:$0xf0] }
 0x406   : > { %4032 = vmatpush.bf16.msra.mxu2 %v10210_v48  ;;  %4056 = vmatpush.bf16.msra.mxu3 %v10214_v54  ;;  %v12553_v48 = vld [vmem:[#allocation6 + $0x2f4] sm:$0xf0]  ;;  %v3479_v54 = vld [vmem:[#allocation3 + $0x26] sm:$0xff]  ;;  %v10290_v61 = vor.u32 %v12535_v14, %v10289_v29  ;;  %v10345_v55 = vld [vmem:[#allocation6 + $0x2d0] sm:$0xf] }
 0x407   : > { %3890 = vmatpush.bf16.msra.mxu1 %v10150_v56  ;;  %3594 = vmatmul.bf16.gmra.mxu0 %v3482_v17  ;;  %v10362_v16 = vor.u32 %v12553_v48, %v10361_v26  ;;  %v12537_v56 = vld [vmem:[#allocation6 + $0x274] sm:$0xf0]  ;;  %v10291_v41 = vld [vmem:[#allocation6 + $0x268] sm:$0xf0]  ;;  %v10281_v15 = vld [vmem:[#allocation6 + $0x250] sm:$0xf] }
 0x408   : > { %3618 = vmatmul.bf16.gmra.mxu1 %v3482_v17  ;;  %3867 = vmatpush.bf16.msra.mxu0 %v10138_v0  ;;  %v3454_v17 = vld [vmem:[#allocation3 + $0x25] sm:$0xff]  ;;  %v10298_v1 = vor.u32 %v12537_v56, %v10297_v2  ;;  %v12533_v6 = vld [vmem:[#allocation6 + $0x254] sm:$0xf0]  ;;  %v10283_v53 = vld [vmem:[#allocation6 + $0x258] sm:$0xf0] }
 0x409   : > { %3722 = vmatmul.bf16.gmra.mxu2 %v3457_v47  ;;  %3746 = vmatmul.bf16.gmra.mxu3 %v3457_v47  ;;  %v10353_v47 = vld [vmem:[#allocation6 + $0x2e0] sm:$0xf]  ;;  %v10282_v42 = vor.u32 %v12533_v6, %v10281_v15  ;;  %v12547_v26 = vld [vmem:[#allocation6 + $0x2c4] sm:$0xf0]  ;;  %v10339_v62 = vld [vmem:[#allocation6 + $0x2c8] sm:$0xf0] }
 0x40a   : > { %4033 = vmatpush.bf16.msra.mxu2 %v10202_v36  ;;  %4057 = vmatpush.bf16.msra.mxu3 %v10206_v50  ;;  %v3480_v36 = vld [vmem:[#allocation3 + $0x2e] sm:$0xff]  ;;  %v10354_v9 = vor.u32 %v12551_v22, %v10353_v47  ;;  %v10337_v58 = vld [vmem:[#allocation6 + $0x2c0] sm:$0xf]  ;;  %v12542_v14 = vld [vmem:[#allocation6 + $0x2a4] sm:$0xf] }
 0x40b   : > { %3891 = vmatpush.bf16.msra.mxu1 %v10142_v13  ;;  %v3455_v50 = vld [vmem:[#allocation3 + $0x2d] sm:$0xff]  ;;  %v3483_v0 = vpack.c.bf16 %v3480_v36, %v3479_v54  ;;  %v10302_v13 = vor.u32 %v12536_v8, %v10299_v10  ;;  %v10273_v33 = vld [vmem:[#allocation6 + $0x240] sm:$0xf]  ;;  %v12531_v54 = vld [vmem:[#allocation6 + $0x244] sm:$0xf0]  ;;  %v10338_v51 = vor.u32 %v12547_v26, %v10337_v58 }
 0x40c   : > { %3868 = vmatpush.bf16.msra.mxu0 %v10130_v5  ;;  %v3458_v40 = vpack.c.bf16 %v3455_v50, %v3454_v17  ;;  %v12549_v5 = vld [vmem:[#allocation6 + $0x2d4] sm:$0xf0]  ;;  %v3757_v7 = vld [vmem:[#allocation3 + $0x7] sm:$0xff]  ;;  %v10329_v57 = vld [vmem:[#allocation6 + $0x2b0] sm:$0xf] }
 0x40d   : > { %v10346_v31 = vor.u32 %v12549_v5, %v10345_v55  ;;  %v12544_v2 = vld [vmem:[#allocation6 + $0x2b4] sm:$0xf]  ;;  %v10331_v36 = vld [vmem:[#allocation6 + $0x2b8] sm:$0xf0]  ;;  %v12529_v8 = vld [vmem:[#allocation6 + $0x234] sm:$0xf0] }
 0x40e   : > { %4034 = vmatpush.bf16.msra.mxu2 %v10194_v63  ;;  %4058 = vmatpush.bf16.msra.mxu3 %v10198_v23  ;;  %v10355_v63 = vld [vmem:[#allocation6 + $0x2e8] sm:$0xf0]  ;;  %v12534_v23 = vld [vmem:[#allocation6 + $0x264] sm:$0xf]  ;;  %v12528_v17 = vld [vmem:[#allocation6 + $0x234] sm:$0xf] }
 0x40f   : > { %3892 = vmatpush.bf16.msra.mxu1 %v10134_v38  ;;  %v10358_v32 = vor.u32 %v12550_v46, %v10355_v63  ;;  %v10294_v3 = vor.u32 %v12534_v23, %v10291_v41  ;;  %v12548_v38 = vld [vmem:[#allocation6 + $0x2d4] sm:$0xf]  ;;  %v10267_v50 = vld [vmem:[#allocation6 + $0x238] sm:$0xf0]  ;;  %v10321_v22 = vld [vmem:[#allocation6 + $0x2a0] sm:$0xf] }
 0x410   : > { %3869 = vmatpush.bf16.msra.mxu0 %v10122_v30  ;;  %v12546_v30 = vld [vmem:[#allocation6 + $0x2c4] sm:$0xf]  ;;  %v3758_v10 = vld [vmem:[#allocation3 + $0xf] sm:$0xff]  ;;  %v12543_v46 = vld [vmem:[#allocation6 + $0x2a4] sm:$0xf0] }
 0x411   : > { %v10342_v11 = vor.u32 %v12546_v30, %v10339_v62  ;;  %v10322_v29 = vor.u32 %v12543_v46, %v10321_v22  ;;  %v10257_v23 = vld [vmem:[#allocation6 + $0x220] sm:$0xf]  ;;  %v10315_v15 = vld [vmem:[#allocation6 + $0x298] sm:$0xf0]  ;;  %v10249_v6 = vld [vmem:[#allocation6 + $0x210] sm:$0xf] }
 0x412   : > { %4035 = vmatpush.bf16.msra.mxu2 %v10186_v19  ;;  %4059 = vmatpush.bf16.msra.mxu3 %v10190_v35  ;;  %v10347_v19 = vld [vmem:[#allocation6 + $0x2d8] sm:$0xf0]  ;;  %v12532_v35 = vld [vmem:[#allocation6 + $0x254] sm:$0xf]  ;;  %v10305_v26 = vld [vmem:[#allocation6 + $0x280] sm:$0xf] }
 0x413   : > { %3893 = vmatpush.bf16.msra.mxu1 %v10126_v60  ;;  %v10350_v44 = vor.u32 %v12548_v38, %v10347_v19  ;;  %v10286_v48 = vor.u32 %v12532_v35, %v10283_v53  ;;  %v12530_v60 = vld [vmem:[#allocation6 + $0x244] sm:$0xf]  ;;  %v12541_v38 = vld [vmem:[#allocation6 + $0x294] sm:$0xf0]  ;;  %v12540_v19 = vld [vmem:[#allocation6 + $0x294] sm:$0xf] }
 0x414   : > { %3870 = vmatpush.bf16.msra.mxu0 %v10114_v34  ;;  %v15128_v34 = vld [vmem:[#allocation3 + $0x17] sm:$0xff]  ;;  %v12539_v30 = vld [vmem:[#allocation6 + $0x284] sm:$0xf0]  ;;  %v12538_v62 = vld [vmem:[#allocation6 + $0x284] sm:$0xf] }
 0x415   : > { %v3929_v63 = vpack.c.bf16 %v15128_v34, %v3758_v10  ;;  %v12525_v35 = vld [vmem:[#allocation6 + $0x214] sm:$0xf0]  ;;  %v12524_v53 = vld [vmem:[#allocation6 + $0x214] sm:$0xf]  ;;  %v10251_v58 = vld [vmem:[#allocation6 + $0x218] sm:$0xf0] }
 0x416   : > { %4036 = vmatpush.bf16.msra.mxu2 %v10178_v59  ;;  %4060 = vmatpush.bf16.msra.mxu3 %v10182_v21  ;;  %v10275_v59 = vld [vmem:[#allocation6 + $0x248] sm:$0xf0]  ;;  %v10274_v21 = vor.u32 %v12531_v54, %v10273_v33  ;;  %v10306_v54 = vor.u32 %v12539_v30, %v10305_v26  ;;  %v12568_v46 = vld [vmem:[#allocation6 + $0x374] sm:$0xf]  ;;  %v12565_v26 = vld [vmem:[#allocation6 + $0x354] sm:$0xf0] }
 0x417   : > { %3894 = vmatpush.bf16.msra.mxu1 %v10118_v37  ;;  %3599 = vmatmul.bf16.gmra.mxu0 %v3483_v0  ;;  %v10278_v56 = vor.u32 %v12530_v60, %v10275_v59  ;;  %v10307_v33 = vld [vmem:[#allocation6 + $0x288] sm:$0xf0]  ;;  %v10241_v60 = vld [vmem:[#allocation6 + $0x200] sm:$0xf]  ;;  %v12523_v59 = vld [vmem:[#allocation6 + $0x204] sm:$0xf0] }
 0x418   : > { %4195 = vmatpush.bf16.msrb.mxu0 %v10298_v1  ;;  %3623 = vmatmul.bf16.gmra.mxu1 %v3483_v0  ;;  %v10334_v1 = vor.u32 %v12544_v2, %v10331_v36  ;;  %v3763_v0 = vpack.c.bf16 %v3758_v10, %v3757_v7  ;;  %v3760_v7 = vld [vmem:[#allocation3 + $0x1f] sm:$0xff]  ;;  %v12584_v10 = vld [vmem:[#allocation6 + $0x3f4] sm:$0xf]  ;;  %v12743_v24 = vld [vmem:[#allocation6 + $0x464] sm:$0xf0] }
 0x419   : > { %3727 = vmatmul.bf16.gmra.mxu2 %v3458_v40  ;;  %3751 = vmatmul.bf16.gmra.mxu3 %v3458_v40  ;;  %v10323_v40 = vld [vmem:[#allocation6 + $0x2a8] sm:$0xf0] }
 0x41a   : > { %4361 = vmatpush.bf16.msrb.mxu2 %v10362_v16  ;;  %4385 = vmatpush.bf16.msrb.mxu3 %v10366_v49  ;;  %v12545_v16 = vld [vmem:[#allocation6 + $0x2b4] sm:$0xf0]  ;;  %v10265_v49 = vld [vmem:[#allocation6 + $0x230] sm:$0xf]  ;;  %v10326_v41 = vor.u32 %v12542_v14, %v10323_v40  ;;  %v10483_v14 = vld [vmem:[#allocation6 + $0x3e8] sm:$0xf0] }
 0x41b   : > { %4219 = vmatpush.bf16.msrb.mxu1 %v10302_v13  ;;  %v10330_v37 = vor.u32 %v12545_v16, %v10329_v57  ;;  %v10266_v47 = vor.u32 %v12529_v8, %v10265_v49  ;;  %v10270_v13 = vor.u32 %v12528_v17, %v10267_v50  ;;  %v3926_v57 = vld [vmem:[#allocation3 + $0x27] sm:$0xff]  ;;  %v10242_v16 = vor.u32 %v12523_v59, %v10241_v60  ;;  %v10489_v49 = vld [vmem:[#allocation6 + $0x3f0] sm:$0xf]  ;;  %v12585_v8 = vld [vmem:[#allocation6 + $0x3f4] sm:$0xf0] }
 0x41c   : > { %4196 = vmatpush.bf16.msrb.mxu0 %v10290_v61  ;;  %v10259_v61 = vld [vmem:[#allocation6 + $0x228] sm:$0xf0]  ;;  %v3930_v36 = vpack.c.bf16 %v3926_v57, %v3760_v7  ;;  %v10490_v17 = vor.u32 %v12585_v8, %v10489_v49  ;;  %v10491_v50 = vld [vmem:[#allocation6 + $0x3f8] sm:$0xf0]  ;;  %v10457_v49 = vld [vmem:[#allocation6 + $0x3b0] sm:$0xf] }
 0x41d   : > { %v12577_v8 = vld [vmem:[#allocation6 + $0x3b4] sm:$0xf0] }
 0x41e   : > { %4362 = vmatpush.bf16.msrb.mxu2 %v10354_v9  ;;  %4386 = vmatpush.bf16.msrb.mxu3 %v10358_v32  ;;  %v12527_v9 = vld [vmem:[#allocation6 + $0x224] sm:$0xf0]  ;;  %v12526_v32 = vld [vmem:[#allocation6 + $0x224] sm:$0xf] }
 0x41f   : > { %4220 = vmatpush.bf16.msrb.mxu1 %v10294_v3  ;;  %v10258_v55 = vor.u32 %v12527_v9, %v10257_v23  ;;  %v10262_v5 = vor.u32 %v12526_v32, %v10259_v61  ;;  %v10313_v3 = vld [vmem:[#allocation6 + $0x290] sm:$0xf]  ;;  %v12567_v9 = vld [vmem:[#allocation6 + $0x364] sm:$0xf0]  ;;  %v12566_v32 = vld [vmem:[#allocation6 + $0x364] sm:$0xf] }
 0x420   : > { %4197 = vmatpush.bf16.msrb.mxu0 %v10282_v42  ;;  %v10250_v42 = vor.u32 %v12525_v35, %v10249_v6  ;;  %v3928_v35 = vld [vmem:[#allocation3 + $0x37] sm:$0xff] }
 0x422   : > { %4363 = vmatpush.bf16.msrb.mxu2 %v10346_v31  ;;  %4387 = vmatpush.bf16.msrb.mxu3 %v10350_v44  ;;  %v10314_v31 = vor.u32 %v12541_v38, %v10313_v3  ;;  %v10318_v44 = vor.u32 %v12540_v19, %v10315_v15  ;;  %v12581_v3 = vld [vmem:[#allocation6 + $0x3d4] sm:$0xf0]  ;;  %v12580_v19 = vld [vmem:[#allocation6 + $0x3d4] sm:$0xf] }
 0x423   : > { %4221 = vmatpush.bf16.msrb.mxu1 %v10286_v48  ;;  %v10254_v48 = vor.u32 %v12524_v53, %v10251_v58  ;;  %v3762_v15 = vld [vmem:[#allocation3 + $0x2f] sm:$0xff] }
 0x424   : > { %4198 = vmatpush.bf16.msrb.mxu0 %v10274_v21  ;;  %v10243_v21 = vld [vmem:[#allocation6 + $0x208] sm:$0xf0]  ;;  %v3931_v53 = vpack.c.bf16 %v3928_v35, %v3762_v15  ;;  %v10409_v58 = vld [vmem:[#allocation6 + $0x350] sm:$0xf] }
 0x425   : > { %v10410_v30 = vor.u32 %v12565_v26, %v10409_v58  ;;  %v10441_v35 = vld [vmem:[#allocation6 + $0x390] sm:$0xf]  ;;  %v10443_v58 = vld [vmem:[#allocation6 + $0x398] sm:$0xf0] }
 0x426   : > { %4364 = vmatpush.bf16.msrb.mxu2 %v10338_v51  ;;  %4388 = vmatpush.bf16.msrb.mxu3 %v10342_v11  ;;  %v12522_v51 = vld [vmem:[#allocation6 + $0x204] sm:$0xf]  ;;  %v10310_v11 = vor.u32 %v12538_v62, %v10307_v33  ;;  %v10411_v62 = vld [vmem:[#allocation6 + $0x358] sm:$0xf0]  ;;  %v10465_v33 = vld [vmem:[#allocation6 + $0x3c0] sm:$0xf] }
 0x427   : > { %4222 = vmatpush.bf16.msrb.mxu1 %v10278_v56  ;;  %3871 = vmatmul.bf16.vlgmr.msra.gmra.mxu0 %v3763_v0  ;;  %v10246_v2 = vor.u32 %v12522_v51, %v10243_v21  ;;  %v3764_v56 = vpack.c.bf16 %v3760_v7, %v15128_v34  ;;  %v10481_v34 = vld [vmem:[#allocation6 + $0x3e0] sm:$0xf]  ;;  %v12578_v51 = vld [vmem:[#allocation6 + $0x3c4] sm:$0xf]  ;;  %v10467_v7 = vld [vmem:[#allocation6 + $0x3c8] sm:$0xf0] }
 0x428   : > { %4199 = vmatpush.bf16.msrb.mxu0 %v10266_v47  ;;  %3895 = vmatmul.bf16.vlgmr.msra.gmra.mxu1 %v3763_v0  ;;  %v10494_v47 = vor.u32 %v12584_v10, %v10491_v50  ;;  %v10427_v0 = vld [vmem:[#allocation6 + $0x378] sm:$0xf0]  ;;  %v10470_v21 = vor.u32 %v12578_v51, %v10467_v7  ;;  %v12576_v10 = vld [vmem:[#allocation6 + $0x3b4] sm:$0xf]  ;;  %v10377_v26 = vld [vmem:[#allocation6 + $0x310] sm:$0xf] }
 0x429   : > { %4037 = vmatmul.bf16.vlgmr.msra.gmra.mxu2 %v3929_v63  ;;  %4061 = vmatmul.bf16.vlgmr.msra.gmra.mxu3 %v3929_v63  ;;  %v12583_v63 = vld [vmem:[#allocation6 + $0x3e4] sm:$0xf0]  ;;  %v10459_v50 = vld [vmem:[#allocation6 + $0x3b8] sm:$0xf0] }
 0x42a   : > { %4365 = vmatpush.bf16.msrb.mxu2 %v10330_v37  ;;  %4389 = vmatpush.bf16.msrb.mxu3 %v10334_v1  ;;  %v10425_v37 = vld [vmem:[#allocation6 + $0x370] sm:$0xf]  ;;  %v12569_v1 = vld [vmem:[#allocation6 + $0x374] sm:$0xf0]  ;;  %v10482_v40 = vor.u32 %v12583_v63, %v10481_v34  ;;  %v4092_v51 = vld [vmem:[#allocation3 + $0x28] sm:$0xff] }
 0x42b   : > { %4223 = vmatpush.bf16.msrb.mxu1 %v10270_v13  ;;  %v10426_v22 = vor.u32 %v12569_v1, %v10425_v37  ;;  %v10430_v13 = vor.u32 %v12568_v46, %v10427_v0  ;;  %v10393_v37 = vld [vmem:[#allocation6 + $0x330] sm:$0xf]  ;;  %v12561_v1 = vld [vmem:[#allocation6 + $0x334] sm:$0xf0] }
 0x42c   : > { %4200 = vmatpush.bf16.msrb.mxu0 %v10258_v55  ;;  %v10419_v55 = vld [vmem:[#allocation6 + $0x368] sm:$0xf0]  ;;  %v4090_v46 = vld [vmem:[#allocation3 + $0x18] sm:$0xff]  ;;  %v10394_v0 = vor.u32 %v12561_v1, %v10393_v37 }
 0x42d   : > { %v10422_v38 = vor.u32 %v12566_v32, %v10419_v55  ;;  %v4255_v34 = vld [vmem:[#allocation3 + $0x11] sm:$0xff]  ;;  %v10451_v55 = vld [vmem:[#allocation6 + $0x3a8] sm:$0xf0] }
 0x42e   : > { %4366 = vmatpush.bf16.msrb.mxu2 %v10322_v29  ;;  %4390 = vmatpush.bf16.msrb.mxu3 %v10326_v41  ;;  %v12582_v29 = vld [vmem:[#allocation6 + $0x3e4] sm:$0xf]  ;;  %v10417_v41 = vld [vmem:[#allocation6 + $0x360] sm:$0xf]  ;;  %v10371_v37 = vld [vmem:[#allocation6 + $0x308] sm:$0xf0] }
 0x42f   : > { %4224 = vmatpush.bf16.msrb.mxu1 %v10262_v5  ;;  %v10486_v23 = vor.u32 %v12582_v29, %v10483_v14  ;;  %v10418_v61 = vor.u32 %v12567_v9, %v10417_v41  ;;  %v10473_v5 = vld [vmem:[#allocation6 + $0x3d0] sm:$0xf]  ;;  %v12560_v14 = vld [vmem:[#allocation6 + $0x334] sm:$0xf]  ;;  %v12575_v9 = vld [vmem:[#allocation6 + $0x3a4] sm:$0xf0] }
 0x430   : > { %4201 = vmatpush.bf16.msrb.mxu0 %v10250_v42  ;;  %v10474_v6 = vor.u32 %v12581_v3, %v10473_v5  ;;  %v3765_v42 = vpack.c.bf16 %v3762_v15, %v3926_v57  ;;  %v12563_v57 = vld [vmem:[#allocation6 + $0x344] sm:$0xf0]  ;;  %v10385_v5 = vld [vmem:[#allocation6 + $0x320] sm:$0xf]  ;;  %v10387_v15 = vld [vmem:[#allocation6 + $0x328] sm:$0xf0] }
 0x432   : > { %4367 = vmatpush.bf16.msrb.mxu2 %v10314_v31  ;;  %4391 = vmatpush.bf16.msrb.mxu3 %v10318_v44  ;;  %v10475_v31 = vld [vmem:[#allocation6 + $0x3d8] sm:$0xf0] }
 0x433   : > { %4225 = vmatpush.bf16.msrb.mxu1 %v10254_v48  ;;  %v10478_v44 = vor.u32 %v12580_v19, %v10475_v31  ;;  %v12564_v48 = vld [vmem:[#allocation6 + $0x354] sm:$0xf]  ;;  %v12558_v31 = vld [vmem:[#allocation6 + $0x324] sm:$0xf] }
 0x434   : > { %4202 = vmatpush.bf16.msrb.mxu0 %v10242_v16  ;;  %v10414_v60 = vor.u32 %v12564_v48, %v10411_v62  ;;  %v12562_v16 = vld [vmem:[#allocation6 + $0x344] sm:$0xf]  ;;  %v12557_v48 = vld [vmem:[#allocation6 + $0x314] sm:$0xf0] }
 0x435   : > { %v10378_v62 = vor.u32 %v12557_v48, %v10377_v26 }
 0x436   : > { %4368 = vmatpush.bf16.msrb.mxu2 %v10306_v54  ;;  %4392 = vmatpush.bf16.msrb.mxu3 %v10310_v11  ;;  %v12579_v54 = vld [vmem:[#allocation6 + $0x3c4] sm:$0xf0]  ;;  %v10401_v11 = vld [vmem:[#allocation6 + $0x340] sm:$0xf] }
 0x437   : > { %4226 = vmatpush.bf16.msrb.mxu1 %v10246_v2  ;;  %3876 = vmatmul.bf16.gmra.mxu0 %v3764_v56  ;;  %v10466_v59 = vor.u32 %v12579_v54, %v10465_v33  ;;  %v10403_v2 = vld [vmem:[#allocation6 + $0x348] sm:$0xf0]  ;;  %v12556_v33 = vld [vmem:[#allocation6 + $0x314] sm:$0xf]  ;;  %v10379_v54 = vld [vmem:[#allocation6 + $0x318] sm:$0xf0] }
 0x438   : > { %3900 = vmatmul.bf16.gmra.mxu1 %v3764_v56  ;;  %4527 = vmatpush.bf16.msra.mxu0 %v10426_v22  ;;  %v10402_v56 = vor.u32 %v12563_v57, %v10401_v11  ;;  %v4089_v22 = vld [vmem:[#allocation3 + $0x10] sm:$0xff]  ;;  %v10382_v7 = vor.u32 %v12556_v33, %v10379_v54  ;;  %v12571_v11 = vld [vmem:[#allocation6 + $0x384] sm:$0xf0]  ;;  %v10547_v33 = vld [vmem:[#allocation6 + $0x468] sm:$0xf0] }
 0x439   : > { %4042 = vmatmul.bf16.gmra.mxu2 %v3930_v36  ;;  %4066 = vmatmul.bf16.gmra.mxu3 %v3930_v36  ;;  %v10406_v36 = vor.u32 %v12562_v16, %v10403_v2  ;;  %v4095_v63 = vpack.c.bf16 %v4090_v46, %v4089_v22  ;;  %v15137_v57 = vld [vmem:[#allocation3 + $0x29] sm:$0xff]  ;;  %v12633_v46 = vld [vmem:[#allocation6 + $0xf4] sm:$0xf0] }
 0x43a   : > { %4693 = vmatpush.bf16.msra.mxu2 %v10490_v17  ;;  %4717 = vmatpush.bf16.msra.mxu3 %v10494_v47  ;;  %v10458_v17 = vor.u32 %v12577_v8, %v10457_v49  ;;  %v10462_v47 = vor.u32 %v12576_v10, %v10459_v50  ;;  %v10369_v49 = vld [vmem:[#allocation6 + $0x300] sm:$0xf]  ;;  %v12554_v50 = vld [vmem:[#allocation6 + $0x304] sm:$0xf]  ;;  %v10617_v22 = vld [vmem:[#allocation6 + $0xf0] sm:$0xf] }
 0x43b   : > { %4551 = vmatpush.bf16.msra.mxu1 %v10430_v13  ;;  %v15132_v13 = vld [vmem:[#allocation3 + $0x19] sm:$0xff]  ;;  %v10601_v54 = vld [vmem:[#allocation6 + $0xd0] sm:$0xf] }
 0x43c   : > { %4528 = vmatpush.bf16.msra.mxu0 %v10418_v61  ;;  %v4261_v29 = vpack.c.bf16 %v15132_v13, %v4255_v34  ;;  %v12574_v61 = vld [vmem:[#allocation6 + $0x3a4] sm:$0xf]  ;;  %v10618_v34 = vor.u32 %v12633_v46, %v10617_v22 }
 0x43d   : > { %v10454_v3 = vor.u32 %v12574_v61, %v10451_v55  ;;  %v12631_v61 = vld [vmem:[#allocation6 + $0xe4] sm:$0xf0] }
 0x43e   : > { %4694 = vmatpush.bf16.msra.mxu2 %v10482_v40  ;;  %4718 = vmatpush.bf16.msra.mxu3 %v10486_v23  ;;  %v10395_v40 = vld [vmem:[#allocation6 + $0x338] sm:$0xf0]  ;;  %v10449_v23 = vld [vmem:[#allocation6 + $0x3a0] sm:$0xf] }
 0x43f   : > { %4552 = vmatpush.bf16.msra.mxu1 %v10422_v38  ;;  %v10398_v41 = vor.u32 %v12560_v14, %v10395_v40  ;;  %v10450_v32 = vor.u32 %v12575_v9, %v10449_v23  ;;  %v12559_v38 = vld [vmem:[#allocation6 + $0x324] sm:$0xf0]  ;;  %v10553_v14 = vld [vmem:[#allocation6 + $0x470] sm:$0xf]  ;;  %v12601_v40 = vld [vmem:[#allocation6 + $0x474] sm:$0xf0] }
 0x440   : > { %4529 = vmatpush.bf16.msra.mxu0 %v10410_v30  ;;  %v10386_v19 = vor.u32 %v12559_v38, %v10385_v5  ;;  %v12600_v23 = vld [vmem:[#allocation6 + $0x474] sm:$0xf]  ;;  %v10555_v9 = vld [vmem:[#allocation6 + $0x478] sm:$0xf0]  ;;  %v10611_v38 = vld [vmem:[#allocation6 + $0xe8] sm:$0xf0] }
 0x441   : > { %v10558_v55 = vor.u32 %v12600_v23, %v10555_v9  ;;  %v12595_v23 = vld [vmem:[#allocation6 + $0x444] sm:$0xf0]  ;;  %v10531_v9 = vld [vmem:[#allocation6 + $0x448] sm:$0xf0] }
 0x442   : > { %4695 = vmatpush.bf16.msra.mxu2 %v10474_v6  ;;  %4719 = vmatpush.bf16.msra.mxu3 %v10478_v44  ;;  %v10390_v6 = vor.u32 %v12558_v31, %v10387_v15  ;;  %v12573_v44 = vld [vmem:[#allocation6 + $0x394] sm:$0xf0]  ;;  %v4093_v31 = vld [vmem:[#allocation3 + $0x30] sm:$0xff] }
 0x443   : > { %4553 = vmatpush.bf16.msra.mxu1 %v10414_v60  ;;  %v10433_v60 = vld [vmem:[#allocation6 + $0x380] sm:$0xf]  ;;  %v4094_v15 = vld [vmem:[#allocation3 + $0x38] sm:$0xff] }
 0x444   : > { %4530 = vmatpush.bf16.msra.mxu0 %v10402_v56  ;;  %v10434_v16 = vor.u32 %v12571_v11, %v10433_v60  ;;  %v12570_v56 = vld [vmem:[#allocation6 + $0x384] sm:$0xf] }
 0x446   : > { %4696 = vmatpush.bf16.msra.mxu2 %v10466_v59  ;;  %4720 = vmatpush.bf16.msra.mxu3 %v10470_v21  ;;  %v4091_v59 = vld [vmem:[#allocation3 + $0x20] sm:$0xff] }
 0x447   : > { %3881 = vmatmul.bf16.gmra.mxu0 %v3765_v42  ;;  %4554 = vmatpush.bf16.msra.mxu1 %v10406_v36  ;;  %v15135_v21 = vld [vmem:[#allocation3 + $0x21] sm:$0xff]  ;;  %v4096_v2 = vpack.c.bf16 %v4092_v51, %v4091_v59  ;;  %v10435_v36 = vld [vmem:[#allocation6 + $0x388] sm:$0xf0]  ;;  %v12629_v59 = vld [vmem:[#allocation6 + $0xd4] sm:$0xf0] }
 0x448   : > { %3905 = vmatmul.bf16.gmra.mxu1 %v3765_v42  ;;  %4531 = vmatpush.bf16.msra.mxu0 %v10394_v0  ;;  %v12572_v42 = vld [vmem:[#allocation6 + $0x394] sm:$0xf]  ;;  %v4262_v8 = vpack.c.bf16 %v15137_v57, %v15135_v21  ;;  %v10438_v10 = vor.u32 %v12570_v56, %v10435_v36  ;;  %v10602_v11 = vor.u32 %v12629_v59, %v10601_v54  ;;  %v12597_v56 = vld [vmem:[#allocation6 + $0x454] sm:$0xf0]  ;;  %v10521_v54 = vld [vmem:[#allocation6 + $0x430] sm:$0xf] }
 0x449   : > { %4047 = vmatmul.bf16.gmra.mxu2 %v3931_v53  ;;  %4071 = vmatmul.bf16.gmra.mxu3 %v3931_v53  ;;  %v10442_v53 = vor.u32 %v12573_v44, %v10441_v35  ;;  %v10446_v30 = vor.u32 %v12572_v42, %v10443_v58  ;;  %v12632_v0 = vld [vmem:[#allocation6 + $0xf4] sm:$0xf]  ;;  %v12599_v35 = vld [vmem:[#allocation6 + $0x464] sm:$0xf0]  ;;  %v15143_v42 = vld [vmem:[#allocation3 + $0x39] sm:$0xff]  ;;  %v4097_v58 = vpack.c.bf16 %v4094_v15, %v4093_v31 }
 0x44a   : > { %4697 = vmatpush.bf16.msra.mxu2 %v10458_v17  ;;  %4721 = vmatpush.bf16.msra.mxu3 %v10462_v47  ;;  %v12555_v17 = vld [vmem:[#allocation6 + $0x304] sm:$0xf0]  ;;  %v10374_v47 = vor.u32 %v12554_v50, %v10371_v37  ;;  %v15141_v44 = vld [vmem:[#allocation3 + $0x31] sm:$0xff]  ;;  %v4587_v31 = vld [vmem:[#allocation3 + $0x1a] sm:$0xff] }
 0x44b   : > { %4555 = vmatpush.bf16.msra.mxu1 %v10398_v41  ;;  %v10370_v1 = vor.u32 %v12555_v17, %v10369_v49  ;;  %v10554_v41 = vor.u32 %v12601_v40, %v10553_v14  ;;  %v4263_v48 = vpack.c.bf16 %v15143_v42, %v15141_v44  ;;  %v12628_v51 = vld [vmem:[#allocation6 + $0xd4] sm:$0xf]  ;;  %v12627_v17 = vld [vmem:[#allocation6 + $0xc4] sm:$0xf0]  ;;  %v10529_v14 = vld [vmem:[#allocation6 + $0x440] sm:$0xf] }
 0x44c   : > { %4532 = vmatpush.bf16.msra.mxu0 %v10386_v19  ;;  %v10545_v19 = vld [vmem:[#allocation6 + $0x460] sm:$0xf]  ;;  %v12596_v36 = vld [vmem:[#allocation6 + $0x454] sm:$0xf] }
 0x44d   : > { %v4588_v15 = vld [vmem:[#allocation3 + $0x22] sm:$0xff] }
 0x44e   : > { %4698 = vmatpush.bf16.msra.mxu2 %v10450_v32  ;;  %4722 = vmatpush.bf16.msra.mxu3 %v10454_v3  ;;  %v10609_v32 = vld [vmem:[#allocation6 + $0xe0] sm:$0xf]  ;;  %v12630_v3 = vld [vmem:[#allocation6 + $0xe4] sm:$0xf] }
 0x44f   : > { %4556 = vmatpush.bf16.msra.mxu1 %v10390_v6  ;;  %v10610_v5 = vor.u32 %v12631_v61, %v10609_v32  ;;  %v10614_v6 = vor.u32 %v12630_v3, %v10611_v38  ;;  %v10530_v32 = vor.u32 %v12595_v23, %v10529_v14  ;;  %v12624_v3 = vld [vmem:[#allocation6 + $0xb4] sm:$0xf]  ;;  %v10569_v14 = vld [vmem:[#allocation6 + $0x90] sm:$0xf] }
 0x450   : > { %4533 = vmatpush.bf16.msra.mxu0 %v10378_v62  ;;  %v12598_v62 = vld [vmem:[#allocation6 + $0x464] sm:$0xf] }
 0x451   : > { %v10550_v60 = vor.u32 %v12598_v62, %v10547_v33 }
 0x452   : > { %4699 = vmatpush.bf16.msra.mxu2 %v10442_v53  ;;  %4723 = vmatpush.bf16.msra.mxu3 %v10446_v30  ;;  %v10546_v53 = vor.u32 %v12599_v35, %v10545_v19  ;;  %v10587_v19 = vld [vmem:[#allocation6 + $0xb8] sm:$0xf0] }
 0x453   : > { %4557 = vmatpush.bf16.msra.mxu1 %v10382_v7  ;;  %v10603_v7 = vld [vmem:[#allocation6 + $0xd8] sm:$0xf0] }
 0x454   : > { %4534 = vmatpush.bf16.msra.mxu0 %v10370_v1 }
 0x456   : > { %4700 = vmatpush.bf16.msra.mxu2 %v10434_v16  ;;  %4724 = vmatpush.bf16.msra.mxu3 %v10438_v10  ;;  %v10606_v16 = vor.u32 %v12628_v51, %v10603_v7  ;;  %v10593_v10 = vld [vmem:[#allocation6 + $0xc0] sm:$0xf]  ;;  %v12592_v51 = vld [vmem:[#allocation6 + $0x434] sm:$0xf]  ;;  %v10523_v7 = vld [vmem:[#allocation6 + $0x438] sm:$0xf0] }
 0x457   : > { %4203 = vmatmul.bf16.vlgmr.msrb.gmra.mxu0 %v4095_v63  ;;  %4558 = vmatpush.bf16.msra.mxu1 %v10374_v47  ;;  %v10594_v1 = vor.u32 %v12627_v17, %v10593_v10 }
 0x458   : > { %4227 = vmatmul.bf16.vlgmr.msrb.gmra.mxu1 %v4095_v63  ;;  %v10619_v63 = vld [vmem:[#allocation6 + $0xf8] sm:$0xf0]  ;;  %4859 = vmatpush.bf16.msrb.mxu0 %v10554_v41  ;;  %v12594_v41 = vld [vmem:[#allocation6 + $0x444] sm:$0xf] }
 0x459   : > { %4369 = vmatmul.bf16.vlgmr.msrb.gmra.mxu2 %v4261_v29  ;;  %4393 = vmatmul.bf16.vlgmr.msrb.gmra.mxu3 %v4261_v29  ;;  %v10622_v29 = vor.u32 %v12632_v0, %v10619_v63  ;;  %v12626_v63 = vld [vmem:[#allocation6 + $0xc4] sm:$0xf]  ;;  %v10534_v61 = vor.u32 %v12594_v41, %v10531_v9  ;;  %v12620_v41 = vld [vmem:[#allocation6 + $0x94] sm:$0xf]  ;;  %v10571_v9 = vld [vmem:[#allocation6 + $0x98] sm:$0xf0] }
 0x45a   : > { %5102 = vmatpush.bf16.msrb.mxu2 %v10618_v34 }
 0x45b   : > { %5126 = vmatpush.bf16.msrb.mxu3 %v10622_v29  ;;  %4883 = vmatpush.bf16.msrb.mxu1 %v10558_v55  ;;  %v10595_v29 = vld [vmem:[#allocation6 + $0xc8] sm:$0xf0]  ;;  %v10585_v55 = vld [vmem:[#allocation6 + $0xb0] sm:$0xf] }
 0x45c   : > { %4860 = vmatpush.bf16.msrb.mxu0 %v10546_v53  ;;  %v10598_v40 = vor.u32 %v12626_v63, %v10595_v29  ;;  %v4427_v53 = vpack.c.bf16 %v15135_v21, %v15132_v13  ;;  %v12622_v21 = vld [vmem:[#allocation6 + $0xa4] sm:$0xf] }
 0x45e   : > { %5103 = vmatpush.bf16.msrb.mxu2 %v10610_v5  ;;  %v12625_v5 = vld [vmem:[#allocation6 + $0xb4] sm:$0xf0] }
 0x45f   : > { %5127 = vmatpush.bf16.msrb.mxu3 %v10614_v6  ;;  %4884 = vmatpush.bf16.msrb.mxu1 %v10550_v60  ;;  %v10586_v38 = vor.u32 %v12625_v5, %v10585_v55  ;;  %v10590_v6 = vor.u32 %v12624_v3, %v10587_v19  ;;  %v12593_v60 = vld [vmem:[#allocation6 + $0x434] sm:$0xf0]  ;;  %v12588_v5 = vld [vmem:[#allocation6 + $0x414] sm:$0xf]  ;;  %v10507_v3 = vld [vmem:[#allocation6 + $0x418] sm:$0xf0] }
 0x460   : > { %v10522_v59 = vor.u32 %v12593_v60, %v10521_v54  ;;  %v12589_v55 = vld [vmem:[#allocation6 + $0x414] sm:$0xf0]  ;;  %v10510_v19 = vor.u32 %v12588_v5, %v10507_v3  ;;  %v10497_v54 = vld [vmem:[#allocation6 + $0x400] sm:$0xf]  ;;  %v12647_v5 = vld [vmem:[#allocation6 + $0x164] sm:$0xf0] }
 0x461   : > { %v12646_v3 = vld [vmem:[#allocation6 + $0x164] sm:$0xf] }
 0x462   : > { %5104 = vmatpush.bf16.msrb.mxu2 %v10602_v11  ;;  %v10577_v11 = vld [vmem:[#allocation6 + $0xa0] sm:$0xf] }
 0x463   : > { %5128 = vmatpush.bf16.msrb.mxu3 %v10606_v16  ;;  %v10526_v16 = vor.u32 %v12592_v51, %v10523_v7 }
 0x466   : > { %5105 = vmatpush.bf16.msrb.mxu2 %v10594_v1 }
 0x467   : > { %4208 = vmatmul.bf16.gmra.mxu0 %v4096_v2  ;;  %5129 = vmatpush.bf16.msrb.mxu3 %v10598_v40  ;;  %v12621_v40 = vld [vmem:[#allocation6 + $0x94] sm:$0xf0] }
 0x468   : > { %4232 = vmatmul.bf16.gmra.mxu1 %v4096_v2  ;;  %v10537_v2 = vld [vmem:[#allocation6 + $0x450] sm:$0xf]  ;;  %v10570_v23 = vor.u32 %v12621_v40, %v10569_v14 }
 0x469   : > { %4374 = vmatmul.bf16.gmra.mxu2 %v4262_v8  ;;  %4398 = vmatmul.bf16.gmra.mxu3 %v4262_v8  ;;  %v10538_v49 = vor.u32 %v12597_v56, %v10537_v2  ;;  %v10539_v8 = vld [vmem:[#allocation6 + $0x458] sm:$0xf0]  ;;  %v12623_v2 = vld [vmem:[#allocation6 + $0xa4] sm:$0xf0]  ;;  %v10579_v56 = vld [vmem:[#allocation6 + $0xa8] sm:$0xf0] }
 0x46a   : > { %v10542_v37 = vor.u32 %v12596_v36, %v10539_v8  ;;  %5106 = vmatpush.bf16.msrb.mxu2 %v10586_v38  ;;  %v10578_v13 = vor.u32 %v12623_v2, %v10577_v11  ;;  %v10513_v36 = vld [vmem:[#allocation6 + $0x420] sm:$0xf]  ;;  %v12591_v8 = vld [vmem:[#allocation6 + $0x424] sm:$0xf0]  ;;  %v12586_v2 = vld [vmem:[#allocation6 + $0x404] sm:$0xf] }
 0x46b   : > { %4861 = vmatpush.bf16.msrb.mxu0 %v10538_v49  ;;  %5130 = vmatpush.bf16.msrb.mxu3 %v10590_v6  ;;  %v10582_v49 = vor.u32 %v12622_v21, %v10579_v56  ;;  %v10514_v17 = vor.u32 %v12591_v8, %v10513_v36  ;;  %v4589_v6 = vld [vmem:[#allocation3 + $0x2a] sm:$0xff]  ;;  %v12648_v8 = vld [vmem:[#allocation6 + $0x174] sm:$0xf] }
 0x46c   : > { %4885 = vmatpush.bf16.msrb.mxu1 %v10542_v37  ;;  %v10515_v37 = vld [vmem:[#allocation6 + $0x428] sm:$0xf0]  ;;  %v10681_v40 = vld [vmem:[#allocation6 + $0x70] sm:$0xf] }
 0x46e   : > { %5107 = vmatpush.bf16.msrb.mxu2 %v10578_v13  ;;  %v10499_v13 = vld [vmem:[#allocation6 + $0x408] sm:$0xf0] }
 0x46f   : > { %4862 = vmatpush.bf16.msrb.mxu0 %v10530_v32  ;;  %5131 = vmatpush.bf16.msrb.mxu3 %v10582_v49  ;;  %v10505_v32 = vld [vmem:[#allocation6 + $0x410] sm:$0xf]  ;;  %v10502_v49 = vor.u32 %v12586_v2, %v10499_v13  ;;  %v12614_v13 = vld [vmem:[#allocation6 + $0x64] sm:$0xf] }
 0x470   : > { %4886 = vmatpush.bf16.msrb.mxu1 %v10534_v61  ;;  %v10574_v61 = vor.u32 %v12620_v41, %v10571_v9  ;;  %v10506_v38 = vor.u32 %v12589_v55, %v10505_v32  ;;  %v12616_v9 = vld [vmem:[#allocation6 + $0x74] sm:$0xf]  ;;  %v10683_v32 = vld [vmem:[#allocation6 + $0x78] sm:$0xf0] }
 0x471   : > { %v10686_v55 = vor.u32 %v12616_v9, %v10683_v32 }
 0x472   : > { %5108 = vmatpush.bf16.msrb.mxu2 %v10570_v23  ;;  %v12617_v23 = vld [vmem:[#allocation6 + $0x74] sm:$0xf0] }
 0x473   : > { %4863 = vmatpush.bf16.msrb.mxu0 %v10522_v59  ;;  %5132 = vmatpush.bf16.msrb.mxu3 %v10574_v61  ;;  %v10682_v41 = vor.u32 %v12617_v23, %v10681_v40  ;;  %v10737_v61 = vld [vmem:[#allocation6 + $0x160] sm:$0xf] }
 0x474   : > { %v3590_v26 = vpop.f32.mrf.mxu0  ;;  %4887 = vmatpush.bf16.msrb.mxu1 %v10526_v16  ;;  %v12587_v16 = vld [vmem:[#allocation6 + $0x404] sm:$0xf0] }
 0x475   : > { %v3614_v30 = vpop.f32.mrf.mxu1  ;;  %v10498_v36 = vor.u32 %v12587_v16, %v10497_v54 }
 0x477   : > { %4213 = vmatmul.bf16.gmra.mxu0 %v4097_v58 }
 0x478   : > { %4237 = vmatmul.bf16.gmra.mxu1 %v4097_v58  ;;  %4864 = vmatpush.bf16.msrb.mxu0 %v10514_v17  ;;  %v10747_v17 = vld [vmem:[#allocation6 + $0x178] sm:$0xf0] }
 0x479   : > { %4379 = vmatmul.bf16.gmra.mxu2 %v4263_v48  ;;  %4403 = vmatmul.bf16.gmra.mxu3 %v4263_v48 }
 0x47c   : > { %v3718_v50 = vpop.f32.mrf.mxu2  ;;  %v3742_v22 = vpop.f32.mrf.mxu3  ;;  %4865 = vmatpush.bf16.msrb.mxu0 %v10506_v38  ;;  %v10739_v38 = vld [vmem:[#allocation6 + $0x168] sm:$0xf0] }
 0x47d   : > { %v15147_v47 = vadd.f32 %v3718_v50, %v3590_v26  ;;  %v3592_v46 = vpop.f32.mrf.mxu0  ;;  %v15149_v0 = vadd.f32 %v3742_v22, %v3614_v30  ;;  %v3616_v34 = vpop.f32.mrf.mxu1  ;;  %v4593_v30 = vpack.c.bf16 %v4588_v15, %v4587_v31  ;;  %v12590_v50 = vld [vmem:[#allocation6 + $0x424] sm:$0xf]  ;;  %v10561_v31 = vld [vmem:[#allocation6 + $0x80] sm:$0xf]  ;;  %v12619_v15 = vld [vmem:[#allocation6 + $0x84] sm:$0xf0] }
 0x480   : > { %4866 = vmatpush.bf16.msrb.mxu0 %v10498_v36  ;;  %v10729_v36 = vld [vmem:[#allocation6 + $0x150] sm:$0xf] }
 0x484   : > { %v3720_v35 = vpop.f32.mrf.mxu2  ;;  %v3744_v26 = vpop.f32.mrf.mxu3 }
 0x485   : > { %v15153_v58 = vadd.f32 %v3720_v35, %v3592_v46  ;;  %v3595_v48 = vpop.f32.mrf.mxu0  ;;  %v15155_v62 = vadd.f32 %v3744_v26, %v3616_v34  ;;  %v3619_v33 = vpop.f32.mrf.mxu1  ;;  %v10518_v34 = vor.u32 %v12590_v50, %v10515_v37  ;;  %v4590_v35 = vld [vmem:[#allocation3 + $0x32] sm:$0xff]  ;;  %v10750_v37 = vor.u32 %v12648_v8, %v10747_v17 }
 0x486   : > { %v4594_v7 = vpack.c.bf16 %v4590_v35, %v4589_v6  ;;  %v10673_v6 = vld [vmem:[#allocation6 + $0x60] sm:$0xf]  ;;  %v12615_v35 = vld [vmem:[#allocation6 + $0x64] sm:$0xf0]  ;;  %v12644_v8 = vld [vmem:[#allocation6 + $0x154] sm:$0xf] }
 0x487   : > { %4535 = vmatmul.bf16.vlgmr.msra.gmra.mxu0 %v4427_v53  ;;  %4888 = vmatpush.bf16.msrb.mxu1 %v10518_v34 }
 0x488   : > { %4559 = vmatmul.bf16.vlgmr.msra.gmra.mxu1 %v4427_v53  ;;  %v10562_v53 = vor.u32 %v12619_v15, %v10561_v31  ;;  %5230 = vmatpush.bf16.msra.mxu0 %v10682_v41  ;;  %v10738_v31 = vor.u32 %v12647_v5, %v10737_v61  ;;  %v10742_v15 = vor.u32 %v12646_v3, %v10739_v38  ;;  %v12642_v38 = vld [vmem:[#allocation6 + $0x144] sm:$0xf] }
 0x489   : > { %4701 = vmatmul.bf16.vlgmr.msra.gmra.mxu2 %v4593_v30  ;;  %4725 = vmatmul.bf16.vlgmr.msra.gmra.mxu3 %v4593_v30  ;;  %v12618_v30 = vld [vmem:[#allocation6 + $0x84] sm:$0xf] }
 0x48a   : > { %5109 = vmatpush.bf16.msrb.mxu2 %v10562_v53  ;;  %v4591_v53 = vld [vmem:[#allocation3 + $0x3a] sm:$0xff] }
 0x48b   : > { %4889 = vmatpush.bf16.msrb.mxu1 %v10510_v19  ;;  %v4426_v19 = vld [vmem:[#allocation3 + $0x41] sm:$0xff] }
 0x48c   : > { %v3723_v10 = vpop.f32.mrf.mxu2  ;;  %v3747_v22 = vpop.f32.mrf.mxu3 }
 0x48d   : > { %v15157_v1 = vadd.f32 %v3723_v10, %v3595_v48  ;;  %v3597_v46 = vpop.f32.mrf.mxu0  ;;  %v15159_v63 = vadd.f32 %v3747_v22, %v3619_v33  ;;  %v3621_v29 = vpop.f32.mrf.mxu1  ;;  %v4428_v48 = vpack.c.bf16 %v15141_v44, %v15137_v57  ;;  %v10563_v33 = vld [vmem:[#allocation6 + $0x88] sm:$0xf0]  ;;  %v10745_v57 = vld [vmem:[#allocation6 + $0x170] sm:$0xf]  ;;  %v12649_v44 = vld [vmem:[#allocation6 + $0x174] sm:$0xf0] }
 0x48e   : > { %v10566_v11 = vor.u32 %v12618_v30, %v10563_v33  ;;  %v10746_v10 = vor.u32 %v12649_v44, %v10745_v57  ;;  %v4429_v33 = vpack.c.bf16 %v4426_v19, %v15143_v42  ;;  %v12645_v44 = vld [vmem:[#allocation6 + $0x154] sm:$0xf0]  ;;  %v10731_v42 = vld [vmem:[#allocation6 + $0x158] sm:$0xf0]  ;;  %v10723_v19 = vld [vmem:[#allocation6 + $0x148] sm:$0xf0] }
 0x48f   : > { %4890 = vmatpush.bf16.msrb.mxu1 %v10502_v49  ;;  %v10734_v17 = vor.u32 %v12644_v8, %v10731_v42 }
 0x490   : > { %5133 = vmatpush.bf16.msrb.mxu3 %v10566_v11  ;;  %5383 = vmatpush.bf16.msra.mxu2 %v10746_v10  ;;  %v10730_v10 = vor.u32 %v12645_v44, %v10729_v36 }
 0x493   : > { %5254 = vmatpush.bf16.msra.mxu1 %v10686_v55 }
 0x494   : > { %v3725_v26 = vpop.f32.mrf.mxu2  ;;  %v3749_v59 = vpop.f32.mrf.mxu3  ;;  %5407 = vmatpush.bf16.msra.mxu3 %v10750_v37  ;;  %5384 = vmatpush.bf16.msra.mxu2 %v10738_v31  ;;  %v12613_v37 = vld [vmem:[#allocation6 + $0x54] sm:$0xf0] }
 0x495   : > { %v15163_v60 = vadd.f32 %v3725_v26, %v3597_v46  ;;  %v3600_v51 = vpop.f32.mrf.mxu0  ;;  %v15165_v21 = vadd.f32 %v3749_v59, %v3621_v29  ;;  %v3624_v56 = vpop.f32.mrf.mxu1  ;;  %v4592_v26 = vld [vmem:[#allocation3 + $0x42] sm:$0xff] }
 0x497   : > { %4540 = vmatmul.bf16.gmra.mxu0 %v4428_v48 }
 0x498   : > { %4564 = vmatmul.bf16.gmra.mxu1 %v4428_v48  ;;  %v10674_v48 = vor.u32 %v12615_v35, %v10673_v6  ;;  %5408 = vmatpush.bf16.msra.mxu3 %v10742_v15  ;;  %v4753_v15 = vld [vmem:[#allocation3 + $0x1b] sm:$0xff]  ;;  %v10726_v6 = vor.u32 %v12642_v38, %v10723_v19  ;;  %v12607_v38 = vld [vmem:[#allocation6 + $0x24] sm:$0xf0] }
 0x499   : > { %4706 = vmatmul.bf16.gmra.mxu2 %v4594_v7  ;;  %4730 = vmatmul.bf16.gmra.mxu3 %v4594_v7  ;;  %v4595_v7 = vpack.c.bf16 %v4592_v26, %v4591_v53  ;;  %v10657_v35 = vld [vmem:[#allocation6 + $0x40] sm:$0xf]  ;;  %v12611_v53 = vld [vmem:[#allocation6 + $0x44] sm:$0xf0]  ;;  %v12610_v26 = vld [vmem:[#allocation6 + $0x44] sm:$0xf] }
 0x49a   : > { %5231 = vmatpush.bf16.msra.mxu0 %v10674_v48  ;;  %5385 = vmatpush.bf16.msra.mxu2 %v10730_v10  ;;  %v10658_v48 = vor.u32 %v12611_v53, %v10657_v35 }
 0x49c   : > { %v3728_v50 = vpop.f32.mrf.mxu2  ;;  %v3752_v46 = vpop.f32.mrf.mxu3  ;;  %5409 = vmatpush.bf16.msra.mxu3 %v10734_v17 }
 0x49d   : > { %v15167_v22 = vadd.f32 %v3728_v50, %v3600_v51  ;;  %v3602_v34 = vpop.f32.mrf.mxu0  ;;  %v15169_v29 = vadd.f32 %v3752_v46, %v3624_v56  ;;  %v3626_v14 = vpop.f32.mrf.mxu1  ;;  %v10675_v56 = vld [vmem:[#allocation6 + $0x68] sm:$0xf0]  ;;  %v10665_v50 = vld [vmem:[#allocation6 + $0x50] sm:$0xf] }
 0x49e   : > { %v10678_v57 = vor.u32 %v12614_v13, %v10675_v56  ;;  %v10666_v46 = vor.u32 %v12613_v37, %v10665_v50  ;;  %v4997_v13 = vld [vmem:[#allocation3 + $0x36] sm:$0xff]  ;;  %v4998_v56 = vld [vmem:[#allocation3 + $0x3e] sm:$0xff]  ;;  %v10649_v37 = vld [vmem:[#allocation6 + $0x30] sm:$0xf] }
 0x49f   : > { %v5003_v42 = vpack.c.bf16 %v4998_v56, %v4997_v13  ;;  %v10699_v13 = vld [vmem:[#allocation6 + $0x118] sm:$0xf0]  ;;  %v10633_v56 = vld [vmem:[#allocation6 + $0x10] sm:$0xf] }
 0x4a0   : > { %5255 = vmatpush.bf16.msra.mxu1 %v10678_v57  ;;  %5232 = vmatpush.bf16.msra.mxu0 %v10666_v46 }
 0x4a1   : > { %5410 = vmatpush.bf16.msra.mxu3 %v10726_v6 }
 0x4a4   : > { %v3730_v30 = vpop.f32.mrf.mxu2  ;;  %v3754_v59 = vpop.f32.mrf.mxu3  ;;  %5233 = vmatpush.bf16.msra.mxu0 %v10658_v48 }
 0x4a5   : > { %v15172_v54 = vadd.f32 %v3730_v30, %v3602_v34  ;;  %v3872_v51 = vpop.f32.mrf.mxu0  ;;  %v15174_v11 = vadd.f32 %v3754_v59, %v3626_v14  ;;  %v3896_v2 = vpop.f32.mrf.mxu1  ;;  %v10667_v34 = vld [vmem:[#allocation6 + $0x58] sm:$0xf0]  ;;  %v10721_v14 = vld [vmem:[#allocation6 + $0x140] sm:$0xf]  ;;  %v10659_v30 = vld [vmem:[#allocation6 + $0x48] sm:$0xf0] }
 0x4a6   : > { %v3911_v16 = vadd.f32 %v3872_v51, %v15147_v47  ;;  %v3912_v49 = vadd.f32 %v3896_v2, %v15149_v0  ;;  %v12612_v47 = vld [vmem:[#allocation6 + $0x54] sm:$0xf]  ;;  %v12643_v0 = vld [vmem:[#allocation6 + $0x144] sm:$0xf0]  ;;  %v12641_v59 = vld [vmem:[#allocation6 + $0x134] sm:$0xf0] }
 0x4a7   : > { %4545 = vmatmul.bf16.gmra.mxu0 %v4429_v33  ;;  %v10670_v23 = vor.u32 %v12612_v47, %v10667_v34  ;;  %v10722_v41 = vor.u32 %v12643_v0, %v10721_v14  ;;  %v4754_v51 = vld [vmem:[#allocation3 + $0x23] sm:$0xff]  ;;  %v10715_v2 = vld [vmem:[#allocation6 + $0x138] sm:$0xf0]  ;;  %v12609_v47 = vld [vmem:[#allocation6 + $0x34] sm:$0xf0] }
 0x4a8   : > { %4569 = vmatmul.bf16.gmra.mxu1 %v4429_v33  ;;  %v10713_v33 = vld [vmem:[#allocation6 + $0x130] sm:$0xf]  ;;  %v10650_v34 = vor.u32 %v12609_v47, %v10649_v37  ;;  %v12608_v14 = vld [vmem:[#allocation6 + $0x34] sm:$0xf]  ;;  %v10651_v0 = vld [vmem:[#allocation6 + $0x38] sm:$0xf0] }
 0x4a9   : > { %4711 = vmatmul.bf16.gmra.mxu2 %v4595_v7  ;;  %4735 = vmatmul.bf16.gmra.mxu3 %v4595_v7  ;;  %v10662_v7 = vor.u32 %v12610_v26, %v10659_v30  ;;  %v4999_v37 = vld [vmem:[#allocation3 + $0x46] sm:$0xff]  ;;  %v5000_v47 = vld [vmem:[#allocation3 + $0x4e] sm:$0xff] }
 0x4aa   : > { %5256 = vmatpush.bf16.msra.mxu1 %v10670_v23  ;;  %5386 = vmatpush.bf16.msra.mxu2 %v10722_v41  ;;  %v10654_v23 = vor.u32 %v12608_v14, %v10651_v0  ;;  %v12639_v41 = vld [vmem:[#allocation6 + $0x124] sm:$0xf0]  ;;  %v12634_v14 = vld [vmem:[#allocation6 + $0x104] sm:$0xf]  ;;  %v10691_v0 = vld [vmem:[#allocation6 + $0x108] sm:$0xf0] }
 0x4ab   : > { %5234 = vmatpush.bf16.msra.mxu0 %v10650_v34 }
 0x4ac   : > { %v4038_v40 = vpop.f32.mrf.mxu2  ;;  %v4062_v32 = vpop.f32.mrf.mxu3 }
 0x4ad   : > { %v15178_v9 = vadd.f32 %v4038_v40, %v3911_v16  ;;  %v3874_v61 = vpop.f32.mrf.mxu0  ;;  %v15180_v55 = vadd.f32 %v4062_v32, %v3912_v49  ;;  %v3898_v3 = vpop.f32.mrf.mxu1  ;;  %v12640_v16 = vld [vmem:[#allocation6 + $0x134] sm:$0xf]  ;;  %v4759_v49 = vpack.c.bf16 %v4754_v51, %v4753_v15  ;;  %v10705_v40 = vld [vmem:[#allocation6 + $0x120] sm:$0xf]  ;;  %v10643_v15 = vld [vmem:[#allocation6 + $0x28] sm:$0xf0] }
 0x4ae   : > { %v3913_v5 = vadd.f32 %v3874_v61, %v15153_v58  ;;  %v3914_v31 = vadd.f32 %v3898_v3, %v15155_v62  ;;  %v10714_v58 = vor.u32 %v12641_v59, %v10713_v33  ;;  %v10718_v62 = vor.u32 %v12640_v16, %v10715_v2  ;;  %5257 = vmatpush.bf16.msra.mxu1 %v10662_v7  ;;  %v12638_v61 = vld [vmem:[#allocation6 + $0x124] sm:$0xf]  ;;  %v10697_v59 = vld [vmem:[#allocation6 + $0x110] sm:$0xf]  ;;  %v12637_v51 = vld [vmem:[#allocation6 + $0x114] sm:$0xf0] }
 0x4af   : > { %v10706_v32 = vor.u32 %v12639_v41, %v10705_v40  ;;  %v10698_v16 = vor.u32 %v12637_v51, %v10697_v59  ;;  %v12636_v2 = vld [vmem:[#allocation6 + $0x114] sm:$0xf]  ;;  %v10625_v40 = vld [vmem:[#allocation6] sm:$0xf]  ;;  %v10875_v51 = vld [vmem:[#allocation6 + $0x278] sm:$0xf0] }
 0x4b0   : > { %5387 = vmatpush.bf16.msra.mxu2 %v10714_v58  ;;  %5411 = vmatpush.bf16.msra.mxu3 %v10718_v62  ;;  %v4755_v58 = vld [vmem:[#allocation3 + $0x2b] sm:$0xff]  ;;  %v10702_v62 = vor.u32 %v12636_v2, %v10699_v13 }
 0x4b2   : > { %5258 = vmatpush.bf16.msra.mxu1 %v10654_v23 }
 0x4b4   : > { %v4040_v36 = vpop.f32.mrf.mxu2  ;;  %v4064_v44 = vpop.f32.mrf.mxu3  ;;  %5388 = vmatpush.bf16.msra.mxu2 %v10706_v32 }
 0x4b5   : > { %v15184_v57 = vadd.f32 %v4040_v36, %v3913_v5  ;;  %v3877_v8 = vpop.f32.mrf.mxu0  ;;  %v15186_v10 = vadd.f32 %v4064_v44, %v3914_v31  ;;  %v3901_v50 = vpop.f32.mrf.mxu1  ;;  %v10707_v5 = vld [vmem:[#allocation6 + $0x128] sm:$0xf0]  ;;  %v12606_v31 = vld [vmem:[#allocation6 + $0x24] sm:$0xf]  ;;  %v12605_v36 = vld [vmem:[#allocation6 + $0x14] sm:$0xf0] }
 0x4b6   : > { %v3915_v17 = vadd.f32 %v3877_v8, %v15157_v1  ;;  %v3916_v46 = vadd.f32 %v3901_v50, %v15159_v63  ;;  %v10641_v1 = vld [vmem:[#allocation6 + $0x20] sm:$0xf]  ;;  %v10710_v3 = vor.u32 %v12638_v61, %v10707_v5  ;;  %v10646_v26 = vor.u32 %v12606_v31, %v10643_v15  ;;  %v10635_v44 = vld [vmem:[#allocation6 + $0x18] sm:$0xf0]  ;;  %v4756_v8 = vld [vmem:[#allocation3 + $0x33] sm:$0xff] }
 0x4b7   : > { %4867 = vmatmul.bf16.vlgmr.msrb.gmra.mxu0 %v4759_v49  ;;  %v10642_v19 = vor.u32 %v12607_v38, %v10641_v1  ;;  %v12635_v50 = vld [vmem:[#allocation6 + $0x104] sm:$0xf0]  ;;  %v4760_v34 = vpack.c.bf16 %v4756_v8, %v4755_v58  ;;  %v5004_v61 = vpack.c.bf16 %v5000_v47, %v4999_v37  ;;  %v10694_v5 = vor.u32 %v12634_v14, %v10691_v0  ;;  %v10627_v38 = vld [vmem:[#allocation6 + $0x8] sm:$0xf0]  ;;  %v12678_v47 = vld [vmem:[#allocation6 + $0x264] sm:$0xf] }
 0x4b8   : > { %4891 = vmatmul.bf16.vlgmr.msrb.gmra.mxu1 %v4759_v49  ;;  %5412 = vmatpush.bf16.msra.mxu3 %v10710_v3  ;;  %v12604_v49 = vld [vmem:[#allocation6 + $0x14] sm:$0xf]  ;;  %v12603_v1 = vld [vmem:[#allocation6 + $0x4] sm:$0xf0]  ;;  %v12602_v3 = vld [vmem:[#allocation6 + $0x4] sm:$0xf] }
 0x4b9   : > { %5110 = vmatmul.bf16.vlgmr.msrb.gmra.mxu2 %v5003_v42  ;;  %5134 = vmatmul.bf16.vlgmr.msrb.gmra.mxu3 %v5003_v42  ;;  %v10634_v42 = vor.u32 %v12605_v36, %v10633_v56  ;;  %v10626_v15 = vor.u32 %v12603_v1, %v10625_v40  ;;  %v12665_v36 = vld [vmem:[#allocation6 + $0x1f4] sm:$0xf0]  ;;  %v12679_v37 = vld [vmem:[#allocation6 + $0x264] sm:$0xf0] }
 0x4ba   : > { %5235 = vmatpush.bf16.msra.mxu0 %v10642_v19  ;;  %5259 = vmatpush.bf16.msra.mxu1 %v10646_v26  ;;  %v10873_v26 = vld [vmem:[#allocation6 + $0x270] sm:$0xf]  ;;  %v12663_v0 = vld [vmem:[#allocation6 + $0x1e4] sm:$0xf0]  ;;  %v5001_v40 = vld [vmem:[#allocation3 + $0x56] sm:$0xff] }
 0x4bb   : > { %5389 = vmatpush.bf16.msra.mxu2 %v10698_v16 }
 0x4bc   : > { %v4043_v63 = vpop.f32.mrf.mxu2  ;;  %v4067_v35 = vpop.f32.mrf.mxu3  ;;  %5413 = vmatpush.bf16.msra.mxu3 %v10702_v62  ;;  %v10809_v62 = vld [vmem:[#allocation6 + $0x1f0] sm:$0xf] }
 0x4bd   : > { %v15190_v6 = vadd.f32 %v4043_v63, %v3915_v17  ;;  %v3879_v53 = vpop.f32.mrf.mxu0  ;;  %v15192_v48 = vadd.f32 %v4067_v35, %v3916_v46  ;;  %v3903_v33 = vpop.f32.mrf.mxu1  ;;  %v10689_v17 = vld [vmem:[#allocation6 + $0x100] sm:$0xf]  ;;  %v10630_v35 = vor.u32 %v12602_v3, %v10627_v38  ;;  %v10810_v8 = vor.u32 %v12665_v36, %v10809_v62  ;;  %v10795_v62 = vld [vmem:[#allocation6 + $0x1d8] sm:$0xf0] }
 0x4be   : > { %v3917_v30 = vadd.f32 %v3879_v53, %v15163_v60  ;;  %v3918_v7 = vadd.f32 %v3903_v33, %v15165_v21  ;;  %v10638_v60 = vor.u32 %v12604_v49, %v10635_v44  ;;  %v10690_v21 = vor.u32 %v12635_v50, %v10689_v17  ;;  %5236 = vmatpush.bf16.msra.mxu0 %v10634_v42  ;;  %v12680_v33 = vld [vmem:[#allocation6 + $0x274] sm:$0xf]  ;;  %v4757_v44 = vld [vmem:[#allocation3 + $0x3b] sm:$0xff] }
 0x4bf   : > { %v10878_v58 = vor.u32 %v12680_v33, %v10875_v51  ;;  %v12664_v42 = vld [vmem:[#allocation6 + $0x1f4] sm:$0xf]  ;;  %v10865_v17 = vld [vmem:[#allocation6 + $0x260] sm:$0xf] }
 0x4c0   : > { %5260 = vmatpush.bf16.msra.mxu1 %v10638_v60  ;;  %5390 = vmatpush.bf16.msra.mxu2 %v10690_v21  ;;  %v10811_v60 = vld [vmem:[#allocation6 + $0x1f8] sm:$0xf0]  ;;  %v10867_v21 = vld [vmem:[#allocation6 + $0x268] sm:$0xf0]  ;;  %v12676_v51 = vld [vmem:[#allocation6 + $0x254] sm:$0xf] }
 0x4c1   : > { %5414 = vmatpush.bf16.msra.mxu3 %v10694_v5  ;;  %v10814_v50 = vor.u32 %v12664_v42, %v10811_v60  ;;  %v10870_v14 = vor.u32 %v12678_v47, %v10867_v21  ;;  %v10849_v36 = vld [vmem:[#allocation6 + $0x240] sm:$0xf]  ;;  %v12674_v21 = vld [vmem:[#allocation6 + $0x244] sm:$0xf] }
 0x4c2   : > { %5237 = vmatpush.bf16.msra.mxu0 %v10626_v15 }
 0x4c4   : > { %v4045_v46 = vpop.f32.mrf.mxu2  ;;  %v4069_v41 = vpop.f32.mrf.mxu3  ;;  %5261 = vmatpush.bf16.msra.mxu1 %v10630_v35  ;;  %v12662_v35 = vld [vmem:[#allocation6 + $0x1e4] sm:$0xf] }
 0x4c5   : > { %v15196_v23 = vadd.f32 %v4045_v46, %v3917_v30  ;;  %v3882_v32 = vpop.f32.mrf.mxu0  ;;  %v15198_v63 = vadd.f32 %v4069_v41, %v3918_v7  ;;  %v3906_v31 = vpop.f32.mrf.mxu1  ;;  %v12681_v30 = vld [vmem:[#allocation6 + $0x274] sm:$0xf0]  ;;  %5737 = vmatpush.bf16.msrb.mxu3 %v10878_v58  ;;  %v4758_v46 = vld [vmem:[#allocation3 + $0x43] sm:$0xff] }
 0x4c6   : > { %v3919_v19 = vadd.f32 %v3882_v32, %v15167_v22  ;;  %v3920_v53 = vadd.f32 %v3906_v31, %v15169_v29  ;;  %v10874_v59 = vor.u32 %v12681_v30, %v10873_v26  ;;  %5548 = vmatpush.bf16.msrb.mxu0 %v10810_v8  ;;  %v5002_v41 = vld [vmem:[#allocation3 + $0x5e] sm:$0xff]  ;;  %v10857_v26 = vld [vmem:[#allocation6 + $0x250] sm:$0xf] }
 0x4c7   : > { %4872 = vmatmul.bf16.gmra.mxu0 %v4760_v34  ;;  %v5005_v38 = vpack.c.bf16 %v5002_v41, %v5001_v40  ;;  %v12659_v40 = vld [vmem:[#allocation6 + $0x1c4] sm:$0xf0]  ;;  %v12658_v41 = vld [vmem:[#allocation6 + $0x1c4] sm:$0xf] }
 0x4c8   : > { %4896 = vmatmul.bf16.gmra.mxu1 %v4760_v34  ;;  %5713 = vmatpush.bf16.msrb.mxu2 %v10874_v59  ;;  %v10866_v34 = vor.u32 %v12679_v37, %v10865_v17  ;;  %v12677_v59 = vld [vmem:[#allocation6 + $0x254] sm:$0xf0] }
 0x4c9   : > { %5115 = vmatmul.bf16.gmra.mxu2 %v5004_v61  ;;  %5139 = vmatmul.bf16.gmra.mxu3 %v5004_v61  ;;  %v4761_v61 = vpack.c.bf16 %v4758_v46, %v4757_v44  ;;  %v10858_v58 = vor.u32 %v12677_v59, %v10857_v26  ;;  %v10851_v46 = vld [vmem:[#allocation6 + $0x248] sm:$0xf0] }
 0x4ca   : > { %5572 = vmatpush.bf16.msrb.mxu1 %v10814_v50  ;;  %5738 = vmatpush.bf16.msrb.mxu3 %v10870_v14  ;;  %v4972_v14 = vld [vmem:[#allocation3 + $0x35] sm:$0xff] }
 0x4cc   : > { %v4048_v7 = vpop.f32.mrf.mxu2  ;;  %v4072_v16 = vpop.f32.mrf.mxu3  ;;  %5714 = vmatpush.bf16.msrb.mxu2 %v10866_v34 }
 0x4cd   : > { %v15202_v22 = vadd.f32 %v4048_v7, %v3919_v19  ;;  %v3884_v2 = vpop.f32.mrf.mxu0  ;;  %v15204_v29 = vadd.f32 %v4072_v16, %v3920_v53  ;;  %v3908_v56 = vpop.f32.mrf.mxu1  ;;  %v10803_v53 = vld [vmem:[#allocation6 + $0x1e8] sm:$0xf0]  ;;  %v10859_v7 = vld [vmem:[#allocation6 + $0x258] sm:$0xf0] }
 0x4ce   : > { %v3921_v13 = vadd.f32 %v3884_v2, %v15172_v54  ;;  %v3922_v49 = vadd.f32 %v3908_v56, %v15174_v11  ;;  %v10801_v54 = vld [vmem:[#allocation6 + $0x1e0] sm:$0xf]  ;;  %v10806_v33 = vor.u32 %v12662_v35, %v10803_v53  ;;  %v10862_v16 = vor.u32 %v12676_v51, %v10859_v7  ;;  %v10793_v2 = vld [vmem:[#allocation6 + $0x1d0] sm:$0xf]  ;;  %v5278_v35 = vld [vmem:[#allocation3 + $0x37] sm:$0xff] }
 0x4cf   : > { %v10802_v32 = vor.u32 %v12663_v0, %v10801_v54  ;;  %v10854_v54 = vor.u32 %v12674_v21, %v10851_v46  ;;  %v10785_v0 = vld [vmem:[#allocation6 + $0x1c0] sm:$0xf]  ;;  %v12655_v21 = vld [vmem:[#allocation6 + $0x1a4] sm:$0xf0] }
 0x4d0   : > { %5573 = vmatpush.bf16.msrb.mxu1 %v10806_v33  ;;  %5715 = vmatpush.bf16.msrb.mxu2 %v10858_v58  ;;  %v15220_v53 = vld [vmem:[#allocation3 + $0x3f] sm:$0xff] }
 0x4d1   : > { %5549 = vmatpush.bf16.msrb.mxu0 %v10802_v32  ;;  %5739 = vmatpush.bf16.msrb.mxu3 %v10862_v16  ;;  %v10786_v32 = vor.u32 %v12659_v40, %v10785_v0  ;;  %v5284_v7 = vpack.c.bf16 %v15220_v53, %v5278_v35  ;;  %v10827_v35 = vld [vmem:[#allocation6 + $0x218] sm:$0xf0] }
 0x4d4   : > { %v4050_v11 = vpop.f32.mrf.mxu2  ;;  %v4074_v1 = vpop.f32.mrf.mxu3 }
 0x4d5   : > { %v15208_v5 = vadd.f32 %v4050_v11, %v3921_v13  ;;  %v4204_v3 = vpop.f32.mrf.mxu0  ;;  %v15210_v19 = vadd.f32 %v4074_v1, %v3922_v49  ;;  %v4228_v15 = vpop.f32.mrf.mxu1  ;;  %v12661_v13 = vld [vmem:[#allocation6 + $0x1d4] sm:$0xf0]  ;;  %v10787_v11 = vld [vmem:[#allocation6 + $0x1c8] sm:$0xf0]  ;;  %5740 = vmatpush.bf16.msrb.mxu3 %v10854_v54 }
 0x4d6   : > { %v4243_v31 = vadd.f32 %v4204_v3, %v15178_v9  ;;  %v4244_v30 = vadd.f32 %v4228_v15, %v15180_v55  ;;  %v12660_v9 = vld [vmem:[#allocation6 + $0x1d4] sm:$0xf]  ;;  %v10794_v56 = vor.u32 %v12661_v13, %v10793_v2  ;;  %v12675_v55 = vld [vmem:[#allocation6 + $0x244] sm:$0xf0]  ;;  %v12673_v1 = vld [vmem:[#allocation6 + $0x234] sm:$0xf0] }
 0x4d7   : > { %4877 = vmatmul.bf16.gmra.mxu0 %v4761_v61  ;;  %v10798_v44 = vor.u32 %v12660_v9, %v10795_v62  ;;  %v10850_v8 = vor.u32 %v12675_v55, %v10849_v36  ;;  %v4973_v3 = vld [vmem:[#allocation3 + $0x3d] sm:$0xff]  ;;  %v10777_v13 = vld [vmem:[#allocation6 + $0x1b0] sm:$0xf]  ;;  %v12657_v9 = vld [vmem:[#allocation6 + $0x1b4] sm:$0xf0] }
 0x4d8   : > { %4901 = vmatmul.bf16.gmra.mxu1 %v4761_v61  ;;  %5550 = vmatpush.bf16.msrb.mxu0 %v10794_v56  ;;  %v10841_v61 = vld [vmem:[#allocation6 + $0x230] sm:$0xf]  ;;  %v10843_v15 = vld [vmem:[#allocation6 + $0x238] sm:$0xf0]  ;;  %v10778_v62 = vor.u32 %v12657_v9, %v10777_v13  ;;  %v12656_v36 = vld [vmem:[#allocation6 + $0x1b4] sm:$0xf] }
 0x4d9   : > { %5120 = vmatmul.bf16.gmra.mxu2 %v5005_v38  ;;  %5144 = vmatmul.bf16.gmra.mxu3 %v5005_v38  ;;  %v10790_v38 = vor.u32 %v12658_v41, %v10787_v11  ;;  %v10779_v55 = vld [vmem:[#allocation6 + $0x1b8] sm:$0xf0]  ;;  %v12667_v13 = vld [vmem:[#allocation6 + $0x204] sm:$0xf0] }
 0x4da   : > { %5574 = vmatpush.bf16.msrb.mxu1 %v10798_v44  ;;  %5716 = vmatpush.bf16.msrb.mxu2 %v10850_v8  ;;  %v10782_v44 = vor.u32 %v12656_v36, %v10779_v55  ;;  %v12671_v8 = vld [vmem:[#allocation6 + $0x224] sm:$0xf0]  ;;  %v12666_v55 = vld [vmem:[#allocation6 + $0x204] sm:$0xf] }
 0x4db   : > { %v15235_v9 = vld [vmem:[#allocation3 + $0x47] sm:$0xff] }
 0x4dc   : > { %v4370_v49 = vpop.f32.mrf.mxu2  ;;  %v4394_v60 = vpop.f32.mrf.mxu3  ;;  %5551 = vmatpush.bf16.msrb.mxu0 %v10786_v32 }
 0x4dd   : > { %v15214_v42 = vadd.f32 %v4370_v49, %v4243_v31  ;;  %v4206_v17 = vpop.f32.mrf.mxu0  ;;  %v15216_v50 = vadd.f32 %v4394_v60, %v4244_v30  ;;  %v4230_v47 = vpop.f32.mrf.mxu1  ;;  %v12672_v31 = vld [vmem:[#allocation6 + $0x234] sm:$0xf]  ;;  %v4978_v30 = vpack.c.bf16 %v4973_v3, %v4972_v14  ;;  %v10833_v49 = vld [vmem:[#allocation6 + $0x220] sm:$0xf]  ;;  %v10771_v14 = vld [vmem:[#allocation6 + $0x1a8] sm:$0xf0] }
 0x4de   : > { %v4245_v37 = vadd.f32 %v4206_v17, %v15184_v57  ;;  %v4246_v34 = vadd.f32 %v4230_v47, %v15186_v10  ;;  %v10842_v57 = vor.u32 %v12673_v1, %v10841_v61  ;;  %v10846_v10 = vor.u32 %v12672_v31, %v10843_v15  ;;  %5575 = vmatpush.bf16.msrb.mxu1 %v10790_v38  ;;  %v12670_v17 = vld [vmem:[#allocation6 + $0x224] sm:$0xf]  ;;  %v10825_v1 = vld [vmem:[#allocation6 + $0x210] sm:$0xf]  ;;  %v12669_v3 = vld [vmem:[#allocation6 + $0x214] sm:$0xf0] }
 0x4df   : > { %v10834_v60 = vor.u32 %v12671_v8, %v10833_v49  ;;  %v10826_v31 = vor.u32 %v12669_v3, %v10825_v1  ;;  %v12668_v15 = vld [vmem:[#allocation6 + $0x214] sm:$0xf]  ;;  %v10819_v49 = vld [vmem:[#allocation6 + $0x208] sm:$0xf0] }
 0x4e0   : > { %5717 = vmatpush.bf16.msrb.mxu2 %v10842_v57  ;;  %5741 = vmatpush.bf16.msrb.mxu3 %v10846_v10  ;;  %v4974_v57 = vld [vmem:[#allocation3 + $0x45] sm:$0xff]  ;;  %v10761_v10 = vld [vmem:[#allocation6 + $0x190] sm:$0xf]  ;;  %v12712_v1 = vld [vmem:[#allocation6 + $0x374] sm:$0xf] }
 0x4e1   : > { %5552 = vmatpush.bf16.msrb.mxu0 %v10778_v62 }
 0x4e2   : > { %5576 = vmatpush.bf16.msrb.mxu1 %v10782_v44  ;;  %v10753_v44 = vld [vmem:[#allocation6 + $0x180] sm:$0xf] }
 0x4e4   : > { %v4372_v26 = vpop.f32.mrf.mxu2  ;;  %v4396_v59 = vpop.f32.mrf.mxu3  ;;  %5718 = vmatpush.bf16.msrb.mxu2 %v10834_v60 }
 0x4e5   : > { %v15222_v33 = vadd.f32 %v4372_v26, %v4245_v37  ;;  %v4209_v51 = vpop.f32.mrf.mxu0  ;;  %v15225_v58 = vadd.f32 %v4396_v59, %v4246_v34  ;;  %v4233_v2 = vpop.f32.mrf.mxu1  ;;  %v10835_v37 = vld [vmem:[#allocation6 + $0x228] sm:$0xf0]  ;;  %v12654_v34 = vld [vmem:[#allocation6 + $0x1a4] sm:$0xf]  ;;  %v10830_v26 = vor.u32 %v12668_v15, %v10827_v35  ;;  %v12652_v59 = vld [vmem:[#allocation6 + $0x194] sm:$0xf] }
 0x4e6   : > { %v4247_v16 = vadd.f32 %v4209_v51, %v15190_v6  ;;  %v4248_v56 = vadd.f32 %v4233_v2, %v15192_v48  ;;  %v10769_v6 = vld [vmem:[#allocation6 + $0x1a0] sm:$0xf]  ;;  %v10838_v47 = vor.u32 %v12670_v17, %v10835_v37  ;;  %v10774_v41 = vor.u32 %v12654_v34, %v10771_v14  ;;  %v10763_v51 = vld [vmem:[#allocation6 + $0x198] sm:$0xf0] }
 0x4e7   : > { %5238 = vmatmul.bf16.vlgmr.msra.gmra.mxu0 %v4978_v30  ;;  %v10770_v46 = vor.u32 %v12655_v21, %v10769_v6  ;;  %v10817_v2 = vld [vmem:[#allocation6 + $0x200] sm:$0xf]  ;;  %v10822_v6 = vor.u32 %v12666_v55, %v10819_v49  ;;  %v12650_v21 = vld [vmem:[#allocation6 + $0x184] sm:$0xf]  ;;  %v10995_v55 = vld [vmem:[#allocation6 + $0x368] sm:$0xf0] }
 0x4e8   : > { %5262 = vmatmul.bf16.vlgmr.msra.gmra.mxu1 %v4978_v30  ;;  %5742 = vmatpush.bf16.msrb.mxu3 %v10838_v47  ;;  %v12653_v30 = vld [vmem:[#allocation6 + $0x194] sm:$0xf0]  ;;  %v12651_v47 = vld [vmem:[#allocation6 + $0x184] sm:$0xf0]  ;;  %v4977_v49 = vld [vmem:[#allocation3 + $0x5d] sm:$0xff] }
 0x4e9   : > { %5391 = vmatmul.bf16.vlgmr.msra.gmra.mxu2 %v5284_v7  ;;  %5415 = vmatmul.bf16.vlgmr.msra.gmra.mxu3 %v5284_v7  ;;  %v4975_v7 = vld [vmem:[#allocation3 + $0x4d] sm:$0xff] }
 0x4ea   : > { %5553 = vmatpush.bf16.msrb.mxu0 %v10770_v46  ;;  %5577 = vmatpush.bf16.msrb.mxu1 %v10774_v41  ;;  %v4979_v36 = vpack.c.bf16 %v4975_v7, %v4974_v57  ;;  %v4976_v7 = vld [vmem:[#allocation3 + $0x55] sm:$0xff] }
 0x4eb   : > { %5719 = vmatpush.bf16.msrb.mxu2 %v10826_v31 }
 0x4ec   : > { %v4375_v48 = vpop.f32.mrf.mxu2  ;;  %v4399_v0 = vpop.f32.mrf.mxu3  ;;  %5743 = vmatpush.bf16.msrb.mxu3 %v10830_v26 }
 0x4ed   : > { %v15229_v54 = vadd.f32 %v4375_v48, %v4247_v16  ;;  %v4211_v40 = vpop.f32.mrf.mxu0  ;;  %v15231_v32 = vadd.f32 %v4399_v0, %v4248_v56  ;;  %v4235_v61 = vpop.f32.mrf.mxu1  ;;  %v10762_v16 = vor.u32 %v12653_v30, %v10761_v10  ;;  %v15237_v56 = vld [vmem:[#allocation3 + $0x4f] sm:$0xff]  ;;  %v10754_v0 = vor.u32 %v12651_v47, %v10753_v44 }
 0x4ee   : > { %v4249_v11 = vadd.f32 %v4211_v40, %v15196_v23  ;;  %v4250_v38 = vadd.f32 %v4235_v61, %v15198_v63  ;;  %v10766_v23 = vor.u32 %v12652_v59, %v10763_v51  ;;  %v10818_v63 = vor.u32 %v12667_v13, %v10817_v2  ;;  %v10755_v48 = vld [vmem:[#allocation6 + $0x188] sm:$0xf0]  ;;  %v12713_v61 = vld [vmem:[#allocation6 + $0x374] sm:$0xf0]  ;;  %v10937_v30 = vld [vmem:[#allocation6 + $0x2f0] sm:$0xf] }
 0x4ef   : > { %5554 = vmatpush.bf16.msrb.mxu0 %v10762_v16  ;;  %v5285_v37 = vpack.c.bf16 %v15237_v56, %v15235_v9  ;;  %v10758_v40 = vor.u32 %v12650_v21, %v10755_v48  ;;  %v12697_v59 = vld [vmem:[#allocation6 + $0x2f4] sm:$0xf0]  ;;  %v10939_v2 = vld [vmem:[#allocation6 + $0x2f8] sm:$0xf0]  ;;  %v10993_v13 = vld [vmem:[#allocation6 + $0x360] sm:$0xf]  ;;  %v4980_v21 = vpack.c.bf16 %v4977_v49, %v4976_v7 }
 0x4f0   : > { %5578 = vmatpush.bf16.msrb.mxu1 %v10766_v23  ;;  %5720 = vmatpush.bf16.msrb.mxu2 %v10818_v63  ;;  %v10938_v16 = vor.u32 %v12697_v59, %v10937_v30  ;;  %v12696_v23 = vld [vmem:[#allocation6 + $0x2f4] sm:$0xf]  ;;  %v10977_v7 = vld [vmem:[#allocation6 + $0x340] sm:$0xf]  ;;  %v10979_v49 = vld [vmem:[#allocation6 + $0x348] sm:$0xf0] }
 0x4f1   : > { %5744 = vmatpush.bf16.msrb.mxu3 %v10822_v6  ;;  %v10942_v63 = vor.u32 %v12696_v23, %v10939_v2  ;;  %v15255_v6 = vld [vmem:[#allocation3 + $0x5f] sm:$0xff]  ;;  %v12692_v30 = vld [vmem:[#allocation6 + $0x2d4] sm:$0xf] }
 0x4f3   : > { %5555 = vmatpush.bf16.msrb.mxu0 %v10754_v0 }
 0x4f4   : > { %v4377_v62 = vpop.f32.mrf.mxu2  ;;  %v4401_v60 = vpop.f32.mrf.mxu3  ;;  %5579 = vmatpush.bf16.msrb.mxu1 %v10758_v40 }
 0x4f5   : > { %v15239_v8 = vadd.f32 %v4377_v62, %v4249_v11  ;;  %v4214_v17 = vpop.f32.mrf.mxu0  ;;  %v15243_v46 = vadd.f32 %v4401_v60, %v4250_v38  ;;  %v4238_v14 = vpop.f32.mrf.mxu1  ;;  %v11001_v11 = vld [vmem:[#allocation6 + $0x370] sm:$0xf]  ;;  %v11003_v38 = vld [vmem:[#allocation6 + $0x378] sm:$0xf0]  ;;  %v12711_v62 = vld [vmem:[#allocation6 + $0x364] sm:$0xf0] }
 0x4f6   : > { %v4251_v34 = vadd.f32 %v4214_v17, %v15202_v22  ;;  %v4252_v41 = vadd.f32 %v4238_v14, %v15204_v29  ;;  %v11002_v3 = vor.u32 %v12713_v61, %v11001_v11  ;;  %v11006_v31 = vor.u32 %v12712_v1, %v11003_v38  ;;  %v12695_v17 = vld [vmem:[#allocation6 + $0x2e4] sm:$0xf0]  ;;  %v12694_v11 = vld [vmem:[#allocation6 + $0x2e4] sm:$0xf]  ;;  %v10931_v61 = vld [vmem:[#allocation6 + $0x2e8] sm:$0xf0] }
 0x4f7   : > { %5243 = vmatmul.bf16.gmra.mxu0 %v4979_v36  ;;  %v10994_v44 = vor.u32 %v12711_v62, %v10993_v13  ;;  %v10985_v1 = vld [vmem:[#allocation6 + $0x350] sm:$0xf]  ;;  %v12709_v38 = vld [vmem:[#allocation6 + $0x354] sm:$0xf0] }
 0x4f8   : > { %5267 = vmatmul.bf16.gmra.mxu1 %v4979_v36  ;;  %6043 = vmatpush.bf16.msra.mxu2 %v11002_v3  ;;  %v12710_v36 = vld [vmem:[#allocation6 + $0x364] sm:$0xf]  ;;  %v10934_v3 = vor.u32 %v12694_v11, %v10931_v61  ;;  %v12704_v61 = vld [vmem:[#allocation6 + $0x334] sm:$0xf] }
 0x4f9   : > { %5396 = vmatmul.bf16.gmra.mxu2 %v5285_v37  ;;  %5420 = vmatmul.bf16.gmra.mxu3 %v5285_v37  ;;  %v10998_v60 = vor.u32 %v12710_v36, %v10995_v55  ;;  %v15253_v37 = vld [vmem:[#allocation3 + $0x57] sm:$0xff]  ;;  %v12706_v55 = vld [vmem:[#allocation6 + $0x344] sm:$0xf] }
 0x4fa   : > { %6067 = vmatpush.bf16.msra.mxu3 %v11006_v31  ;;  %5878 = vmatpush.bf16.msra.mxu0 %v10938_v16  ;;  %v5286_v0 = vpack.c.bf16 %v15255_v6, %v15253_v37  ;;  %v10987_v31 = vld [vmem:[#allocation6 + $0x358] sm:$0xf0]  ;;  %v12707_v16 = vld [vmem:[#allocation6 + $0x344] sm:$0xf0] }
 0x4fb   : > { %5902 = vmatpush.bf16.msra.mxu1 %v10942_v63  ;;  %v10978_v13 = vor.u32 %v12707_v16, %v10977_v7  ;;  %v12688_v16 = vld [vmem:[#allocation6 + $0x2b4] sm:$0xf] }
 0x4fc   : > { %v4380_v57 = vpop.f32.mrf.mxu2  ;;  %v4404_v15 = vpop.f32.mrf.mxu3  ;;  %6044 = vmatpush.bf16.msra.mxu2 %v10994_v44  ;;  %v10982_v44 = vor.u32 %v12706_v55, %v10979_v49  ;;  %v12703_v55 = vld [vmem:[#allocation6 + $0x324] sm:$0xf0]  ;;  %v12702_v49 = vld [vmem:[#allocation6 + $0x324] sm:$0xf] }
 0x4fd   : > { %v15247_v22 = vadd.f32 %v4380_v57, %v4251_v34  ;;  %v4216_v35 = vpop.f32.mrf.mxu0  ;;  %v15249_v29 = vadd.f32 %v4404_v15, %v4252_v41  ;;  %v4240_v26 = vpop.f32.mrf.mxu1  ;;  %v12708_v57 = vld [vmem:[#allocation6 + $0x354] sm:$0xf]  ;;  %v10986_v15 = vor.u32 %v12709_v38, %v10985_v1  ;;  %v10971_v1 = vld [vmem:[#allocation6 + $0x338] sm:$0xf0]  ;;  %v5609_v38 = vld [vmem:[#allocation3 + $0x48] sm:$0xff] }
 0x4fe   : > { %v4253_v10 = vadd.f32 %v4216_v35, %v15208_v5  ;;  %v4254_v51 = vadd.f32 %v4240_v26, %v15210_v19  ;;  %v10929_v5 = vld [vmem:[#allocation6 + $0x2e0] sm:$0xf]  ;;  %6068 = vmatpush.bf16.msra.mxu3 %v10998_v60  ;;  %v10990_v35 = vor.u32 %v12708_v57, %v10987_v31  ;;  %v12693_v26 = vld [vmem:[#allocation6 + $0x2d4] sm:$0xf0]  ;;  %v10974_v57 = vor.u32 %v12704_v61, %v10971_v1  ;;  %v10899_v61 = vld [vmem:[#allocation6 + $0x2a8] sm:$0xf0] }
 0x4ff   : > { %v10930_v19 = vor.u32 %v12695_v17, %v10929_v5  ;;  %5903 = vmatpush.bf16.msra.mxu1 %v10934_v3  ;;  %v10913_v60 = vld [vmem:[#allocation6 + $0x2c0] sm:$0xf]  ;;  %v12691_v5 = vld [vmem:[#allocation6 + $0x2c4] sm:$0xf0]  ;;  %v12690_v17 = vld [vmem:[#allocation6 + $0x2c4] sm:$0xf] }
 0x500   : > { %6045 = vmatpush.bf16.msra.mxu2 %v10986_v15  ;;  %v5608_v3 = vld [vmem:[#allocation3 + $0x40] sm:$0xff]  ;;  %v5449_v15 = vpack.c.bf16 %v15235_v9, %v15220_v53 }
 0x501   : > { %5879 = vmatpush.bf16.msra.mxu0 %v10930_v19  ;;  %v10914_v19 = vor.u32 %v12691_v5, %v10913_v60  ;;  %v10961_v9 = vld [vmem:[#allocation6 + $0x320] sm:$0xf] }
 0x502   : > { %6069 = vmatpush.bf16.msra.mxu3 %v10990_v35  ;;  %v10962_v5 = vor.u32 %v12703_v55, %v10961_v9  ;;  %v5611_v9 = vld [vmem:[#allocation3 + $0x58] sm:$0xff] }
 0x504   : > { %v4382_v47 = vpop.f32.mrf.mxu2  ;;  %v4406_v34 = vpop.f32.mrf.mxu3  ;;  %6046 = vmatpush.bf16.msra.mxu2 %v10978_v13 }
 0x505   : > { %v15257_v48 = vadd.f32 %v4382_v47, %v4253_v10  ;;  %v15259_v14 = vpop.f32.mrf.mxu0  ;;  %v15263_v40 = vadd.f32 %v4406_v34, %v4254_v51  ;;  %v15265_v41 = vpop.f32.mrf.mxu1  ;;  %v10921_v10 = vld [vmem:[#allocation6 + $0x2d0] sm:$0xf]  ;;  %v10923_v51 = vld [vmem:[#allocation6 + $0x2d8] sm:$0xf0]  ;;  %v10915_v47 = vld [vmem:[#allocation6 + $0x2c8] sm:$0xf0] }
 0x506   : > { %v10922_v59 = vor.u32 %v12693_v26, %v10921_v10  ;;  %v10926_v2 = vor.u32 %v12692_v30, %v10923_v51  ;;  %v12705_v34 = vld [vmem:[#allocation6 + $0x334] sm:$0xf0]  ;;  %6070 = vmatpush.bf16.msra.mxu3 %v10982_v44  ;;  %v5614_v26 = vpack.c.bf16 %v5609_v38, %v5608_v3  ;;  %v10953_v3 = vld [vmem:[#allocation6 + $0x310] sm:$0xf] }
 0x507   : > { %5248 = vmatmul.bf16.gmra.mxu0 %v4980_v21  ;;  %v12689_v51 = vld [vmem:[#allocation6 + $0x2b4] sm:$0xf0] }
 0x508   : > { %5272 = vmatmul.bf16.gmra.mxu1 %v4980_v21  ;;  %5880 = vmatpush.bf16.msra.mxu0 %v10922_v59  ;;  %v10969_v21 = vld [vmem:[#allocation6 + $0x330] sm:$0xf]  ;;  %v12701_v38 = vld [vmem:[#allocation6 + $0x314] sm:$0xf0] }
 0x509   : > { %5401 = vmatmul.bf16.gmra.mxu2 %v5286_v0  ;;  %5425 = vmatmul.bf16.gmra.mxu3 %v5286_v0  ;;  %v10918_v0 = vor.u32 %v12690_v17, %v10915_v47  ;;  %v10970_v11 = vor.u32 %v12705_v34, %v10969_v21  ;;  %v10905_v59 = vld [vmem:[#allocation6 + $0x2b0] sm:$0xf]  ;;  %v10963_v17 = vld [vmem:[#allocation6 + $0x328] sm:$0xf0]  ;;  %v12687_v47 = vld [vmem:[#allocation6 + $0x2a4] sm:$0xf0] }
 0x50a   : > { %5904 = vmatpush.bf16.msra.mxu1 %v10926_v2  ;;  %6071 = vmatpush.bf16.msra.mxu3 %v10974_v57  ;;  %v10906_v7 = vor.u32 %v12689_v51, %v10905_v59  ;;  %v10907_v2 = vld [vmem:[#allocation6 + $0x2b8] sm:$0xf0]  ;;  %v10966_v34 = vor.u32 %v12702_v49, %v10963_v17  ;;  %v10954_v57 = vor.u32 %v12701_v38, %v10953_v3  ;;  %v10889_v59 = vld [vmem:[#allocation6 + $0x290] sm:$0xf]  ;;  %v10947_v3 = vld [vmem:[#allocation6 + $0x308] sm:$0xf0] }
 0x50b   : > { %6047 = vmatpush.bf16.msra.mxu2 %v10970_v11  ;;  %v10910_v13 = vor.u32 %v12688_v16, %v10907_v2  ;;  %v12686_v11 = vld [vmem:[#allocation6 + $0x2a4] sm:$0xf]  ;;  %v12684_v16 = vld [vmem:[#allocation6 + $0x294] sm:$0xf]  ;;  %v10891_v2 = vld [vmem:[#allocation6 + $0x298] sm:$0xf0]  ;;  %v5450_v17 = vpack.c.bf16 %v15253_v37, %v15237_v56 }
 0x50c   : > { %v15267_v23 = vpop.f32.mrf.mxu2  ;;  %v15269_v63 = vpop.f32.mrf.mxu3  ;;  %5881 = vmatpush.bf16.msra.mxu0 %v10914_v19  ;;  %v10897_v19 = vld [vmem:[#allocation6 + $0x2a0] sm:$0xf]  ;;  %v10902_v1 = vor.u32 %v12686_v11, %v10899_v61  ;;  %v10894_v49 = vor.u32 %v12684_v16, %v10891_v2  ;;  %v12682_v56 = vld [vmem:[#allocation6 + $0x284] sm:$0xf]  ;;  %v10883_v37 = vld [vmem:[#allocation6 + $0x288] sm:$0xf0] }
 0x50d   : > { %v15271_v62 = vpop.f32.mrf.mxu0  ;;  %v15273_v36 = vpop.f32.mrf.mxu1  ;;  %v10881_v38 = vld [vmem:[#allocation6 + $0x280] sm:$0xf] }
 0x50e   : > { %5905 = vmatpush.bf16.msra.mxu1 %v10918_v0  ;;  %v10898_v0 = vor.u32 %v12687_v47, %v10897_v19  ;;  %6072 = vmatpush.bf16.msra.mxu3 %v10966_v34  ;;  %v10945_v19 = vld [vmem:[#allocation6 + $0x300] sm:$0xf]  ;;  %v12699_v47 = vld [vmem:[#allocation6 + $0x304] sm:$0xf0]  ;;  %v12698_v34 = vld [vmem:[#allocation6 + $0x304] sm:$0xf] }
 0x50f   : > { %6048 = vmatpush.bf16.msra.mxu2 %v10962_v5 }
 0x510   : > { %5882 = vmatpush.bf16.msra.mxu0 %v10906_v7  ;;  %v12685_v7 = vld [vmem:[#allocation6 + $0x294] sm:$0xf0] }
 0x511   : > { %v10890_v55 = vor.u32 %v12685_v7, %v10889_v59 }
 0x512   : > { %5906 = vmatpush.bf16.msra.mxu1 %v10910_v13  ;;  %v5610_v13 = vld [vmem:[#allocation3 + $0x50] sm:$0xff] }
 0x513   : > { %6049 = vmatpush.bf16.msra.mxu2 %v10954_v57  ;;  %v5615_v61 = vpack.c.bf16 %v5611_v9, %v5610_v13  ;;  %v12683_v57 = vld [vmem:[#allocation6 + $0x284] sm:$0xf0]  ;;  %v11129_v9 = vld [vmem:[#allocation6 + $0x470] sm:$0xf] }
 0x514   : > { %v15275_v31 = vpop.f32.mrf.mxu2  ;;  %v15279_v35 = vpop.f32.mrf.mxu3  ;;  %5883 = vmatpush.bf16.msra.mxu0 %v10898_v0  ;;  %v10882_v59 = vor.u32 %v12683_v57, %v10881_v38  ;;  %v4575_v57 = vadd.f32 %v15259_v14, %v15214_v42 }
 0x515   : > { %v15281_v10 = vpop.f32.mrf.mxu0  ;;  %v15283_v30 = vpop.f32.mrf.mxu1 }
 0x516   : > { %5907 = vmatpush.bf16.msra.mxu1 %v10902_v1  ;;  %v10946_v1 = vor.u32 %v12699_v47, %v10945_v19  ;;  %v11131_v47 = vld [vmem:[#allocation6 + $0x478] sm:$0xf0] }
 0x517   : > { %5556 = vmatmul.bf16.vlgmr.msrb.gmra.mxu0 %v5449_v15 }
 0x518   : > { %5580 = vmatmul.bf16.vlgmr.msrb.gmra.mxu1 %v5449_v15  ;;  %v12700_v15 = vld [vmem:[#allocation6 + $0x314] sm:$0xf]  ;;  %5884 = vmatpush.bf16.msra.mxu0 %v10890_v55  ;;  %v12745_v55 = vld [vmem:[#allocation6 + $0x474] sm:$0xf0] }
 0x519   : > { %5721 = vmatmul.bf16.vlgmr.msrb.gmra.mxu2 %v5614_v26  ;;  %5745 = vmatmul.bf16.vlgmr.msrb.gmra.mxu3 %v5614_v26  ;;  %v10955_v26 = vld [vmem:[#allocation6 + $0x318] sm:$0xf0]  ;;  %v11130_v19 = vor.u32 %v12745_v55, %v11129_v9 }
 0x51a   : > { %v10958_v51 = vor.u32 %v12700_v15, %v10955_v26  ;;  %5908 = vmatpush.bf16.msra.mxu1 %v10894_v49  ;;  %v10950_v26 = vor.u32 %v12698_v34, %v10947_v3  ;;  %6050 = vmatpush.bf16.msra.mxu2 %v10946_v1  ;;  %v12744_v49 = vld [vmem:[#allocation6 + $0x474] sm:$0xf]  ;;  %v11065_v34 = vld [vmem:[#allocation6 + $0x3f0] sm:$0xf]  ;;  %v12729_v1 = vld [vmem:[#allocation6 + $0x3f4] sm:$0xf0] }
 0x51b   : > { %v11134_v3 = vor.u32 %v12744_v49, %v11131_v47  ;;  %v11066_v38 = vor.u32 %v12729_v1, %v11065_v34  ;;  %v12728_v1 = vld [vmem:[#allocation6 + $0x3f4] sm:$0xf] }
 0x51c   : > { %v15285_v53 = vpop.f32.mrf.mxu2  ;;  %v15287_v44 = vpop.f32.mrf.mxu3  ;;  %6073 = vmatpush.bf16.msra.mxu3 %v10958_v51  ;;  %v10886_v51 = vor.u32 %v12682_v56, %v10883_v37  ;;  %5885 = vmatpush.bf16.msra.mxu0 %v10882_v59  ;;  %v5613_v59 = vld [vmem:[#allocation3 + $0x68] sm:$0xff]  ;;  %v4576_v56 = vadd.f32 %v15265_v41, %v15216_v50  ;;  %v4741_v37 = vadd.f32 %v15267_v23, %v4575_v57  ;;  %v11121_v23 = vld [vmem:[#allocation6 + $0x460] sm:$0xf] }
 0x51d   : > { %v15289_v60 = vpop.f32.mrf.mxu0  ;;  %v15291_v21 = vpop.f32.mrf.mxu1 }
 0x51e   : > { %5909 = vmatpush.bf16.msra.mxu1 %v10886_v51  ;;  %6373 = vmatpush.bf16.msrb.mxu2 %v11130_v19  ;;  %v4742_v49 = vadd.f32 %v15269_v63, %v4576_v56 }
 0x520   : > { %6074 = vmatpush.bf16.msra.mxu3 %v10950_v26  ;;  %v5612_v26 = vld [vmem:[#allocation3 + $0x60] sm:$0xff]  ;;  %6208 = vmatpush.bf16.msrb.mxu0 %v11066_v38 }
 0x521   : > { %v5616_v19 = vpack.c.bf16 %v5613_v59, %v5612_v26  ;;  %v11057_v26 = vld [vmem:[#allocation6 + $0x3e0] sm:$0xf]  ;;  %v12727_v59 = vld [vmem:[#allocation6 + $0x3e4] sm:$0xf0] }
 0x524   : > { %v15293_v5 = vpop.f32.mrf.mxu2  ;;  %v15297_v0 = vpop.f32.mrf.mxu3  ;;  %6397 = vmatpush.bf16.msrb.mxu3 %v11134_v3  ;;  %v11067_v3 = vld [vmem:[#allocation6 + $0x3f8] sm:$0xf0] }
 0x525   : > { %v15299_v11 = vpop.f32.mrf.mxu0  ;;  %v15301_v15 = vpop.f32.mrf.mxu1  ;;  %v11070_v57 = vor.u32 %v12728_v1, %v11067_v3  ;;  %v11113_v1 = vld [vmem:[#allocation6 + $0x450] sm:$0xf]  ;;  %v4578_v3 = vadd.f32 %v15273_v36, %v15225_v58 }
 0x527   : > { %5561 = vmatmul.bf16.gmra.mxu0 %v5450_v17  ;;  %6232 = vmatpush.bf16.msrb.mxu1 %v11070_v57 }
 0x528   : > { %5585 = vmatmul.bf16.gmra.mxu1 %v5450_v17  ;;  %v3449_v17 = vld [vmem:[%s15841_s7] sm:$0x3] }
 0x529   : > { %5726 = vmatmul.bf16.gmra.mxu2 %v5615_v61  ;;  %5750 = vmatmul.bf16.gmra.mxu3 %v5615_v61  ;;  %v5448_v61 = vld [vmem:[#allocation3 + $0x67] sm:$0xff]  ;;  %v15321_v9 = vperm.slane %v3449_v17, 0  ;;  %v15327_v14 = vperm.slane %v3449_v17, 1  ;;  %v11122_v17 = vor.u32 %v12743_v24, %v11121_v23 }
 0x52a   : > { %v5451_v55 = vpack.c.bf16 %v5448_v61, %v15255_v6  ;;  %v12742_v6 = vld [vmem:[#allocation6 + $0x464] sm:$0xf]  ;;  %v11123_v61 = vld [vmem:[#allocation6 + $0x468] sm:$0xf0] }
 0x52b   : > { %v11126_v56 = vor.u32 %v12742_v6, %v11123_v61  ;;  %6374 = vmatpush.bf16.msrb.mxu2 %v11122_v17  ;;  %v5774_v17 = vld [vmem:[#allocation3 + $0x49] sm:$0xff] }
 0x52c   : > { %v15303_v7 = vpop.f32.mrf.mxu2  ;;  %v15305_v16 = vpop.f32.mrf.mxu3 }
 0x52d   : > { %v15307_v2 = vpop.f32.mrf.mxu0  ;;  %v15309_v13 = vpop.f32.mrf.mxu1  ;;  %6398 = vmatpush.bf16.msrb.mxu3 %v11126_v56  ;;  %v12740_v56 = vld [vmem:[#allocation6 + $0x454] sm:$0xf] }
 0x534   : > { %v15319_v51 = vpop.f32.mrf.mxu2  ;;  %v15325_v47 = vpop.f32.mrf.mxu3 }
 0x535   : > { %v4868_v42 = vpop.f32.mrf.mxu0  ;;  %v4892_v50 = vpop.f32.mrf.mxu1 }
 0x536   : > { %v4907_v34 = vadd.f32 %v4868_v42, %v4741_v37  ;;  %v4908_v41 = vadd.f32 %v4892_v50, %v4742_v49  ;;  %v12726_v37 = vld [vmem:[#allocation6 + $0x3e4] sm:$0xf]  ;;  %v4577_v49 = vadd.f32 %v15271_v62, %v15222_v33  ;;  %v11059_v50 = vld [vmem:[#allocation6 + $0x3e8] sm:$0xf0] }
 0x537   : > { %5566 = vmatmul.bf16.gmra.mxu0 %v5451_v55  ;;  %v11062_v24 = vor.u32 %v12726_v37, %v11059_v50  ;;  %v11051_v50 = vld [vmem:[#allocation6 + $0x3d8] sm:$0xf0] }
 0x538   : > { %v4924_v38 = vadd.f32 %v15321_v9, %v4907_v34  ;;  %v4925_v63 = vadd.f32 %v15327_v14, %v4908_v41  ;;  %5590 = vmatmul.bf16.gmra.mxu1 %v5451_v55  ;;  %v11058_v34 = vor.u32 %v12727_v59, %v11057_v26  ;;  %v12741_v55 = vld [vmem:[#allocation6 + $0x454] sm:$0xf0]  ;;  %v4743_v23 = vadd.f32 %v15275_v31, %v4577_v49  ;;  %v5773_v31 = vld [vmem:[#allocation3 + $0x41] sm:$0xff]  ;;  %v11115_v26 = vld [vmem:[#allocation6 + $0x458] sm:$0xf0] }
 0x539   : > { %5731 = vmatmul.bf16.gmra.mxu2 %v5616_v19  ;;  %5755 = vmatmul.bf16.gmra.mxu3 %v5616_v19  ;;  %v11114_v62 = vor.u32 %v12741_v55, %v11113_v1  ;;  %v4744_v19 = vadd.f32 %v15279_v35, %v4578_v3  ;;  %v11118_v37 = vor.u32 %v12740_v56, %v11115_v26  ;;  %v11049_v49 = vld [vmem:[#allocation6 + $0x3d0] sm:$0xf]  ;;  %v12725_v35 = vld [vmem:[#allocation6 + $0x3d4] sm:$0xf0]  ;;  %v11105_v1 = vld [vmem:[#allocation6 + $0x440] sm:$0xf] }
 0x53a   : > { %v4936_v42 = vmax.f32 %v4924_v38, 0.0  ;;  %v4937_v41 = vmax.f32 %v4925_v63, 0.0  ;;  %6209 = vmatpush.bf16.msrb.mxu0 %v11058_v34  ;;  %6233 = vmatpush.bf16.msrb.mxu1 %v11062_v24  ;;  %v11050_v34 = vor.u32 %v12725_v35, %v11049_v49  ;;  %v12739_v3 = vld [vmem:[#allocation6 + $0x444] sm:$0xf0]  ;;  %v15351_v55 = vld [vmem:[#allocation3 + $0x51] sm:$0xff] }
 0x53b   : > { %6375 = vmatpush.bf16.msrb.mxu2 %v11114_v62  ;;  %6399 = vmatpush.bf16.msrb.mxu3 %v11118_v37  ;;  %v11106_v62 = vor.u32 %v12739_v3, %v11105_v1  ;;  %v12723_v37 = vld [vmem:[#allocation6 + $0x3c4] sm:$0xf0]  ;;  %v12722_v49 = vld [vmem:[#allocation6 + $0x3c4] sm:$0xf] }
 0x53c   : > { %v15337_v6 = vmul.f32 %v4936_v42, %v14565_v18  ;;  %v15339_v33 = vpop.f32.mrf.mxu2  ;;  %v15343_v38 = vmul.f32 %v4937_v41, %v14565_v18  ;;  %v15345_v58 = vpop.f32.mrf.mxu3  ;;  %v12724_v42 = vld [vmem:[#allocation6 + $0x3d4] sm:$0xf]  ;;  %v4579_v41 = vadd.f32 %v15281_v10, %v15229_v54  ;;  %v5779_v10 = vpack.c.bf16 %v5774_v17, %v5773_v31 }
 0x53d   : > { %v4870_v36 = vpop.f32.mrf.mxu0  ;;  %v4894_v61 = vpop.f32.mrf.mxu1 }
 0x53e   : > { %v4909_v57 = vadd.f32 %v4870_v36, %v4743_v23  ;;  %v4910_v63 = vadd.f32 %v4894_v61, %v4744_v19  ;;  %v11054_v23 = vor.u32 %v12724_v42, %v11051_v50  ;;  %v12738_v19 = vld [vmem:[#allocation6 + $0x444] sm:$0xf]  ;;  %v11107_v36 = vld [vmem:[#allocation6 + $0x448] sm:$0xf0]  ;;  %6210 = vmatpush.bf16.msrb.mxu0 %v11050_v34  ;;  %v4745_v56 = vadd.f32 %v15285_v53, %v4579_v41 }
 0x53f   : > { %6376 = vmatpush.bf16.msrb.mxu2 %v11106_v62  ;;  %v5944_v53 = vpack.c.bf16 %v15351_v55, %v5774_v17  ;;  %v11043_v34 = vld [vmem:[#allocation6 + $0x3c8] sm:$0xf0]  ;;  %v12736_v62 = vld [vmem:[#allocation6 + $0x434] sm:$0xf] }
 0x540   : > { %v4926_v59 = vadd.f32 %v15321_v9, %v4909_v57  ;;  %v4927_v18 = vadd.f32 %v15327_v14, %v4910_v63  ;;  %v4580_v57 = vadd.f32 %v15283_v30, %v15231_v32  ;;  %v11110_v63 = vor.u32 %v12738_v19, %v11107_v36  ;;  %6234 = vmatpush.bf16.msrb.mxu1 %v11054_v23  ;;  %v11099_v19 = vld [vmem:[#allocation6 + $0x438] sm:$0xf0]  ;;  %v11033_v36 = vld [vmem:[#allocation6 + $0x3b0] sm:$0xf] }
 0x541   : > { %v11046_v31 = vor.u32 %v12722_v49, %v11043_v34  ;;  %v12735_v34 = vld [vmem:[#allocation6 + $0x424] sm:$0xf0] }
 0x542   : > { %v4938_v24 = vmax.f32 %v4926_v59, 0.0  ;;  %v4939_v61 = vmax.f32 %v4927_v18, 0.0  ;;  %v11041_v59 = vld [vmem:[#allocation6 + $0x3c0] sm:$0xf]  ;;  %v4746_v35 = vadd.f32 %v15287_v44, %v4580_v57  ;;  %6400 = vmatpush.bf16.msrb.mxu3 %v11110_v63  ;;  %v11097_v44 = vld [vmem:[#allocation6 + $0x430] sm:$0xf] }
 0x543   : > { %v11042_v18 = vor.u32 %v12723_v37, %v11041_v59  ;;  %v12721_v63 = vld [vmem:[#allocation6 + $0x3b4] sm:$0xf0]  ;;  %v11035_v59 = vld [vmem:[#allocation6 + $0x3b8] sm:$0xf0]  ;;  %v4581_v37 = vadd.f32 %v15289_v60, %v15239_v8 }
 0x544   : > { %v15357_v26 = vmul.f32 %v4938_v24, %v14584_v25  ;;  %v15359_v54 = vpop.f32.mrf.mxu2  ;;  %v15363_v32 = vmul.f32 %v4939_v61, %v14584_v25  ;;  %v15365_v30 = vpop.f32.mrf.mxu3  ;;  %v12737_v24 = vld [vmem:[#allocation6 + $0x434] sm:$0xf0]  ;;  %6235 = vmatpush.bf16.msrb.mxu1 %v11046_v31  ;;  %v11102_v61 = vor.u32 %v12736_v62, %v11099_v19  ;;  %v12734_v31 = vld [vmem:[#allocation6 + $0x424] sm:$0xf] }
 0x545   : > { %v4873_v42 = vpop.f32.mrf.mxu0  ;;  %v4897_v1 = vpop.f32.mrf.mxu1  ;;  %6211 = vmatpush.bf16.msrb.mxu0 %v11042_v18  ;;  %v11098_v17 = vor.u32 %v12737_v24, %v11097_v44  ;;  %v11089_v18 = vld [vmem:[#allocation6 + $0x420] sm:$0xf]  ;;  %v4747_v44 = vadd.f32 %v15293_v5, %v4581_v37 }
 0x546   : > { %v4911_v50 = vadd.f32 %v4873_v42, %v4745_v56  ;;  %v6494_v3 = vpack.c.bf16 %v15357_v26, %v15337_v6  ;;  %v4912_v41 = vadd.f32 %v4897_v1, %v4746_v35  ;;  %v6495_v25 = vpack.c.bf16 %v15363_v32, %v15343_v38  ;;  %v12720_v56 = vld [vmem:[#allocation6 + $0x3b4] sm:$0xf]  ;;  %6401 = vmatpush.bf16.msrb.mxu3 %v11102_v61 }
 0x547   : > { %5886 = vmatmul.bf16.vlgmr.msra.gmra.mxu0 %v5779_v10  ;;  %6377 = vmatpush.bf16.msrb.mxu2 %v11098_v17  ;;  %v11034_v35 = vor.u32 %v12721_v63, %v11033_v36  ;;  %v11038_v42 = vor.u32 %v12720_v56, %v11035_v59  ;;  %v12718_v17 = vld [vmem:[#allocation6 + $0x3a4] sm:$0xf]  ;;  %v11027_v36 = vld [vmem:[#allocation6 + $0x3a8] sm:$0xf0]  ;;  %v11081_v56 = vld [vmem:[#allocation6 + $0x410] sm:$0xf] }
 0x548   : > { %v4928_v23 = vadd.f32 %v15321_v9, %v4911_v50  ;;  %v4929_v57 = vadd.f32 %v15327_v14, %v4912_v41  ;;  %5910 = vmatmul.bf16.vlgmr.msra.gmra.mxu1 %v5779_v10  ;;  %v4582_v50 = vadd.f32 %v15291_v21, %v15243_v46  ;;  %v11090_v10 = vor.u32 %v12735_v34, %v11089_v18  ;;  %v11091_v41 = vld [vmem:[#allocation6 + $0x428] sm:$0xf0]  ;;  %v12733_v59 = vld [vmem:[#allocation6 + $0x414] sm:$0xf0]  ;;  %v11017_v34 = vld [vmem:[#allocation6 + $0x390] sm:$0xf] }
 0x549   : > { %6051 = vmatmul.bf16.vlgmr.msra.gmra.mxu2 %v5944_v53  ;;  %6075 = vmatmul.bf16.vlgmr.msra.gmra.mxu3 %v5944_v53  ;;  %v11094_v60 = vor.u32 %v12734_v31, %v11091_v41  ;;  %v11025_v53 = vld [vmem:[#allocation6 + $0x3a0] sm:$0xf]  ;;  %v11030_v63 = vor.u32 %v12718_v17, %v11027_v36  ;;  %v11019_v41 = vld [vmem:[#allocation6 + $0x398] sm:$0xf0] }
 0x54a   : > { %v4940_v49 = vmax.f32 %v4928_v23, 0.0  ;;  %v4941_v1 = vmax.f32 %v4929_v57, 0.0  ;;  %6212 = vmatpush.bf16.msrb.mxu0 %v11034_v35  ;;  %6236 = vmatpush.bf16.msrb.mxu1 %v11038_v42  ;;  %v12719_v23 = vld [vmem:[#allocation6 + $0x3a4] sm:$0xf0]  ;;  %v4748_v46 = vadd.f32 %v15297_v0, %v4582_v50  ;;  %v11082_v35 = vor.u32 %v12733_v59, %v11081_v56  ;;  %v12732_v42 = vld [vmem:[#allocation6 + $0x414] sm:$0xf] }
 0x54b   : > { %v11026_v5 = vor.u32 %v12719_v23, %v11025_v53  ;;  %6378 = vmatpush.bf16.msrb.mxu2 %v11090_v10  ;;  %6402 = vmatpush.bf16.msrb.mxu3 %v11094_v60  ;;  %v11083_v0 = vld [vmem:[#allocation6 + $0x418] sm:$0xf0]  ;;  %v12717_v50 = vld [vmem:[#allocation6 + $0x394] sm:$0xf0]  ;;  %v12731_v53 = vld [vmem:[#allocation6 + $0x404] sm:$0xf0]  ;;  %v4583_v60 = vadd.f32 %v15299_v11, %v15247_v22 }
 0x54c   : > { %v15380_v24 = vmul.f32 %v4940_v49, %v14570_v20  ;;  %v15382_v8 = vpop.f32.mrf.mxu2  ;;  %v15386_v21 = vmul.f32 %v4941_v1, %v14570_v20  ;;  %v15388_v62 = vpop.f32.mrf.mxu3  ;;  %v5776_v49 = vld [vmem:[#allocation3 + $0x59] sm:$0xff]  ;;  %v11086_v18 = vor.u32 %v12732_v42, %v11083_v0  ;;  %v12716_v1 = vld [vmem:[#allocation6 + $0x394] sm:$0xf]  ;;  %v11018_v10 = vor.u32 %v12717_v50, %v11017_v34  ;;  %v15394_v17 = vld [vmem:[#allocation3 + $0x61] sm:$0xff] }
 0x54d   : > { %v4875_v19 = vpop.f32.mrf.mxu0  ;;  %v4899_v61 = vpop.f32.mrf.mxu1  ;;  %v5780_v22 = vpack.c.bf16 %v5776_v49, %v15351_v55  ;;  %v12730_v11 = vld [vmem:[#allocation6 + $0x404] sm:$0xf]  ;;  %v11075_v56 = vld [vmem:[#allocation6 + $0x408] sm:$0xf0]  ;;  %v11009_v59 = vld [vmem:[#allocation6 + $0x380] sm:$0xf] }
 0x54e   : > { %v4913_v57 = vadd.f32 %v4875_v19, %v4747_v44  ;;  %v4914_v37 = vadd.f32 %v4899_v61, %v4748_v46  ;;  %6213 = vmatpush.bf16.msrb.mxu0 %v11026_v5  ;;  %6237 = vmatpush.bf16.msrb.mxu1 %v11030_v63  ;;  %v11073_v44 = vld [vmem:[#allocation6 + $0x400] sm:$0xf]  ;;  %v11022_v46 = vor.u32 %v12716_v1, %v11019_v41  ;;  %v12715_v0 = vld [vmem:[#allocation6 + $0x384] sm:$0xf0] }
 0x54f   : > { %6379 = vmatpush.bf16.msrb.mxu2 %v11082_v35  ;;  %v11074_v19 = vor.u32 %v12731_v53, %v11073_v44  ;;  %v4584_v5 = vadd.f32 %v15301_v15, %v15249_v29  ;;  %6403 = vmatpush.bf16.msrb.mxu3 %v11086_v18  ;;  %v5945_v35 = vpack.c.bf16 %v15394_v17, %v5776_v49  ;;  %v11011_v18 = vld [vmem:[#allocation6 + $0x388] sm:$0xf0] }
 0x550   : > { %v4930_v20 = vadd.f32 %v15321_v9, %v4913_v57  ;;  %v4931_v31 = vadd.f32 %v15327_v14, %v4914_v37  ;;  %v4749_v57 = vadd.f32 %v15303_v7, %v4583_v60  ;;  %v11078_v42 = vor.u32 %v12730_v11, %v11075_v56 }
 0x551   : > { %v4750_v37 = vadd.f32 %v15305_v16, %v4584_v5  ;;  %v11010_v50 = vor.u32 %v12715_v0, %v11009_v59  ;;  %v4585_v41 = vadd.f32 %v15307_v2, %v15257_v48  ;;  %v4586_v53 = vadd.f32 %v15309_v13, %v15263_v40  ;;  %v5943_v59 = vld [vmem:[#allocation3 + $0x71] sm:$0xff] }
 0x552   : > { %v4942_v23 = vmax.f32 %v4930_v20, 0.0  ;;  %v4943_v36 = vmax.f32 %v4931_v31, 0.0  ;;  %6214 = vmatpush.bf16.msrb.mxu0 %v11018_v10  ;;  %6238 = vmatpush.bf16.msrb.mxu1 %v11022_v46  ;;  %v12714_v20 = vld [vmem:[#allocation6 + $0x384] sm:$0xf] }
 0x553   : > { %6380 = vmatpush.bf16.msrb.mxu2 %v11074_v19  ;;  %v11014_v1 = vor.u32 %v12714_v20, %v11011_v18  ;;  %6404 = vmatpush.bf16.msrb.mxu3 %v11078_v42  ;;  %v4752_v5 = vadd.f32 %v15325_v47, %v4586_v53 }
 0x554   : > { %v15400_v61 = vmul.f32 %v4942_v23, %v14593_v28  ;;  %v15402_v63 = vpop.f32.mrf.mxu2  ;;  %v15407_v29 = vmul.f32 %v4943_v36, %v14593_v28  ;;  %v15409_v15 = vpop.f32.mrf.mxu3  ;;  %v4751_v23 = vadd.f32 %v15319_v51, %v4585_v41  ;;  %v5778_v51 = vld [vmem:[#allocation3 + $0x69] sm:$0xff] }
 0x555   : > { %v4878_v7 = vpop.f32.mrf.mxu0  ;;  %v4902_v34 = vpop.f32.mrf.mxu1  ;;  %v5946_v20 = vpack.c.bf16 %v5943_v59, %v5778_v51  ;;  %v12760_v41 = vld [vmem:[%s15842_s8 + $0x70] sm:$0xff]  ;;  %v12750_v59 = vld [vmem:[%s15842_s8 + $0x20] sm:$0xff] }
 0x556   : > { %v4915_v55 = vadd.f32 %v4878_v7, %v4749_v57  ;;  %v4916_v31 = vadd.f32 %v4902_v34, %v4750_v37  ;;  %v6496_v28 = vpack.c.bf16 %v15400_v61, %v15380_v24  ;;  %v6497_v16 = vpack.c.bf16 %v15407_v29, %v15386_v21  ;;  %6239 = vmatpush.bf16.msrb.mxu1 %v11014_v1  ;;  %v12769_v29 = vld [vmem:[%s15842_s8 + $0x38] sm:$0xff] }
 0x557   : > { %5891 = vmatmul.bf16.gmra.mxu0 %v5780_v22  ;;  %6838 = vmatpush.bf16.msra.mxu2 %v12769_v29 }
 0x558   : > { %v4932_v10 = vadd.f32 %v15321_v9, %v4915_v55  ;;  %v4933_v49 = vadd.f32 %v15327_v14, %v4916_v31  ;;  %5915 = vmatmul.bf16.gmra.mxu1 %v5780_v22  ;;  %6215 = vmatpush.bf16.msrb.mxu0 %v11010_v50 }
 0x559   : > { %6056 = vmatmul.bf16.gmra.mxu2 %v5945_v35  ;;  %6080 = vmatmul.bf16.gmra.mxu3 %v5945_v35 }
 0x55a   : > { %v4944_v44 = vmax.f32 %v4932_v10, 0.0  ;;  %v4945_v60 = vmax.f32 %v4933_v49, 0.0  ;;  %v12752_v49 = vld [vmem:[%s15842_s8 + $0x30] sm:$0xff] }
 0x55c   : > { %v15424_v46 = vmul.f32 %v4944_v44, %v14591_v27  ;;  %v15426_v19 = vpop.f32.mrf.mxu2  ;;  %v15430_v36 = vmul.f32 %v4945_v60, %v14591_v27  ;;  %v15432_v48 = vpop.f32.mrf.mxu3  ;;  %v5781_v27 = vpack.c.bf16 %v5778_v51, %v15394_v17 }
 0x55d   : > { %v4880_v2 = vpop.f32.mrf.mxu0  ;;  %v4904_v22 = vpop.f32.mrf.mxu1 }
 0x55e   : > { %v4917_v57 = vadd.f32 %v4880_v2, %v4751_v23  ;;  %v4918_v11 = vadd.f32 %v4904_v22, %v4752_v5  ;;  %v12751_v5 = vld [vmem:[%s15842_s8 + $0x28] sm:$0xff]  ;;  %v6104_v22 = vld [vmem:[#allocation3 + $0x52] sm:$0xff] }
 0x55f   : > { %v12759_v2 = vld [vmem:[%s15842_s8 + $0x68] sm:$0xff] }
 0x560   : > { %v4934_v40 = vadd.f32 %v15321_v9, %v4917_v57  ;;  %v4935_v13 = vadd.f32 %v15327_v14, %v4918_v11  ;;  %v6103_v57 = vld [vmem:[#allocation3 + $0x4a] sm:$0xff] }
 0x561   : > { %v6268_v11 = vld [vmem:[#allocation3 + $0x4b] sm:$0xff] }
 0x562   : > { %v4946_v56 = vmax.f32 %v4934_v40, 0.0  ;;  %v4947_v37 = vmax.f32 %v4935_v13, 0.0  ;;  %v6269_v40 = vld [vmem:[#allocation3 + $0x53] sm:$0xff] }
 0x564   : > { %v15437_v7 = vmul.f32 %v4946_v56, %v14619_v43  ;;  %v15439_v47 = vpop.f32.mrf.mxu2  ;;  %v15443_v35 = vmul.f32 %v4947_v37, %v14619_v43  ;;  %v15445_v42 = vpop.f32.mrf.mxu3  ;;  %v12753_v43 = vld [vmem:[%s15842_s8 + $0x38] sm:$0xff]  ;;  %v6274_v56 = vpack.c.bf16 %v6269_v40, %v6268_v11  ;;  %v12758_v37 = vld [vmem:[%s15842_s8 + $0x60] sm:$0xff] }
 0x565   : > { %v5239_v0 = vpop.f32.mrf.mxu0  ;;  %v5263_v55 = vpop.f32.mrf.mxu1  ;;  %6631 = vmatpush.bf16.msra.mxu0 %v12753_v43  ;;  %v6271_v11 = vld [vmem:[#allocation3 + $0x63] sm:$0xff] }
 0x566   : > { %v5240_v18 = vadd.f32 %v5239_v0, %v15339_v33  ;;  %v6498_v34 = vpack.c.bf16 %v15437_v7, %v15424_v46  ;;  %v5264_v50 = vadd.f32 %v5263_v55, %v15345_v58  ;;  %v6499_v1 = vpack.c.bf16 %v15443_v35, %v15430_v36  ;;  %v12761_v33 = vld [vmem:[%s15842_s8 + $0x78] sm:$0xff]  ;;  %v12776_v46 = vld [vmem:[%s15842_s8 + $0x70] sm:$0xff]  ;;  %v12767_v36 = vld [vmem:[%s15842_s8 + $0x28] sm:$0xff] }
 0x567   : > { %5896 = vmatmul.bf16.gmra.mxu0 %v5781_v27  ;;  %6655 = vmatpush.bf16.msra.mxu1 %v12761_v33  ;;  %v12757_v55 = vld [vmem:[%s15842_s8 + $0x58] sm:$0xff]  ;;  %v12748_v33 = vld [vmem:[%s15842_s8 + $0x10] sm:$0xff] }
 0x568   : > { %5920 = vmatmul.bf16.gmra.mxu1 %v5781_v27 }
 0x569   : > { %6061 = vmatmul.bf16.gmra.mxu2 %v5946_v20  ;;  %6085 = vmatmul.bf16.gmra.mxu3 %v5946_v20 }
 0x56a   : > { %6632 = vmatpush.bf16.msra.mxu0 %v12752_v49 }
 0x56b   : > { %6656 = vmatpush.bf16.msra.mxu1 %v12760_v41 }
 0x56c   : > { %v5392_v17 = vpop.f32.mrf.mxu2  ;;  %v5416_v58 = vpop.f32.mrf.mxu3 }
 0x56d   : > { %v15459_v31 = vadd.f32 %v5392_v17, %v5240_v18  ;;  %v5241_v10 = vpop.f32.mrf.mxu0  ;;  %v15467_v44 = vadd.f32 %v5416_v58, %v5264_v50  ;;  %v5265_v60 = vpop.f32.mrf.mxu1  ;;  %v12749_v18 = vld [vmem:[%s15842_s8 + $0x18] sm:$0xff]  ;;  %v12756_v17 = vld [vmem:[%s15842_s8 + $0x50] sm:$0xff] }
 0x56e   : > { %v15470_v53 = vadd.f32 %v5241_v10, %v15359_v54  ;;  %v15473_v23 = vadd.f32 %v5265_v60, %v15365_v30  ;;  %6633 = vmatpush.bf16.msra.mxu0 %v12751_v5  ;;  %v6109_v30 = vpack.c.bf16 %v6104_v22, %v6103_v57  ;;  %v12747_v60 = vld [vmem:[%s15842_s8 + $0x8] sm:$0xff]  ;;  %v6270_v22 = vld [vmem:[#allocation3 + $0x5b] sm:$0xff] }
 0x56f   : > { %6657 = vmatpush.bf16.msra.mxu1 %v12759_v2  ;;  %v12755_v5 = vld [vmem:[%s15842_s8 + $0x48] sm:$0xff]  ;;  %v6105_v2 = vld [vmem:[#allocation3 + $0x5a] sm:$0xff] }
 0x570   : > { %v6106_v57 = vld [vmem:[#allocation3 + $0x62] sm:$0xff] }
 0x571   : > { %v6110_v40 = vpack.c.bf16 %v6106_v57, %v6105_v2 }
 0x572   : > { %6634 = vmatpush.bf16.msra.mxu0 %v12750_v59  ;;  %v12754_v59 = vld [vmem:[%s15842_s8 + $0x40] sm:$0xff] }
 0x573   : > { %6658 = vmatpush.bf16.msra.mxu1 %v12758_v37 }
 0x574   : > { %v15481_v54 = vpop.f32.mrf.mxu2  ;;  %v15483_v13 = vpop.f32.mrf.mxu3 }
 0x575   : > { %v5244_v51 = vpop.f32.mrf.mxu0  ;;  %v5268_v0 = vpop.f32.mrf.mxu1 }
 0x576   : > { %v5245_v27 = vadd.f32 %v5244_v51, %v15382_v8  ;;  %v5269_v20 = vadd.f32 %v5268_v0, %v15388_v62  ;;  %6635 = vmatpush.bf16.msra.mxu0 %v12749_v18  ;;  %v6275_v51 = vpack.c.bf16 %v6271_v11, %v6270_v22 }
 0x577   : > { %6216 = vmatmul.bf16.vlgmr.msrb.gmra.mxu0 %v6109_v30  ;;  %6659 = vmatpush.bf16.msra.mxu1 %v12757_v55 }
 0x578   : > { %6240 = vmatmul.bf16.vlgmr.msrb.gmra.mxu1 %v6109_v30 }
 0x579   : > { %6381 = vmatmul.bf16.vlgmr.msrb.gmra.mxu2 %v6274_v56  ;;  %6405 = vmatmul.bf16.vlgmr.msrb.gmra.mxu3 %v6274_v56  ;;  %v12746_v56 = vld [vmem:[%s15842_s8] sm:$0xff] }
 0x57a   : > { %6636 = vmatpush.bf16.msra.mxu0 %v12748_v33 }
 0x57b   : > { %6660 = vmatpush.bf16.msra.mxu1 %v12756_v17 }
 0x57c   : > { %v5397_v8 = vpop.f32.mrf.mxu2  ;;  %v5421_v62 = vpop.f32.mrf.mxu3 }
 0x57d   : > { %v15499_v50 = vadd.f32 %v5397_v8, %v5245_v27  ;;  %v5246_v43 = vpop.f32.mrf.mxu0  ;;  %v15507_v58 = vadd.f32 %v5421_v62, %v5269_v20  ;;  %v5270_v49 = vpop.f32.mrf.mxu1 }
 0x57e   : > { %v15510_v10 = vadd.f32 %v5246_v43, %v15402_v63  ;;  %v15513_v41 = vadd.f32 %v5270_v49, %v15409_v15  ;;  %6637 = vmatpush.bf16.msra.mxu0 %v12747_v60  ;;  %v6108_v49 = vld [vmem:[#allocation3 + $0x72] sm:$0xff] }
 0x57f   : > { %6661 = vmatpush.bf16.msra.mxu1 %v12755_v5  ;;  %v6272_v60 = vld [vmem:[#allocation3 + $0x6b] sm:$0xff] }
 0x582   : > { %6638 = vmatpush.bf16.msra.mxu0 %v12746_v56  ;;  %v5434_v56 = vadd.f32 %v15483_v13, %v15473_v23 }
 0x583   : > { %6662 = vmatpush.bf16.msra.mxu1 %v12754_v59 }
 0x584   : > { %v5399_v63 = vpop.f32.mrf.mxu2  ;;  %v5423_v15 = vpop.f32.mrf.mxu3 }
 0x585   : > { %v5249_v30 = vpop.f32.mrf.mxu0  ;;  %v5273_v27 = vpop.f32.mrf.mxu1  ;;  %v5437_v13 = vadd.f32 %v5399_v63, %v15510_v10 }
 0x586   : > { %v5250_v37 = vadd.f32 %v5249_v30, %v15426_v19  ;;  %v5274_v0 = vadd.f32 %v5273_v27, %v15432_v48  ;;  %v6107_v19 = vld [vmem:[#allocation3 + $0x6a] sm:$0xff]  ;;  %v6273_v48 = vld [vmem:[#allocation3 + $0x73] sm:$0xff] }
 0x587   : > { %6221 = vmatmul.bf16.gmra.mxu0 %v6110_v40  ;;  %v6111_v2 = vpack.c.bf16 %v6108_v49, %v6107_v19  ;;  %v6276_v11 = vpack.c.bf16 %v6273_v48, %v6272_v60  ;;  %v5438_v48 = vadd.f32 %v5423_v15, %v15513_v41 }
 0x588   : > { %6245 = vmatmul.bf16.gmra.mxu1 %v6110_v40 }
 0x589   : > { %6386 = vmatmul.bf16.gmra.mxu2 %v6275_v51  ;;  %6410 = vmatmul.bf16.gmra.mxu3 %v6275_v51 }
 0x58c   : > { %v5402_v20 = vpop.f32.mrf.mxu2  ;;  %v5426_v55 = vpop.f32.mrf.mxu3 }
 0x58d   : > { %v5439_v18 = vadd.f32 %v5402_v20, %v5250_v37  ;;  %v5251_v8 = vpop.f32.mrf.mxu0  ;;  %v5440_v62 = vadd.f32 %v5426_v55, %v5274_v0  ;;  %v5275_v33 = vpop.f32.mrf.mxu1 }
 0x58e   : > { %v5252_v43 = vadd.f32 %v5251_v8, %v15439_v47  ;;  %v5276_v17 = vadd.f32 %v5275_v33, %v15445_v42  ;;  %v5433_v47 = vadd.f32 %v15481_v54, %v15470_v53 }
 0x594   : > { %v5404_v5 = vpop.f32.mrf.mxu2  ;;  %v5428_v57 = vpop.f32.mrf.mxu3 }
 0x595   : > { %v5557_v22 = vpop.f32.mrf.mxu0  ;;  %v5581_v30 = vpop.f32.mrf.mxu1  ;;  %v5441_v41 = vadd.f32 %v5404_v5, %v5252_v43 }
 0x596   : > { %v5596_v40 = vadd.f32 %v5557_v22, %v15459_v31  ;;  %v5597_v51 = vadd.f32 %v5581_v30, %v15467_v44 }
 0x597   : > { %6226 = vmatmul.bf16.gmra.mxu0 %v6111_v2 }
 0x598   : > { %6250 = vmatmul.bf16.gmra.mxu1 %v6111_v2 }
 0x599   : > { %6391 = vmatmul.bf16.gmra.mxu2 %v6276_v11  ;;  %6415 = vmatmul.bf16.gmra.mxu3 %v6276_v11 }
 0x59c   : > { %v5722_v42 = vpop.f32.mrf.mxu2  ;;  %v5746_v37 = vpop.f32.mrf.mxu3 }
 0x59d   : > { %v15537_v59 = vadd.f32 %v5722_v42, %v5596_v40  ;;  %v5559_v27 = vpop.f32.mrf.mxu0  ;;  %v15539_v0 = vadd.f32 %v5746_v37, %v5597_v51  ;;  %v5583_v20 = vpop.f32.mrf.mxu1  ;;  %v5442_v51 = vadd.f32 %v5428_v57, %v5276_v17 }
 0x59e   : > { %v5598_v31 = vadd.f32 %v5559_v27, %v5433_v47  ;;  %v5599_v44 = vadd.f32 %v5583_v20, %v5434_v56 }
 0x5a4   : > { %v5724_v55 = vpop.f32.mrf.mxu2  ;;  %v5748_v33 = vpop.f32.mrf.mxu3 }
 0x5a5   : > { %v15541_v8 = vadd.f32 %v5724_v55, %v5598_v31  ;;  %v5562_v19 = vpop.f32.mrf.mxu0  ;;  %v15543_v49 = vadd.f32 %v5748_v33, %v5599_v44  ;;  %v5586_v54 = vpop.f32.mrf.mxu1  ;;  %v12768_v44 = vld [vmem:[%s15842_s8 + $0x30] sm:$0xff]  ;;  %v12775_v55 = vld [vmem:[%s15842_s8 + $0x68] sm:$0xff]  ;;  %v12766_v33 = vld [vmem:[%s15842_s8 + $0x20] sm:$0xff] }
 0x5a6   : > { %v5600_v53 = vadd.f32 %v5562_v19, %v15499_v50  ;;  %v5601_v23 = vadd.f32 %v5586_v54, %v15507_v58  ;;  %6839 = vmatpush.bf16.msra.mxu2 %v12768_v44  ;;  %v12774_v19 = vld [vmem:[%s15842_s8 + $0x60] sm:$0xff] }
 0x5a7   : > { %6639 = vmatmul.bf16.vlgmr.msra.gmra.mxu0 %v6494_v3 }
 0x5a8   : > { %6663 = vmatmul.bf16.vlgmr.msra.gmra.mxu1 %v6495_v25 }
 0x5aa   : > { %6840 = vmatpush.bf16.msra.mxu2 %v12767_v36 }
 0x5ac   : > { %v5727_v60 = vpop.f32.mrf.mxu2  ;;  %v5751_v22 = vpop.f32.mrf.mxu3 }
 0x5ad   : > { %v15555_v2 = vadd.f32 %v5727_v60, %v5600_v53  ;;  %v5564_v50 = vpop.f32.mrf.mxu0  ;;  %v15557_v11 = vadd.f32 %v5751_v22, %v5601_v23  ;;  %v5588_v40 = vpop.f32.mrf.mxu1  ;;  %v12765_v60 = vld [vmem:[%s15842_s8 + $0x18] sm:$0xff]  ;;  %v12764_v22 = vld [vmem:[%s15842_s8 + $0x10] sm:$0xff] }
 0x5ae   : > { %v5602_v58 = vadd.f32 %v5564_v50, %v5437_v13  ;;  %v5603_v30 = vadd.f32 %v5588_v40, %v5438_v48  ;;  %6841 = vmatpush.bf16.msra.mxu2 %v12766_v33  ;;  %v12773_v48 = vld [vmem:[%s15842_s8 + $0x58] sm:$0xff]  ;;  %v12772_v50 = vld [vmem:[%s15842_s8 + $0x50] sm:$0xff] }
 0x5b2   : > { %6842 = vmatpush.bf16.msra.mxu2 %v12765_v60 }
 0x5b4   : > { %v5729_v6 = vpop.f32.mrf.mxu2  ;;  %v5753_v3 = vpop.f32.mrf.mxu3 }
 0x5b5   : > { %v15559_v26 = vadd.f32 %v5729_v6, %v5602_v58  ;;  %v5567_v38 = vpop.f32.mrf.mxu0  ;;  %v15561_v32 = vadd.f32 %v5753_v3, %v5603_v30  ;;  %v5591_v10 = vpop.f32.mrf.mxu1  ;;  %v12763_v3 = vld [vmem:[%s15842_s8 + $0x8] sm:$0xff] }
 0x5b6   : > { %v5604_v25 = vadd.f32 %v5567_v38, %v5439_v18  ;;  %v5605_v63 = vadd.f32 %v5591_v10, %v5440_v62  ;;  %6843 = vmatpush.bf16.msra.mxu2 %v12764_v22  ;;  %v12771_v38 = vld [vmem:[%s15842_s8 + $0x48] sm:$0xff]  ;;  %v12770_v10 = vld [vmem:[%s15842_s8 + $0x40] sm:$0xff] }
 0x5b7   : > { %6644 = vmatmul.bf16.gmra.mxu0 %v6496_v28 }
 0x5b8   : > { %6668 = vmatmul.bf16.gmra.mxu1 %v6497_v16  ;;  %v12777_v16 = vld [vmem:[%s15842_s8 + $0x78] sm:$0xff] }
 0x5b9   : > { %6862 = vmatpush.bf16.msra.mxu3 %v12777_v16 }
 0x5ba   : > { %6844 = vmatpush.bf16.msra.mxu2 %v12763_v3 }
 0x5bc   : > { %v5732_v15 = vpop.f32.mrf.mxu2  ;;  %v5756_v42 = vpop.f32.mrf.mxu3 }
 0x5bd   : > { %v15569_v47 = vadd.f32 %v5732_v15, %v5604_v25  ;;  %v5569_v56 = vpop.f32.mrf.mxu0  ;;  %v15571_v37 = vadd.f32 %v5756_v42, %v5605_v63  ;;  %v5593_v27 = vpop.f32.mrf.mxu1  ;;  %6863 = vmatpush.bf16.msra.mxu3 %v12776_v46  ;;  %v12762_v25 = vld [vmem:[%s15842_s8] sm:$0xff] }
 0x5be   : > { %v5606_v18 = vadd.f32 %v5569_v56, %v5441_v41  ;;  %v5607_v62 = vadd.f32 %v5593_v27, %v5442_v51  ;;  %6845 = vmatpush.bf16.msra.mxu2 %v12762_v25 }
 0x5c1   : > { %6864 = vmatpush.bf16.msra.mxu3 %v12775_v55 }
 0x5c4   : > { %v5734_v31 = vpop.f32.mrf.mxu2  ;;  %v5758_v24 = vpop.f32.mrf.mxu3 }
 0x5c5   : > { %v15573_v20 = vadd.f32 %v5734_v31, %v5606_v18  ;;  %v5887_v61 = vpop.f32.mrf.mxu0  ;;  %v15575_v28 = vadd.f32 %v5758_v24, %v5607_v62  ;;  %v5911_v21 = vpop.f32.mrf.mxu1  ;;  %6865 = vmatpush.bf16.msra.mxu3 %v12774_v19 }
 0x5c6   : > { %v5926_v62 = vadd.f32 %v5887_v61, %v15537_v59  ;;  %v5927_v31 = vadd.f32 %v5911_v21, %v15539_v0 }
 0x5c7   : > { %6649 = vmatmul.bf16.gmra.mxu0 %v6498_v34 }
 0x5c8   : > { %6673 = vmatmul.bf16.gmra.mxu1 %v6499_v1 }
 0x5c9   : > { %6866 = vmatpush.bf16.msra.mxu3 %v12773_v48 }
 0x5cc   : > { %v6052_v43 = vpop.f32.mrf.mxu2  ;;  %v6076_v17 = vpop.f32.mrf.mxu3 }
 0x5cd   : > { %v5889_v5 = vpop.f32.mrf.mxu0  ;;  %v15589_v57 = vpop.f32.mrf.mxu1  ;;  %6867 = vmatpush.bf16.msra.mxu3 %v12772_v50  ;;  %v6091_v24 = vadd.f32 %v6052_v43, %v5926_v62  ;;  %v6092_v29 = vadd.f32 %v6076_v17, %v5927_v31 }
 0x5ce   : > { %v5928_v48 = vadd.f32 %v5889_v5, %v15541_v8  ;;  %v5929_v50 = vadd.f32 %v15589_v57, %v15543_v49 }
 0x5d1   : > { %6868 = vmatpush.bf16.msra.mxu3 %v12771_v38 }
 0x5d4   : > { %v6054_v7 = vpop.f32.mrf.mxu2  ;;  %v6078_v35 = vpop.f32.mrf.mxu3 }
 0x5d5   : > { %v15600_v34 = vpop.f32.mrf.mxu0  ;;  %v15602_v1 = vpop.f32.mrf.mxu1  ;;  %6869 = vmatpush.bf16.msra.mxu3 %v12770_v10  ;;  %v6093_v0 = vadd.f32 %v6054_v7, %v5928_v48  ;;  %v6094_v21 = vadd.f32 %v6078_v35, %v5929_v50 }
 0x5d6   : > { %v5930_v49 = vadd.f32 %v15600_v34, %v15555_v2  ;;  %v5931_v7 = vadd.f32 %v15602_v1, %v15557_v11 }
 0x5dc   : > { %v15613_v53 = vpop.f32.mrf.mxu2  ;;  %v15615_v54 = vpop.f32.mrf.mxu3 }
 0x5dd   : > { %v15617_v23 = vpop.f32.mrf.mxu0  ;;  %v15619_v13 = vpop.f32.mrf.mxu1  ;;  %v6095_v31 = vadd.f32 %v15613_v53, %v5930_v49 }
 0x5de   : > { %v5932_v53 = vadd.f32 %v15617_v23, %v15559_v26  ;;  %v5933_v48 = vadd.f32 %v15619_v13, %v15561_v32 }
 0x5e4   : > { %v15633_v58 = vpop.f32.mrf.mxu2  ;;  %v15635_v40 = vpop.f32.mrf.mxu3 }
 0x5e5   : > { %v15637_v30 = vpop.f32.mrf.mxu0  ;;  %v15639_v6 = vpop.f32.mrf.mxu1 }
 0x5ec   : > { %v15653_v63 = vpop.f32.mrf.mxu2  ;;  %v15655_v41 = vpop.f32.mrf.mxu3 }
 0x5ed   : > { %v15657_v15 = vpop.f32.mrf.mxu0  ;;  %v15659_v51 = vpop.f32.mrf.mxu1 }
 0x5f4   : > { %v15661_v42 = vpop.f32.mrf.mxu2  ;;  %v15663_v56 = vpop.f32.mrf.mxu3 }
 0x5f5   : > { %v6217_v18 = vpop.f32.mrf.mxu0  ;;  %v6241_v27 = vpop.f32.mrf.mxu1 }
 0x5f6   : > { %v6256_v16 = vadd.f32 %v6217_v18, %v6091_v24  ;;  %v6257_v44 = vadd.f32 %v6241_v27, %v6092_v29  ;;  %v6096_v24 = vadd.f32 %v15615_v54, %v5931_v7 }
 0x5fc   : > { %v6382_v46 = vpop.f32.mrf.mxu2  ;;  %v6406_v55 = vpop.f32.mrf.mxu3 }
 0x5fd   : > { %v6421_v36 = vadd.f32 %v6382_v46, %v6256_v16  ;;  %v6219_v33 = vpop.f32.mrf.mxu0  ;;  %v6422_v19 = vadd.f32 %v6406_v55, %v6257_v44  ;;  %v6243_v60 = vpop.f32.mrf.mxu1 }
 0x5fe   : > { %v6258_v3 = vadd.f32 %v6219_v33, %v6093_v0  ;;  %v6259_v25 = vadd.f32 %v6243_v60, %v6094_v21 }
 0x5ff   : > { %v6433_v22 = vadd.f32 %v6421_v36, %v15321_v9  ;;  %v6434_v59 = vadd.f32 %v6422_v19, %v15327_v14 }
 0x601   : > { %v6445_v61 = vmax.f32 %v6433_v22, 0.0  ;;  %v6446_v43 = vmax.f32 %v6434_v59, 0.0  ;;  %v6097_v22 = vadd.f32 %v15633_v58, %v5932_v53  ;;  %v6098_v59 = vadd.f32 %v15635_v40, %v5933_v48  ;;  %v15850_v53 = vld [vmem:[#allocation13_spill] sm:$0xff] }
 0x602   : > { %v5935_v40 = vadd.f32 %v15639_v6, %v15571_v37 }
 0x603   : > { %v6457_v17 = vmul.f32 %v6445_v61, %v14609_v39  ;;  %v6458_v38 = vmul.f32 %v6446_v43, %v14609_v39 }
 0x604   : > { %v6384_v10 = vpop.f32.mrf.mxu2  ;;  %v6408_v8 = vpop.f32.mrf.mxu3 }
 0x605   : > { %v6423_v18 = vadd.f32 %v6384_v10, %v6258_v3  ;;  %v6222_v5 = vpop.f32.mrf.mxu0  ;;  %v6424_v27 = vadd.f32 %v6408_v8, %v6259_v25  ;;  %v6246_v62 = vpop.f32.mrf.mxu1  ;;  %v5934_v25 = vadd.f32 %v15637_v30, %v15569_v47  ;;  %v6100_v8 = vadd.f32 %v15655_v41, %v5935_v40 }
 0x606   : > { %v6260_v44 = vadd.f32 %v6222_v5, %v6095_v31  ;;  %v6261_v36 = vadd.f32 %v6246_v62, %v6096_v24  ;;  %v5937_v24 = vadd.f32 %v15659_v51, %v15575_v28 }
 0x607   : > { %v6435_v57 = vadd.f32 %v6423_v18, %v15321_v9  ;;  %v6436_v35 = vadd.f32 %v6424_v27, %v15327_v14  ;;  %v6099_v18 = vadd.f32 %v15653_v63, %v5934_v25  ;;  %v5936_v63 = vadd.f32 %v15657_v15, %v15573_v20 }
 0x609   : > { %v6447_v39 = vmax.f32 %v6435_v57, 0.0  ;;  %v6448_v29 = vmax.f32 %v6436_v35, 0.0 }
 0x60b   : > { %v6459_v16 = vmul.f32 %v6447_v39, %v14635_v52  ;;  %v6460_v46 = vmul.f32 %v6448_v29, %v14635_v52  ;;  %v6101_v29 = vadd.f32 %v15661_v42, %v5936_v63 }
 0x60c   : > { %v6387_v2 = vpop.f32.mrf.mxu2  ;;  %v6411_v55 = vpop.f32.mrf.mxu3 }
 0x60d   : > { %v6425_v34 = vadd.f32 %v6387_v2, %v6260_v44  ;;  %v6224_v33 = vpop.f32.mrf.mxu0  ;;  %v6704_v19 = vpack.c.bf16 %v6459_v16, %v6457_v17  ;;  %v6426_v11 = vadd.f32 %v6411_v55, %v6261_v36  ;;  %v6248_v1 = vpop.f32.mrf.mxu1  ;;  %v6705_v60 = vpack.c.bf16 %v6460_v46, %v6458_v38  ;;  %v15715_v36 = vld [vmem:[%s15843_s9] ss:$0 sm:$0xff] }
 0x60e   : > { %v6262_v21 = vadd.f32 %v6224_v33, %v6097_v22  ;;  %v6263_v23 = vadd.f32 %v6248_v1, %v6098_v59  ;;  %v6102_v44 = vadd.f32 %v15663_v56, %v5937_v24 }
 0x60f   : > { %v6437_v54 = vadd.f32 %v6425_v34, %v15321_v9  ;;  %6846 = vmatmul.bf16.vlgmr.msra.gmra.mxu2 %v6704_v19  ;;  %v6438_v52 = vadd.f32 %v6426_v11, %v15327_v14  ;;  %6870 = vmatmul.bf16.vlgmr.msra.gmra.mxu3 %v6705_v60 }
 0x611   : > { %v6449_v50 = vmax.f32 %v6437_v54, 0.0  ;;  %v6450_v0 = vmax.f32 %v6438_v52, 0.0 }
 0x613   : > { %v6461_v61 = vmul.f32 %v6449_v50, %v14662_v12  ;;  %v6462_v26 = vmul.f32 %v6450_v0, %v14662_v12 }
 0x614   : > { %v6389_v43 = vpop.f32.mrf.mxu2  ;;  %v6413_v3 = vpop.f32.mrf.mxu3 }
 0x615   : > { %v6427_v17 = vadd.f32 %v6389_v43, %v6262_v21  ;;  %v6227_v38 = vpop.f32.mrf.mxu0  ;;  %v6428_v32 = vadd.f32 %v6413_v3, %v6263_v23  ;;  %v6251_v13 = vpop.f32.mrf.mxu1 }
 0x616   : > { %v6264_v62 = vadd.f32 %v6227_v38, %v6099_v18  ;;  %v6265_v57 = vadd.f32 %v6251_v13, %v6100_v8 }
 0x617   : > { %v6439_v58 = vadd.f32 %v6427_v17, %v15321_v9  ;;  %v6440_v10 = vadd.f32 %v6428_v32, %v15327_v14 }
 0x619   : > { %v6451_v12 = vmax.f32 %v6439_v58, 0.0  ;;  %v6452_v5 = vmax.f32 %v6440_v10, 0.0 }
 0x61b   : > { %v6463_v27 = vmul.f32 %v6451_v12, %v14704_v45  ;;  %v6464_v49 = vmul.f32 %v6452_v5, %v14704_v45 }
 0x61c   : > { %v6392_v47 = vpop.f32.mrf.mxu2  ;;  %v6416_v7 = vpop.f32.mrf.mxu3 }
 0x61d   : > { %v6429_v30 = vadd.f32 %v6392_v47, %v6264_v62  ;;  %v6229_v35 = vpop.f32.mrf.mxu0  ;;  %v6706_v31 = vpack.c.bf16 %v6463_v27, %v6461_v61  ;;  %v6430_v37 = vadd.f32 %v6416_v7, %v6265_v57  ;;  %v6253_v6 = vpop.f32.mrf.mxu1  ;;  %v6707_v39 = vpack.c.bf16 %v6464_v49, %v6462_v26 }
 0x61e   : > { %v6266_v15 = vadd.f32 %v6229_v35, %v6101_v29  ;;  %v6267_v28 = vadd.f32 %v6253_v6, %v6102_v44 }
 0x61f   : > { %v6441_v41 = vadd.f32 %v6429_v30, %v15321_v9  ;;  %6851 = vmatmul.bf16.gmra.mxu2 %v6706_v31  ;;  %v6442_v45 = vadd.f32 %v6430_v37, %v15327_v14  ;;  %6875 = vmatmul.bf16.gmra.mxu3 %v6707_v39 }
 0x621   : > { %v6453_v16 = vmax.f32 %v6441_v41, 0.0  ;;  %v6454_v46 = vmax.f32 %v6442_v45, 0.0 }
 0x623   : > { %v6465_v20 = vmul.f32 %v6453_v16, %v14725_v4  ;;  %v6466_v2 = vmul.f32 %v6454_v46, %v14725_v4 }
 0x624   : > { %v6394_v51 = vpop.f32.mrf.mxu2  ;;  %v6418_v55 = vpop.f32.mrf.mxu3 }
 0x625   : > { %v6431_v34 = vadd.f32 %v6394_v51, %v6266_v15  ;;  %v6640_v33 = vpop.f32.mrf.mxu0  ;;  %v6432_v42 = vadd.f32 %v6418_v55, %v6267_v28  ;;  %v6664_v19 = vpop.f32.mrf.mxu1 }
 0x627   : > { %v6443_v56 = vadd.f32 %v6431_v34, %v15321_v9  ;;  %v6444_v11 = vadd.f32 %v6432_v42, %v15327_v14 }
 0x629   : > { %v6455_v1 = vmax.f32 %v6443_v56, 0.0  ;;  %v6456_v60 = vmax.f32 %v6444_v11, 0.0 }
 0x62b   : > { %v6467_v54 = vmul.f32 %v6455_v1, %v15850_v53  ;;  %v6468_v48 = vmul.f32 %v6456_v60, %v15850_v53 }
 0x62d   : > { %v6642_v52 = vpop.f32.mrf.mxu0  ;;  %v6708_v4 = vpack.c.bf16 %v6467_v54, %v6465_v20  ;;  %v6666_v50 = vpop.f32.mrf.mxu1  ;;  %v6709_v59 = vpack.c.bf16 %v6468_v48, %v6466_v2 }
 0x62e   : > { %v6643_v22 = vadd.f32 %v15715_v36, %v6642_v52 }
 0x62f   : > { %6856 = vmatmul.bf16.gmra.mxu2 %v6708_v4  ;;  %6880 = vmatmul.bf16.gmra.mxu3 %v6709_v59 }
 0x630   : > { %v6667_v0 = vadd.f32 %v6666_v50, %v6643_v22 }
 0x632   : > { %v6680_v61 = vmax.f32 %v6667_v0, 0.0 }
 0x634   : > { %6687 = vst.msk [vmem:[#allocation5 + $0x18] sm:$0xff] %vm6685_vm0, %v6680_v61 }
 0x635   : > { %v6645_v9 = vpop.f32.mrf.mxu0  ;;  %v6669_v21 = vpop.f32.mrf.mxu1 }
 0x636   : > { %v6646_v14 = vadd.f32 %v15715_v36, %v6645_v9 }
 0x638   : > { %v6670_v26 = vadd.f32 %v6669_v21, %v6646_v14 }
 0x63a   : > { %v6681_v23 = vmax.f32 %v6670_v26, 0.0 }
 0x63c   : > { %6688 = vst.msk [vmem:[#allocation5 + $0x20] sm:$0xff] %vm6685_vm0, %v6681_v23 }
 0x63d   : > { %v6647_v43 = vpop.f32.mrf.mxu0  ;;  %v6671_v3 = vpop.f32.mrf.mxu1 }
 0x63e   : > { %v6648_v17 = vadd.f32 %v15715_v36, %v6647_v43 }
 0x640   : > { %v6672_v38 = vadd.f32 %v6671_v3, %v6648_v17 }
 0x642   : > { %v6682_v32 = vmax.f32 %v6672_v38, 0.0 }
 0x643   : > { %v6898_v18 = vld [vmem:[#allocation5 + $0x1b] sm:$0xff] }
 0x644   : > { %6689 = vst.msk [vmem:[#allocation5 + $0x28] sm:$0xff] %vm6685_vm0, %v6682_v32 }
 0x645   : > { %v6650_v13 = vpop.f32.mrf.mxu0  ;;  %v6674_v58 = vpop.f32.mrf.mxu1 }
 0x646   : > { %v6651_v25 = vadd.f32 %v15715_v36, %v6650_v13 }
 0x648   : > { %v6675_v40 = vadd.f32 %v6674_v58, %v6651_v25 }
 0x64a   : > { %v6683_v10 = vmax.f32 %v6675_v40, 0.0 }
 0x64b   : > { %v6899_v12 = vld [vmem:[#allocation5 + $0x25] sm:$0xff] }
 0x64c   : > { %6690 = vst.msk [vmem:[#allocation5 + $0x30] sm:$0xff] %vm6685_vm0, %v6683_v10  ;;  %v6900_v8 = vmax.f32 %v6898_v18, %v6899_v12 }
 0x64d   : > { %v6652_v5 = vpop.f32.mrf.mxu0  ;;  %v6676_v49 = vpop.f32.mrf.mxu1 }
 0x64e   : > { %v6653_v27 = vadd.f32 %v15715_v36, %v6652_v5  ;;  %v6902_v62 = vrot.slane %v6900_v8, 1 }
 0x650   : > { %v6677_v57 = vadd.f32 %v6676_v49, %v6653_v27  ;;  %v15732_v47 = vmax.f32 %v6900_v8, %v6902_v62 }
 0x652   : > { %v6684_v30 = vmax.f32 %v6677_v57, 0.0  ;;  %v6927_v7 = vrot.slane %v15732_v47, 2  ;;  %v6933_v35 = vrot.slane %v15732_v47, 6  ;;  %v6931_v10 = vrot.slane %v15732_v47, 4 }
 0x653   : > { %v6905_v46 = vld [vmem:[#allocation5 + $0x2f] sm:$0xff] }
 0x654   : > { %6691 = vst.msk [vmem:[#allocation5 + $0x38] sm:$0xff] %vm6685_vm0, %v6684_v30  ;;  %v13056_v31 = vpack.i.bf16 %v6933_v35, %v6927_v7 }
 0x656   : > { %13057 = vrot.lane.b32.xlu0 %v13056_v31, %s13095_s17 }
 0x692   : > { %v6847_v37 = vpop.f32.mrf.mxu2  ;;  %v6871_v39 = vpop.f32.mrf.mxu3 }
 0x693   : > { %v6848_v6 = vadd.f32 %v15715_v36, %v6847_v37 }
 0x695   : > { %v6872_v63 = vadd.f32 %v6871_v39, %v6848_v6 }
 0x697   : > { %v6886_v41 = vmax.f32 %v6872_v63, 0.0 }
 0x699   : > { %6892 = vst.msk [vmem:[#allocation5 + $0x40] sm:$0xff] %vm6685_vm0, %v6886_v41 }
 0x69a   : > { %v6849_v24 = vpop.f32.mrf.mxu2  ;;  %v6873_v29 = vpop.f32.mrf.mxu3 }
 0x69b   : > { %v6850_v45 = vadd.f32 %v15715_v36, %v6849_v24 }
 0x69d   : > { %v6874_v16 = vadd.f32 %v6873_v29, %v6850_v45 }
 0x69f   : > { %v6887_v44 = vmax.f32 %v6874_v16, 0.0 }
 0x6a0   : > { %v6906_v20 = vld [vmem:[#allocation5 + $0x39] sm:$0xff] }
 0x6a1   : > { %6893 = vst.msk [vmem:[#allocation5 + $0x48] sm:$0xff] %vm6685_vm0, %v6887_v44  ;;  %v6907_v15 = vmax.f32 %v6905_v46, %v6906_v20 }
 0x6a2   : > { %v6852_v2 = vpop.f32.mrf.mxu2  ;;  %v6876_v51 = vpop.f32.mrf.mxu3 }
 0x6a3   : > { %v6853_v28 = vadd.f32 %v15715_v36, %v6852_v2  ;;  %v6909_v34 = vrot.slane %v6907_v15, 1 }
 0x6a5   : > { %v6877_v55 = vadd.f32 %v6876_v51, %v6853_v28  ;;  %v6911_v33 = vmax.f32 %v6907_v15, %v6909_v34 }
 0x6a7   : > { %v6888_v42 = vmax.f32 %v6877_v55, 0.0  ;;  %v6938_v19 = vrot.slane %v6911_v33, 2  ;;  %v6944_v56 = vrot.slane %v6911_v33, 6  ;;  %v6942_v37 = vrot.slane %v6911_v33, 4 }
 0x6a8   : > { %v6912_v52 = vld [vmem:[#allocation5 + $0x43] sm:$0xff] }
 0x6a9   : > { %6894 = vst.msk [vmem:[#allocation5 + $0x50] sm:$0xff] %vm6685_vm0, %v6888_v42  ;;  %v13061_v11 = vpack.i.bf16 %v6944_v56, %v6938_v19 }
 0x6aa   : > { %v6854_v1 = vpop.f32.mrf.mxu2  ;;  %v6878_v53 = vpop.f32.mrf.mxu3 }
 0x6ab   : > { %v6855_v60 = vadd.f32 %v15715_v36, %v6854_v1  ;;  %13062 = vrot.lane.b32.xlu0 %v13061_v11, %s13095_s17 }
 0x6ad   : > { %v6879_v54 = vadd.f32 %v6878_v53, %v6855_v60 }
 0x6af   : > { %v6889_v48 = vmax.f32 %v6879_v54, 0.0 }
 0x6b0   : > { %v6913_v4 = vld [vmem:[#allocation5 + $0x4d] sm:$0xff] }
 0x6b1   : > { %6895 = vst.msk [vmem:[#allocation5 + $0x58] sm:$0xff] %vm6685_vm0, %v6889_v48  ;;  %v6914_v22 = vmax.f32 %v6912_v52, %v6913_v4 }
 0x6b2   : > { %v6857_v50 = vpop.f32.mrf.mxu2  ;;  %v6881_v0 = vpop.f32.mrf.mxu3 }
 0x6b3   : > { %v6858_v59 = vadd.f32 %v15715_v36, %v6857_v50  ;;  %v6916_v61 = vrot.slane %v6914_v22, 1 }
 0x6b5   : > { %v6882_v9 = vadd.f32 %v6881_v0, %v6858_v59  ;;  %v6918_v14 = vmax.f32 %v6914_v22, %v6916_v61 }
 0x6b7   : > { %v6890_v21 = vmax.f32 %v6882_v9, 0.0  ;;  %v6949_v26 = vrot.slane %v6918_v14, 2  ;;  %v6955_v23 = vrot.slane %v6918_v14, 6  ;;  %v6953_v29 = vrot.slane %v6918_v14, 4 }
 0x6b8   : > { %v6919_v58 = vld [vmem:[#allocation5 + $0x57] sm:$0xff] }
 0x6b9   : > { %6896 = vst.msk [vmem:[#allocation5 + $0x60] sm:$0xff] %vm6685_vm0, %v6890_v21  ;;  %v13066_v43 = vpack.i.bf16 %v6955_v23, %v6949_v26 }
 0x6ba   : > { %v6859_v17 = vpop.f32.mrf.mxu2  ;;  %v6883_v38 = vpop.f32.mrf.mxu3 }
 0x6bb   : > { %v6860_v3 = vadd.f32 %v15715_v36, %v6859_v17  ;;  %13067 = vrot.lane.b32.xlu1 %v13066_v43, %s13095_s17 }
 0x6bd   : > { %v6884_v32 = vadd.f32 %v6883_v38, %v6860_v3 }
 0x6bf   : > { %v6891_v13 = vmax.f32 %v6884_v32, 0.0 }
 0x6c1   : > { %6897 = vst.msk [vmem:[#allocation5 + $0x68] sm:$0xff] %vm6685_vm0, %v6891_v13 }
 0x6c8   : > { %v13058_v25 = vpop.permute.xlu0 %13057  ;;  %v6920_v40 = vld [vmem:[#allocation5 + $0x61] sm:$0xff] }
 0x6c9   : > { %v13060_v18 = vunpack.i.h.bf16 %v13058_v25  ;;  %v13059_v12 = vunpack.i.l.bf16 %v13058_v25  ;;  %v6921_v8 = vmax.f32 %v6919_v58, %v6920_v40 }
 0x6cb   : > { %v6971_v5 = vsel %vm6685_vm0, %v6931_v10, %v13060_v18  ;;  %v6970_v36 = vsel %vm6685_vm0, %v15732_v47, %v13059_v12  ;;  %v6923_v27 = vrot.slane %v6921_v8, 1 }
 0x6cc   : > { %v15756_v62 = vpack.c.bf16 %v6971_v5, %v6971_v5  ;;  %v15758_v49 = vpack.c.bf16 %v6970_v36, %v6970_v36 }
 0x6cd   : > { %v6925_v57 = vmax.f32 %v6921_v8, %v6923_v27 }
 0x6cf   : > { %v6960_v30 = vrot.slane %v6925_v57, 2  ;;  %v6966_v7 = vrot.slane %v6925_v57, 6  ;;  %v6964_v51 = vrot.slane %v6925_v57, 4 }
 0x6d1   : > { %v13071_v35 = vpack.i.bf16 %v6966_v7, %v6960_v30 }
 0x6d3   : > { %13072 = vrot.lane.b32.xlu1 %v13071_v35, %s13095_s17 }
 0x71d   : > { %v13063_v31 = vpop.permute.xlu0 %13062 }
 0x71e   : > { %v13065_v6 = vunpack.i.h.bf16 %v13063_v31  ;;  %v13064_v39 = vunpack.i.l.bf16 %v13063_v31 }
 0x720   : > { %v6973_v63 = vsel %vm6685_vm0, %v6942_v37, %v13065_v6  ;;  %v6972_v41 = vsel %vm6685_vm0, %v6911_v33, %v13064_v39 }
 0x721   : > { %v15763_v47 = vpack.c.bf16 %v6973_v63, %v6973_v63  ;;  %v15765_v24 = vpack.c.bf16 %v6972_v41, %v6972_v41 }
 0x72d   : > { %v13068_v45 = vpop.permute.xlu1 %13067 }
 0x72e   : > { %v13070_v16 = vunpack.i.h.bf16 %v13068_v45  ;;  %v13069_v44 = vunpack.i.l.bf16 %v13068_v45 }
 0x730   : > { %v6975_v46 = vsel %vm6685_vm0, %v6953_v29, %v13070_v16  ;;  %v6974_v20 = vsel %vm6685_vm0, %v6918_v14, %v13069_v44 }
 0x731   : > { %v15769_v15 = vpack.c.bf16 %v6975_v46, %v6975_v46  ;;  %v15771_v2 = vpack.c.bf16 %v6974_v20, %v6974_v20 }
 0x745   : > { %v13073_v28 = vpop.permute.xlu1 %13072 }
 0x746   : > { %v13075_v34 = vunpack.i.h.bf16 %v13073_v28  ;;  %v13074_v55 = vunpack.i.l.bf16 %v13073_v28 }
 0x748   : > { %v6977_v33 = vsel %vm6685_vm0, %v6964_v51, %v13075_v34  ;;  %v6976_v42 = vsel %vm6685_vm0, %v6925_v57, %v13074_v55 }
 0x749   : > { %v15775_v19 = vpack.c.bf16 %v6977_v33, %v6977_v33  ;;  %v15777_v56 = vpack.c.bf16 %v6976_v42, %v6976_v42 }
 0x74a   : > { %13086 = dma.done.wait (%p13038_p6), [#allocation8 + $0x1], 32768 }
 0x74b   : > { %13088 = vsyncadd (%p13038_p6), [#allocation8 + $0x1], 4294934528  ;;  %v11378_v11 = vld [vmem:[#allocation7 + $0xe0] sm:$0xf]  ;;  %v12808_v1 = vld [vmem:[#allocation7 + $0xec] sm:$0xf0] }
 0x74c   : > { %v11506_v60 = vld [vmem:[#allocation7 + $0x1e0] sm:$0xf]  ;;  %v11379_v53 = vor.u32 %v12808_v1, %v11378_v11  ;;  %v12840_v54 = vld [vmem:[#allocation7 + $0x1ec] sm:$0xf0]  ;;  %vm8967_vm1 = vcmask 1040384   ;;  %vm8969_vm2 = vcmask 1042434  }
 0x74d   : > { %v11634_v48 = vld [vmem:[#allocation7 + $0x2e0] sm:$0xf]  ;;  %v12872_v52 = vld [vmem:[#allocation7 + $0x2ec] sm:$0xf0]  ;;  %v11507_v4 = vor.u32 %v12840_v54, %v11506_v60  ;;  %vm8971_vm3 = vcmask 1041408  }
 0x74e   : > { %v11635_v22 = vor.u32 %v12872_v52, %v11634_v48  ;;  %v11762_v50 = vld [vmem:[#allocation7 + $0x3e0] sm:$0xf]  ;;  %v12904_v59 = vld [vmem:[#allocation7 + $0x3ec] sm:$0xf0]  ;;  %8540 = vmatpush.bf16.msrb.mxu0 %v11379_v53 }
 0x74f   : > { %v11362_v0 = vld [vmem:[#allocation7 + $0xc0] sm:$0xf]  ;;  %v11763_v61 = vor.u32 %v12904_v59, %v11762_v50  ;;  %v12804_v9 = vld [vmem:[#allocation7 + $0xcc] sm:$0xf0]  ;;  %8553 = vmatpush.bf16.msrb.mxu1 %v11507_v4 }
 0x750   : > { %v11490_v14 = vld [vmem:[#allocation7 + $0x1c0] sm:$0xf]  ;;  %v12836_v21 = vld [vmem:[#allocation7 + $0x1cc] sm:$0xf0]  ;;  %8566 = vmatpush.bf16.msrb.mxu2 %v11635_v22  ;;  %v11363_v26 = vor.u32 %v12804_v9, %v11362_v0 }
 0x751   : > { %v11491_v23 = vor.u32 %v12836_v21, %v11490_v14  ;;  %v11618_v43 = vld [vmem:[#allocation7 + $0x2c0] sm:$0xf]  ;;  %v12868_v17 = vld [vmem:[#allocation7 + $0x2cc] sm:$0xf0]  ;;  %8579 = vmatpush.bf16.msrb.mxu3 %v11763_v61 }
 0x752   : > { %v11746_v3 = vld [vmem:[#allocation7 + $0x3c0] sm:$0xf]  ;;  %v11619_v38 = vor.u32 %v12868_v17, %v11618_v43  ;;  %v12900_v32 = vld [vmem:[#allocation7 + $0x3cc] sm:$0xf0]  ;;  %8541 = vmatpush.bf16.msrb.mxu0 %v11363_v26 }
 0x753   : > { %v11346_v13 = vld [vmem:[#allocation7 + $0xa0] sm:$0xf]  ;;  %v12800_v25 = vld [vmem:[#allocation7 + $0xac] sm:$0xf0]  ;;  %v11747_v58 = vor.u32 %v12900_v32, %v11746_v3  ;;  %8554 = vmatpush.bf16.msrb.mxu1 %v11491_v23 }
 0x754   : > { %v11474_v40 = vld [vmem:[#allocation7 + $0x1a0] sm:$0xf]  ;;  %v12832_v10 = vld [vmem:[#allocation7 + $0x1ac] sm:$0xf0]  ;;  %v11347_v12 = vor.u32 %v12800_v25, %v11346_v13  ;;  %8567 = vmatpush.bf16.msrb.mxu2 %v11619_v38 }
 0x755   : > { %v11602_v18 = vld [vmem:[#allocation7 + $0x2a0] sm:$0xf]  ;;  %v12864_v8 = vld [vmem:[#allocation7 + $0x2ac] sm:$0xf0]  ;;  %v11475_v27 = vor.u32 %v12832_v10, %v11474_v40  ;;  %8580 = vmatpush.bf16.msrb.mxu3 %v11747_v58 }
 0x756   : > { %v11730_v5 = vld [vmem:[#allocation7 + $0x3a0] sm:$0xf]  ;;  %v12896_v36 = vld [vmem:[#allocation7 + $0x3ac] sm:$0xf0]  ;;  %v11603_v57 = vor.u32 %v12864_v8, %v11602_v18  ;;  %8542 = vmatpush.bf16.msrb.mxu0 %v11347_v12 }
 0x757   : > { %v11330_v30 = vld [vmem:[#allocation7 + $0x80] sm:$0xf]  ;;  %v12796_v7 = vld [vmem:[#allocation7 + $0x8c] sm:$0xf0]  ;;  %v11731_v31 = vor.u32 %v12896_v36, %v11730_v5  ;;  %8555 = vmatpush.bf16.msrb.mxu1 %v11475_v27 }
 0x758   : > { %v11458_v35 = vld [vmem:[#allocation7 + $0x180] sm:$0xf]  ;;  %v12828_v37 = vld [vmem:[#allocation7 + $0x18c] sm:$0xf0]  ;;  %v11331_v45 = vor.u32 %v12796_v7, %v11330_v30  ;;  %8568 = vmatpush.bf16.msrb.mxu2 %v11603_v57 }
 0x759   : > { %v11586_v6 = vld [vmem:[#allocation7 + $0x280] sm:$0xf]  ;;  %v12860_v39 = vld [vmem:[#allocation7 + $0x28c] sm:$0xf0]  ;;  %v11459_v29 = vor.u32 %v12828_v37, %v11458_v35  ;;  %8581 = vmatpush.bf16.msrb.mxu3 %v11731_v31 }
 0x75a   : > { %v11714_v63 = vld [vmem:[#allocation7 + $0x380] sm:$0xf]  ;;  %v12892_v41 = vld [vmem:[#allocation7 + $0x38c] sm:$0xf0]  ;;  %v11587_v16 = vor.u32 %v12860_v39, %v11586_v6  ;;  %8543 = vmatpush.bf16.msrb.mxu0 %v11331_v45 }
 0x75b   : > { %v11314_v44 = vld [vmem:[#allocation7 + $0x60] sm:$0xf]  ;;  %v12792_v46 = vld [vmem:[#allocation7 + $0x6c] sm:$0xf0]  ;;  %v11715_v28 = vor.u32 %v12892_v41, %v11714_v63  ;;  %8556 = vmatpush.bf16.msrb.mxu1 %v11459_v29 }
 0x75c   : > { %v11442_v20 = vld [vmem:[#allocation7 + $0x160] sm:$0xf]  ;;  %v12824_v51 = vld [vmem:[#allocation7 + $0x16c] sm:$0xf0]  ;;  %v11315_v11 = vor.u32 %v12792_v46, %v11314_v44  ;;  %8569 = vmatpush.bf16.msrb.mxu2 %v11587_v16 }
 0x75d   : > { %v11570_v34 = vld [vmem:[#allocation7 + $0x260] sm:$0xf]  ;;  %v12856_v55 = vld [vmem:[#allocation7 + $0x26c] sm:$0xf0]  ;;  %v11443_v1 = vor.u32 %v12824_v51, %v11442_v20  ;;  %8582 = vmatpush.bf16.msrb.mxu3 %v11715_v28 }
 0x75e   : > { %v11698_v33 = vld [vmem:[#allocation7 + $0x360] sm:$0xf]  ;;  %v12888_v42 = vld [vmem:[#allocation7 + $0x36c] sm:$0xf0]  ;;  %v11571_v60 = vor.u32 %v12856_v55, %v11570_v34  ;;  %8544 = vmatpush.bf16.msrb.mxu0 %v11315_v11 }
 0x75f   : > { %v11298_v53 = vld [vmem:[#allocation7 + $0x40] sm:$0xf]  ;;  %v12788_v54 = vld [vmem:[#allocation7 + $0x4c] sm:$0xf0]  ;;  %v11699_v52 = vor.u32 %v12888_v42, %v11698_v33  ;;  %8557 = vmatpush.bf16.msrb.mxu1 %v11443_v1 }
 0x760   : > { %v11426_v48 = vld [vmem:[#allocation7 + $0x140] sm:$0xf]  ;;  %v12820_v4 = vld [vmem:[#allocation7 + $0x14c] sm:$0xf0]  ;;  %v11299_v61 = vor.u32 %v12788_v54, %v11298_v53  ;;  %8570 = vmatpush.bf16.msrb.mxu2 %v11571_v60 }
 0x761   : > { %v11554_v22 = vld [vmem:[#allocation7 + $0x240] sm:$0xf]  ;;  %v12852_v50 = vld [vmem:[#allocation7 + $0x24c] sm:$0xf0]  ;;  %v11427_v9 = vor.u32 %v12820_v4, %v11426_v48  ;;  %8583 = vmatpush.bf16.msrb.mxu3 %v11699_v52 }
 0x762   : > { %v11682_v59 = vld [vmem:[#allocation7 + $0x340] sm:$0xf]  ;;  %v12884_v0 = vld [vmem:[#allocation7 + $0x34c] sm:$0xf0]  ;;  %v11555_v14 = vor.u32 %v12852_v50, %v11554_v22  ;;  %8545 = vmatpush.bf16.msrb.mxu0 %v11299_v61 }
 0x763   : > { %v11282_v21 = vld [vmem:[#allocation7 + $0x20] sm:$0xf]  ;;  %v12784_v26 = vld [vmem:[#allocation7 + $0x2c] sm:$0xf0]  ;;  %v11683_v43 = vor.u32 %v12884_v0, %v11682_v59  ;;  %8558 = vmatpush.bf16.msrb.mxu1 %v11427_v9 }
 0x764   : > { %v11410_v23 = vld [vmem:[#allocation7 + $0x120] sm:$0xf]  ;;  %v12816_v17 = vld [vmem:[#allocation7 + $0x12c] sm:$0xf0]  ;;  %v11283_v25 = vor.u32 %v12784_v26, %v11282_v21  ;;  %8571 = vmatpush.bf16.msrb.mxu2 %v11555_v14 }
 0x765   : > { %v11538_v3 = vld [vmem:[#allocation7 + $0x220] sm:$0xf]  ;;  %v12848_v38 = vld [vmem:[#allocation7 + $0x22c] sm:$0xf0]  ;;  %v11411_v10 = vor.u32 %v12816_v17, %v11410_v23  ;;  %8584 = vmatpush.bf16.msrb.mxu3 %v11683_v43 }
 0x766   : > { %v11666_v32 = vld [vmem:[#allocation7 + $0x320] sm:$0xf]  ;;  %v12880_v13 = vld [vmem:[#allocation7 + $0x32c] sm:$0xf0]  ;;  %v11539_v18 = vor.u32 %v12848_v38, %v11538_v3  ;;  %8546 = vmatpush.bf16.msrb.mxu0 %v11283_v25 }
 0x767   : > { %v11266_v58 = vld [vmem:[#allocation7] sm:$0xf]  ;;  %v12780_v40 = vld [vmem:[#allocation7 + $0xc] sm:$0xf0]  ;;  %v11667_v36 = vor.u32 %v12880_v13, %v11666_v32  ;;  %8559 = vmatpush.bf16.msrb.mxu1 %v11411_v10 }
 0x768   : > { %v11394_v12 = vld [vmem:[#allocation7 + $0x100] sm:$0xf]  ;;  %v12812_v8 = vld [vmem:[#allocation7 + $0x10c] sm:$0xf0]  ;;  %v11267_v37 = vor.u32 %v12780_v40, %v11266_v58  ;;  %8572 = vmatpush.bf16.msrb.mxu2 %v11539_v18 }
 0x769   : > { %v11522_v5 = vld [vmem:[#allocation7 + $0x200] sm:$0xf]  ;;  %v12844_v27 = vld [vmem:[#allocation7 + $0x20c] sm:$0xf0]  ;;  %v11395_v41 = vor.u32 %v12812_v8, %v11394_v12  ;;  %8585 = vmatpush.bf16.msrb.mxu3 %v11667_v36 }
 0x76a   : > { %v11650_v57 = vld [vmem:[#allocation7 + $0x300] sm:$0xf]  ;;  %v12876_v30 = vld [vmem:[#allocation7 + $0x30c] sm:$0xf0]  ;;  %v11523_v45 = vor.u32 %v12844_v27, %v11522_v5  ;;  %8547 = vmatpush.bf16.msrb.mxu0 %v11267_v37 }
 0x76b   : > { %v11890_v7 = vld [vmem:[#allocation7 + $0x4e0] sm:$0xf]  ;;  %v12936_v35 = vld [vmem:[#allocation7 + $0x4ec] sm:$0xf0]  ;;  %v11651_v44 = vor.u32 %v12876_v30, %v11650_v57  ;;  %8560 = vmatpush.bf16.msrb.mxu1 %v11395_v41 }
 0x76c   : > { %v12018_v31 = vld [vmem:[#allocation7 + $0x5e0] sm:$0xf]  ;;  %v12968_v6 = vld [vmem:[#allocation7 + $0x5ec] sm:$0xf0]  ;;  %v11891_v46 = vor.u32 %v12936_v35, %v11890_v7  ;;  %8573 = vmatpush.bf16.msrb.mxu2 %v11523_v45 }
 0x76d   : > { %v12146_v39 = vld [vmem:[#allocation7 + $0x6e0] sm:$0xf]  ;;  %v13000_v63 = vld [vmem:[#allocation7 + $0x6ec] sm:$0xf0]  ;;  %v12019_v20 = vor.u32 %v12968_v6, %v12018_v31  ;;  %8586 = vmatpush.bf16.msrb.mxu3 %v11651_v44  ;;  %8548 = vmatmul.bf16.vlgmr.msrb.gmra.mxu0 %v15758_v49 }
 0x76e   : > { %v12274_v29 = vld [vmem:[#allocation7 + $0x7e0] sm:$0xf]  ;;  %v13032_v16 = vld [vmem:[#allocation7 + $0x7ec] sm:$0xf0]  ;;  %v12147_v28 = vor.u32 %v13000_v63, %v12146_v39  ;;  %8592 = vmatpush.bf16.msra.mxu0 %v11891_v46  ;;  %8561 = vmatmul.bf16.vlgmr.msrb.gmra.mxu1 %v15756_v62 }
 0x76f   : > { %v11874_v51 = vld [vmem:[#allocation7 + $0x4c0] sm:$0xf]  ;;  %v12932_v34 = vld [vmem:[#allocation7 + $0x4cc] sm:$0xf0]  ;;  %v12275_v33 = vor.u32 %v13032_v16, %v12274_v29  ;;  %8605 = vmatpush.bf16.msra.mxu1 %v12019_v20  ;;  %8574 = vmatmul.bf16.vlgmr.msrb.gmra.mxu2 %v15765_v24 }
 0x770   : > { %v12002_v55 = vld [vmem:[#allocation7 + $0x5c0] sm:$0xf]  ;;  %v12964_v42 = vld [vmem:[#allocation7 + $0x5cc] sm:$0xf0]  ;;  %v11875_v54 = vor.u32 %v12932_v34, %v11874_v51  ;;  %8618 = vmatpush.bf16.msra.mxu2 %v12147_v28  ;;  %8587 = vmatmul.bf16.vlgmr.msrb.gmra.mxu3 %v15763_v47 }
 0x771   : > { %v12130_v11 = vld [vmem:[#allocation7 + $0x6c0] sm:$0xf]  ;;  %v12996_v1 = vld [vmem:[#allocation7 + $0x6cc] sm:$0xf0]  ;;  %v12003_v48 = vor.u32 %v12964_v42, %v12002_v55  ;;  %8631 = vmatpush.bf16.msra.mxu3 %v12275_v33 }
 0x772   : > { %v12258_v60 = vld [vmem:[#allocation7 + $0x7c0] sm:$0xf]  ;;  %v13028_v53 = vld [vmem:[#allocation7 + $0x7cc] sm:$0xf0]  ;;  %v12131_v52 = vor.u32 %v12996_v1, %v12130_v11  ;;  %8593 = vmatpush.bf16.msra.mxu0 %v11875_v54 }
 0x773   : > { %v11858_v4 = vld [vmem:[#allocation7 + $0x4a0] sm:$0xf]  ;;  %v12928_v22 = vld [vmem:[#allocation7 + $0x4ac] sm:$0xf0]  ;;  %v12259_v59 = vor.u32 %v13028_v53, %v12258_v60  ;;  %8606 = vmatpush.bf16.msra.mxu1 %v12003_v48 }
 0x774   : > { %v11986_v50 = vld [vmem:[#allocation7 + $0x5a0] sm:$0xf]  ;;  %v12960_v0 = vld [vmem:[#allocation7 + $0x5ac] sm:$0xf0]  ;;  %v11859_v26 = vor.u32 %v12928_v22, %v11858_v4  ;;  %8619 = vmatpush.bf16.msra.mxu2 %v12131_v52 }
 0x775   : > { %v12114_v61 = vld [vmem:[#allocation7 + $0x6a0] sm:$0xf]  ;;  %v12992_v9 = vld [vmem:[#allocation7 + $0x6ac] sm:$0xf0]  ;;  %v11987_v23 = vor.u32 %v12960_v0, %v11986_v50  ;;  %8632 = vmatpush.bf16.msra.mxu3 %v12259_v59 }
 0x776   : > { %v12242_v14 = vld [vmem:[#allocation7 + $0x7a0] sm:$0xf]  ;;  %v13024_v21 = vld [vmem:[#allocation7 + $0x7ac] sm:$0xf0]  ;;  %v12115_v43 = vor.u32 %v12992_v9, %v12114_v61  ;;  %8594 = vmatpush.bf16.msra.mxu0 %v11859_v26 }
 0x777   : > { %v11842_v17 = vld [vmem:[#allocation7 + $0x480] sm:$0xf]  ;;  %v12924_v3 = vld [vmem:[#allocation7 + $0x48c] sm:$0xf0]  ;;  %v12243_v32 = vor.u32 %v13024_v21, %v12242_v14  ;;  %8607 = vmatpush.bf16.msra.mxu1 %v11987_v23 }
 0x778   : > { %v11970_v38 = vld [vmem:[#allocation7 + $0x580] sm:$0xf]  ;;  %v12956_v13 = vld [vmem:[#allocation7 + $0x58c] sm:$0xf0]  ;;  %v11843_v18 = vor.u32 %v12924_v3, %v11842_v17  ;;  %8620 = vmatpush.bf16.msra.mxu2 %v12115_v43  ;;  %v12806_v3 = vld [vmem:[#allocation7 + $0xe4] sm:$0xf] }
 0x779   : > { %v12098_v25 = vld [vmem:[#allocation7 + $0x680] sm:$0xf]  ;;  %v12988_v58 = vld [vmem:[#allocation7 + $0x68c] sm:$0xf0]  ;;  %v11971_v12 = vor.u32 %v12956_v13, %v11970_v38  ;;  %8633 = vmatpush.bf16.msra.mxu3 %v12243_v32  ;;  %v11380_v38 = vld [vmem:[#allocation7 + $0xf0] sm:$0xf0] }
 0x77a   : > { %v12226_v40 = vld [vmem:[#allocation7 + $0x780] sm:$0xf]  ;;  %v13020_v10 = vld [vmem:[#allocation7 + $0x78c] sm:$0xf0]  ;;  %v12099_v8 = vor.u32 %v12988_v58, %v12098_v25  ;;  %8595 = vmatpush.bf16.msra.mxu0 %v11843_v18  ;;  %v12838_v32 = vld [vmem:[#allocation7 + $0x1e4] sm:$0xf] }
 0x77b   : > { %v11826_v5 = vld [vmem:[#allocation7 + $0x460] sm:$0xf]  ;;  %v12920_v36 = vld [vmem:[#allocation7 + $0x46c] sm:$0xf0]  ;;  %v12227_v57 = vor.u32 %v13020_v10, %v12226_v40  ;;  %8608 = vmatpush.bf16.msra.mxu1 %v11971_v12  ;;  %v11508_v25 = vld [vmem:[#allocation7 + $0x1f0] sm:$0xf0] }
 0x77c   : > { %v11954_v27 = vld [vmem:[#allocation7 + $0x560] sm:$0xf]  ;;  %v12952_v30 = vld [vmem:[#allocation7 + $0x56c] sm:$0xf0]  ;;  %v11827_v6 = vor.u32 %v12920_v36, %v11826_v5  ;;  %8621 = vmatpush.bf16.msra.mxu2 %v12099_v8  ;;  %v12870_v58 = vld [vmem:[#allocation7 + $0x2e4] sm:$0xf]  ;;  %v11383_v36 = vor.u32 %v12806_v3, %v11380_v38 }
 0x77d   : > { %v12082_v7 = vld [vmem:[#allocation7 + $0x660] sm:$0xf]  ;;  %v12984_v35 = vld [vmem:[#allocation7 + $0x66c] sm:$0xf0]  ;;  %v11955_v39 = vor.u32 %v12952_v30, %v11954_v27  ;;  %8634 = vmatpush.bf16.msra.mxu3 %v12227_v57  ;;  %v11636_v40 = vld [vmem:[#allocation7 + $0x2f0] sm:$0xf0]  ;;  %v11511_v27 = vor.u32 %v12838_v32, %v11508_v25 }
 0x77e   : > { %v12210_v31 = vld [vmem:[#allocation7 + $0x760] sm:$0xf]  ;;  %v13016_v37 = vld [vmem:[#allocation7 + $0x76c] sm:$0xf0]  ;;  %v12083_v63 = vor.u32 %v12984_v35, %v12082_v7  ;;  %8596 = vmatpush.bf16.msra.mxu0 %v11827_v6  ;;  %v12902_v12 = vld [vmem:[#allocation7 + $0x3e4] sm:$0xf]  ;;  %v11639_v57 = vor.u32 %v12870_v58, %v11636_v40 }
 0x77f   : > { %v11810_v41 = vld [vmem:[#allocation7 + $0x440] sm:$0xf]  ;;  %v12916_v45 = vld [vmem:[#allocation7 + $0x44c] sm:$0xf0]  ;;  %v12211_v16 = vor.u32 %v13016_v37, %v12210_v31  ;;  %8609 = vmatpush.bf16.msra.mxu1 %v11955_v39  ;;  %v11764_v8 = vld [vmem:[#allocation7 + $0x3f0] sm:$0xf0] }
 0x780   : > { %v11938_v29 = vld [vmem:[#allocation7 + $0x540] sm:$0xf]  ;;  %v12948_v44 = vld [vmem:[#allocation7 + $0x54c] sm:$0xf0]  ;;  %v11811_v34 = vor.u32 %v12916_v45, %v11810_v41  ;;  %8622 = vmatpush.bf16.msra.mxu2 %v12083_v63  ;;  %v12802_v30 = vld [vmem:[#allocation7 + $0xc4] sm:$0xf]  ;;  %v11767_v31 = vor.u32 %v12902_v12, %v11764_v8 }
 0x781   : > { %v12066_v46 = vld [vmem:[#allocation7 + $0x640] sm:$0xf]  ;;  %v12980_v20 = vld [vmem:[#allocation7 + $0x64c] sm:$0xf0]  ;;  %v11939_v55 = vor.u32 %v12948_v44, %v11938_v29  ;;  %8635 = vmatpush.bf16.msra.mxu3 %v12211_v16  ;;  %v11364_v7 = vld [vmem:[#allocation7 + $0xd0] sm:$0xf0] }
 0x782   : > { %v12194_v28 = vld [vmem:[#allocation7 + $0x740] sm:$0xf]  ;;  %v13012_v51 = vld [vmem:[#allocation7 + $0x74c] sm:$0xf0]  ;;  %v12067_v33 = vor.u32 %v12980_v20, %v12066_v46  ;;  %8597 = vmatpush.bf16.msra.mxu0 %v11811_v34  ;;  %v12834_v35 = vld [vmem:[#allocation7 + $0x1c4] sm:$0xf]  ;;  %v11367_v45 = vor.u32 %v12802_v30, %v11364_v7 }
 0x783   : > { %v11794_v42 = vld [vmem:[#allocation7 + $0x420] sm:$0xf]  ;;  %v12912_v11 = vld [vmem:[#allocation7 + $0x42c] sm:$0xf0]  ;;  %v12195_v60 = vor.u32 %v13012_v51, %v12194_v28  ;;  %8610 = vmatpush.bf16.msra.mxu1 %v11939_v55  ;;  %v11492_v37 = vld [vmem:[#allocation7 + $0x1d0] sm:$0xf0] }
 0x784   : > { %v11922_v1 = vld [vmem:[#allocation7 + $0x520] sm:$0xf]  ;;  %v12944_v53 = vld [vmem:[#allocation7 + $0x52c] sm:$0xf0]  ;;  %v11795_v22 = vor.u32 %v12912_v11, %v11794_v42  ;;  %8623 = vmatpush.bf16.msra.mxu2 %v12067_v33  ;;  %v12866_v6 = vld [vmem:[#allocation7 + $0x2c4] sm:$0xf]  ;;  %v11495_v29 = vor.u32 %v12834_v35, %v11492_v37 }
 0x785   : > { %v12050_v54 = vld [vmem:[#allocation7 + $0x620] sm:$0xf]  ;;  %v12976_v48 = vld [vmem:[#allocation7 + $0x62c] sm:$0xf0]  ;;  %v11923_v0 = vor.u32 %v12944_v53, %v11922_v1  ;;  %8636 = vmatpush.bf16.msra.mxu3 %v12195_v60  ;;  %v11620_v39 = vld [vmem:[#allocation7 + $0x2d0] sm:$0xf0] }
 0x786   : > { %v12178_v52 = vld [vmem:[#allocation7 + $0x720] sm:$0xf]  ;;  %v13008_v4 = vld [vmem:[#allocation7 + $0x72c] sm:$0xf0]  ;;  %v12051_v61 = vor.u32 %v12976_v48, %v12050_v54  ;;  %8598 = vmatpush.bf16.msra.mxu0 %v11795_v22  ;;  %v12898_v63 = vld [vmem:[#allocation7 + $0x3c4] sm:$0xf]  ;;  %v11623_v16 = vor.u32 %v12866_v6, %v11620_v39 }
 0x787   : > { %v11778_v50 = vld [vmem:[#allocation7 + $0x400] sm:$0xf]  ;;  %v12908_v59 = vld [vmem:[#allocation7 + $0x40c] sm:$0xf0]  ;;  %v12179_v26 = vor.u32 %v13008_v4, %v12178_v52  ;;  %8611 = vmatpush.bf16.msra.mxu1 %v11923_v0  ;;  %v11748_v41 = vld [vmem:[#allocation7 + $0x3d0] sm:$0xf0] }
 0x788   : > { %v11906_v9 = vld [vmem:[#allocation7 + $0x500] sm:$0xf]  ;;  %v12940_v14 = vld [vmem:[#allocation7 + $0x50c] sm:$0xf0]  ;;  %v11779_v13 = vor.u32 %v12908_v59, %v11778_v50  ;;  %8624 = vmatpush.bf16.msra.mxu2 %v12051_v61  ;;  %v12798_v44 = vld [vmem:[#allocation7 + $0xa4] sm:$0xf]  ;;  %v11751_v28 = vor.u32 %v12898_v63, %v11748_v41 }
 0x789   : > { %v12034_v21 = vld [vmem:[#allocation7 + $0x600] sm:$0xf]  ;;  %v12972_v23 = vld [vmem:[#allocation7 + $0x60c] sm:$0xf0]  ;;  %v11907_v10 = vor.u32 %v12940_v14, %v11906_v9  ;;  %8637 = vmatpush.bf16.msra.mxu3 %v12179_v26  ;;  %v11348_v46 = vld [vmem:[#allocation7 + $0xb0] sm:$0xf0] }
 0x78a   : > { %v12162_v43 = vld [vmem:[#allocation7 + $0x700] sm:$0xf]  ;;  %v13004_v17 = vld [vmem:[#allocation7 + $0x70c] sm:$0xf0]  ;;  %v12035_v18 = vor.u32 %v12972_v23, %v12034_v21  ;;  %8599 = vmatpush.bf16.msra.mxu0 %v11779_v13  ;;  %v12830_v20 = vld [vmem:[#allocation7 + $0x1a4] sm:$0xf]  ;;  %v11351_v11 = vor.u32 %v12798_v44, %v11348_v46 }
 0x78b   : > { %v12163_v5 = vor.u32 %v13004_v17, %v12162_v43  ;;  %8612 = vmatpush.bf16.msra.mxu1 %v11907_v10  ;;  %v11476_v51 = vld [vmem:[#allocation7 + $0x1b0] sm:$0xf0]  ;;  %v12862_v34 = vld [vmem:[#allocation7 + $0x2a4] sm:$0xf] }
 0x78c   : > { %8625 = vmatpush.bf16.msra.mxu2 %v12035_v18  ;;  %v11604_v55 = vld [vmem:[#allocation7 + $0x2b0] sm:$0xf0]  ;;  %v12894_v33 = vld [vmem:[#allocation7 + $0x3a4] sm:$0xf]  ;;  %v11479_v1 = vor.u32 %v12830_v20, %v11476_v51 }
 0x78d   : > { %8638 = vmatpush.bf16.msra.mxu3 %v12163_v5  ;;  %v11732_v42 = vld [vmem:[#allocation7 + $0x3b0] sm:$0xf0]  ;;  %8600 = vmatmul.bf16.vlgmr.msra.gmra.mxu0 %v15771_v2  ;;  %v11607_v60 = vor.u32 %v12862_v34, %v11604_v55  ;;  %v12794_v53 = vld [vmem:[#allocation7 + $0x84] sm:$0xf] }
 0x78e   : > { %8644 = vmatpush.bf16.msrb.mxu0 %v11383_v36  ;;  %8613 = vmatmul.bf16.vlgmr.msra.gmra.mxu1 %v15769_v15  ;;  %v11332_v54 = vld [vmem:[#allocation7 + $0x90] sm:$0xf0]  ;;  %v12826_v48 = vld [vmem:[#allocation7 + $0x184] sm:$0xf]  ;;  %v11735_v52 = vor.u32 %v12894_v33, %v11732_v42 }
 0x78f   : > { %8657 = vmatpush.bf16.msrb.mxu1 %v11511_v27  ;;  %8626 = vmatmul.bf16.vlgmr.msra.gmra.mxu2 %v15777_v56  ;;  %v11460_v4 = vld [vmem:[#allocation7 + $0x190] sm:$0xf0]  ;;  %v12858_v22 = vld [vmem:[#allocation7 + $0x284] sm:$0xf]  ;;  %v11335_v61 = vor.u32 %v12794_v53, %v11332_v54 }
 0x790   : > { %8670 = vmatpush.bf16.msrb.mxu2 %v11639_v57  ;;  %8639 = vmatmul.bf16.vlgmr.msra.gmra.mxu3 %v15775_v19  ;;  %v11588_v50 = vld [vmem:[#allocation7 + $0x290] sm:$0xf0]  ;;  %v12890_v59 = vld [vmem:[#allocation7 + $0x384] sm:$0xf]  ;;  %v11463_v9 = vor.u32 %v12826_v48, %v11460_v4 }
 0x791   : > { %8683 = vmatpush.bf16.msrb.mxu3 %v11767_v31  ;;  %v11716_v0 = vld [vmem:[#allocation7 + $0x390] sm:$0xf0]  ;;  %v11591_v14 = vor.u32 %v12858_v22, %v11588_v50  ;;  %v12790_v21 = vld [vmem:[#allocation7 + $0x64] sm:$0xf] }
 0x792   : > { %8645 = vmatpush.bf16.msrb.mxu0 %v11367_v45  ;;  %v11316_v26 = vld [vmem:[#allocation7 + $0x70] sm:$0xf0]  ;;  %v12822_v23 = vld [vmem:[#allocation7 + $0x164] sm:$0xf]  ;;  %v11719_v43 = vor.u32 %v12890_v59, %v11716_v0 }
 0x793   : > { %8658 = vmatpush.bf16.msrb.mxu1 %v11495_v29  ;;  %v11444_v17 = vld [vmem:[#allocation7 + $0x170] sm:$0xf0]  ;;  %v12854_v3 = vld [vmem:[#allocation7 + $0x264] sm:$0xf]  ;;  %v11319_v25 = vor.u32 %v12790_v21, %v11316_v26 }
 0x794   : > { %8671 = vmatpush.bf16.msrb.mxu2 %v11623_v16  ;;  %v11572_v38 = vld [vmem:[#allocation7 + $0x270] sm:$0xf0]  ;;  %v12886_v32 = vld [vmem:[#allocation7 + $0x364] sm:$0xf]  ;;  %v11447_v58 = vor.u32 %v12822_v23, %v11444_v17 }
 0x795   : > { %8684 = vmatpush.bf16.msrb.mxu3 %v11751_v28  ;;  %v11700_v13 = vld [vmem:[#allocation7 + $0x370] sm:$0xf0]  ;;  %v11575_v40 = vor.u32 %v12854_v3, %v11572_v38  ;;  %v12786_v10 = vld [vmem:[#allocation7 + $0x44] sm:$0xf] }
 0x796   : > { %8646 = vmatpush.bf16.msrb.mxu0 %v11351_v11  ;;  %v11300_v18 = vld [vmem:[#allocation7 + $0x50] sm:$0xf0]  ;;  %v12818_v12 = vld [vmem:[#allocation7 + $0x144] sm:$0xf]  ;;  %v11703_v8 = vor.u32 %v12886_v32, %v11700_v13 }
 0x797   : > { %8659 = vmatpush.bf16.msrb.mxu1 %v11479_v1  ;;  %v11428_v5 = vld [vmem:[#allocation7 + $0x150] sm:$0xf0]  ;;  %v12850_v36 = vld [vmem:[#allocation7 + $0x244] sm:$0xf]  ;;  %v11303_v7 = vor.u32 %v12786_v10, %v11300_v18 }
 0x798   : > { %8672 = vmatpush.bf16.msrb.mxu2 %v11607_v60  ;;  %v11556_v27 = vld [vmem:[#allocation7 + $0x250] sm:$0xf0]  ;;  %v12882_v57 = vld [vmem:[#allocation7 + $0x344] sm:$0xf]  ;;  %v11431_v35 = vor.u32 %v12818_v12, %v11428_v5 }
 0x799   : > { %8685 = vmatpush.bf16.msrb.mxu3 %v11735_v52  ;;  %v11684_v30 = vld [vmem:[#allocation7 + $0x350] sm:$0xf0]  ;;  %v11559_v31 = vor.u32 %v12850_v36, %v11556_v27  ;;  %v12782_v37 = vld [vmem:[#allocation7 + $0x24] sm:$0xf] }
 0x79a   : > { %8647 = vmatpush.bf16.msrb.mxu0 %v11335_v61  ;;  %v11284_v6 = vld [vmem:[#allocation7 + $0x30] sm:$0xf0]  ;;  %v12814_v39 = vld [vmem:[#allocation7 + $0x124] sm:$0xf]  ;;  %v11687_v63 = vor.u32 %v12882_v57, %v11684_v30 }
 0x79b   : > { %8660 = vmatpush.bf16.msrb.mxu1 %v11463_v9  ;;  %v11412_v41 = vld [vmem:[#allocation7 + $0x130] sm:$0xf0]  ;;  %v12846_v45 = vld [vmem:[#allocation7 + $0x224] sm:$0xf]  ;;  %v11287_v46 = vor.u32 %v12782_v37, %v11284_v6 }
 0x79c   : > { %8673 = vmatpush.bf16.msrb.mxu2 %v11591_v14  ;;  %v11540_v29 = vld [vmem:[#allocation7 + $0x230] sm:$0xf0]  ;;  %v12878_v16 = vld [vmem:[#allocation7 + $0x324] sm:$0xf]  ;;  %v11415_v51 = vor.u32 %v12814_v39, %v11412_v41 }
 0x79d   : > { %8686 = vmatpush.bf16.msrb.mxu3 %v11719_v43  ;;  %v11668_v44 = vld [vmem:[#allocation7 + $0x330] sm:$0xf0]  ;;  %v12778_v20 = vld [vmem:[#allocation7 + $0x4] sm:$0xf]  ;;  %v11543_v34 = vor.u32 %v12846_v45, %v11540_v29 }
 0x79e   : > { %8648 = vmatpush.bf16.msrb.mxu0 %v11319_v25  ;;  %v11268_v28 = vld [vmem:[#allocation7 + $0x10] sm:$0xf0]  ;;  %v12810_v55 = vld [vmem:[#allocation7 + $0x104] sm:$0xf]  ;;  %v11671_v11 = vor.u32 %v12878_v16, %v11668_v44 }
 0x79f   : > { %8661 = vmatpush.bf16.msrb.mxu1 %v11447_v58  ;;  %v11396_v33 = vld [vmem:[#allocation7 + $0x110] sm:$0xf0]  ;;  %v12842_v42 = vld [vmem:[#allocation7 + $0x204] sm:$0xf]  ;;  %v11271_v4 = vor.u32 %v12778_v20, %v11268_v28 }
 0x7a0   : > { %8674 = vmatpush.bf16.msrb.mxu2 %v11575_v40  ;;  %v11524_v1 = vld [vmem:[#allocation7 + $0x210] sm:$0xf0]  ;;  %v12874_v60 = vld [vmem:[#allocation7 + $0x304] sm:$0xf]  ;;  %v11399_v0 = vor.u32 %v12810_v55, %v11396_v33 }
 0x7a1   : > { %8687 = vmatpush.bf16.msrb.mxu3 %v11703_v8  ;;  %v11652_v53 = vld [vmem:[#allocation7 + $0x310] sm:$0xf0]  ;;  %v12934_v54 = vld [vmem:[#allocation7 + $0x4e4] sm:$0xf]  ;;  %v11527_v61 = vor.u32 %v12842_v42, %v11524_v1 }
 0x7a2   : > { %8649 = vmatpush.bf16.msrb.mxu0 %v11303_v7  ;;  %v11892_v48 = vld [vmem:[#allocation7 + $0x4f0] sm:$0xf0]  ;;  %v12966_v52 = vld [vmem:[#allocation7 + $0x5e4] sm:$0xf]  ;;  %v11655_v21 = vor.u32 %v12874_v60, %v11652_v53 }
 0x7a3   : > { %8662 = vmatpush.bf16.msrb.mxu1 %v11431_v35  ;;  %v12020_v22 = vld [vmem:[#allocation7 + $0x5f0] sm:$0xf0]  ;;  %v12998_v50 = vld [vmem:[#allocation7 + $0x6e4] sm:$0xf]  ;;  %v11895_v26 = vor.u32 %v12934_v54, %v11892_v48 }
 0x7a4   : > { %8675 = vmatpush.bf16.msrb.mxu2 %v11559_v31  ;;  %v12148_v59 = vld [vmem:[#allocation7 + $0x6f0] sm:$0xf0]  ;;  %v13030_v9 = vld [vmem:[#allocation7 + $0x7e4] sm:$0xf]  ;;  %v12023_v23 = vor.u32 %v12966_v52, %v12020_v22 }
 0x7a5   : > { %8688 = vmatpush.bf16.msrb.mxu3 %v11687_v63  ;;  %v12276_v14 = vld [vmem:[#allocation7 + $0x7f0] sm:$0xf0]  ;;  %v12151_v43 = vor.u32 %v12998_v50, %v12148_v59  ;;  %v12930_v17 = vld [vmem:[#allocation7 + $0x4c4] sm:$0xf] }
 0x7a6   : > { %8650 = vmatpush.bf16.msrb.mxu0 %v11287_v46  ;;  %v11876_v3 = vld [vmem:[#allocation7 + $0x4d0] sm:$0xf0]  ;;  %v12962_v38 = vld [vmem:[#allocation7 + $0x5c4] sm:$0xf]  ;;  %v12279_v32 = vor.u32 %v13030_v9, %v12276_v14 }
 0x7a7   : > { %8663 = vmatpush.bf16.msrb.mxu1 %v11415_v51  ;;  %v12004_v13 = vld [vmem:[#allocation7 + $0x5d0] sm:$0xf0]  ;;  %v12994_v25 = vld [vmem:[#allocation7 + $0x6c4] sm:$0xf]  ;;  %v11879_v18 = vor.u32 %v12930_v17, %v11876_v3 }
 0x7a8   : > { %8676 = vmatpush.bf16.msrb.mxu2 %v11543_v34  ;;  %v12132_v58 = vld [vmem:[#allocation7 + $0x6d0] sm:$0xf0]  ;;  %v13026_v40 = vld [vmem:[#allocation7 + $0x7c4] sm:$0xf]  ;;  %v12007_v12 = vor.u32 %v12962_v38, %v12004_v13 }
 0x7a9   : > { %8689 = vmatpush.bf16.msrb.mxu3 %v11671_v11  ;;  %v12260_v10 = vld [vmem:[#allocation7 + $0x7d0] sm:$0xf0]  ;;  %v12135_v8 = vor.u32 %v12994_v25, %v12132_v58  ;;  %v12926_v5 = vld [vmem:[#allocation7 + $0x4a4] sm:$0xf] }
 0x7aa   : > { %8651 = vmatpush.bf16.msrb.mxu0 %v11271_v4  ;;  %v11860_v36 = vld [vmem:[#allocation7 + $0x4b0] sm:$0xf0]  ;;  %v12958_v27 = vld [vmem:[#allocation7 + $0x5a4] sm:$0xf]  ;;  %v12263_v57 = vor.u32 %v13026_v40, %v12260_v10 }
 0x7ab   : > { %8664 = vmatpush.bf16.msrb.mxu1 %v11399_v0  ;;  %v11988_v30 = vld [vmem:[#allocation7 + $0x5b0] sm:$0xf0]  ;;  %v12990_v7 = vld [vmem:[#allocation7 + $0x6a4] sm:$0xf]  ;;  %v11863_v6 = vor.u32 %v12926_v5, %v11860_v36 }
 0x7ac   : > { %8677 = vmatpush.bf16.msrb.mxu2 %v11527_v61  ;;  %v12116_v35 = vld [vmem:[#allocation7 + $0x6b0] sm:$0xf0]  ;;  %v13022_v31 = vld [vmem:[#allocation7 + $0x7a4] sm:$0xf]  ;;  %v11991_v39 = vor.u32 %v12958_v27, %v11988_v30 }
 0x7ad   : > { %8690 = vmatpush.bf16.msrb.mxu3 %v11655_v21  ;;  %v12244_v37 = vld [vmem:[#allocation7 + $0x7b0] sm:$0xf0]  ;;  %8652 = vmatmul.bf16.vlgmr.msrb.gmra.mxu0 %v15758_v49  ;;  %v12119_v63 = vor.u32 %v12990_v7, %v12116_v35  ;;  %v12922_v41 = vld [vmem:[#allocation7 + $0x484] sm:$0xf] }
 0x7ae   : > { %8696 = vmatpush.bf16.msra.mxu0 %v11895_v26  ;;  %8665 = vmatmul.bf16.vlgmr.msrb.gmra.mxu1 %v15756_v62  ;;  %v11844_v45 = vld [vmem:[#allocation7 + $0x490] sm:$0xf0]  ;;  %v12954_v29 = vld [vmem:[#allocation7 + $0x584] sm:$0xf]  ;;  %v12247_v16 = vor.u32 %v13022_v31, %v12244_v37 }
 0x7af   : > { %8709 = vmatpush.bf16.msra.mxu1 %v12023_v23  ;;  %8678 = vmatmul.bf16.vlgmr.msrb.gmra.mxu2 %v15765_v24  ;;  %v11972_v44 = vld [vmem:[#allocation7 + $0x590] sm:$0xf0]  ;;  %v12986_v46 = vld [vmem:[#allocation7 + $0x684] sm:$0xf]  ;;  %v11847_v34 = vor.u32 %v12922_v41, %v11844_v45  ;;  %v11386_v45 = vld [vmem:[#allocation7 + $0xe8] sm:$0xf] }
 0x7b0   : > { %8722 = vmatpush.bf16.msra.mxu2 %v12151_v43  ;;  %8691 = vmatmul.bf16.vlgmr.msrb.gmra.mxu3 %v15763_v47  ;;  %v12100_v20 = vld [vmem:[#allocation7 + $0x690] sm:$0xf0]  ;;  %v13018_v28 = vld [vmem:[#allocation7 + $0x784] sm:$0xf]  ;;  %v11975_v55 = vor.u32 %v12954_v29, %v11972_v44  ;;  %v12809_v29 = vld [vmem:[#allocation7 + $0xf4] sm:$0xf0] }
 0x7b1   : > { %8735 = vmatpush.bf16.msra.mxu3 %v12279_v32  ;;  %v12228_v51 = vld [vmem:[#allocation7 + $0x790] sm:$0xf0]  ;;  %v12103_v33 = vor.u32 %v12986_v46, %v12100_v20  ;;  %v12918_v42 = vld [vmem:[#allocation7 + $0x464] sm:$0xf]  ;;  %v12841_v46 = vld [vmem:[#allocation7 + $0x1f4] sm:$0xf0] }
 0x7b2   : > { %8697 = vmatpush.bf16.msra.mxu0 %v11879_v18  ;;  %v11828_v11 = vld [vmem:[#allocation7 + $0x470] sm:$0xf0]  ;;  %v12950_v1 = vld [vmem:[#allocation7 + $0x564] sm:$0xf]  ;;  %v12231_v60 = vor.u32 %v13018_v28, %v12228_v51  ;;  %v11642_v20 = vld [vmem:[#allocation7 + $0x2e8] sm:$0xf] }
 0x7b3   : > { %8710 = vmatpush.bf16.msra.mxu1 %v12007_v12  ;;  %v11956_v53 = vld [vmem:[#allocation7 + $0x570] sm:$0xf0]  ;;  %v12982_v54 = vld [vmem:[#allocation7 + $0x664] sm:$0xf]  ;;  %v11831_v22 = vor.u32 %v12918_v42, %v11828_v11  ;;  %v12873_v28 = vld [vmem:[#allocation7 + $0x2f4] sm:$0xf0]  ;;  %v11387_v11 = vor.u32 %v12809_v29, %v11386_v45 }
 0x7b4   : > { %8723 = vmatpush.bf16.msra.mxu2 %v12135_v8  ;;  %v12084_v48 = vld [vmem:[#allocation7 + $0x670] sm:$0xf0]  ;;  %v13014_v52 = vld [vmem:[#allocation7 + $0x764] sm:$0xf]  ;;  %v11959_v50 = vor.u32 %v12950_v1, %v11956_v53  ;;  %v11370_v53 = vld [vmem:[#allocation7 + $0xc8] sm:$0xf] }
 0x7b5   : > { %8736 = vmatpush.bf16.msra.mxu3 %v12263_v57  ;;  %v12212_v4 = vld [vmem:[#allocation7 + $0x770] sm:$0xf0]  ;;  %v12087_v59 = vor.u32 %v12982_v54, %v12084_v48  ;;  %v12914_v0 = vld [vmem:[#allocation7 + $0x444] sm:$0xf]  ;;  %v12805_v54 = vld [vmem:[#allocation7 + $0xd4] sm:$0xf0] }
 0x7b6   : > { %8698 = vmatpush.bf16.msra.mxu0 %v11863_v6  ;;  %v11812_v61 = vld [vmem:[#allocation7 + $0x450] sm:$0xf0]  ;;  %v12946_v9 = vld [vmem:[#allocation7 + $0x544] sm:$0xf]  ;;  %v12215_v14 = vor.u32 %v13014_v52, %v12212_v4  ;;  %v11498_v48 = vld [vmem:[#allocation7 + $0x1c8] sm:$0xf] }
 0x7b7   : > { %8711 = vmatpush.bf16.msra.mxu1 %v11991_v39  ;;  %v11940_v21 = vld [vmem:[#allocation7 + $0x550] sm:$0xf0]  ;;  %v12978_v26 = vld [vmem:[#allocation7 + $0x644] sm:$0xf]  ;;  %v11815_v3 = vor.u32 %v12914_v0, %v11812_v61  ;;  %v12837_v4 = vld [vmem:[#allocation7 + $0x1d4] sm:$0xf0]  ;;  %v11371_v61 = vor.u32 %v12805_v54, %v11370_v53 }
 0x7b8   : > { %8724 = vmatpush.bf16.msra.mxu2 %v12119_v63  ;;  %v12068_v23 = vld [vmem:[#allocation7 + $0x650] sm:$0xf0]  ;;  %v13010_v43 = vld [vmem:[#allocation7 + $0x744] sm:$0xf]  ;;  %v11943_v38 = vor.u32 %v12946_v9, %v11940_v21  ;;  %v12901_v0 = vld [vmem:[#allocation7 + $0x3d4] sm:$0xf0]  ;;  %v11499_v9 = vor.u32 %v12837_v4, %v11498_v48 }
 0x7b9   : > { %8737 = vmatpush.bf16.msra.mxu3 %v12247_v16  ;;  %v12196_v17 = vld [vmem:[#allocation7 + $0x750] sm:$0xf0]  ;;  %v12071_v32 = vor.u32 %v12978_v26, %v12068_v23  ;;  %v12910_v13 = vld [vmem:[#allocation7 + $0x424] sm:$0xf]  ;;  %v11514_v16 = vld [vmem:[#allocation7 + $0x1e8] sm:$0xf] }
 0x7ba   : > { %8699 = vmatpush.bf16.msra.mxu0 %v11847_v34  ;;  %v11796_v25 = vld [vmem:[#allocation7 + $0x430] sm:$0xf0]  ;;  %v12942_v58 = vld [vmem:[#allocation7 + $0x524] sm:$0xf]  ;;  %v12199_v40 = vor.u32 %v13010_v43, %v12196_v17  ;;  %v11515_v1 = vor.u32 %v12841_v46, %v11514_v16  ;;  %v11354_v21 = vld [vmem:[#allocation7 + $0xa8] sm:$0xf] }
 0x7bb   : > { %8712 = vmatpush.bf16.msra.mxu1 %v11975_v55  ;;  %v11924_v10 = vld [vmem:[#allocation7 + $0x530] sm:$0xf0]  ;;  %v12974_v18 = vld [vmem:[#allocation7 + $0x624] sm:$0xf]  ;;  %v11799_v36 = vor.u32 %v12910_v13, %v11796_v25  ;;  %v11770_v55 = vld [vmem:[#allocation7 + $0x3e8] sm:$0xf] }
 0x7bc   : > { %8725 = vmatpush.bf16.msra.mxu2 %v12103_v33  ;;  %v12052_v12 = vld [vmem:[#allocation7 + $0x630] sm:$0xf0]  ;;  %v13006_v8 = vld [vmem:[#allocation7 + $0x724] sm:$0xf]  ;;  %v11927_v30 = vor.u32 %v12942_v58, %v11924_v10  ;;  %v12905_v33 = vld [vmem:[#allocation7 + $0x3f4] sm:$0xf0] }
 0x7bd   : > { %8738 = vmatpush.bf16.msra.mxu3 %v12231_v60  ;;  %v12180_v5 = vld [vmem:[#allocation7 + $0x730] sm:$0xf0]  ;;  %v12906_v27 = vld [vmem:[#allocation7 + $0x404] sm:$0xf]  ;;  %v12055_v7 = vor.u32 %v12974_v18, %v12052_v12  ;;  %v11643_v60 = vor.u32 %v12873_v28, %v11642_v20  ;;  %v11771_v52 = vor.u32 %v12905_v33, %v11770_v55  ;;  %v12801_v26 = vld [vmem:[#allocation7 + $0xb4] sm:$0xf0] }
 0x7be   : > { %8700 = vmatpush.bf16.msra.mxu0 %v11831_v22  ;;  %v11780_v57 = vld [vmem:[#allocation7 + $0x410] sm:$0xf0]  ;;  %v12938_v35 = vld [vmem:[#allocation7 + $0x504] sm:$0xf]  ;;  %v12183_v6 = vor.u32 %v13006_v8, %v12180_v5  ;;  %v11626_v22 = vld [vmem:[#allocation7 + $0x2c8] sm:$0xf]  ;;  %v11355_v25 = vor.u32 %v12801_v26, %v11354_v21 }
 0x7bf   : > { %8713 = vmatpush.bf16.msra.mxu1 %v11959_v50  ;;  %v11908_v31 = vld [vmem:[#allocation7 + $0x510] sm:$0xf0]  ;;  %v12970_v37 = vld [vmem:[#allocation7 + $0x604] sm:$0xf]  ;;  %v11783_v44 = vor.u32 %v12906_v27, %v11780_v57  ;;  %v12869_v50 = vld [vmem:[#allocation7 + $0x2d4] sm:$0xf0] }
 0x7c0   : > { %8726 = vmatpush.bf16.msra.mxu2 %v12087_v59  ;;  %v12036_v39 = vld [vmem:[#allocation7 + $0x610] sm:$0xf0]  ;;  %v13002_v63 = vld [vmem:[#allocation7 + $0x704] sm:$0xf]  ;;  %v11911_v51 = vor.u32 %v12938_v35, %v11908_v31  ;;  %v11754_v59 = vld [vmem:[#allocation7 + $0x3c8] sm:$0xf] }
 0x7c1   : > { %8739 = vmatpush.bf16.msra.mxu3 %v12215_v14  ;;  %v12164_v41 = vld [vmem:[#allocation7 + $0x710] sm:$0xf0]  ;;  %v12039_v34 = vor.u32 %v12970_v37, %v12036_v39  ;;  %v11627_v14 = vor.u32 %v12869_v50, %v11626_v22  ;;  %v11482_v23 = vld [vmem:[#allocation7 + $0x1a8] sm:$0xf]  ;;  %v11755_v43 = vor.u32 %v12901_v0, %v11754_v59  ;;  %v12833_v17 = vld [vmem:[#allocation7 + $0x1b4] sm:$0xf0] }
 0x7c2   : > { %8701 = vmatpush.bf16.msra.mxu0 %v11815_v3  ;;  %v12167_v42 = vor.u32 %v13002_v63, %v12164_v41  ;;  %v11610_v3 = vld [vmem:[#allocation7 + $0x2a8] sm:$0xf]  ;;  %v12897_v13 = vld [vmem:[#allocation7 + $0x3b4] sm:$0xf0]  ;;  %v11483_v58 = vor.u32 %v12833_v17, %v11482_v23 }
 0x7c3   : > { %8714 = vmatpush.bf16.msra.mxu1 %v11943_v38  ;;  %v12865_v38 = vld [vmem:[#allocation7 + $0x2b4] sm:$0xf0]  ;;  %v11338_v10 = vld [vmem:[#allocation7 + $0x88] sm:$0xf] }
 0x7c4   : > { %8727 = vmatpush.bf16.msra.mxu2 %v12071_v32  ;;  %v11738_v32 = vld [vmem:[#allocation7 + $0x3a8] sm:$0xf]  ;;  %v12797_v18 = vld [vmem:[#allocation7 + $0x94] sm:$0xf0] }
 0x7c5   : > { %8740 = vmatpush.bf16.msra.mxu3 %v12199_v40  ;;  %v11611_v40 = vor.u32 %v12865_v38, %v11610_v3  ;;  %v11466_v12 = vld [vmem:[#allocation7 + $0x188] sm:$0xf]  ;;  %v11739_v8 = vor.u32 %v12897_v13, %v11738_v32  ;;  %v12829_v5 = vld [vmem:[#allocation7 + $0x194] sm:$0xf0] }
 0x7c6   : > { %8702 = vmatpush.bf16.msra.mxu0 %v11799_v36  ;;  %v11594_v36 = vld [vmem:[#allocation7 + $0x288] sm:$0xf]  ;;  %v12861_v27 = vld [vmem:[#allocation7 + $0x294] sm:$0xf0]  ;;  %v11467_v35 = vor.u32 %v12829_v5, %v11466_v12 }
 0x7c7   : > { %8715 = vmatpush.bf16.msra.mxu1 %v11927_v30  ;;  %v11722_v57 = vld [vmem:[#allocation7 + $0x388] sm:$0xf]  ;;  %v12893_v30 = vld [vmem:[#allocation7 + $0x394] sm:$0xf0]  ;;  %v11595_v31 = vor.u32 %v12861_v27, %v11594_v36 }
 0x7c8   : > { %8728 = vmatpush.bf16.msra.mxu2 %v12055_v7  ;;  %v11339_v7 = vor.u32 %v12797_v18, %v11338_v10  ;;  %v11322_v37 = vld [vmem:[#allocation7 + $0x68] sm:$0xf]  ;;  %v11723_v63 = vor.u32 %v12893_v30, %v11722_v57  ;;  %v12825_v41 = vld [vmem:[#allocation7 + $0x174] sm:$0xf0] }
 0x7c9   : > { %8741 = vmatpush.bf16.msra.mxu3 %v12183_v6  ;;  %v12793_v6 = vld [vmem:[#allocation7 + $0x74] sm:$0xf0]  ;;  %v11450_v39 = vld [vmem:[#allocation7 + $0x168] sm:$0xf] }
 0x7ca   : > { %8703 = vmatpush.bf16.msra.mxu0 %v11783_v44  ;;  %v11578_v45 = vld [vmem:[#allocation7 + $0x268] sm:$0xf]  ;;  %v12857_v29 = vld [vmem:[#allocation7 + $0x274] sm:$0xf0]  ;;  %v11323_v46 = vor.u32 %v12793_v6, %v11322_v37  ;;  %v11451_v20 = vor.u32 %v12825_v41, %v11450_v39 }
 0x7cb   : > { %8716 = vmatpush.bf16.msra.mxu1 %v11911_v51  ;;  %v11706_v16 = vld [vmem:[#allocation7 + $0x368] sm:$0xf]  ;;  %v12889_v44 = vld [vmem:[#allocation7 + $0x374] sm:$0xf0]  ;;  %v11579_v28 = vor.u32 %v12857_v29, %v11578_v45 }
 0x7cc   : > { %8729 = vmatpush.bf16.msra.mxu2 %v12039_v34  ;;  %v11306_v51 = vld [vmem:[#allocation7 + $0x48] sm:$0xf]  ;;  %v12789_v34 = vld [vmem:[#allocation7 + $0x54] sm:$0xf0]  ;;  %v11707_v33 = vor.u32 %v12889_v44, %v11706_v16 }
 0x7cd   : > { %8742 = vmatpush.bf16.msra.mxu3 %v12167_v42  ;;  %8704 = vmatmul.bf16.vlgmr.msra.gmra.mxu0 %v15771_v2  ;;  %v11434_v55 = vld [vmem:[#allocation7 + $0x148] sm:$0xf]  ;;  %v12821_v42 = vld [vmem:[#allocation7 + $0x154] sm:$0xf0]  ;;  %v11307_v54 = vor.u32 %v12789_v34, %v11306_v51 }
 0x7ce   : > { %8748 = vmatpush.bf16.msrb.mxu0 %v11387_v11  ;;  %8717 = vmatmul.bf16.vlgmr.msra.gmra.mxu1 %v15769_v15  ;;  %v11562_v11 = vld [vmem:[#allocation7 + $0x248] sm:$0xf]  ;;  %v12885_v53 = vld [vmem:[#allocation7 + $0x354] sm:$0xf0]  ;;  %v11435_v48 = vor.u32 %v12821_v42, %v11434_v55 }
 0x7cf   : > { %8761 = vmatpush.bf16.msrb.mxu1 %v11515_v1  ;;  %8730 = vmatmul.bf16.vlgmr.msra.gmra.mxu2 %v15777_v56  ;;  %v12853_v1 = vld [vmem:[#allocation7 + $0x254] sm:$0xf0]  ;;  %v11290_v4 = vld [vmem:[#allocation7 + $0x28] sm:$0xf] }
 0x7d0   : > { %8774 = vmatpush.bf16.msrb.mxu2 %v11643_v60  ;;  %8743 = vmatmul.bf16.vlgmr.msra.gmra.mxu3 %v15775_v19  ;;  %v11690_v60 = vld [vmem:[#allocation7 + $0x348] sm:$0xf]  ;;  %v12785_v22 = vld [vmem:[#allocation7 + $0x34] sm:$0xf0] }
 0x7d1   : > { %8787 = vmatpush.bf16.msrb.mxu3 %v11771_v52  ;;  %v11563_v52 = vor.u32 %v12853_v1, %v11562_v11  ;;  %v11418_v50 = vld [vmem:[#allocation7 + $0x128] sm:$0xf]  ;;  %v11691_v59 = vor.u32 %v12885_v53, %v11690_v60  ;;  %v12817_v0 = vld [vmem:[#allocation7 + $0x134] sm:$0xf0]  ;;  %v11291_v26 = vor.u32 %v12785_v22, %v11290_v4 }
 0x7d2   : > { %8749 = vmatpush.bf16.msrb.mxu0 %v11371_v61  ;;  %v11546_v61 = vld [vmem:[#allocation7 + $0x228] sm:$0xf]  ;;  %v12881_v21 = vld [vmem:[#allocation7 + $0x334] sm:$0xf0]  ;;  %v11419_v17 = vor.u32 %v12817_v0, %v11418_v50 }
 0x7d3   : > { %8762 = vmatpush.bf16.msrb.mxu1 %v11499_v9  ;;  %v12849_v9 = vld [vmem:[#allocation7 + $0x234] sm:$0xf0]  ;;  %v11274_v23 = vld [vmem:[#allocation7 + $0x8] sm:$0xf] }
 0x7d4   : > { %8775 = vmatpush.bf16.msrb.mxu2 %v11627_v14  ;;  %v11674_v14 = vld [vmem:[#allocation7 + $0x328] sm:$0xf]  ;;  %v11547_v3 = vor.u32 %v12849_v9, %v11546_v61  ;;  %v12813_v32 = vld [vmem:[#allocation7 + $0x114] sm:$0xf0] }
 0x7d5   : > { %8788 = vmatpush.bf16.msrb.mxu3 %v11755_v43  ;;  %v12781_v43 = vld [vmem:[#allocation7 + $0x14] sm:$0xf0]  ;;  %v11402_v38 = vld [vmem:[#allocation7 + $0x108] sm:$0xf] }
 0x7d6   : > { %8750 = vmatpush.bf16.msrb.mxu0 %v11355_v25  ;;  %v11530_v13 = vld [vmem:[#allocation7 + $0x208] sm:$0xf]  ;;  %v11675_v25 = vor.u32 %v12881_v21, %v11674_v14  ;;  %v12877_v10 = vld [vmem:[#allocation7 + $0x314] sm:$0xf0]  ;;  %v11275_v5 = vor.u32 %v12781_v43, %v11274_v23  ;;  %v11403_v30 = vor.u32 %v12813_v32, %v11402_v38 }
 0x7d7   : > { %8763 = vmatpush.bf16.msrb.mxu1 %v11483_v58  ;;  %v12845_v58 = vld [vmem:[#allocation7 + $0x214] sm:$0xf0]  ;;  %v11898_v18 = vld [vmem:[#allocation7 + $0x4e8] sm:$0xf] }
 0x7d8   : > { %8776 = vmatpush.bf16.msrb.mxu2 %v11611_v40  ;;  %v11658_v40 = vld [vmem:[#allocation7 + $0x308] sm:$0xf]  ;;  %v12937_v12 = vld [vmem:[#allocation7 + $0x4f4] sm:$0xf0] }
 0x7d9   : > { %8789 = vmatpush.bf16.msrb.mxu3 %v11739_v8  ;;  %v12026_v8 = vld [vmem:[#allocation7 + $0x5e8] sm:$0xf]  ;;  %v12969_v36 = vld [vmem:[#allocation7 + $0x5f4] sm:$0xf0]  ;;  %v11659_v37 = vor.u32 %v12877_v10, %v11658_v40  ;;  %v11899_v6 = vor.u32 %v12937_v12, %v11898_v18 }
 0x7da   : > { %8751 = vmatpush.bf16.msrb.mxu0 %v11339_v7  ;;  %v12154_v27 = vld [vmem:[#allocation7 + $0x6e8] sm:$0xf]  ;;  %v13001_v57 = vld [vmem:[#allocation7 + $0x6f4] sm:$0xf0]  ;;  %v11531_v7 = vor.u32 %v12845_v58, %v11530_v13  ;;  %v12027_v39 = vor.u32 %v12969_v36, %v12026_v8 }
 0x7db   : > { %8764 = vmatpush.bf16.msrb.mxu1 %v11467_v35  ;;  %v12282_v35 = vld [vmem:[#allocation7 + $0x7e8] sm:$0xf]  ;;  %v12933_v45 = vld [vmem:[#allocation7 + $0x4d4] sm:$0xf0] }
 0x7dc   : > { %8777 = vmatpush.bf16.msrb.mxu2 %v11595_v31  ;;  %v13033_v31 = vld [vmem:[#allocation7 + $0x7f4] sm:$0xf0]  ;;  %v11882_v41 = vld [vmem:[#allocation7 + $0x4c8] sm:$0xf] }
 0x7dd   : > { %8790 = vmatpush.bf16.msrb.mxu3 %v11723_v63  ;;  %v12155_v63 = vor.u32 %v13001_v57, %v12154_v27  ;;  %v12010_v29 = vld [vmem:[#allocation7 + $0x5c8] sm:$0xf]  ;;  %v12283_v16 = vor.u32 %v13033_v31, %v12282_v35  ;;  %v12965_v44 = vld [vmem:[#allocation7 + $0x5d4] sm:$0xf0]  ;;  %v11883_v34 = vor.u32 %v12933_v45, %v11882_v41 }
 0x7de   : > { %8752 = vmatpush.bf16.msrb.mxu0 %v11323_v46  ;;  %v12138_v46 = vld [vmem:[#allocation7 + $0x6c8] sm:$0xf]  ;;  %v13029_v51 = vld [vmem:[#allocation7 + $0x7d4] sm:$0xf0] }
 0x7df   : > { %8765 = vmatpush.bf16.msrb.mxu1 %v11451_v20  ;;  %v12997_v20 = vld [vmem:[#allocation7 + $0x6d4] sm:$0xf0]  ;;  %v11866_v55 = vld [vmem:[#allocation7 + $0x4a8] sm:$0xf] }
 0x7e0   : > { %8778 = vmatpush.bf16.msrb.mxu2 %v11579_v28  ;;  %v12266_v28 = vld [vmem:[#allocation7 + $0x7c8] sm:$0xf]  ;;  %v12139_v42 = vor.u32 %v12997_v20, %v12138_v46  ;;  %v12929_v11 = vld [vmem:[#allocation7 + $0x4b4] sm:$0xf0] }
 0x7e1   : > { %8791 = vmatpush.bf16.msrb.mxu3 %v11707_v33  ;;  %v12011_v33 = vor.u32 %v12965_v44, %v12010_v29  ;;  %v11994_v1 = vld [vmem:[#allocation7 + $0x5a8] sm:$0xf]  ;;  %v12961_v60 = vld [vmem:[#allocation7 + $0x5b4] sm:$0xf0]  ;;  %v12267_v53 = vor.u32 %v13029_v51, %v12266_v28  ;;  %v11867_v50 = vor.u32 %v12929_v11, %v11866_v55 }
 0x7e2   : > { %8753 = vmatpush.bf16.msrb.mxu0 %v11307_v54  ;;  %v12122_v54 = vld [vmem:[#allocation7 + $0x6a8] sm:$0xf]  ;;  %v13025_v22 = vld [vmem:[#allocation7 + $0x7b4] sm:$0xf0]  ;;  %v11995_v0 = vor.u32 %v12961_v60, %v11994_v1 }
 0x7e3   : > { %8766 = vmatpush.bf16.msrb.mxu1 %v11435_v48  ;;  %v12993_v48 = vld [vmem:[#allocation7 + $0x6b4] sm:$0xf0]  ;;  %v12250_v4 = vld [vmem:[#allocation7 + $0x7a8] sm:$0xf] }
 0x7e4   : > { %8779 = vmatpush.bf16.msrb.mxu2 %v11563_v52  ;;  %v15803_v52 = vld [vmem:[%s15845_s11] sm:$0xf]  ;;  %v12123_v61 = vor.u32 %v12993_v48, %v12122_v54  ;;  %v12925_v9 = vld [vmem:[#allocation7 + $0x494] sm:$0xf0]  ;;  %v11978_v14 = vld [vmem:[#allocation7 + $0x588] sm:$0xf] }
 0x7e5   : > { %8792 = vmatpush.bf16.msrb.mxu3 %v11691_v59  ;;  %v11850_v59 = vld [vmem:[#allocation7 + $0x488] sm:$0xf]  ;;  %v8532_v21 = vperm.slane %v15803_v52, 0  ;;  %v12957_v23 = vld [vmem:[#allocation7 + $0x594] sm:$0xf0] }
 0x7e6   : > { %8754 = vmatpush.bf16.msrb.mxu0 %v11291_v26  ;;  %v12251_v26 = vor.u32 %v13025_v22, %v12250_v4  ;;  %v12106_v43 = vld [vmem:[#allocation7 + $0x688] sm:$0xf]  ;;  %v13021_v38 = vld [vmem:[#allocation7 + $0x794] sm:$0xf0]  ;;  %v11851_v32 = vor.u32 %v12925_v9, %v11850_v59 }
 0x7e7   : > { %8767 = vmatpush.bf16.msrb.mxu1 %v11419_v17  ;;  %v12989_v17 = vld [vmem:[#allocation7 + $0x694] sm:$0xf0]  ;;  %v11834_v40 = vld [vmem:[#allocation7 + $0x468] sm:$0xf] }
 0x7e8   : > { %8780 = vmatpush.bf16.msrb.mxu2 %v11547_v3  ;;  %v12234_v3 = vld [vmem:[#allocation7 + $0x788] sm:$0xf]  ;;  %v12107_v58 = vor.u32 %v12989_v17, %v12106_v43  ;;  %v12921_v10 = vld [vmem:[#allocation7 + $0x474] sm:$0xf0] }
 0x7e9   : > { %8793 = vmatpush.bf16.msrb.mxu3 %v11675_v25  ;;  %v11979_v25 = vor.u32 %v12957_v23, %v11978_v14  ;;  %v11962_v18 = vld [vmem:[#allocation7 + $0x568] sm:$0xf]  ;;  %v12953_v36 = vld [vmem:[#allocation7 + $0x574] sm:$0xf0]  ;;  %v11835_v31 = vor.u32 %v12921_v10, %v11834_v40  ;;  %v12807_v10 = vld [vmem:[#allocation7 + $0xec] sm:$0xf] }
 0x7ea   : > { %8755 = vmatpush.bf16.msrb.mxu0 %v11275_v5  ;;  %v8549_v13 = vpop.f32.mrf.mxu0  ;;  %v12235_v5 = vor.u32 %v13021_v38, %v12234_v3  ;;  %v12090_v27 = vld [vmem:[#allocation7 + $0x668] sm:$0xf]  ;;  %v12985_v57 = vld [vmem:[#allocation7 + $0x674] sm:$0xf0] }
 0x7eb   : > { %8768 = vmatpush.bf16.msrb.mxu1 %v11403_v30  ;;  %v8550_v12 = vadd.f32 %v8549_v13, %v8532_v21  ;;  %v8562_v8 = vpop.f32.mrf.mxu1  ;;  %v12218_v30 = vld [vmem:[#allocation7 + $0x768] sm:$0xf]  ;;  %v12981_v46 = vld [vmem:[#allocation7 + $0x654] sm:$0xf0] }
 0x7ec   : > { %8781 = vmatpush.bf16.msrb.mxu2 %v11531_v7  ;;  %v13017_v7 = vld [vmem:[#allocation7 + $0x774] sm:$0xf0]  ;;  %v11946_v41 = vld [vmem:[#allocation7 + $0x548] sm:$0xf] }
 0x7ed   : > { %8794 = vmatpush.bf16.msrb.mxu3 %v11659_v37  ;;  %8756 = vmatmul.bf16.vlgmr.msrb.gmra.mxu0 %v15758_v49  ;;  %v8563_v35 = vadd.f32 %v8562_v8, %v8550_v12  ;;  %v11963_v37 = vor.u32 %v12953_v36, %v11962_v18  ;;  %v12219_v29 = vor.u32 %v13017_v7, %v12218_v30  ;;  %v12074_v44 = vld [vmem:[#allocation7 + $0x648] sm:$0xf]  ;;  %v12945_v22 = vld [vmem:[#allocation7 + $0x534] sm:$0xf0]  ;;  %v11388_v18 = vld [vmem:[#allocation7 + $0xf8] sm:$0xf0] }
 0x7ee   : > { %8800 = vmatpush.bf16.msra.mxu0 %v11899_v6  ;;  %8769 = vmatmul.bf16.vlgmr.msrb.gmra.mxu1 %v15756_v62  ;;  %v12091_v6 = vor.u32 %v12985_v57, %v12090_v27  ;;  %v12202_v51 = vld [vmem:[#allocation7 + $0x748] sm:$0xf]  ;;  %v12075_v1 = vor.u32 %v12981_v46, %v12074_v44  ;;  %v12977_v59 = vld [vmem:[#allocation7 + $0x634] sm:$0xf0]  ;;  %v12839_v12 = vld [vmem:[#allocation7 + $0x1ec] sm:$0xf] }
 0x7ef   : > { %8813 = vmatpush.bf16.msra.mxu1 %v12027_v39  ;;  %8782 = vmatmul.bf16.vlgmr.msrb.gmra.mxu2 %v15765_v24  ;;  %v11818_v39 = vld [vmem:[#allocation7 + $0x448] sm:$0xf]  ;;  %v12909_v21 = vld [vmem:[#allocation7 + $0x414] sm:$0xf0]  ;;  %v12871_v36 = vld [vmem:[#allocation7 + $0x2ec] sm:$0xf] }
 0x7f0   : > { %8826 = vmatpush.bf16.msra.mxu2 %v12155_v63  ;;  %8795 = vmatmul.bf16.vlgmr.msrb.gmra.mxu3 %v15763_v47  ;;  %v12917_v63 = vld [vmem:[#allocation7 + $0x454] sm:$0xf0]  ;;  %v11802_v60 = vld [vmem:[#allocation7 + $0x428] sm:$0xf]  ;;  %v11644_v27 = vld [vmem:[#allocation7 + $0x2f8] sm:$0xf0] }
 0x7f1   : > { %8839 = vmatpush.bf16.msra.mxu3 %v12283_v16  ;;  %v12949_v16 = vld [vmem:[#allocation7 + $0x554] sm:$0xf0]  ;;  %v11819_v55 = vor.u32 %v12917_v63, %v11818_v39  ;;  %v11930_v54 = vld [vmem:[#allocation7 + $0x528] sm:$0xf]  ;;  %v12903_v7 = vld [vmem:[#allocation7 + $0x3ec] sm:$0xf]  ;;  %v11647_v39 = vor.u32 %v12871_v36, %v11644_v27 }
 0x7f2   : > { %8801 = vmatpush.bf16.msra.mxu0 %v11883_v34  ;;  %v8575_v45 = vpop.f32.mrf.mxu2  ;;  %v13013_v34 = vld [vmem:[#allocation7 + $0x754] sm:$0xf0]  ;;  %v11947_v11 = vor.u32 %v12949_v16, %v11946_v41  ;;  %v11786_v14 = vld [vmem:[#allocation7 + $0x408] sm:$0xf]  ;;  %v12803_v63 = vld [vmem:[#allocation7 + $0xcc] sm:$0xf] }
 0x7f3   : > { %8814 = vmatpush.bf16.msra.mxu1 %v12011_v33  ;;  %v8576_v20 = vadd.f32 %v8575_v45, %v8563_v35  ;;  %v8588_v28 = vpop.f32.mrf.mxu3  ;;  %v8564_v48 = vpop.f32.mrf.mxu1  ;;  %v12203_v4 = vor.u32 %v13013_v34, %v12202_v51  ;;  %v11914_v43 = vld [vmem:[#allocation7 + $0x508] sm:$0xf]  ;;  %v12941_v17 = vld [vmem:[#allocation7 + $0x514] sm:$0xf0]  ;;  %v11787_v8 = vor.u32 %v12909_v21, %v11786_v14  ;;  %v11772_v35 = vld [vmem:[#allocation7 + $0x3f8] sm:$0xf0] }
 0x7f4   : > { %8827 = vmatpush.bf16.msra.mxu2 %v12139_v42  ;;  %v8551_v42 = vpop.f32.mrf.mxu0  ;;  %v12042_v3 = vld [vmem:[#allocation7 + $0x608] sm:$0xf]  ;;  %v12973_v13 = vld [vmem:[#allocation7 + $0x614] sm:$0xf0]  ;;  %v11915_v57 = vor.u32 %v12941_v17, %v11914_v43  ;;  %v11372_v41 = vld [vmem:[#allocation7 + $0xd8] sm:$0xf0] }
 0x7f5   : > { %8840 = vmatpush.bf16.msra.mxu3 %v12267_v53  ;;  %v15809_v33 = vadd.f32 %v8588_v28, %v8576_v20  ;;  %v12913_v53 = vld [vmem:[#allocation7 + $0x434] sm:$0xf0]  ;;  %v12043_v30 = vor.u32 %v12973_v13, %v12042_v3  ;;  %v12835_v45 = vld [vmem:[#allocation7 + $0x1cc] sm:$0xf]  ;;  %v11500_v16 = vld [vmem:[#allocation7 + $0x1d8] sm:$0xf0]  ;;  %v11375_v51 = vor.u32 %v12803_v63, %v11372_v41 }
 0x7f6   : > { %8802 = vmatpush.bf16.msra.mxu0 %v11867_v50  ;;  %v12058_v50 = vld [vmem:[#allocation7 + $0x628] sm:$0xf]  ;;  %v11803_v9 = vor.u32 %v12913_v53, %v11802_v60  ;;  %v12867_v44 = vld [vmem:[#allocation7 + $0x2cc] sm:$0xf]  ;;  %v11628_v46 = vld [vmem:[#allocation7 + $0x2d8] sm:$0xf0]  ;;  %v11503_v34 = vor.u32 %v12835_v45, %v11500_v16 }
 0x7f7   : > { %8815 = vmatpush.bf16.msra.mxu1 %v11995_v0  ;;  %v12186_v0 = vld [vmem:[#allocation7 + $0x728] sm:$0xf]  ;;  %v12059_v23 = vor.u32 %v12977_v59, %v12058_v50  ;;  %v12899_v20 = vld [vmem:[#allocation7 + $0x3cc] sm:$0xf]  ;;  %v11756_v28 = vld [vmem:[#allocation7 + $0x3d8] sm:$0xf0] }
 0x7f8   : > { %8828 = vmatpush.bf16.msra.mxu2 %v12123_v61  ;;  %v13009_v61 = vld [vmem:[#allocation7 + $0x734] sm:$0xf0]  ;;  %v12799_v42 = vld [vmem:[#allocation7 + $0xac] sm:$0xf]  ;;  %v11759_v60 = vor.u32 %v12899_v20, %v11756_v28  ;;  %v11484_v53 = vld [vmem:[#allocation7 + $0x1b8] sm:$0xf0] }
 0x7f9   : > { %8841 = vmatpush.bf16.msra.mxu3 %v12251_v26  ;;  %v11931_v26 = vor.u32 %v12945_v22, %v11930_v54  ;;  %v12863_v54 = vld [vmem:[#allocation7 + $0x2ac] sm:$0xf]  ;;  %v11612_v48 = vld [vmem:[#allocation7 + $0x2b8] sm:$0xf0] }
 0x7fa   : > { %8803 = vmatpush.bf16.msra.mxu0 %v11851_v32  ;;  %v8577_v38 = vpop.f32.mrf.mxu2  ;;  %v12187_v32 = vor.u32 %v13009_v61, %v12186_v0  ;;  %v11740_v22 = vld [vmem:[#allocation7 + $0x3b8] sm:$0xf0]  ;;  %v11615_v0 = vor.u32 %v12863_v54, %v11612_v48  ;;  %v12795_v61 = vld [vmem:[#allocation7 + $0x8c] sm:$0xf] }
 0x7fb   : > { %8816 = vmatpush.bf16.msra.mxu1 %v11979_v25  ;;  %v12170_v25 = vld [vmem:[#allocation7 + $0x708] sm:$0xf]  ;;  %v8590_v40 = vpop.f32.mrf.mxu3  ;;  %v12827_v14 = vld [vmem:[#allocation7 + $0x18c] sm:$0xf]  ;;  %v11596_v43 = vld [vmem:[#allocation7 + $0x298] sm:$0xf0] }
 0x7fc   : > { %8829 = vmatpush.bf16.msra.mxu2 %v12107_v58  ;;  %v13005_v58 = vld [vmem:[#allocation7 + $0x714] sm:$0xf0]  ;;  %v12891_v17 = vld [vmem:[#allocation7 + $0x38c] sm:$0xf]  ;;  %v11724_v3 = vld [vmem:[#allocation7 + $0x398] sm:$0xf0] }
 0x7fd   : > { %8842 = vmatpush.bf16.msra.mxu3 %v12235_v5  ;;  %v11516_v5 = vld [vmem:[#allocation7 + $0x1f8] sm:$0xf0]  ;;  %v12855_v36 = vld [vmem:[#allocation7 + $0x26c] sm:$0xf] }
 0x7fe   : > { %8804 = vmatpush.bf16.msra.mxu0 %v11835_v31  ;;  %v12171_v31 = vor.u32 %v13005_v58, %v12170_v25  ;;  %v12791_v58 = vld [vmem:[#allocation7 + $0x6c] sm:$0xf]  ;;  %v11324_v40 = vld [vmem:[#allocation7 + $0x78] sm:$0xf0] }
 0x7ff   : > { %8817 = vmatpush.bf16.msra.mxu1 %v11963_v37  ;;  %v11391_v37 = vor.u32 %v12807_v10, %v11388_v18  ;;  %v12823_v10 = vld [vmem:[#allocation7 + $0x16c] sm:$0xf]  ;;  %v11580_v27 = vld [vmem:[#allocation7 + $0x278] sm:$0xf0] }
 0x800   : > { %8830 = vmatpush.bf16.msra.mxu2 %v12091_v6  ;;  %v11519_v6 = vor.u32 %v12839_v12, %v11516_v5  ;;  %v11452_v5 = vld [vmem:[#allocation7 + $0x178] sm:$0xf0]  ;;  %v12819_v63 = vld [vmem:[#allocation7 + $0x14c] sm:$0xf] }
 0x801   : > { %8843 = vmatpush.bf16.msra.mxu3 %v12219_v29  ;;  %v11775_v29 = vor.u32 %v12903_v7, %v11772_v35  ;;  %v11327_v35 = vor.u32 %v12791_v58, %v11324_v40  ;;  %v11436_v45 = vld [vmem:[#allocation7 + $0x158] sm:$0xf0]  ;;  %v12883_v20 = vld [vmem:[#allocation7 + $0x34c] sm:$0xf] }
 0x802   : > { %8805 = vmatpush.bf16.msra.mxu0 %v11819_v55  ;;  %v11631_v55 = vor.u32 %v12867_v44, %v11628_v46  ;;  %v11564_v16 = vld [vmem:[#allocation7 + $0x258] sm:$0xf0]  ;;  %v12935_v40 = vld [vmem:[#allocation7 + $0x4ec] sm:$0xf] }
 0x803   : > { %8818 = vmatpush.bf16.msra.mxu1 %v11947_v11  ;;  %v11356_v11 = vld [vmem:[#allocation7 + $0xb8] sm:$0xf0] }
 0x804   : > { %8831 = vmatpush.bf16.msra.mxu2 %v12075_v1  ;;  %v12831_v1 = vld [vmem:[#allocation7 + $0x1ac] sm:$0xf]  ;;  %v11359_v50 = vor.u32 %v12799_v42, %v11356_v11  ;;  %v11692_v28 = vld [vmem:[#allocation7 + $0x358] sm:$0xf0]  ;;  %v11439_v42 = vor.u32 %v12819_v63, %v11436_v45 }
 0x805   : > { %8844 = vmatpush.bf16.msra.mxu3 %v12203_v4  ;;  %v12895_v4 = vld [vmem:[#allocation7 + $0x3ac] sm:$0xf]  ;;  %v11487_v59 = vor.u32 %v12831_v1, %v11484_v53  ;;  %v11695_v48 = vor.u32 %v12883_v20, %v11692_v28  ;;  %v11884_v63 = vld [vmem:[#allocation7 + $0x4d8] sm:$0xf0] }
 0x806   : > { %8806 = vmatpush.bf16.msra.mxu0 %v11803_v9  ;;  %v11340_v9 = vld [vmem:[#allocation7 + $0x98] sm:$0xf0]  ;;  %v11743_v21 = vor.u32 %v12895_v4, %v11740_v22  ;;  %v12783_v1 = vld [vmem:[#allocation7 + $0x2c] sm:$0xf] }
 0x807   : > { %8819 = vmatpush.bf16.msra.mxu1 %v11931_v26  ;;  %v11468_v26 = vld [vmem:[#allocation7 + $0x198] sm:$0xf0]  ;;  %v11343_v38 = vor.u32 %v12795_v61, %v11340_v9  ;;  %v12815_v53 = vld [vmem:[#allocation7 + $0x12c] sm:$0xf] }
 0x808   : > { %8832 = vmatpush.bf16.msra.mxu2 %v12059_v23  ;;  %v12859_v23 = vld [vmem:[#allocation7 + $0x28c] sm:$0xf]  ;;  %v11471_v13 = vor.u32 %v12827_v14, %v11468_v26  ;;  %v11420_v4 = vld [vmem:[#allocation7 + $0x138] sm:$0xf0] }
 0x809   : > { %8845 = vmatpush.bf16.msra.mxu3 %v12187_v32  ;;  %v11599_v25 = vor.u32 %v12859_v23, %v11596_v43  ;;  %v12847_v22 = vld [vmem:[#allocation7 + $0x22c] sm:$0xf]  ;;  %v11276_v14 = vld [vmem:[#allocation7 + $0x18] sm:$0xf0] }
 0x80a   : > { %8807 = vmatpush.bf16.msra.mxu0 %v11787_v8  ;;  %v8601_v32 = vpop.f32.mrf.mxu0  ;;  %v11727_v8 = vor.u32 %v12891_v17, %v11724_v3  ;;  %v12779_v9 = vld [vmem:[#allocation7 + $0xc] sm:$0xf]  ;;  %v11404_v43 = vld [vmem:[#allocation7 + $0x118] sm:$0xf0] }
 0x80b   : > { %8820 = vmatpush.bf16.msra.mxu1 %v11915_v57  ;;  %v8602_v18 = vadd.f32 %v8601_v32, %v15809_v33  ;;  %v8614_v12 = vpop.f32.mrf.mxu1  ;;  %v12887_v57 = vld [vmem:[#allocation7 + $0x36c] sm:$0xf]  ;;  %v11532_v32 = vld [vmem:[#allocation7 + $0x218] sm:$0xf0] }
 0x80c   : > { %8833 = vmatpush.bf16.msra.mxu2 %v12043_v30  ;;  %v11708_v30 = vld [vmem:[#allocation7 + $0x378] sm:$0xf0]  ;;  %v12811_v23 = vld [vmem:[#allocation7 + $0x10c] sm:$0xf] }
 0x80d   : > { %8846 = vmatpush.bf16.msra.mxu3 %v12171_v31  ;;  %8808 = vmatmul.bf16.vlgmr.msra.gmra.mxu0 %v15771_v2  ;;  %v8615_v7 = vadd.f32 %v8614_v12, %v8602_v18  ;;  %v11455_v31 = vor.u32 %v12823_v10, %v11452_v5  ;;  %v11711_v33 = vor.u32 %v12887_v57, %v11708_v30  ;;  %v12843_v17 = vld [vmem:[#allocation7 + $0x20c] sm:$0xf]  ;;  %v11900_v10 = vld [vmem:[#allocation7 + $0x4f8] sm:$0xf0] }
 0x80e   : > { %8852 = vmatpush.bf16.msrb.mxu0 %v11391_v37  ;;  %8821 = vmatmul.bf16.vlgmr.msra.gmra.mxu1 %v15769_v15  ;;  %v11583_v37 = vor.u32 %v12855_v36, %v11580_v27  ;;  %v12967_v18 = vld [vmem:[#allocation7 + $0x5ec] sm:$0xf]  ;;  %v11279_v12 = vor.u32 %v12779_v9, %v11276_v14  ;;  %v12156_v36 = vld [vmem:[#allocation7 + $0x6f8] sm:$0xf0]  ;;  %v11407_v27 = vor.u32 %v12811_v23, %v11404_v43  ;;  %v8533_v9 = vperm.slane %v15803_v52, 1 }
 0x80f   : > { %8865 = vmatpush.bf16.msrb.mxu1 %v11519_v6  ;;  %8834 = vmatmul.bf16.vlgmr.msra.gmra.mxu2 %v15777_v56  ;;  %v12787_v6 = vld [vmem:[#allocation7 + $0x4c] sm:$0xf]  ;;  %v11535_v57 = vor.u32 %v12843_v17, %v11532_v32  ;;  %v12012_v45 = vld [vmem:[#allocation7 + $0x5d8] sm:$0xf0] }
 0x810   : > { %8878 = vmatpush.bf16.msrb.mxu2 %v11647_v39  ;;  %8847 = vmatmul.bf16.vlgmr.msra.gmra.mxu3 %v15775_v19  ;;  %v11308_v39 = vld [vmem:[#allocation7 + $0x58] sm:$0xf0]  ;;  %v12999_v5 = vld [vmem:[#allocation7 + $0x6ec] sm:$0xf] }
 0x811   : > { %8891 = vmatpush.bf16.msrb.mxu3 %v11775_v29  ;;  %v12851_v29 = vld [vmem:[#allocation7 + $0x24c] sm:$0xf]  ;;  %v11836_v32 = vld [vmem:[#allocation7 + $0x478] sm:$0xf0] }
 0x812   : > { %8853 = vmatpush.bf16.msrb.mxu0 %v11375_v51  ;;  %v8627_v41 = vpop.f32.mrf.mxu2  ;;  %v11311_v51 = vor.u32 %v12787_v6, %v11308_v39  ;;  %v11567_v11 = vor.u32 %v12851_v29, %v11564_v16  ;;  %v13031_v30 = vld [vmem:[#allocation7 + $0x7ec] sm:$0xf]  ;;  %v12159_v6 = vor.u32 %v12999_v5, %v12156_v36  ;;  %v12140_v16 = vld [vmem:[#allocation7 + $0x6d8] sm:$0xf0] }
 0x813   : > { %8866 = vmatpush.bf16.msrb.mxu1 %v11503_v34  ;;  %v8628_v44 = vadd.f32 %v8627_v41, %v8615_v7  ;;  %v8640_v46 = vpop.f32.mrf.mxu3  ;;  %v8616_v54 = vpop.f32.mrf.mxu1  ;;  %v12284_v7 = vld [vmem:[#allocation7 + $0x7f8] sm:$0xf0]  ;;  %v12931_v39 = vld [vmem:[#allocation7 + $0x4cc] sm:$0xf] }
 0x814   : > { %8879 = vmatpush.bf16.msrb.mxu2 %v11631_v55  ;;  %v8603_v55 = vpop.f32.mrf.mxu0  ;;  %v12963_v41 = vld [vmem:[#allocation7 + $0x5cc] sm:$0xf]  ;;  %v11887_v20 = vor.u32 %v12931_v39, %v11884_v63  ;;  %v12124_v54 = vld [vmem:[#allocation7 + $0x6b8] sm:$0xf0] }
 0x815   : > { %8892 = vmatpush.bf16.msrb.mxu3 %v11759_v60  ;;  %v15816_v34 = vadd.f32 %v8640_v46, %v8628_v44  ;;  %v11292_v60 = vld [vmem:[#allocation7 + $0x38] sm:$0xf0]  ;;  %v12995_v29 = vld [vmem:[#allocation7 + $0x6cc] sm:$0xf]  ;;  %v12015_v28 = vor.u32 %v12963_v41, %v12012_v45 }
 0x816   : > { %8854 = vmatpush.bf16.msrb.mxu0 %v11359_v50  ;;  %v11548_v50 = vld [vmem:[#allocation7 + $0x238] sm:$0xf0]  ;;  %v11295_v61 = vor.u32 %v12783_v1, %v11292_v60  ;;  %v13027_v44 = vld [vmem:[#allocation7 + $0x7cc] sm:$0xf] }
 0x817   : > { %8867 = vmatpush.bf16.msrb.mxu1 %v11487_v59  ;;  %v12879_v59 = vld [vmem:[#allocation7 + $0x32c] sm:$0xf]  ;;  %v11551_v26 = vor.u32 %v12847_v22, %v11548_v50  ;;  %v12268_v46 = vld [vmem:[#allocation7 + $0x7d8] sm:$0xf0] }
 0x818   : > { %8880 = vmatpush.bf16.msrb.mxu2 %v11615_v0  ;;  %v11676_v0 = vld [vmem:[#allocation7 + $0x338] sm:$0xf0]  ;;  %v12927_v55 = vld [vmem:[#allocation7 + $0x4ac] sm:$0xf]  ;;  %v12271_v1 = vor.u32 %v13027_v44, %v12268_v46 }
 0x819   : > { %8893 = vmatpush.bf16.msrb.mxu3 %v11743_v21  ;;  %v11423_v21 = vor.u32 %v12815_v53, %v11420_v4  ;;  %v11996_v60 = vld [vmem:[#allocation7 + $0x5b8] sm:$0xf0]  ;;  %v12991_v53 = vld [vmem:[#allocation7 + $0x6ac] sm:$0xf] }
 0x81a   : > { %8855 = vmatpush.bf16.msrb.mxu0 %v11343_v38  ;;  %v8629_v3 = vpop.f32.mrf.mxu2  ;;  %v11679_v38 = vor.u32 %v12879_v59, %v11676_v0  ;;  %v12252_v4 = vld [vmem:[#allocation7 + $0x7b8] sm:$0xf0]  ;;  %v12923_v50 = vld [vmem:[#allocation7 + $0x48c] sm:$0xf]  ;;  %v12127_v0 = vor.u32 %v12991_v53, %v12124_v54 }
 0x81b   : > { %8868 = vmatpush.bf16.msrb.mxu1 %v11471_v13  ;;  %v12875_v13 = vld [vmem:[#allocation7 + $0x30c] sm:$0xf]  ;;  %v8642_v58 = vpop.f32.mrf.mxu3  ;;  %v12220_v5 = vld [vmem:[#allocation7 + $0x778] sm:$0xf0] }
 0x81c   : > { %8881 = vmatpush.bf16.msrb.mxu2 %v11599_v25  ;;  %v11660_v25 = vld [vmem:[#allocation7 + $0x318] sm:$0xf0]  ;;  %v13019_v23 = vld [vmem:[#allocation7 + $0x78c] sm:$0xf] }
 0x81d   : > { %8894 = vmatpush.bf16.msrb.mxu3 %v11727_v8  ;;  %v12028_v8 = vld [vmem:[#allocation7 + $0x5f8] sm:$0xf0]  ;;  %v12979_v63 = vld [vmem:[#allocation7 + $0x64c] sm:$0xf] }
 0x81e   : > { %8856 = vmatpush.bf16.msrb.mxu0 %v11327_v35  ;;  %v11663_v35 = vor.u32 %v12875_v13, %v11660_v25  ;;  %v12951_v13 = vld [vmem:[#allocation7 + $0x56c] sm:$0xf]  ;;  %v11948_v39 = vld [vmem:[#allocation7 + $0x558] sm:$0xf0] }
 0x81f   : > { %8869 = vmatpush.bf16.msrb.mxu1 %v11455_v31  ;;  %v11903_v31 = vor.u32 %v12935_v40, %v11900_v10  ;;  %v11964_v10 = vld [vmem:[#allocation7 + $0x578] sm:$0xf0]  ;;  %v12975_v54 = vld [vmem:[#allocation7 + $0x62c] sm:$0xf] }
 0x820   : > { %8882 = vmatpush.bf16.msrb.mxu2 %v11583_v37  ;;  %v12031_v37 = vor.u32 %v12967_v18, %v12028_v8  ;;  %v12983_v18 = vld [vmem:[#allocation7 + $0x66c] sm:$0xf]  ;;  %v12076_v41 = vld [vmem:[#allocation7 + $0x658] sm:$0xf0] }
 0x821   : > { %8895 = vmatpush.bf16.msrb.mxu3 %v11711_v33  ;;  %v12287_v33 = vor.u32 %v13031_v30, %v12284_v7  ;;  %v13015_v8 = vld [vmem:[#allocation7 + $0x76c] sm:$0xf]  ;;  %v11932_v53 = vld [vmem:[#allocation7 + $0x538] sm:$0xf0] }
 0x822   : > { %8857 = vmatpush.bf16.msrb.mxu0 %v11311_v51  ;;  %v12143_v51 = vor.u32 %v12995_v29, %v12140_v16  ;;  %v12915_v7 = vld [vmem:[#allocation7 + $0x44c] sm:$0xf]  ;;  %v12204_v16 = vld [vmem:[#allocation7 + $0x758] sm:$0xf0] }
 0x823   : > { %8870 = vmatpush.bf16.msrb.mxu1 %v11439_v42  ;;  %v11868_v42 = vld [vmem:[#allocation7 + $0x4b8] sm:$0xf0]  ;;  %v13011_v29 = vld [vmem:[#allocation7 + $0x74c] sm:$0xf] }
 0x824   : > { %8883 = vmatpush.bf16.msrb.mxu2 %v11567_v11  ;;  %v12959_v11 = vld [vmem:[#allocation7 + $0x5ac] sm:$0xf]  ;;  %v11871_v22 = vor.u32 %v12927_v55, %v11868_v42  ;;  %v11804_v42 = vld [vmem:[#allocation7 + $0x438] sm:$0xf0] }
 0x825   : > { %8896 = vmatpush.bf16.msrb.mxu3 %v11695_v48  ;;  %v13023_v48 = vld [vmem:[#allocation7 + $0x7ac] sm:$0xf]  ;;  %v11999_v59 = vor.u32 %v12959_v11, %v11996_v60  ;;  %v12207_v60 = vor.u32 %v13011_v29, %v12204_v16 }
 0x826   : > { %8858 = vmatpush.bf16.msrb.mxu0 %v11295_v61  ;;  %v11852_v61 = vld [vmem:[#allocation7 + $0x498] sm:$0xf0]  ;;  %v12255_v14 = vor.u32 %v13023_v48, %v12252_v4  ;;  %v12911_v55 = vld [vmem:[#allocation7 + $0x42c] sm:$0xf] }
 0x827   : > { %8871 = vmatpush.bf16.msrb.mxu1 %v11423_v21  ;;  %v11980_v21 = vld [vmem:[#allocation7 + $0x598] sm:$0xf0]  ;;  %v11855_v43 = vor.u32 %v12923_v50, %v11852_v61  ;;  %v12943_v11 = vld [vmem:[#allocation7 + $0x52c] sm:$0xf]  ;;  %v11807_v50 = vor.u32 %v12911_v55, %v11804_v42 }
 0x828   : > { %8884 = vmatpush.bf16.msrb.mxu2 %v11551_v26  ;;  %v12987_v26 = vld [vmem:[#allocation7 + $0x68c] sm:$0xf]  ;;  %v12060_v48 = vld [vmem:[#allocation7 + $0x638] sm:$0xf0] }
 0x829   : > { %8897 = vmatpush.bf16.msrb.mxu3 %v11679_v38  ;;  %v12919_v38 = vld [vmem:[#allocation7 + $0x46c] sm:$0xf] }
 0x82a   : > { %8859 = vmatpush.bf16.msrb.mxu0 %v11279_v12  ;;  %v8653_v17 = vpop.f32.mrf.mxu0  ;;  %v12092_v12 = vld [vmem:[#allocation7 + $0x678] sm:$0xf0]  ;;  %v13007_v4 = vld [vmem:[#allocation7 + $0x72c] sm:$0xf] }
 0x82b   : > { %8872 = vmatpush.bf16.msrb.mxu1 %v11407_v27  ;;  %v8654_v25 = vadd.f32 %v8653_v17, %v8533_v9  ;;  %v8666_v58 = vpop.f32.mrf.mxu1  ;;  %v11839_v27 = vor.u32 %v12919_v38, %v11836_v32  ;;  %v12095_v30 = vor.u32 %v12983_v18, %v12092_v12  ;;  %v12907_v61 = vld [vmem:[#allocation7 + $0x40c] sm:$0xf]  ;;  %v12172_v17 = vld [vmem:[#allocation7 + $0x718] sm:$0xf0] }
 0x82c   : > { %8885 = vmatpush.bf16.msrb.mxu2 %v11535_v57  ;;  %v11967_v57 = vor.u32 %v12951_v13, %v11964_v10  ;;  %v12939_v9 = vld [vmem:[#allocation7 + $0x50c] sm:$0xf] }
 0x82d   : > { %8898 = vmatpush.bf16.msrb.mxu3 %v11663_v35  ;;  %8860 = vmatmul.bf16.vlgmr.msrb.gmra.mxu0 %v15758_v49  ;;  %v12108_v49 = vld [vmem:[#allocation7 + $0x698] sm:$0xf0]  ;;  %v8667_v36 = vadd.f32 %v8666_v58, %v8654_v25 }
 0x82e   : > { %8904 = vmatpush.bf16.msra.mxu0 %v11903_v31  ;;  %8873 = vmatmul.bf16.vlgmr.msrb.gmra.mxu1 %v15756_v62  ;;  %v12111_v3 = vor.u32 %v12987_v26, %v12108_v49  ;;  %v11820_v35 = vld [vmem:[#allocation7 + $0x458] sm:$0xf0]  ;;  %v12947_v31 = vld [vmem:[#allocation7 + $0x54c] sm:$0xf] }
 0x82f   : > { %8917 = vmatpush.bf16.msra.mxu1 %v12031_v37  ;;  %8886 = vmatmul.bf16.vlgmr.msrb.gmra.mxu2 %v15765_v24  ;;  %v12955_v24 = vld [vmem:[#allocation7 + $0x58c] sm:$0xf]  ;;  %v11823_v44 = vor.u32 %v12915_v7, %v11820_v35  ;;  %v11916_v26 = vld [vmem:[#allocation7 + $0x518] sm:$0xf0] }
 0x830   : > { %8930 = vmatpush.bf16.msra.mxu2 %v12159_v6  ;;  %8899 = vmatmul.bf16.vlgmr.msrb.gmra.mxu3 %v15763_v47  ;;  %v12236_v47 = vld [vmem:[#allocation7 + $0x798] sm:$0xf0]  ;;  %v11983_v62 = vor.u32 %v12955_v24, %v11980_v21  ;;  %v12223_v6 = vor.u32 %v13015_v8, %v12220_v5  ;;  %v12971_v49 = vld [vmem:[#allocation7 + $0x60c] sm:$0xf] }
 0x831   : > { %8943 = vmatpush.bf16.msra.mxu3 %v12287_v33  ;;  %v12239_v40 = vor.u32 %v13019_v23, %v12236_v47  ;;  %v11788_v24 = vld [vmem:[#allocation7 + $0x418] sm:$0xf0] }
 0x832   : > { %8905 = vmatpush.bf16.msra.mxu0 %v11887_v20  ;;  %v8679_v37 = vpop.f32.mrf.mxu2  ;;  %v8655_v20 = vpop.f32.mrf.mxu0  ;;  %v12044_v23 = vld [vmem:[#allocation7 + $0x618] sm:$0xf0] }
 0x833   : > { %8918 = vmatpush.bf16.msra.mxu1 %v12015_v28  ;;  %v8680_v33 = vadd.f32 %v8679_v37, %v8667_v36  ;;  %v8692_v45 = vpop.f32.mrf.mxu3  ;;  %v11951_v28 = vor.u32 %v12947_v31, %v11948_v39  ;;  %v12047_v38 = vor.u32 %v12971_v49, %v12044_v23 }
 0x834   : > { %8931 = vmatpush.bf16.msra.mxu2 %v12143_v51  ;;  %v12079_v51 = vor.u32 %v12979_v63, %v12076_v41 }
 0x835   : > { %8944 = vmatpush.bf16.msra.mxu3 %v12271_v1  ;;  %v8693_v46 = vadd.f32 %v8692_v45, %v8680_v33  ;;  %v8668_v1 = vpop.f32.mrf.mxu1 }
 0x836   : > { %8906 = vmatpush.bf16.msra.mxu0 %v11871_v22  ;;  %v12188_v22 = vld [vmem:[#allocation7 + $0x738] sm:$0xf0] }
 0x837   : > { %8919 = vmatpush.bf16.msra.mxu1 %v11999_v59  ;;  %v11935_v59 = vor.u32 %v12943_v11, %v11932_v53  ;;  %v12191_v21 = vor.u32 %v13007_v4, %v12188_v22  ;;  %v8535_v4 = vperm.slane %v15803_v52, 3 }
 0x838   : > { %8932 = vmatpush.bf16.msra.mxu2 %v12127_v0  ;;  %v12063_v0 = vor.u32 %v12975_v54, %v12060_v48 }
 0x839   : > { %8945 = vmatpush.bf16.msra.mxu3 %v12255_v14 }
 0x83a   : > { %8907 = vmatpush.bf16.msra.mxu0 %v11855_v43  ;;  %v8681_v14 = vpop.f32.mrf.mxu2  ;;  %v13003_v43 = vld [vmem:[#allocation7 + $0x70c] sm:$0xf] }
 0x83b   : > { %8920 = vmatpush.bf16.msra.mxu1 %v11983_v62  ;;  %v8694_v47 = vpop.f32.mrf.mxu3  ;;  %v11791_v62 = vor.u32 %v12907_v61, %v11788_v24  ;;  %v12175_v32 = vor.u32 %v13003_v43, %v12172_v17 }
 0x83c   : > { %8933 = vmatpush.bf16.msra.mxu2 %v12111_v3  ;;  %v11919_v3 = vor.u32 %v12939_v9, %v11916_v26 }
 0x83d   : > { %8946 = vmatpush.bf16.msra.mxu3 %v12239_v40 }
 0x83e   : > { %8908 = vmatpush.bf16.msra.mxu0 %v11839_v27 }
 0x83f   : > { %8921 = vmatpush.bf16.msra.mxu1 %v11967_v57 }
 0x840   : > { %8934 = vmatpush.bf16.msra.mxu2 %v12095_v30 }
 0x841   : > { %8947 = vmatpush.bf16.msra.mxu3 %v12223_v6 }
 0x842   : > { %8909 = vmatpush.bf16.msra.mxu0 %v11823_v44 }
 0x843   : > { %8922 = vmatpush.bf16.msra.mxu1 %v11951_v28 }
 0x844   : > { %8935 = vmatpush.bf16.msra.mxu2 %v12079_v51 }
 0x845   : > { %8948 = vmatpush.bf16.msra.mxu3 %v12207_v60 }
 0x846   : > { %8910 = vmatpush.bf16.msra.mxu0 %v11807_v50 }
 0x847   : > { %8923 = vmatpush.bf16.msra.mxu1 %v11935_v59 }
 0x848   : > { %8936 = vmatpush.bf16.msra.mxu2 %v12063_v0 }
 0x849   : > { %8949 = vmatpush.bf16.msra.mxu3 %v12191_v21 }
 0x84a   : > { %8911 = vmatpush.bf16.msra.mxu0 %v11791_v62  ;;  %v8705_v13 = vpop.f32.mrf.mxu0 }
 0x84b   : > { %8924 = vmatpush.bf16.msra.mxu1 %v11919_v3  ;;  %v8706_v25 = vadd.f32 %v8705_v13, %v8693_v46  ;;  %v8718_v58 = vpop.f32.mrf.mxu1 }
 0x84c   : > { %8937 = vmatpush.bf16.msra.mxu2 %v12047_v38 }
 0x84d   : > { %8950 = vmatpush.bf16.msra.mxu3 %v12175_v32  ;;  %8912 = vmatmul.bf16.vlgmr.msra.gmra.mxu0 %v15771_v2  ;;  %v8719_v40 = vadd.f32 %v8718_v58, %v8706_v25  ;;  %v8956_v2 = vmax.f32 %v15816_v34, 0.0  ;;  %v8974_v25 = vlaneseq }
 0x84e   : > { %8925 = vmatmul.bf16.vlgmr.msra.gmra.mxu1 %v15769_v15 }
 0x84f   : > { %8938 = vmatmul.bf16.vlgmr.msra.gmra.mxu2 %v15777_v56  ;;  %vm8976_vm4 = vcmp.lt.s32.totalorder %v8974_v25, 512 }
 0x850   : > { %8951 = vmatmul.bf16.vlgmr.msra.gmra.mxu3 %v15775_v19  ;;  %v8534_v19 = vperm.slane %v15803_v52, 2 }
 0x852   : > { %v8731_v10 = vpop.f32.mrf.mxu2  ;;  %v8707_v5 = vpop.f32.mrf.mxu0 }
 0x853   : > { %v8732_v18 = vadd.f32 %v8731_v10, %v8719_v40  ;;  %v8744_v12 = vpop.f32.mrf.mxu3  ;;  %v8720_v36 = vpop.f32.mrf.mxu1 }
 0x855   : > { %v8745_v8 = vadd.f32 %v8744_v12, %v8732_v18 }
 0x857   : > { %v8957_v27 = vmax.f32 %v8745_v8, 0.0 }
 0x859   : > { %v8964_v57 = vrot.slane %v8957_v27, 7 }
 0x85a   : > { %v8733_v15 = vpop.f32.mrf.mxu2 }
 0x85b   : > { %v8968_v30 = vsel %vm8967_vm1, %v8956_v2, %v8964_v57  ;;  %v8746_v56 = vpop.f32.mrf.mxu3 }
 0x86a   : > { %v8757_v7 = vpop.f32.mrf.mxu0 }
 0x86b   : > { %v8758_v35 = vadd.f32 %v8757_v7, %v8534_v19  ;;  %v8770_v31 = vpop.f32.mrf.mxu1 }
 0x86d   : > { %v8771_v37 = vadd.f32 %v8770_v31, %v8758_v35 }
 0x872   : > { %v8783_v6 = vpop.f32.mrf.mxu2  ;;  %v8759_v33 = vpop.f32.mrf.mxu0 }
 0x873   : > { %v8784_v39 = vadd.f32 %v8783_v6, %v8771_v37  ;;  %v8796_v63 = vpop.f32.mrf.mxu3  ;;  %v8772_v45 = vpop.f32.mrf.mxu1 }
 0x875   : > { %v8797_v41 = vadd.f32 %v8796_v63, %v8784_v39 }
 0x87a   : > { %v8785_v29 = vpop.f32.mrf.mxu2 }
 0x87b   : > { %v8798_v16 = vpop.f32.mrf.mxu3 }
 0x88a   : > { %v8809_v44 = vpop.f32.mrf.mxu0 }
 0x88b   : > { %v8822_v34 = vpop.f32.mrf.mxu1  ;;  %v8810_v61 = vadd.f32 %v8809_v44, %v8797_v41 }
 0x88d   : > { %v8823_v9 = vadd.f32 %v8822_v34, %v8810_v61 }
 0x892   : > { %v8835_v46 = vpop.f32.mrf.mxu2  ;;  %v8811_v28 = vpop.f32.mrf.mxu0 }
 0x893   : > { %v8848_v20 = vpop.f32.mrf.mxu3  ;;  %v8824_v51 = vpop.f32.mrf.mxu1  ;;  %v8836_v49 = vadd.f32 %v8835_v46, %v8823_v9 }
 0x895   : > { %v8849_v47 = vadd.f32 %v8848_v20, %v8836_v49 }
 0x897   : > { %v8958_v32 = vmax.f32 %v8849_v47, 0.0 }
 0x899   : > { %v8965_v40 = vrot.slane %v8958_v32, 6 }
 0x89a   : > { %v8837_v55 = vpop.f32.mrf.mxu2 }
 0x89b   : > { %v8850_v42 = vpop.f32.mrf.mxu3 }
 0x8aa   : > { %v8861_v11 = vpop.f32.mrf.mxu0 }
 0x8ab   : > { %v8874_v1 = vpop.f32.mrf.mxu1  ;;  %v8862_v59 = vadd.f32 %v8861_v11, %v8535_v4 }
 0x8ad   : > { %v8875_v0 = vadd.f32 %v8874_v1, %v8862_v59 }
 0x8b2   : > { %v8887_v60 = vpop.f32.mrf.mxu2  ;;  %v8863_v54 = vpop.f32.mrf.mxu0 }
 0x8b3   : > { %v8900_v53 = vpop.f32.mrf.mxu3  ;;  %v8876_v48 = vpop.f32.mrf.mxu1  ;;  %v8888_v24 = vadd.f32 %v8887_v60, %v8875_v0 }
 0x8b5   : > { %v8901_v14 = vadd.f32 %v8900_v53, %v8888_v24 }
 0x8ba   : > { %v8889_v22 = vpop.f32.mrf.mxu2 }
 0x8bb   : > { %v8902_v50 = vpop.f32.mrf.mxu3 }
 0x8ca   : > { %v8913_v21 = vpop.f32.mrf.mxu0 }
 0x8cb   : > { %v8926_v26 = vpop.f32.mrf.mxu1  ;;  %v8914_v23 = vadd.f32 %v8913_v21, %v8901_v14 }
 0x8cd   : > { %v8927_v43 = vadd.f32 %v8926_v26, %v8914_v23 }
 0x8d2   : > { %v8939_v17 = vpop.f32.mrf.mxu2  ;;  %v8915_v38 = vpop.f32.mrf.mxu0 }
 0x8d3   : > { %v8940_v62 = vadd.f32 %v8939_v17, %v8927_v43  ;;  %v8952_v3 = vpop.f32.mrf.mxu3  ;;  %v8928_v52 = vpop.f32.mrf.mxu1 }
 0x8d5   : > { %v8953_v13 = vadd.f32 %v8952_v3, %v8940_v62 }
 0x8d7   : > { %v8959_v58 = vmax.f32 %v8953_v13, 0.0 }
 0x8d9   : > { %v8966_v10 = vrot.slane %v8959_v58, 5 }
 0x8da   : > { %v8941_v18 = vpop.f32.mrf.mxu2 }
 0x8db   : > { %v8970_v12 = vsel %vm8969_vm2, %v8965_v40, %v8966_v10  ;;  %v8954_v8 = vpop.f32.mrf.mxu3 }
 0x8dc   : > { %v8972_v5 = vsel %vm8971_vm3, %v8968_v30, %v8970_v12 }
 0x8dd   : > { %8978 = vst.msk [vmem:[%s13177_s29] sm:$0xf] %vm8976_vm4, %v8972_v5 }
 0x8de PF: > { %s22_s21 = sadd.s32 1, %s13091_s21  }
 0x8df   : > { %p19_p7 = scmp.ge.s32.totalorder %s22_s21, 4  }
 0x8e1   :  { %21 = sbr.rel (!%p19_p7) target bundleno = 1 (0x1), region = 167 }
 0x8e6   :  { %8998 = vsyncmov [#allocation8] }
 0x8e9   :  { %s8999_s19 = vpop.sfrf %8998 }
 0x8ea   :  { %p12290_p8 = scmp.ne.s32.totalorder %s8999_s19, 0 }
 0x8ec   :  { %9003 = shalt.err (%p12290_p8)  }
 0x8ed   :  { %9005 = vsyncmov [#allocation8 + $0x1] }
 0x8f0   :  { %s9006_s20 = vpop.sfrf %9005 }
 0x8f1   :  { %p12291_p9 = scmp.ne.s32.totalorder %s9006_s20, 0 }
 0x8f3   :  { %9010 = shalt.err (%p12291_p9)  }

</bundles_post_ra>
